<compile_context>
chip_gen: v6e
topology: v6e:2x2x1
jax: 0.10.0
libtpu: 0.0.40
codegen_flags: <defaults>
</compile_context>

<pallas_src>
import functools

import jax
import jax.numpy as jnp
from jax.experimental import pallas as pl
from jax.experimental.pallas import tpu as pltpu


# =============================================================================
# Fused forward kernel (B samples = B*T rows per grid step)
# =============================================================================
def fused_forward_kernel(bb_ref, wg_ref, bg_ref, sg_ref,
                         win_ref, bin_ref, wdil_ref, bdil_ref,
                         wres_ref, bres_ref, wout_ref, bout_ref,
                         w1_ref, b1_ref, w2_ref, b2_ref,
                         out_ref, *, T):
    R = bb_ref.shape[0]                       # B*T rows in this grid step
    n_stages, L = wdil_ref.shape[0], wdil_ref.shape[1]
    F2 = win_ref.shape[1]                     # fused (tool|phase) channel width = 2F
    bf16 = jnp.bfloat16

    def dot(a, w):                            # bf16 MXU matmul, f32 accumulation
        return jnp.dot(a.astype(bf16), w, preferred_element_type=jnp.float32)

    # ---- fused tool+phase SGCN: (R, V*C) -> (R, 2F) --------------------------
    x = bb_ref[...]
    h = jnp.maximum(dot(x, wg_ref[...]) + bg_ref[...], 0.0)    # (R, 2*V*F)
    f = dot(h, sg_ref[...])                                    # node mean -> (R, 2F)

    # Causal shift along T on the flattened row axis: a global row shift by s plus
    # zeroing rows with (row % T) < s is exactly a per-sample causal shift.
    row_t = jax.lax.broadcasted_iota(jnp.int32, (R, F2), 0) % T

    def shift(v, s):                          # s: static Python int
        if s <= 0:
            return v
        if s >= T:
            return jnp.zeros_like(v)
        shifted = jnp.concatenate(
            [jnp.zeros((s, F2), v.dtype), v[:R - s, :]], axis=0)
        return jnp.where(row_t < s, 0.0, shifted)

    # number of leading layers whose shifted taps are not all identically zero (d < T)
    n_head = 0
    while n_head < L and (2 ** n_head) < T:
        n_head += 1

    # ---- block-diagonal (tool | phase) causal MS-TCN stages -------------------
    for st in range(n_stages):
        f = dot(f, win_ref[st]) + bin_ref[st]                  # conv_1x1 in
        # heterogeneous head layers (d < T): 2 or 3 live taps, unrolled
        for i in range(n_head):
            d = 2 ** i
            if 2 * d < T:      # all three taps live: weight rows [t-2d | t-d | t]
                stacked = jnp.concatenate([shift(f, 2 * d), shift(f, d), f], axis=1)
                w = wdil_ref[st, i]
            else:              # t-2d tap identically zero: use rows [t-d | t]
                stacked = jnp.concatenate([shift(f, d), f], axis=1)
                w = wdil_ref[st, i, pl.ds(F2, 2 * F2), :]
            hh = jnp.maximum(dot(stacked, w) + bdil_ref[st, i], 0.0)
            hh = dot(hh, wres_ref[st, i]) + bres_ref[st, i]    # 1x1 (dropout = identity)
            f = f + hh
        # homogeneous tail (d >= T): only the current tap lives; fori_loop bounds
        # live ranges instead of unrolling 10 more layers per stage.
        if n_head < L:
            def tail_body(i, f_c):
                w = wdil_ref[st, i][2 * F2:, :]                # current-tap rows [4F:6F]
                hh = jnp.maximum(dot(f_c, w) + bdil_ref[st, i], 0.0)
                hh = dot(hh, wres_ref[st, i]) + bres_ref[st, i]
                return f_c + hh
            f = jax.lax.fori_loop(n_head, L, tail_body, f)
        f = dot(f, wout_ref[st]) + bout_ref[st]                # conv_out

    # ---- fused FC heads (zero-padded so the output slab is lane-dense) --------
    g = jnp.maximum(dot(f, w1_ref[...]) + b1_ref[...], 0.0)    # (R, 3*fc_h)
    heads = dot(g, w2_ref[...]) + b2_ref[...]                  # (R, out_pad - 2F)

    # single lane-dense store: [feature(2F) | stage(18) | tool(15) | RSD(1) | pad]
    out_ref[...] = jnp.concatenate([f, heads], axis=1)


# =============================================================================
# Forward wrapper (single pallas_call)
# =============================================================================
def gcn_progress_net_forward(x, bb, fp, *, target_rows=256):
    del x  # unused for stream='Graph'
    N, T, V, C = bb.shape
    F = fp["F"]
    n_phase3 = fp["n_phase"] * 3
    n_tool3 = fp["n_tool"] * 3
    head_cols = fp["w2"].shape[1]             # zero-padded head width
    out_pad = 2 * F + head_cols               # lane-dense slab width (multiple of 128)

    # samples per grid step: fill the MXU M dimension (~256 rows on v6e/v7x)
    B = max(1, min(N, max(1, target_rows // T)))
    while N % B:
        B -= 1
    R = B * T
    grid = (N // B,)

    bb_flat = bb.reshape(N * T, V * C)

    weights = (fp["wg"], fp["bg"], fp["sg"],
               fp["win"], fp["bin"], fp["wdil"], fp["bdil"],
               fp["wres"], fp["bres"], fp["wout"], fp["bout"],
               fp["w1"], fp["b1"], fp["w2"], fp["b2"])

    def full(arr):    # whole-array block, constant block index -> VMEM-resident weights
        return pl.BlockSpec(arr.shape, lambda g, nd=arr.ndim: (0,) * nd)

    # advisory cost estimate for XLA's scheduler
    L = fp["wdil"].shape[1]
    n_stages = fp["wdil"].shape[0]

    def layer_k(i):
        d = 2 ** i
        return 6 * F if 2 * d < T else (4 * F if d < T else 2 * F)

    per_row = (2 * (V * C) * (2 * V * F) + 2 * (2 * V * F) * (2 * F)
               + n_stages * (2 * 2 * (2 * F) * (2 * F)
                             + sum(2 * layer_k(i) * (2 * F) + 2 * (2 * F) * (2 * F)
                                   for i in range(L)))
               + 2 * (2 * F) * fp["w1"].shape[1]
               + 2 * fp["w1"].shape[1] * head_cols)
    w_bytes = sum(int(w.size) * w.dtype.itemsize for w in weights)
    cost = pl.CostEstimate(
        flops=int(per_row) * N * T,
        transcendentals=0,
        bytes_accessed=int(w_bytes + bb_flat.size * 4 + N * T * out_pad * 4))

    out = pl.pallas_call(
        functools.partial(fused_forward_kernel, T=T),
        out_shape=jax.ShapeDtypeStruct((N * T, out_pad), jnp.float32),
        grid=grid,
        in_specs=[pl.BlockSpec((R, V * C), lambda g: (g, 0))]
                 + [full(w) for w in weights],
        out_specs=pl.BlockSpec((R, out_pad), lambda g: (g, 0)),
        compiler_params=pltpu.CompilerParams(dimension_semantics=("parallel",)),
        cost_estimate=cost,
    )(bb_flat, *weights)

    out = out.reshape(N, T, out_pad)
    c0 = 2 * F
    c1 = c0 + n_phase3
    c2 = c1 + n_tool3
    feature = out[..., :c0]
    stage_RSD = out[..., c0:c1]
    tool_stage_RSD = out[..., c1:c2]
    RSD = out[..., c2]                        # squeeze(-1) -> (N, T)
    return feature, stage_RSD, tool_stage_RSD, RSD


# =============================================================================
# Parameter construction (deterministic, synthetic) + one-time algebraic fusion
# =============================================================================
def build_adjacency(V):
    # chain graph with self loops (max_hop=1), 'uniform' strategy normalization A @ D^-1
    idx = jnp.arange(V)
    A = (jnp.abs(idx[:, None] - idx[None, :]) <= 1).astype(jnp.float32)
    Dl = jnp.sum(A, axis=0)
    return A / Dl[None, :]


def _dense(key, shape, scale=0.1):
    return scale * jax.random.normal(key, shape, jnp.float32)


def init_params(key, *, V, C_in=4, F=16, L=14, n_tcn_stages=2,
                fc_h=256, n_phase=6, n_tool=5):
    A_norm = build_adjacency(V)
    keys = iter(jax.random.split(key, 128))
    nk = lambda: next(keys)

    def gcn_branch():
        # edge_importance M initialized to ones -> A_eff = A_norm * 1
        return dict(a=A_norm * jnp.ones((V, V), jnp.float32),
                    w=_dense(nk(), (C_in, F)), b=_dense(nk(), (1, F)))

    def tcn_stage():
        # weights stored in (in, out) orientation for row-major (rows, F) matmuls
        return dict(w_in=_dense(nk(), (F, F)), b_in=_dense(nk(), (F,)),
                    w_dil=_dense(nk(), (L, 3, F, F)), b_dil=_dense(nk(), (L, F)),
                    w_res=_dense(nk(), (L, F, F)), b_res=_dense(nk(), (L, F)),
                    w_out=_dense(nk(), (F, F)), b_out=_dense(nk(), (F,)))

    def head(out_dim):
        return dict(w1=_dense(nk(), (2 * F, fc_h)), b1=_dense(nk(), (1, fc_h)),
                    w2=_dense(nk(), (fc_h, out_dim)), b2=_dense(nk(), (1, out_dim)))

    return dict(
        V=V, C=C_in, F=F, L=L, n_phase=n_phase, n_tool=n_tool,
        tool_gcn=gcn_branch(), phase_gcn=gcn_branch(),
        tcn_tool=[tcn_stage() for _ in range(n_tcn_stages)],
        tcn_phase=[tcn_stage() for _ in range(n_tcn_stages)],
        fc_stage_RSD=head(n_phase * 3),
        fc_tool_stage_RSD=head(n_tool * 3),
        fc_RSD=head(1),
    )


def _block_diag(*mats):
    rows = sum(m.shape[0] for m in mats)
    cols = sum(m.shape[1] for m in mats)
    out = jnp.zeros((rows, cols), jnp.float32)
    r = c = 0
    for m in mats:
        out = out.at[r:r + m.shape[0], c:c + m.shape[1]].set(m)
        r += m.shape[0]
        c += m.shape[1]
    return out


def fuse_params(p):
    """One-time algebraic fusion of the per-branch PyTorch-style parameters."""
    V, C, F, L = p["V"], p["C"], p["F"], p["L"]

    # ---- SGCN: fold adjacency aggregation + 1x1 projection of BOTH branches into one
    #      (V*C, 2*V*F) matmul; per-node ReLU -> node-mean becomes a (2*V*F, 2F) selector.
    def big_w(g):
        # Wbig[w*C + c, v*F + f] = A_eff[v, w] * W[c, f]
        return jnp.einsum('vw,cf->wcvf', g["a"], g["w"]).reshape(V * C, V * F)

    wg = jnp.concatenate([big_w(p["tool_gcn"]), big_w(p["phase_gcn"])], axis=1)
    bg = jnp.concatenate([jnp.tile(p["tool_gcn"]["b"], (1, V)),
                          jnp.tile(p["phase_gcn"]["b"], (1, V))], axis=1)
    sel = jnp.tile(jnp.eye(F, dtype=jnp.float32), (V, 1)) / V        # mean over nodes
    sg = _block_diag(sel, sel)

    # ---- MS-TCN: block-diagonal (tool | phase) channels; 3 dilated taps stacked along K.
    def fuse_stage(t, q):
        win = _block_diag(t["w_in"], q["w_in"])
        bin_ = jnp.concatenate([t["b_in"], q["b_in"]])[None, :]
        wdil = jnp.stack([
            jnp.concatenate([_block_diag(t["w_dil"][i, k], q["w_dil"][i, k])
                             for k in range(3)], axis=0)             # rows: [t-2d | t-d | t]
            for i in range(L)])
        bdil = jnp.stack([jnp.concatenate([t["b_dil"][i], q["b_dil"][i]])[None, :]
                          for i in range(L)])
        wres = jnp.stack([_block_diag(t["w_res"][i], q["w_res"][i]) for i in range(L)])
        bres = jnp.stack([jnp.concatenate([t["b_res"][i], q["b_res"][i]])[None, :]
                          for i in range(L)])
        wout = _block_diag(t["w_out"], q["w_out"])
        bout = jnp.concatenate([t["b_out"], q["b_out"]])[None, :]
        return win, bin_, wdil, bdil, wres, bres, wout, bout

    stages = [fuse_stage(t, q) for t, q in zip(p["tcn_tool"], p["tcn_phase"])]
    win, bin_, wdil, bdil, wres, bres, wout, bout = (
        jnp.stack([s[j] for s in stages]) for j in range(8))

    # ---- FC heads: one wide first layer, block-diagonal second layer.
    hs, ht, hr = p["fc_stage_RSD"], p["fc_tool_stage_RSD"], p["fc_RSD"]
    w1 = jnp.concatenate([hs["w1"], ht["w1"], hr["w1"]], axis=1)     # (2F, 3*fc_h)
    b1 = jnp.concatenate([hs["b1"], ht["b1"], hr["b1"]], axis=1)
    w2 = _block_diag(hs["w2"], ht["w2"], hr["w2"])                   # (3*fc_h, 34)
    b2 = jnp.concatenate([hs["b2"], ht["b2"], hr["b2"]], axis=1)

    # zero-pad head columns so [feature(2F) | heads] is an exact multiple of 128 lanes
    raw = 2 * F + w2.shape[1]
    out_pad = ((raw + 127) // 128) * 128
    pad = out_pad - raw
    w2 = jnp.pad(w2, ((0, 0), (0, pad)))
    b2 = jnp.pad(b2, ((0, 0), (0, pad)))

    # MXU is bf16-native on all generations: matmul weights -> bf16, biases stay f32
    bf = lambda a: a.astype(jnp.bfloat16)
    return dict(F=F, n_phase=p["n_phase"], n_tool=p["n_tool"],
                wg=bf(wg), bg=bg, sg=bf(sg),
                win=bf(win), bin=bin_, wdil=bf(wdil), bdil=bdil,
                wres=bf(wres), bres=bres, wout=bf(wout), bout=bout,
                w1=bf(w1), b1=b1, w2=bf(w2), b2=b2)


# =============================================================================
# Pure-JAX reference (un-fused, per-branch, f32) for a structural correctness check
# =============================================================================
def _reference_forward(bb, p):
    N, T, V, C = bb.shape
    L = p["L"]
    hp = jax.lax.Precision.HIGHEST

    def sgcn(g):
        agg = jnp.einsum('vw,ntwc->ntvc', g["a"], bb, precision=hp)
        proj = jnp.einsum('ntvc,cf->ntvf', agg, g["w"], precision=hp) + g["b"][0]
        return jnp.mean(jnp.maximum(proj, 0.0), axis=2)              # (N, T, F)

    def shift(f, s):
        if s >= T:
            return jnp.zeros_like(f)
        return jnp.pad(f, ((0, 0), (s, 0), (0, 0)))[:, :T, :]

    def tcn_stage(f, sp):
        f = jnp.einsum('ntf,fg->ntg', f, sp["w_in"], precision=hp) + sp["b_in"]
        for i in range(L):
            d = 2 ** i
            h = (jnp.einsum('ntf,fg->ntg', shift(f, 2 * d), sp["w_dil"][i, 0], precision=hp)
                 + jnp.einsum('ntf,fg->ntg', shift(f, d), sp["w_dil"][i, 1], precision=hp)
                 + jnp.einsum('ntf,fg->ntg', f, sp["w_dil"][i, 2], precision=hp)
                 + sp["b_dil"][i])
            h = jnp.maximum(h, 0.0)
            h = jnp.einsum('ntf,fg->ntg', h, sp["w_res"][i], precision=hp) + sp["b_res"][i]
            f = f + h
        return jnp.einsum('ntf,fg->ntg', f, sp["w_out"], precision=hp) + sp["b_out"]

    def head(z, hd):
        g = jnp.maximum(jnp.einsum('ntf,fh->nth', z, hd["w1"], precision=hp) + hd["b1"][0], 0.0)
        return jnp.einsum('nth,ho->nto', g, hd["w2"], precision=hp) + hd["b2"][0]

    tool, phase = sgcn(p["tool_gcn"]), sgcn(p["phase_gcn"])
    for sp in p["tcn_tool"]:
        tool = tcn_stage(tool, sp)
    for sp in p["tcn_phase"]:
        phase = tcn_stage(phase, sp)
    feat = jnp.concatenate([tool, phase], axis=-1)
    return (feat, head(feat, p["fc_stage_RSD"]), head(feat, p["fc_tool_stage_RSD"]),
            head(feat, p["fc_RSD"])[..., 0])


if __name__ == "__main__":
    N, T, V, C = 8, 16, 6, 4
    key = jax.random.PRNGKey(0)
    k_bb, k_x, k_params = jax.random.split(key, 3)
    bb = jax.random.normal(k_bb, (N, T, V, C), jnp.float32)
    x_dummy = jax.random.normal(k_x, (N, 16, T), jnp.float32)   # unused (stream='Graph')
    params = init_params(k_params, V=V)
    fused = fuse_params(params)

    feature, stage_RSD, tool_stage_RSD, RSD = gcn_progress_net_forward(x_dummy, bb, fused)
    jax.block_until_ready((feature, stage_RSD, tool_stage_RSD, RSD))

    assert feature.shape == (N, T, 32)
    assert stage_RSD.shape == (N, T, 18)          # num_classes_phase * 3
    assert tool_stage_RSD.shape == (N, T, 15)     # num_class * 3
    assert RSD.shape == (N, T)
    outs = (feature, stage_RSD, tool_stage_RSD, RSD)
    assert all(bool(jnp.all(jnp.isfinite(a))) for a in outs)

    # structural check vs the un-fused pure-JAX f32 reference; tolerance covers the
    # bf16 weight cast + MXU accumulation differences.
    refs = _reference_forward(bb, params)
    for r, o in zip(refs, outs):
        assert r.shape == o.shape
        err = float(jnp.max(jnp.abs(r - o)))
        tol = 4e-2 * max(1.0, float(jnp.max(jnp.abs(r))))
        assert err < tol, (err, tol)

    print("KERNEL_OK")
</pallas_src>

<mosaic_0001>
module attributes {stable_mosaic.version = 11 : i64} {
  func.func @fused_forward_kernel(%arg0: i32, %arg1: memref<128x24xf32, #tpu.memory_space<vmem>>, %arg2: memref<24x192xbf16, #tpu.memory_space<vmem>>, %arg3: memref<1x192xf32, #tpu.memory_space<vmem>>, %arg4: memref<192x32xbf16, #tpu.memory_space<vmem>>, %arg5: memref<2x32x32xbf16, #tpu.memory_space<vmem>>, %arg6: memref<2x1x32xf32, #tpu.memory_space<vmem>>, %arg7: memref<2x14x96x32xbf16, #tpu.memory_space<vmem>>, %arg8: memref<2x14x1x32xf32, #tpu.memory_space<vmem>>, %arg9: memref<2x14x32x32xbf16, #tpu.memory_space<vmem>>, %arg10: memref<2x14x1x32xf32, #tpu.memory_space<vmem>>, %arg11: memref<2x32x32xbf16, #tpu.memory_space<vmem>>, %arg12: memref<2x1x32xf32, #tpu.memory_space<vmem>>, %arg13: memref<32x768xbf16, #tpu.memory_space<vmem>>, %arg14: memref<1x768xf32, #tpu.memory_space<vmem>>, %arg15: memref<768x96xbf16, #tpu.memory_space<vmem>>, %arg16: memref<1x96xf32, #tpu.memory_space<vmem>>, %arg17: memref<128x128xf32, #tpu.memory_space<vmem>>) attributes {dimension_semantics = [#tpu.dimension_semantics<parallel>], iteration_bounds = array<i64: 1>, scalar_prefetch = 0 : i64, scratch_operands = 0 : i64, tpu.core_type = #tpu.core_type<tc>, window_params = [{transform_indices = @transform_0, window_bounds = array<i64: 128, 24>}, {pipeline_mode = #tpu.pipeline_mode<synchronous>, transform_indices = @transform_1, window_bounds = array<i64: 24, 192>}, {pipeline_mode = #tpu.pipeline_mode<synchronous>, transform_indices = @transform_2, window_bounds = array<i64: 1, 192>}, {pipeline_mode = #tpu.pipeline_mode<synchronous>, transform_indices = @transform_3, window_bounds = array<i64: 192, 32>}, {pipeline_mode = #tpu.pipeline_mode<synchronous>, transform_indices = @transform_4, window_bounds = array<i64: 2, 32, 32>}, {pipeline_mode = #tpu.pipeline_mode<synchronous>, transform_indices = @transform_5, window_bounds = array<i64: 2, 1, 32>}, {pipeline_mode = #tpu.pipeline_mode<synchronous>, transform_indices = @transform_6, window_bounds = array<i64: 2, 14, 96, 32>}, {pipeline_mode = #tpu.pipeline_mode<synchronous>, transform_indices = @transform_7, window_bounds = array<i64: 2, 14, 1, 32>}, {pipeline_mode = #tpu.pipeline_mode<synchronous>, transform_indices = @transform_8, window_bounds = array<i64: 2, 14, 32, 32>}, {pipeline_mode = #tpu.pipeline_mode<synchronous>, transform_indices = @transform_9, window_bounds = array<i64: 2, 14, 1, 32>}, {pipeline_mode = #tpu.pipeline_mode<synchronous>, transform_indices = @transform_10, window_bounds = array<i64: 2, 32, 32>}, {pipeline_mode = #tpu.pipeline_mode<synchronous>, transform_indices = @transform_11, window_bounds = array<i64: 2, 1, 32>}, {pipeline_mode = #tpu.pipeline_mode<synchronous>, transform_indices = @transform_12, window_bounds = array<i64: 32, 768>}, {pipeline_mode = #tpu.pipeline_mode<synchronous>, transform_indices = @transform_13, window_bounds = array<i64: 1, 768>}, {pipeline_mode = #tpu.pipeline_mode<synchronous>, transform_indices = @transform_14, window_bounds = array<i64: 768, 96>}, {pipeline_mode = #tpu.pipeline_mode<synchronous>, transform_indices = @transform_15, window_bounds = array<i64: 1, 96>}, {transform_indices = @transform_16, window_bounds = array<i64: 128, 128>}]} {
    %c0 = arith.constant 0 : index
    %c0_0 = arith.constant 0 : index
    %0 = vector.load %arg1[%c0, %c0_0] : memref<128x24xf32, #tpu.memory_space<vmem>>, vector<128x24xf32>
    %c0_1 = arith.constant 0 : index
    %c0_2 = arith.constant 0 : index
    %1 = vector.load %arg2[%c0_1, %c0_2] : memref<24x192xbf16, #tpu.memory_space<vmem>>, vector<24x192xbf16>
    %2 = arith.truncf %0 : vector<128x24xf32> to vector<128x24xbf16>
    %cst = arith.constant dense<0.000000e+00> : vector<128x192xf32>
    %3 = tpu.matmul %2, %1, %cst {dimension_numbers = #tpu.dot_dimension_numbers<[1], [0], [0], [1], [0, 0, 1, 1], [], []>} : vector<128x24xbf16>, vector<24x192xbf16>, vector<128x192xf32> -> vector<128x192xf32>
    %c0_3 = arith.constant 0 : index
    %c0_4 = arith.constant 0 : index
    %4 = vector.load %arg3[%c0_3, %c0_4] : memref<1x192xf32, #tpu.memory_space<vmem>>, vector<1x192xf32>
    %5 = vector.broadcast %4 : vector<1x192xf32> to vector<128x192xf32>
    %6 = arith.addf %3, %5 : vector<128x192xf32>
    %cst_5 = arith.constant 0.000000e+00 : f32
    %7 = vector.broadcast %cst_5 : f32 to vector<128x192xf32>
    %8 = arith.maximumf %6, %7 : vector<128x192xf32>
    %c0_6 = arith.constant 0 : index
    %c0_7 = arith.constant 0 : index
    %9 = vector.load %arg4[%c0_6, %c0_7] : memref<192x32xbf16, #tpu.memory_space<vmem>>, vector<192x32xbf16>
    %10 = arith.truncf %8 : vector<128x192xf32> to vector<128x192xbf16>
    %cst_8 = arith.constant dense<0.000000e+00> : vector<128x32xf32>
    %11 = tpu.matmul %10, %9, %cst_8 {dimension_numbers = #tpu.dot_dimension_numbers<[1], [0], [0], [1], [0, 0, 1, 1], [], []>} : vector<128x192xbf16>, vector<192x32xbf16>, vector<128x32xf32> -> vector<128x32xf32>
    %12 = tpu.iota {dimensions = array<i32: 0>} : vector<128x32xi32>
    %c16_i32 = arith.constant 16 : i32
    %c0_i32 = arith.constant 0 : i32
    %13 = arith.cmpi eq, %c16_i32, %c0_i32 : i32
    %c1_i32 = arith.constant 1 : i32
    %14 = arith.select %13, %c1_i32, %c16_i32 : i32
    %15 = vector.broadcast %14 : i32 to vector<128x32xi32>
    %16 = arith.remsi %12, %15 : vector<128x32xi32>
    %c0_i32_9 = arith.constant 0 : i32
    %17 = vector.broadcast %c0_i32_9 : i32 to vector<128x32xi32>
    %18 = arith.cmpi ne, %16, %17 : vector<128x32xi32>
    %c0_i32_10 = arith.constant 0 : i32
    %19 = vector.broadcast %c0_i32_10 : i32 to vector<128x32xi32>
    %20 = arith.cmpi slt, %16, %19 : vector<128x32xi32>
    %c0_i32_11 = arith.constant 0 : i32
    %21 = arith.cmpi slt, %14, %c0_i32_11 : i32
    %22 = vector.broadcast %21 : i1 to vector<128x32xi1>
    %23 = vector.broadcast %22 : vector<128x32xi1> to vector<128x32xi1>
    %24 = arith.xori %20, %23 : vector<128x32xi1>
    %25 = arith.andi %24, %18 : vector<128x32xi1>
    %26 = vector.broadcast %14 : i32 to vector<128x32xi32>
    %27 = arith.addi %16, %26 : vector<128x32xi32>
    %28 = arith.select %25, %27, %16 : vector<128x32xi1>, vector<128x32xi32>
    %c0_12 = arith.constant 0 : index
    %c0_13 = arith.constant 0 : index
    %c0_14 = arith.constant 0 : index
    %29 = vector.load %arg5[%c0_12, %c0_13, %c0_14] : memref<2x32x32xbf16, #tpu.memory_space<vmem>>, vector<1x32x32xbf16>
    %30 = vector.shape_cast %29 : vector<1x32x32xbf16> to vector<32x32xbf16>
    %31 = arith.truncf %11 : vector<128x32xf32> to vector<128x32xbf16>
    %cst_15 = arith.constant dense<0.000000e+00> : vector<128x32xf32>
    %32 = tpu.matmul %31, %30, %cst_15 {dimension_numbers = #tpu.dot_dimension_numbers<[1], [0], [0], [1], [0, 0, 1, 1], [], []>} : vector<128x32xbf16>, vector<32x32xbf16>, vector<128x32xf32> -> vector<128x32xf32>
    %c0_16 = arith.constant 0 : index
    %c0_17 = arith.constant 0 : index
    %c0_18 = arith.constant 0 : index
    %33 = vector.load %arg6[%c0_16, %c0_17, %c0_18] : memref<2x1x32xf32, #tpu.memory_space<vmem>>, vector<1x1x32xf32>
    %34 = vector.shape_cast %33 : vector<1x1x32xf32> to vector<1x32xf32>
    %35 = vector.broadcast %34 : vector<1x32xf32> to vector<128x32xf32>
    %36 = arith.addf %32, %35 : vector<128x32xf32>
    %cst_19 = arith.constant 0.000000e+00 : f32
    %37 = vector.broadcast %cst_19 : f32 to vector<2x32xf32>
    %38 = vector.extract_strided_slice %36 {offsets = [0, 0], sizes = [126, 32], strides = [1, 1]} : vector<128x32xf32> to vector<126x32xf32>
    %39 = tpu.concatenate %37, %38 in 0 : vector<2x32xf32>, vector<126x32xf32> -> vector<128x32xf32>
    %c2_i32 = arith.constant 2 : i32
    %40 = vector.broadcast %c2_i32 : i32 to vector<128x32xi32>
    %41 = arith.cmpi slt, %28, %40 : vector<128x32xi32>
    %cst_20 = arith.constant 0.000000e+00 : f32
    %42 = vector.broadcast %cst_20 : f32 to vector<128x32xf32>
    %43 = arith.select %41, %42, %39 : vector<128x32xi1>, vector<128x32xf32>
    %cst_21 = arith.constant 0.000000e+00 : f32
    %44 = vector.broadcast %cst_21 : f32 to vector<1x32xf32>
    %45 = vector.extract_strided_slice %36 {offsets = [0, 0], sizes = [127, 32], strides = [1, 1]} : vector<128x32xf32> to vector<127x32xf32>
    %46 = tpu.concatenate %44, %45 in 0 : vector<1x32xf32>, vector<127x32xf32> -> vector<128x32xf32>
    %c1_i32_22 = arith.constant 1 : i32
    %47 = vector.broadcast %c1_i32_22 : i32 to vector<128x32xi32>
    %48 = arith.cmpi slt, %28, %47 : vector<128x32xi32>
    %cst_23 = arith.constant 0.000000e+00 : f32
    %49 = vector.broadcast %cst_23 : f32 to vector<128x32xf32>
    %50 = arith.select %48, %49, %46 : vector<128x32xi1>, vector<128x32xf32>
    %51 = tpu.concatenate %43, %50, %36 in 1 : vector<128x32xf32>, vector<128x32xf32>, vector<128x32xf32> -> vector<128x96xf32>
    %c0_24 = arith.constant 0 : index
    %c0_25 = arith.constant 0 : index
    %c0_26 = arith.constant 0 : index
    %c0_27 = arith.constant 0 : index
    %52 = vector.load %arg7[%c0_24, %c0_25, %c0_26, %c0_27] : memref<2x14x96x32xbf16, #tpu.memory_space<vmem>>, vector<1x1x96x32xbf16>
    %53 = vector.shape_cast %52 : vector<1x1x96x32xbf16> to vector<96x32xbf16>
    %54 = arith.truncf %51 : vector<128x96xf32> to vector<128x96xbf16>
    %cst_28 = arith.constant dense<0.000000e+00> : vector<128x32xf32>
    %55 = tpu.matmul %54, %53, %cst_28 {dimension_numbers = #tpu.dot_dimension_numbers<[1], [0], [0], [1], [0, 0, 1, 1], [], []>} : vector<128x96xbf16>, vector<96x32xbf16>, vector<128x32xf32> -> vector<128x32xf32>
    %c0_29 = arith.constant 0 : index
    %c0_30 = arith.constant 0 : index
    %c0_31 = arith.constant 0 : index
    %c0_32 = arith.constant 0 : index
    %56 = vector.load %arg8[%c0_29, %c0_30, %c0_31, %c0_32] : memref<2x14x1x32xf32, #tpu.memory_space<vmem>>, vector<1x1x1x32xf32>
    %57 = vector.shape_cast %56 : vector<1x1x1x32xf32> to vector<1x32xf32>
    %58 = vector.broadcast %57 : vector<1x32xf32> to vector<128x32xf32>
    %59 = arith.addf %55, %58 : vector<128x32xf32>
    %cst_33 = arith.constant 0.000000e+00 : f32
    %60 = vector.broadcast %cst_33 : f32 to vector<128x32xf32>
    %61 = arith.maximumf %59, %60 : vector<128x32xf32>
    %c0_34 = arith.constant 0 : index
    %c0_35 = arith.constant 0 : index
    %c0_36 = arith.constant 0 : index
    %c0_37 = arith.constant 0 : index
    %62 = vector.load %arg9[%c0_34, %c0_35, %c0_36, %c0_37] : memref<2x14x32x32xbf16, #tpu.memory_space<vmem>>, vector<1x1x32x32xbf16>
    %63 = vector.shape_cast %62 : vector<1x1x32x32xbf16> to vector<32x32xbf16>
    %64 = arith.truncf %61 : vector<128x32xf32> to vector<128x32xbf16>
    %cst_38 = arith.constant dense<0.000000e+00> : vector<128x32xf32>
    %65 = tpu.matmul %64, %63, %cst_38 {dimension_numbers = #tpu.dot_dimension_numbers<[1], [0], [0], [1], [0, 0, 1, 1], [], []>} : vector<128x32xbf16>, vector<32x32xbf16>, vector<128x32xf32> -> vector<128x32xf32>
    %c0_39 = arith.constant 0 : index
    %c0_40 = arith.constant 0 : index
    %c0_41 = arith.constant 0 : index
    %c0_42 = arith.constant 0 : index
    %66 = vector.load %arg10[%c0_39, %c0_40, %c0_41, %c0_42] : memref<2x14x1x32xf32, #tpu.memory_space<vmem>>, vector<1x1x1x32xf32>
    %67 = vector.shape_cast %66 : vector<1x1x1x32xf32> to vector<1x32xf32>
    %68 = vector.broadcast %67 : vector<1x32xf32> to vector<128x32xf32>
    %69 = arith.addf %65, %68 : vector<128x32xf32>
    %70 = arith.addf %36, %69 : vector<128x32xf32>
    %cst_43 = arith.constant 0.000000e+00 : f32
    %71 = vector.broadcast %cst_43 : f32 to vector<4x32xf32>
    %72 = vector.extract_strided_slice %70 {offsets = [0, 0], sizes = [124, 32], strides = [1, 1]} : vector<128x32xf32> to vector<124x32xf32>
    %73 = tpu.concatenate %71, %72 in 0 : vector<4x32xf32>, vector<124x32xf32> -> vector<128x32xf32>
    %c4_i32 = arith.constant 4 : i32
    %74 = vector.broadcast %c4_i32 : i32 to vector<128x32xi32>
    %75 = arith.cmpi slt, %28, %74 : vector<128x32xi32>
    %cst_44 = arith.constant 0.000000e+00 : f32
    %76 = vector.broadcast %cst_44 : f32 to vector<128x32xf32>
    %77 = arith.select %75, %76, %73 : vector<128x32xi1>, vector<128x32xf32>
    %cst_45 = arith.constant 0.000000e+00 : f32
    %78 = vector.broadcast %cst_45 : f32 to vector<2x32xf32>
    %79 = vector.extract_strided_slice %70 {offsets = [0, 0], sizes = [126, 32], strides = [1, 1]} : vector<128x32xf32> to vector<126x32xf32>
    %80 = tpu.concatenate %78, %79 in 0 : vector<2x32xf32>, vector<126x32xf32> -> vector<128x32xf32>
    %c2_i32_46 = arith.constant 2 : i32
    %81 = vector.broadcast %c2_i32_46 : i32 to vector<128x32xi32>
    %82 = arith.cmpi slt, %28, %81 : vector<128x32xi32>
    %cst_47 = arith.constant 0.000000e+00 : f32
    %83 = vector.broadcast %cst_47 : f32 to vector<128x32xf32>
    %84 = arith.select %82, %83, %80 : vector<128x32xi1>, vector<128x32xf32>
    %85 = tpu.concatenate %77, %84, %70 in 1 : vector<128x32xf32>, vector<128x32xf32>, vector<128x32xf32> -> vector<128x96xf32>
    %c0_48 = arith.constant 0 : index
    %c1 = arith.constant 1 : index
    %c0_49 = arith.constant 0 : index
    %c0_50 = arith.constant 0 : index
    %86 = vector.load %arg7[%c0_48, %c1, %c0_49, %c0_50] : memref<2x14x96x32xbf16, #tpu.memory_space<vmem>>, vector<1x1x96x32xbf16>
    %87 = vector.shape_cast %86 : vector<1x1x96x32xbf16> to vector<96x32xbf16>
    %88 = arith.truncf %85 : vector<128x96xf32> to vector<128x96xbf16>
    %cst_51 = arith.constant dense<0.000000e+00> : vector<128x32xf32>
    %89 = tpu.matmul %88, %87, %cst_51 {dimension_numbers = #tpu.dot_dimension_numbers<[1], [0], [0], [1], [0, 0, 1, 1], [], []>} : vector<128x96xbf16>, vector<96x32xbf16>, vector<128x32xf32> -> vector<128x32xf32>
    %c0_52 = arith.constant 0 : index
    %c1_53 = arith.constant 1 : index
    %c0_54 = arith.constant 0 : index
    %c0_55 = arith.constant 0 : index
    %90 = vector.load %arg8[%c0_52, %c1_53, %c0_54, %c0_55] : memref<2x14x1x32xf32, #tpu.memory_space<vmem>>, vector<1x1x1x32xf32>
    %91 = vector.shape_cast %90 : vector<1x1x1x32xf32> to vector<1x32xf32>
    %92 = vector.broadcast %91 : vector<1x32xf32> to vector<128x32xf32>
    %93 = arith.addf %89, %92 : vector<128x32xf32>
    %cst_56 = arith.constant 0.000000e+00 : f32
    %94 = vector.broadcast %cst_56 : f32 to vector<128x32xf32>
    %95 = arith.maximumf %93, %94 : vector<128x32xf32>
    %c0_57 = arith.constant 0 : index
    %c1_58 = arith.constant 1 : index
    %c0_59 = arith.constant 0 : index
    %c0_60 = arith.constant 0 : index
    %96 = vector.load %arg9[%c0_57, %c1_58, %c0_59, %c0_60] : memref<2x14x32x32xbf16, #tpu.memory_space<vmem>>, vector<1x1x32x32xbf16>
    %97 = vector.shape_cast %96 : vector<1x1x32x32xbf16> to vector<32x32xbf16>
    %98 = arith.truncf %95 : vector<128x32xf32> to vector<128x32xbf16>
    %cst_61 = arith.constant dense<0.000000e+00> : vector<128x32xf32>
    %99 = tpu.matmul %98, %97, %cst_61 {dimension_numbers = #tpu.dot_dimension_numbers<[1], [0], [0], [1], [0, 0, 1, 1], [], []>} : vector<128x32xbf16>, vector<32x32xbf16>, vector<128x32xf32> -> vector<128x32xf32>
    %c0_62 = arith.constant 0 : index
    %c1_63 = arith.constant 1 : index
    %c0_64 = arith.constant 0 : index
    %c0_65 = arith.constant 0 : index
    %100 = vector.load %arg10[%c0_62, %c1_63, %c0_64, %c0_65] : memref<2x14x1x32xf32, #tpu.memory_space<vmem>>, vector<1x1x1x32xf32>
    %101 = vector.shape_cast %100 : vector<1x1x1x32xf32> to vector<1x32xf32>
    %102 = vector.broadcast %101 : vector<1x32xf32> to vector<128x32xf32>
    %103 = arith.addf %99, %102 : vector<128x32xf32>
    %104 = arith.addf %70, %103 : vector<128x32xf32>
    %cst_66 = arith.constant 0.000000e+00 : f32
    %105 = vector.broadcast %cst_66 : f32 to vector<8x32xf32>
    %106 = vector.extract_strided_slice %104 {offsets = [0, 0], sizes = [120, 32], strides = [1, 1]} : vector<128x32xf32> to vector<120x32xf32>
    %107 = tpu.concatenate %105, %106 in 0 : vector<8x32xf32>, vector<120x32xf32> -> vector<128x32xf32>
    %c8_i32 = arith.constant 8 : i32
    %108 = vector.broadcast %c8_i32 : i32 to vector<128x32xi32>
    %109 = arith.cmpi slt, %28, %108 : vector<128x32xi32>
    %cst_67 = arith.constant 0.000000e+00 : f32
    %110 = vector.broadcast %cst_67 : f32 to vector<128x32xf32>
    %111 = arith.select %109, %110, %107 : vector<128x32xi1>, vector<128x32xf32>
    %cst_68 = arith.constant 0.000000e+00 : f32
    %112 = vector.broadcast %cst_68 : f32 to vector<4x32xf32>
    %113 = vector.extract_strided_slice %104 {offsets = [0, 0], sizes = [124, 32], strides = [1, 1]} : vector<128x32xf32> to vector<124x32xf32>
    %114 = tpu.concatenate %112, %113 in 0 : vector<4x32xf32>, vector<124x32xf32> -> vector<128x32xf32>
    %c4_i32_69 = arith.constant 4 : i32
    %115 = vector.broadcast %c4_i32_69 : i32 to vector<128x32xi32>
    %116 = arith.cmpi slt, %28, %115 : vector<128x32xi32>
    %cst_70 = arith.constant 0.000000e+00 : f32
    %117 = vector.broadcast %cst_70 : f32 to vector<128x32xf32>
    %118 = arith.select %116, %117, %114 : vector<128x32xi1>, vector<128x32xf32>
    %119 = tpu.concatenate %111, %118, %104 in 1 : vector<128x32xf32>, vector<128x32xf32>, vector<128x32xf32> -> vector<128x96xf32>
    %c0_71 = arith.constant 0 : index
    %c2 = arith.constant 2 : index
    %c0_72 = arith.constant 0 : index
    %c0_73 = arith.constant 0 : index
    %120 = vector.load %arg7[%c0_71, %c2, %c0_72, %c0_73] : memref<2x14x96x32xbf16, #tpu.memory_space<vmem>>, vector<1x1x96x32xbf16>
    %121 = vector.shape_cast %120 : vector<1x1x96x32xbf16> to vector<96x32xbf16>
    %122 = arith.truncf %119 : vector<128x96xf32> to vector<128x96xbf16>
    %cst_74 = arith.constant dense<0.000000e+00> : vector<128x32xf32>
    %123 = tpu.matmul %122, %121, %cst_74 {dimension_numbers = #tpu.dot_dimension_numbers<[1], [0], [0], [1], [0, 0, 1, 1], [], []>} : vector<128x96xbf16>, vector<96x32xbf16>, vector<128x32xf32> -> vector<128x32xf32>
    %c0_75 = arith.constant 0 : index
    %c2_76 = arith.constant 2 : index
    %c0_77 = arith.constant 0 : index
    %c0_78 = arith.constant 0 : index
    %124 = vector.load %arg8[%c0_75, %c2_76, %c0_77, %c0_78] : memref<2x14x1x32xf32, #tpu.memory_space<vmem>>, vector<1x1x1x32xf32>
    %125 = vector.shape_cast %124 : vector<1x1x1x32xf32> to vector<1x32xf32>
    %126 = vector.broadcast %125 : vector<1x32xf32> to vector<128x32xf32>
    %127 = arith.addf %123, %126 : vector<128x32xf32>
    %cst_79 = arith.constant 0.000000e+00 : f32
    %128 = vector.broadcast %cst_79 : f32 to vector<128x32xf32>
    %129 = arith.maximumf %127, %128 : vector<128x32xf32>
    %c0_80 = arith.constant 0 : index
    %c2_81 = arith.constant 2 : index
    %c0_82 = arith.constant 0 : index
    %c0_83 = arith.constant 0 : index
    %130 = vector.load %arg9[%c0_80, %c2_81, %c0_82, %c0_83] : memref<2x14x32x32xbf16, #tpu.memory_space<vmem>>, vector<1x1x32x32xbf16>
    %131 = vector.shape_cast %130 : vector<1x1x32x32xbf16> to vector<32x32xbf16>
    %132 = arith.truncf %129 : vector<128x32xf32> to vector<128x32xbf16>
    %cst_84 = arith.constant dense<0.000000e+00> : vector<128x32xf32>
    %133 = tpu.matmul %132, %131, %cst_84 {dimension_numbers = #tpu.dot_dimension_numbers<[1], [0], [0], [1], [0, 0, 1, 1], [], []>} : vector<128x32xbf16>, vector<32x32xbf16>, vector<128x32xf32> -> vector<128x32xf32>
    %c0_85 = arith.constant 0 : index
    %c2_86 = arith.constant 2 : index
    %c0_87 = arith.constant 0 : index
    %c0_88 = arith.constant 0 : index
    %134 = vector.load %arg10[%c0_85, %c2_86, %c0_87, %c0_88] : memref<2x14x1x32xf32, #tpu.memory_space<vmem>>, vector<1x1x1x32xf32>
    %135 = vector.shape_cast %134 : vector<1x1x1x32xf32> to vector<1x32xf32>
    %136 = vector.broadcast %135 : vector<1x32xf32> to vector<128x32xf32>
    %137 = arith.addf %133, %136 : vector<128x32xf32>
    %138 = arith.addf %104, %137 : vector<128x32xf32>
    %cst_89 = arith.constant 0.000000e+00 : f32
    %139 = vector.broadcast %cst_89 : f32 to vector<8x32xf32>
    %140 = vector.extract_strided_slice %138 {offsets = [0, 0], sizes = [120, 32], strides = [1, 1]} : vector<128x32xf32> to vector<120x32xf32>
    %141 = tpu.concatenate %139, %140 in 0 : vector<8x32xf32>, vector<120x32xf32> -> vector<128x32xf32>
    %c8_i32_90 = arith.constant 8 : i32
    %142 = vector.broadcast %c8_i32_90 : i32 to vector<128x32xi32>
    %143 = arith.cmpi slt, %28, %142 : vector<128x32xi32>
    %cst_91 = arith.constant 0.000000e+00 : f32
    %144 = vector.broadcast %cst_91 : f32 to vector<128x32xf32>
    %145 = arith.select %143, %144, %141 : vector<128x32xi1>, vector<128x32xf32>
    %146 = tpu.concatenate %145, %138 in 1 : vector<128x32xf32>, vector<128x32xf32> -> vector<128x64xf32>
    %c0_92 = arith.constant 0 : index
    %c3 = arith.constant 3 : index
    %c32 = arith.constant 32 : index
    %c0_93 = arith.constant 0 : index
    %147 = vector.load %arg7[%c0_92, %c3, %c32, %c0_93] : memref<2x14x96x32xbf16, #tpu.memory_space<vmem>>, vector<1x1x64x32xbf16>
    %148 = vector.shape_cast %147 : vector<1x1x64x32xbf16> to vector<64x32xbf16>
    %149 = arith.truncf %146 : vector<128x64xf32> to vector<128x64xbf16>
    %cst_94 = arith.constant dense<0.000000e+00> : vector<128x32xf32>
    %150 = tpu.matmul %149, %148, %cst_94 {dimension_numbers = #tpu.dot_dimension_numbers<[1], [0], [0], [1], [0, 0, 1, 1], [], []>} : vector<128x64xbf16>, vector<64x32xbf16>, vector<128x32xf32> -> vector<128x32xf32>
    %c0_95 = arith.constant 0 : index
    %c3_96 = arith.constant 3 : index
    %c0_97 = arith.constant 0 : index
    %c0_98 = arith.constant 0 : index
    %151 = vector.load %arg8[%c0_95, %c3_96, %c0_97, %c0_98] : memref<2x14x1x32xf32, #tpu.memory_space<vmem>>, vector<1x1x1x32xf32>
    %152 = vector.shape_cast %151 : vector<1x1x1x32xf32> to vector<1x32xf32>
    %153 = vector.broadcast %152 : vector<1x32xf32> to vector<128x32xf32>
    %154 = arith.addf %150, %153 : vector<128x32xf32>
    %cst_99 = arith.constant 0.000000e+00 : f32
    %155 = vector.broadcast %cst_99 : f32 to vector<128x32xf32>
    %156 = arith.maximumf %154, %155 : vector<128x32xf32>
    %c0_100 = arith.constant 0 : index
    %c3_101 = arith.constant 3 : index
    %c0_102 = arith.constant 0 : index
    %c0_103 = arith.constant 0 : index
    %157 = vector.load %arg9[%c0_100, %c3_101, %c0_102, %c0_103] : memref<2x14x32x32xbf16, #tpu.memory_space<vmem>>, vector<1x1x32x32xbf16>
    %158 = vector.shape_cast %157 : vector<1x1x32x32xbf16> to vector<32x32xbf16>
    %159 = arith.truncf %156 : vector<128x32xf32> to vector<128x32xbf16>
    %cst_104 = arith.constant dense<0.000000e+00> : vector<128x32xf32>
    %160 = tpu.matmul %159, %158, %cst_104 {dimension_numbers = #tpu.dot_dimension_numbers<[1], [0], [0], [1], [0, 0, 1, 1], [], []>} : vector<128x32xbf16>, vector<32x32xbf16>, vector<128x32xf32> -> vector<128x32xf32>
    %c0_105 = arith.constant 0 : index
    %c3_106 = arith.constant 3 : index
    %c0_107 = arith.constant 0 : index
    %c0_108 = arith.constant 0 : index
    %161 = vector.load %arg10[%c0_105, %c3_106, %c0_107, %c0_108] : memref<2x14x1x32xf32, #tpu.memory_space<vmem>>, vector<1x1x1x32xf32>
    %162 = vector.shape_cast %161 : vector<1x1x1x32xf32> to vector<1x32xf32>
    %163 = vector.broadcast %162 : vector<1x32xf32> to vector<128x32xf32>
    %164 = arith.addf %160, %163 : vector<128x32xf32>
    %165 = arith.addf %138, %164 : vector<128x32xf32>
    %c4_i32_109 = arith.constant 4 : i32
    %c10_i32 = arith.constant 10 : i32
    %166 = arith.addi %c4_i32_109, %c10_i32 : i32
    %c1_i32_110 = arith.constant 1 : i32
    %167 = scf.for %arg18 = %c4_i32_109 to %166 step %c1_i32_110 iter_args(%arg19 = %165) -> (vector<128x32xf32>)  : i32 {
      %c0_247 = arith.constant 0 : index
      %339 = arith.index_cast %arg18 : i32 to index
      %c0_248 = arith.constant 0 : index
      %c0_249 = arith.constant 0 : index
      %340 = vector.load %arg7[%c0_247, %339, %c0_248, %c0_249] : memref<2x14x96x32xbf16, #tpu.memory_space<vmem>>, vector<1x1x96x32xbf16>
      %341 = vector.shape_cast %340 : vector<1x1x96x32xbf16> to vector<96x32xbf16>
      %342 = vector.extract_strided_slice %341 {offsets = [64, 0], sizes = [32, 32], strides = [1, 1]} : vector<96x32xbf16> to vector<32x32xbf16>
      %343 = arith.truncf %arg19 : vector<128x32xf32> to vector<128x32xbf16>
      %cst_250 = arith.constant dense<0.000000e+00> : vector<128x32xf32>
      %344 = tpu.matmul %343, %342, %cst_250 {dimension_numbers = #tpu.dot_dimension_numbers<[1], [0], [0], [1], [0, 0, 1, 1], [], []>} : vector<128x32xbf16>, vector<32x32xbf16>, vector<128x32xf32> -> vector<128x32xf32>
      %c0_251 = arith.constant 0 : index
      %345 = arith.index_cast %arg18 : i32 to index
      %c0_252 = arith.constant 0 : index
      %c0_253 = arith.constant 0 : index
      %346 = vector.load %arg8[%c0_251, %345, %c0_252, %c0_253] : memref<2x14x1x32xf32, #tpu.memory_space<vmem>>, vector<1x1x1x32xf32>
      %347 = vector.shape_cast %346 : vector<1x1x1x32xf32> to vector<1x32xf32>
      %348 = vector.broadcast %347 : vector<1x32xf32> to vector<128x32xf32>
      %349 = arith.addf %344, %348 : vector<128x32xf32>
      %cst_254 = arith.constant 0.000000e+00 : f32
      %350 = vector.broadcast %cst_254 : f32 to vector<128x32xf32>
      %351 = arith.maximumf %349, %350 : vector<128x32xf32>
      %c0_255 = arith.constant 0 : index
      %352 = arith.index_cast %arg18 : i32 to index
      %c0_256 = arith.constant 0 : index
      %c0_257 = arith.constant 0 : index
      %353 = vector.load %arg9[%c0_255, %352, %c0_256, %c0_257] : memref<2x14x32x32xbf16, #tpu.memory_space<vmem>>, vector<1x1x32x32xbf16>
      %354 = vector.shape_cast %353 : vector<1x1x32x32xbf16> to vector<32x32xbf16>
      %355 = arith.truncf %351 : vector<128x32xf32> to vector<128x32xbf16>
      %cst_258 = arith.constant dense<0.000000e+00> : vector<128x32xf32>
      %356 = tpu.matmul %355, %354, %cst_258 {dimension_numbers = #tpu.dot_dimension_numbers<[1], [0], [0], [1], [0, 0, 1, 1], [], []>} : vector<128x32xbf16>, vector<32x32xbf16>, vector<128x32xf32> -> vector<128x32xf32>
      %c0_259 = arith.constant 0 : index
      %357 = arith.index_cast %arg18 : i32 to index
      %c0_260 = arith.constant 0 : index
      %c0_261 = arith.constant 0 : index
      %358 = vector.load %arg10[%c0_259, %357, %c0_260, %c0_261] : memref<2x14x1x32xf32, #tpu.memory_space<vmem>>, vector<1x1x1x32xf32>
      %359 = vector.shape_cast %358 : vector<1x1x1x32xf32> to vector<1x32xf32>
      %360 = vector.broadcast %359 : vector<1x32xf32> to vector<128x32xf32>
      %361 = arith.addf %356, %360 : vector<128x32xf32>
      %362 = arith.addf %arg19, %361 : vector<128x32xf32>
      scf.yield %362 : vector<128x32xf32>
    }
    %c10_i32_111 = arith.constant 10 : i32
    %c0_112 = arith.constant 0 : index
    %c0_113 = arith.constant 0 : index
    %c0_114 = arith.constant 0 : index
    %168 = vector.load %arg11[%c0_112, %c0_113, %c0_114] : memref<2x32x32xbf16, #tpu.memory_space<vmem>>, vector<1x32x32xbf16>
    %169 = vector.shape_cast %168 : vector<1x32x32xbf16> to vector<32x32xbf16>
    %170 = arith.truncf %167 : vector<128x32xf32> to vector<128x32xbf16>
    %cst_115 = arith.constant dense<0.000000e+00> : vector<128x32xf32>
    %171 = tpu.matmul %170, %169, %cst_115 {dimension_numbers = #tpu.dot_dimension_numbers<[1], [0], [0], [1], [0, 0, 1, 1], [], []>} : vector<128x32xbf16>, vector<32x32xbf16>, vector<128x32xf32> -> vector<128x32xf32>
    %c0_116 = arith.constant 0 : index
    %c0_117 = arith.constant 0 : index
    %c0_118 = arith.constant 0 : index
    %172 = vector.load %arg12[%c0_116, %c0_117, %c0_118] : memref<2x1x32xf32, #tpu.memory_space<vmem>>, vector<1x1x32xf32>
    %173 = vector.shape_cast %172 : vector<1x1x32xf32> to vector<1x32xf32>
    %174 = vector.broadcast %173 : vector<1x32xf32> to vector<128x32xf32>
    %175 = arith.addf %171, %174 : vector<128x32xf32>
    %c1_119 = arith.constant 1 : index
    %c0_120 = arith.constant 0 : index
    %c0_121 = arith.constant 0 : index
    %176 = vector.load %arg5[%c1_119, %c0_120, %c0_121] : memref<2x32x32xbf16, #tpu.memory_space<vmem>>, vector<1x32x32xbf16>
    %177 = vector.shape_cast %176 : vector<1x32x32xbf16> to vector<32x32xbf16>
    %178 = arith.truncf %175 : vector<128x32xf32> to vector<128x32xbf16>
    %cst_122 = arith.constant dense<0.000000e+00> : vector<128x32xf32>
    %179 = tpu.matmul %178, %177, %cst_122 {dimension_numbers = #tpu.dot_dimension_numbers<[1], [0], [0], [1], [0, 0, 1, 1], [], []>} : vector<128x32xbf16>, vector<32x32xbf16>, vector<128x32xf32> -> vector<128x32xf32>
    %c1_123 = arith.constant 1 : index
    %c0_124 = arith.constant 0 : index
    %c0_125 = arith.constant 0 : index
    %180 = vector.load %arg6[%c1_123, %c0_124, %c0_125] : memref<2x1x32xf32, #tpu.memory_space<vmem>>, vector<1x1x32xf32>
    %181 = vector.shape_cast %180 : vector<1x1x32xf32> to vector<1x32xf32>
    %182 = vector.broadcast %181 : vector<1x32xf32> to vector<128x32xf32>
    %183 = arith.addf %179, %182 : vector<128x32xf32>
    %cst_126 = arith.constant 0.000000e+00 : f32
    %184 = vector.broadcast %cst_126 : f32 to vector<2x32xf32>
    %185 = vector.extract_strided_slice %183 {offsets = [0, 0], sizes = [126, 32], strides = [1, 1]} : vector<128x32xf32> to vector<126x32xf32>
    %186 = tpu.concatenate %184, %185 in 0 : vector<2x32xf32>, vector<126x32xf32> -> vector<128x32xf32>
    %c2_i32_127 = arith.constant 2 : i32
    %187 = vector.broadcast %c2_i32_127 : i32 to vector<128x32xi32>
    %188 = arith.cmpi slt, %28, %187 : vector<128x32xi32>
    %cst_128 = arith.constant 0.000000e+00 : f32
    %189 = vector.broadcast %cst_128 : f32 to vector<128x32xf32>
    %190 = arith.select %188, %189, %186 : vector<128x32xi1>, vector<128x32xf32>
    %cst_129 = arith.constant 0.000000e+00 : f32
    %191 = vector.broadcast %cst_129 : f32 to vector<1x32xf32>
    %192 = vector.extract_strided_slice %183 {offsets = [0, 0], sizes = [127, 32], strides = [1, 1]} : vector<128x32xf32> to vector<127x32xf32>
    %193 = tpu.concatenate %191, %192 in 0 : vector<1x32xf32>, vector<127x32xf32> -> vector<128x32xf32>
    %c1_i32_130 = arith.constant 1 : i32
    %194 = vector.broadcast %c1_i32_130 : i32 to vector<128x32xi32>
    %195 = arith.cmpi slt, %28, %194 : vector<128x32xi32>
    %cst_131 = arith.constant 0.000000e+00 : f32
    %196 = vector.broadcast %cst_131 : f32 to vector<128x32xf32>
    %197 = arith.select %195, %196, %193 : vector<128x32xi1>, vector<128x32xf32>
    %198 = tpu.concatenate %190, %197, %183 in 1 : vector<128x32xf32>, vector<128x32xf32>, vector<128x32xf32> -> vector<128x96xf32>
    %c1_132 = arith.constant 1 : index
    %c0_133 = arith.constant 0 : index
    %c0_134 = arith.constant 0 : index
    %c0_135 = arith.constant 0 : index
    %199 = vector.load %arg7[%c1_132, %c0_133, %c0_134, %c0_135] : memref<2x14x96x32xbf16, #tpu.memory_space<vmem>>, vector<1x1x96x32xbf16>
    %200 = vector.shape_cast %199 : vector<1x1x96x32xbf16> to vector<96x32xbf16>
    %201 = arith.truncf %198 : vector<128x96xf32> to vector<128x96xbf16>
    %cst_136 = arith.constant dense<0.000000e+00> : vector<128x32xf32>
    %202 = tpu.matmul %201, %200, %cst_136 {dimension_numbers = #tpu.dot_dimension_numbers<[1], [0], [0], [1], [0, 0, 1, 1], [], []>} : vector<128x96xbf16>, vector<96x32xbf16>, vector<128x32xf32> -> vector<128x32xf32>
    %c1_137 = arith.constant 1 : index
    %c0_138 = arith.constant 0 : index
    %c0_139 = arith.constant 0 : index
    %c0_140 = arith.constant 0 : index
    %203 = vector.load %arg8[%c1_137, %c0_138, %c0_139, %c0_140] : memref<2x14x1x32xf32, #tpu.memory_space<vmem>>, vector<1x1x1x32xf32>
    %204 = vector.shape_cast %203 : vector<1x1x1x32xf32> to vector<1x32xf32>
    %205 = vector.broadcast %204 : vector<1x32xf32> to vector<128x32xf32>
    %206 = arith.addf %202, %205 : vector<128x32xf32>
    %cst_141 = arith.constant 0.000000e+00 : f32
    %207 = vector.broadcast %cst_141 : f32 to vector<128x32xf32>
    %208 = arith.maximumf %206, %207 : vector<128x32xf32>
    %c1_142 = arith.constant 1 : index
    %c0_143 = arith.constant 0 : index
    %c0_144 = arith.constant 0 : index
    %c0_145 = arith.constant 0 : index
    %209 = vector.load %arg9[%c1_142, %c0_143, %c0_144, %c0_145] : memref<2x14x32x32xbf16, #tpu.memory_space<vmem>>, vector<1x1x32x32xbf16>
    %210 = vector.shape_cast %209 : vector<1x1x32x32xbf16> to vector<32x32xbf16>
    %211 = arith.truncf %208 : vector<128x32xf32> to vector<128x32xbf16>
    %cst_146 = arith.constant dense<0.000000e+00> : vector<128x32xf32>
    %212 = tpu.matmul %211, %210, %cst_146 {dimension_numbers = #tpu.dot_dimension_numbers<[1], [0], [0], [1], [0, 0, 1, 1], [], []>} : vector<128x32xbf16>, vector<32x32xbf16>, vector<128x32xf32> -> vector<128x32xf32>
    %c1_147 = arith.constant 1 : index
    %c0_148 = arith.constant 0 : index
    %c0_149 = arith.constant 0 : index
    %c0_150 = arith.constant 0 : index
    %213 = vector.load %arg10[%c1_147, %c0_148, %c0_149, %c0_150] : memref<2x14x1x32xf32, #tpu.memory_space<vmem>>, vector<1x1x1x32xf32>
    %214 = vector.shape_cast %213 : vector<1x1x1x32xf32> to vector<1x32xf32>
    %215 = vector.broadcast %214 : vector<1x32xf32> to vector<128x32xf32>
    %216 = arith.addf %212, %215 : vector<128x32xf32>
    %217 = arith.addf %183, %216 : vector<128x32xf32>
    %cst_151 = arith.constant 0.000000e+00 : f32
    %218 = vector.broadcast %cst_151 : f32 to vector<4x32xf32>
    %219 = vector.extract_strided_slice %217 {offsets = [0, 0], sizes = [124, 32], strides = [1, 1]} : vector<128x32xf32> to vector<124x32xf32>
    %220 = tpu.concatenate %218, %219 in 0 : vector<4x32xf32>, vector<124x32xf32> -> vector<128x32xf32>
    %c4_i32_152 = arith.constant 4 : i32
    %221 = vector.broadcast %c4_i32_152 : i32 to vector<128x32xi32>
    %222 = arith.cmpi slt, %28, %221 : vector<128x32xi32>
    %cst_153 = arith.constant 0.000000e+00 : f32
    %223 = vector.broadcast %cst_153 : f32 to vector<128x32xf32>
    %224 = arith.select %222, %223, %220 : vector<128x32xi1>, vector<128x32xf32>
    %cst_154 = arith.constant 0.000000e+00 : f32
    %225 = vector.broadcast %cst_154 : f32 to vector<2x32xf32>
    %226 = vector.extract_strided_slice %217 {offsets = [0, 0], sizes = [126, 32], strides = [1, 1]} : vector<128x32xf32> to vector<126x32xf32>
    %227 = tpu.concatenate %225, %226 in 0 : vector<2x32xf32>, vector<126x32xf32> -> vector<128x32xf32>
    %c2_i32_155 = arith.constant 2 : i32
    %228 = vector.broadcast %c2_i32_155 : i32 to vector<128x32xi32>
    %229 = arith.cmpi slt, %28, %228 : vector<128x32xi32>
    %cst_156 = arith.constant 0.000000e+00 : f32
    %230 = vector.broadcast %cst_156 : f32 to vector<128x32xf32>
    %231 = arith.select %229, %230, %227 : vector<128x32xi1>, vector<128x32xf32>
    %232 = tpu.concatenate %224, %231, %217 in 1 : vector<128x32xf32>, vector<128x32xf32>, vector<128x32xf32> -> vector<128x96xf32>
    %c1_157 = arith.constant 1 : index
    %c1_158 = arith.constant 1 : index
    %c0_159 = arith.constant 0 : index
    %c0_160 = arith.constant 0 : index
    %233 = vector.load %arg7[%c1_157, %c1_158, %c0_159, %c0_160] : memref<2x14x96x32xbf16, #tpu.memory_space<vmem>>, vector<1x1x96x32xbf16>
    %234 = vector.shape_cast %233 : vector<1x1x96x32xbf16> to vector<96x32xbf16>
    %235 = arith.truncf %232 : vector<128x96xf32> to vector<128x96xbf16>
    %cst_161 = arith.constant dense<0.000000e+00> : vector<128x32xf32>
    %236 = tpu.matmul %235, %234, %cst_161 {dimension_numbers = #tpu.dot_dimension_numbers<[1], [0], [0], [1], [0, 0, 1, 1], [], []>} : vector<128x96xbf16>, vector<96x32xbf16>, vector<128x32xf32> -> vector<128x32xf32>
    %c1_162 = arith.constant 1 : index
    %c1_163 = arith.constant 1 : index
    %c0_164 = arith.constant 0 : index
    %c0_165 = arith.constant 0 : index
    %237 = vector.load %arg8[%c1_162, %c1_163, %c0_164, %c0_165] : memref<2x14x1x32xf32, #tpu.memory_space<vmem>>, vector<1x1x1x32xf32>
    %238 = vector.shape_cast %237 : vector<1x1x1x32xf32> to vector<1x32xf32>
    %239 = vector.broadcast %238 : vector<1x32xf32> to vector<128x32xf32>
    %240 = arith.addf %236, %239 : vector<128x32xf32>
    %cst_166 = arith.constant 0.000000e+00 : f32
    %241 = vector.broadcast %cst_166 : f32 to vector<128x32xf32>
    %242 = arith.maximumf %240, %241 : vector<128x32xf32>
    %c1_167 = arith.constant 1 : index
    %c1_168 = arith.constant 1 : index
    %c0_169 = arith.constant 0 : index
    %c0_170 = arith.constant 0 : index
    %243 = vector.load %arg9[%c1_167, %c1_168, %c0_169, %c0_170] : memref<2x14x32x32xbf16, #tpu.memory_space<vmem>>, vector<1x1x32x32xbf16>
    %244 = vector.shape_cast %243 : vector<1x1x32x32xbf16> to vector<32x32xbf16>
    %245 = arith.truncf %242 : vector<128x32xf32> to vector<128x32xbf16>
    %cst_171 = arith.constant dense<0.000000e+00> : vector<128x32xf32>
    %246 = tpu.matmul %245, %244, %cst_171 {dimension_numbers = #tpu.dot_dimension_numbers<[1], [0], [0], [1], [0, 0, 1, 1], [], []>} : vector<128x32xbf16>, vector<32x32xbf16>, vector<128x32xf32> -> vector<128x32xf32>
    %c1_172 = arith.constant 1 : index
    %c1_173 = arith.constant 1 : index
    %c0_174 = arith.constant 0 : index
    %c0_175 = arith.constant 0 : index
    %247 = vector.load %arg10[%c1_172, %c1_173, %c0_174, %c0_175] : memref<2x14x1x32xf32, #tpu.memory_space<vmem>>, vector<1x1x1x32xf32>
    %248 = vector.shape_cast %247 : vector<1x1x1x32xf32> to vector<1x32xf32>
    %249 = vector.broadcast %248 : vector<1x32xf32> to vector<128x32xf32>
    %250 = arith.addf %246, %249 : vector<128x32xf32>
    %251 = arith.addf %217, %250 : vector<128x32xf32>
    %cst_176 = arith.constant 0.000000e+00 : f32
    %252 = vector.broadcast %cst_176 : f32 to vector<8x32xf32>
    %253 = vector.extract_strided_slice %251 {offsets = [0, 0], sizes = [120, 32], strides = [1, 1]} : vector<128x32xf32> to vector<120x32xf32>
    %254 = tpu.concatenate %252, %253 in 0 : vector<8x32xf32>, vector<120x32xf32> -> vector<128x32xf32>
    %c8_i32_177 = arith.constant 8 : i32
    %255 = vector.broadcast %c8_i32_177 : i32 to vector<128x32xi32>
    %256 = arith.cmpi slt, %28, %255 : vector<128x32xi32>
    %cst_178 = arith.constant 0.000000e+00 : f32
    %257 = vector.broadcast %cst_178 : f32 to vector<128x32xf32>
    %258 = arith.select %256, %257, %254 : vector<128x32xi1>, vector<128x32xf32>
    %cst_179 = arith.constant 0.000000e+00 : f32
    %259 = vector.broadcast %cst_179 : f32 to vector<4x32xf32>
    %260 = vector.extract_strided_slice %251 {offsets = [0, 0], sizes = [124, 32], strides = [1, 1]} : vector<128x32xf32> to vector<124x32xf32>
    %261 = tpu.concatenate %259, %260 in 0 : vector<4x32xf32>, vector<124x32xf32> -> vector<128x32xf32>
    %c4_i32_180 = arith.constant 4 : i32
    %262 = vector.broadcast %c4_i32_180 : i32 to vector<128x32xi32>
    %263 = arith.cmpi slt, %28, %262 : vector<128x32xi32>
    %cst_181 = arith.constant 0.000000e+00 : f32
    %264 = vector.broadcast %cst_181 : f32 to vector<128x32xf32>
    %265 = arith.select %263, %264, %261 : vector<128x32xi1>, vector<128x32xf32>
    %266 = tpu.concatenate %258, %265, %251 in 1 : vector<128x32xf32>, vector<128x32xf32>, vector<128x32xf32> -> vector<128x96xf32>
    %c1_182 = arith.constant 1 : index
    %c2_183 = arith.constant 2 : index
    %c0_184 = arith.constant 0 : index
    %c0_185 = arith.constant 0 : index
    %267 = vector.load %arg7[%c1_182, %c2_183, %c0_184, %c0_185] : memref<2x14x96x32xbf16, #tpu.memory_space<vmem>>, vector<1x1x96x32xbf16>
    %268 = vector.shape_cast %267 : vector<1x1x96x32xbf16> to vector<96x32xbf16>
    %269 = arith.truncf %266 : vector<128x96xf32> to vector<128x96xbf16>
    %cst_186 = arith.constant dense<0.000000e+00> : vector<128x32xf32>
    %270 = tpu.matmul %269, %268, %cst_186 {dimension_numbers = #tpu.dot_dimension_numbers<[1], [0], [0], [1], [0, 0, 1, 1], [], []>} : vector<128x96xbf16>, vector<96x32xbf16>, vector<128x32xf32> -> vector<128x32xf32>
    %c1_187 = arith.constant 1 : index
    %c2_188 = arith.constant 2 : index
    %c0_189 = arith.constant 0 : index
    %c0_190 = arith.constant 0 : index
    %271 = vector.load %arg8[%c1_187, %c2_188, %c0_189, %c0_190] : memref<2x14x1x32xf32, #tpu.memory_space<vmem>>, vector<1x1x1x32xf32>
    %272 = vector.shape_cast %271 : vector<1x1x1x32xf32> to vector<1x32xf32>
    %273 = vector.broadcast %272 : vector<1x32xf32> to vector<128x32xf32>
    %274 = arith.addf %270, %273 : vector<128x32xf32>
    %cst_191 = arith.constant 0.000000e+00 : f32
    %275 = vector.broadcast %cst_191 : f32 to vector<128x32xf32>
    %276 = arith.maximumf %274, %275 : vector<128x32xf32>
    %c1_192 = arith.constant 1 : index
    %c2_193 = arith.constant 2 : index
    %c0_194 = arith.constant 0 : index
    %c0_195 = arith.constant 0 : index
    %277 = vector.load %arg9[%c1_192, %c2_193, %c0_194, %c0_195] : memref<2x14x32x32xbf16, #tpu.memory_space<vmem>>, vector<1x1x32x32xbf16>
    %278 = vector.shape_cast %277 : vector<1x1x32x32xbf16> to vector<32x32xbf16>
    %279 = arith.truncf %276 : vector<128x32xf32> to vector<128x32xbf16>
    %cst_196 = arith.constant dense<0.000000e+00> : vector<128x32xf32>
    %280 = tpu.matmul %279, %278, %cst_196 {dimension_numbers = #tpu.dot_dimension_numbers<[1], [0], [0], [1], [0, 0, 1, 1], [], []>} : vector<128x32xbf16>, vector<32x32xbf16>, vector<128x32xf32> -> vector<128x32xf32>
    %c1_197 = arith.constant 1 : index
    %c2_198 = arith.constant 2 : index
    %c0_199 = arith.constant 0 : index
    %c0_200 = arith.constant 0 : index
    %281 = vector.load %arg10[%c1_197, %c2_198, %c0_199, %c0_200] : memref<2x14x1x32xf32, #tpu.memory_space<vmem>>, vector<1x1x1x32xf32>
    %282 = vector.shape_cast %281 : vector<1x1x1x32xf32> to vector<1x32xf32>
    %283 = vector.broadcast %282 : vector<1x32xf32> to vector<128x32xf32>
    %284 = arith.addf %280, %283 : vector<128x32xf32>
    %285 = arith.addf %251, %284 : vector<128x32xf32>
    %cst_201 = arith.constant 0.000000e+00 : f32
    %286 = vector.broadcast %cst_201 : f32 to vector<8x32xf32>
    %287 = vector.extract_strided_slice %285 {offsets = [0, 0], sizes = [120, 32], strides = [1, 1]} : vector<128x32xf32> to vector<120x32xf32>
    %288 = tpu.concatenate %286, %287 in 0 : vector<8x32xf32>, vector<120x32xf32> -> vector<128x32xf32>
    %c8_i32_202 = arith.constant 8 : i32
    %289 = vector.broadcast %c8_i32_202 : i32 to vector<128x32xi32>
    %290 = arith.cmpi slt, %28, %289 : vector<128x32xi32>
    %cst_203 = arith.constant 0.000000e+00 : f32
    %291 = vector.broadcast %cst_203 : f32 to vector<128x32xf32>
    %292 = arith.select %290, %291, %288 : vector<128x32xi1>, vector<128x32xf32>
    %293 = tpu.concatenate %292, %285 in 1 : vector<128x32xf32>, vector<128x32xf32> -> vector<128x64xf32>
    %c1_204 = arith.constant 1 : index
    %c3_205 = arith.constant 3 : index
    %c32_206 = arith.constant 32 : index
    %c0_207 = arith.constant 0 : index
    %294 = vector.load %arg7[%c1_204, %c3_205, %c32_206, %c0_207] : memref<2x14x96x32xbf16, #tpu.memory_space<vmem>>, vector<1x1x64x32xbf16>
    %295 = vector.shape_cast %294 : vector<1x1x64x32xbf16> to vector<64x32xbf16>
    %296 = arith.truncf %293 : vector<128x64xf32> to vector<128x64xbf16>
    %cst_208 = arith.constant dense<0.000000e+00> : vector<128x32xf32>
    %297 = tpu.matmul %296, %295, %cst_208 {dimension_numbers = #tpu.dot_dimension_numbers<[1], [0], [0], [1], [0, 0, 1, 1], [], []>} : vector<128x64xbf16>, vector<64x32xbf16>, vector<128x32xf32> -> vector<128x32xf32>
    %c1_209 = arith.constant 1 : index
    %c3_210 = arith.constant 3 : index
    %c0_211 = arith.constant 0 : index
    %c0_212 = arith.constant 0 : index
    %298 = vector.load %arg8[%c1_209, %c3_210, %c0_211, %c0_212] : memref<2x14x1x32xf32, #tpu.memory_space<vmem>>, vector<1x1x1x32xf32>
    %299 = vector.shape_cast %298 : vector<1x1x1x32xf32> to vector<1x32xf32>
    %300 = vector.broadcast %299 : vector<1x32xf32> to vector<128x32xf32>
    %301 = arith.addf %297, %300 : vector<128x32xf32>
    %cst_213 = arith.constant 0.000000e+00 : f32
    %302 = vector.broadcast %cst_213 : f32 to vector<128x32xf32>
    %303 = arith.maximumf %301, %302 : vector<128x32xf32>
    %c1_214 = arith.constant 1 : index
    %c3_215 = arith.constant 3 : index
    %c0_216 = arith.constant 0 : index
    %c0_217 = arith.constant 0 : index
    %304 = vector.load %arg9[%c1_214, %c3_215, %c0_216, %c0_217] : memref<2x14x32x32xbf16, #tpu.memory_space<vmem>>, vector<1x1x32x32xbf16>
    %305 = vector.shape_cast %304 : vector<1x1x32x32xbf16> to vector<32x32xbf16>
    %306 = arith.truncf %303 : vector<128x32xf32> to vector<128x32xbf16>
    %cst_218 = arith.constant dense<0.000000e+00> : vector<128x32xf32>
    %307 = tpu.matmul %306, %305, %cst_218 {dimension_numbers = #tpu.dot_dimension_numbers<[1], [0], [0], [1], [0, 0, 1, 1], [], []>} : vector<128x32xbf16>, vector<32x32xbf16>, vector<128x32xf32> -> vector<128x32xf32>
    %c1_219 = arith.constant 1 : index
    %c3_220 = arith.constant 3 : index
    %c0_221 = arith.constant 0 : index
    %c0_222 = arith.constant 0 : index
    %308 = vector.load %arg10[%c1_219, %c3_220, %c0_221, %c0_222] : memref<2x14x1x32xf32, #tpu.memory_space<vmem>>, vector<1x1x1x32xf32>
    %309 = vector.shape_cast %308 : vector<1x1x1x32xf32> to vector<1x32xf32>
    %310 = vector.broadcast %309 : vector<1x32xf32> to vector<128x32xf32>
    %311 = arith.addf %307, %310 : vector<128x32xf32>
    %312 = arith.addf %285, %311 : vector<128x32xf32>
    %c4_i32_223 = arith.constant 4 : i32
    %c10_i32_224 = arith.constant 10 : i32
    %313 = arith.addi %c4_i32_223, %c10_i32_224 : i32
    %c1_i32_225 = arith.constant 1 : i32
    %314 = scf.for %arg18 = %c4_i32_223 to %313 step %c1_i32_225 iter_args(%arg19 = %312) -> (vector<128x32xf32>)  : i32 {
      %c1_247 = arith.constant 1 : index
      %339 = arith.index_cast %arg18 : i32 to index
      %c0_248 = arith.constant 0 : index
      %c0_249 = arith.constant 0 : index
      %340 = vector.load %arg7[%c1_247, %339, %c0_248, %c0_249] : memref<2x14x96x32xbf16, #tpu.memory_space<vmem>>, vector<1x1x96x32xbf16>
      %341 = vector.shape_cast %340 : vector<1x1x96x32xbf16> to vector<96x32xbf16>
      %342 = vector.extract_strided_slice %341 {offsets = [64, 0], sizes = [32, 32], strides = [1, 1]} : vector<96x32xbf16> to vector<32x32xbf16>
      %343 = arith.truncf %arg19 : vector<128x32xf32> to vector<128x32xbf16>
      %cst_250 = arith.constant dense<0.000000e+00> : vector<128x32xf32>
      %344 = tpu.matmul %343, %342, %cst_250 {dimension_numbers = #tpu.dot_dimension_numbers<[1], [0], [0], [1], [0, 0, 1, 1], [], []>} : vector<128x32xbf16>, vector<32x32xbf16>, vector<128x32xf32> -> vector<128x32xf32>
      %c1_251 = arith.constant 1 : index
      %345 = arith.index_cast %arg18 : i32 to index
      %c0_252 = arith.constant 0 : index
      %c0_253 = arith.constant 0 : index
      %346 = vector.load %arg8[%c1_251, %345, %c0_252, %c0_253] : memref<2x14x1x32xf32, #tpu.memory_space<vmem>>, vector<1x1x1x32xf32>
      %347 = vector.shape_cast %346 : vector<1x1x1x32xf32> to vector<1x32xf32>
      %348 = vector.broadcast %347 : vector<1x32xf32> to vector<128x32xf32>
      %349 = arith.addf %344, %348 : vector<128x32xf32>
      %cst_254 = arith.constant 0.000000e+00 : f32
      %350 = vector.broadcast %cst_254 : f32 to vector<128x32xf32>
      %351 = arith.maximumf %349, %350 : vector<128x32xf32>
      %c1_255 = arith.constant 1 : index
      %352 = arith.index_cast %arg18 : i32 to index
      %c0_256 = arith.constant 0 : index
      %c0_257 = arith.constant 0 : index
      %353 = vector.load %arg9[%c1_255, %352, %c0_256, %c0_257] : memref<2x14x32x32xbf16, #tpu.memory_space<vmem>>, vector<1x1x32x32xbf16>
      %354 = vector.shape_cast %353 : vector<1x1x32x32xbf16> to vector<32x32xbf16>
      %355 = arith.truncf %351 : vector<128x32xf32> to vector<128x32xbf16>
      %cst_258 = arith.constant dense<0.000000e+00> : vector<128x32xf32>
      %356 = tpu.matmul %355, %354, %cst_258 {dimension_numbers = #tpu.dot_dimension_numbers<[1], [0], [0], [1], [0, 0, 1, 1], [], []>} : vector<128x32xbf16>, vector<32x32xbf16>, vector<128x32xf32> -> vector<128x32xf32>
      %c1_259 = arith.constant 1 : index
      %357 = arith.index_cast %arg18 : i32 to index
      %c0_260 = arith.constant 0 : index
      %c0_261 = arith.constant 0 : index
      %358 = vector.load %arg10[%c1_259, %357, %c0_260, %c0_261] : memref<2x14x1x32xf32, #tpu.memory_space<vmem>>, vector<1x1x1x32xf32>
      %359 = vector.shape_cast %358 : vector<1x1x1x32xf32> to vector<1x32xf32>
      %360 = vector.broadcast %359 : vector<1x32xf32> to vector<128x32xf32>
      %361 = arith.addf %356, %360 : vector<128x32xf32>
      %362 = arith.addf %arg19, %361 : vector<128x32xf32>
      scf.yield %362 : vector<128x32xf32>
    }
    %c10_i32_226 = arith.constant 10 : i32
    %c1_227 = arith.constant 1 : index
    %c0_228 = arith.constant 0 : index
    %c0_229 = arith.constant 0 : index
    %315 = vector.load %arg11[%c1_227, %c0_228, %c0_229] : memref<2x32x32xbf16, #tpu.memory_space<vmem>>, vector<1x32x32xbf16>
    %316 = vector.shape_cast %315 : vector<1x32x32xbf16> to vector<32x32xbf16>
    %317 = arith.truncf %314 : vector<128x32xf32> to vector<128x32xbf16>
    %cst_230 = arith.constant dense<0.000000e+00> : vector<128x32xf32>
    %318 = tpu.matmul %317, %316, %cst_230 {dimension_numbers = #tpu.dot_dimension_numbers<[1], [0], [0], [1], [0, 0, 1, 1], [], []>} : vector<128x32xbf16>, vector<32x32xbf16>, vector<128x32xf32> -> vector<128x32xf32>
    %c1_231 = arith.constant 1 : index
    %c0_232 = arith.constant 0 : index
    %c0_233 = arith.constant 0 : index
    %319 = vector.load %arg12[%c1_231, %c0_232, %c0_233] : memref<2x1x32xf32, #tpu.memory_space<vmem>>, vector<1x1x32xf32>
    %320 = vector.shape_cast %319 : vector<1x1x32xf32> to vector<1x32xf32>
    %321 = vector.broadcast %320 : vector<1x32xf32> to vector<128x32xf32>
    %322 = arith.addf %318, %321 : vector<128x32xf32>
    %c0_234 = arith.constant 0 : index
    %c0_235 = arith.constant 0 : index
    %323 = vector.load %arg13[%c0_234, %c0_235] : memref<32x768xbf16, #tpu.memory_space<vmem>>, vector<32x768xbf16>
    %324 = arith.truncf %322 : vector<128x32xf32> to vector<128x32xbf16>
    %cst_236 = arith.constant dense<0.000000e+00> : vector<128x768xf32>
    %325 = tpu.matmul %324, %323, %cst_236 {dimension_numbers = #tpu.dot_dimension_numbers<[1], [0], [0], [1], [0, 0, 1, 1], [], []>} : vector<128x32xbf16>, vector<32x768xbf16>, vector<128x768xf32> -> vector<128x768xf32>
    %c0_237 = arith.constant 0 : index
    %c0_238 = arith.constant 0 : index
    %326 = vector.load %arg14[%c0_237, %c0_238] : memref<1x768xf32, #tpu.memory_space<vmem>>, vector<1x768xf32>
    %327 = vector.broadcast %326 : vector<1x768xf32> to vector<128x768xf32>
    %328 = arith.addf %325, %327 : vector<128x768xf32>
    %cst_239 = arith.constant 0.000000e+00 : f32
    %329 = vector.broadcast %cst_239 : f32 to vector<128x768xf32>
    %330 = arith.maximumf %328, %329 : vector<128x768xf32>
    %c0_240 = arith.constant 0 : index
    %c0_241 = arith.constant 0 : index
    %331 = vector.load %arg15[%c0_240, %c0_241] : memref<768x96xbf16, #tpu.memory_space<vmem>>, vector<768x96xbf16>
    %332 = arith.truncf %330 : vector<128x768xf32> to vector<128x768xbf16>
    %cst_242 = arith.constant dense<0.000000e+00> : vector<128x96xf32>
    %333 = tpu.matmul %332, %331, %cst_242 {dimension_numbers = #tpu.dot_dimension_numbers<[1], [0], [0], [1], [0, 0, 1, 1], [], []>} : vector<128x768xbf16>, vector<768x96xbf16>, vector<128x96xf32> -> vector<128x96xf32>
    %c0_243 = arith.constant 0 : index
    %c0_244 = arith.constant 0 : index
    %334 = vector.load %arg16[%c0_243, %c0_244] : memref<1x96xf32, #tpu.memory_space<vmem>>, vector<1x96xf32>
    %335 = vector.broadcast %334 : vector<1x96xf32> to vector<128x96xf32>
    %336 = arith.addf %333, %335 : vector<128x96xf32>
    %337 = tpu.concatenate %322, %336 in 1 : vector<128x32xf32>, vector<128x96xf32> -> vector<128x128xf32>
    %c0_245 = arith.constant 0 : index
    %c0_246 = arith.constant 0 : index
    %338 = vector.load %arg17[%c0_245, %c0_246] : memref<128x128xf32, #tpu.memory_space<vmem>>, vector<128x128xf32>
    tpu.vector_store %arg17[%c0_245, %c0_246], %337 {strides = array<i32>} : memref<128x128xf32, #tpu.memory_space<vmem>>, vector<128x128xf32>,
    return
  }
  func.func @transform_0(%arg0: i32) -> (i32, i32) {
    %c0_i32 = arith.constant 0 : i32
    %c0_i32_0 = arith.constant 0 : i32
    return %arg0, %c0_i32 : i32, i32
  }
  func.func @transform_1(%arg0: i32) -> (i32, i32) {
    %c0_i32 = arith.constant 0 : i32
    %c0_i32_0 = arith.constant 0 : i32
    %c0_i32_1 = arith.constant 0 : i32
    return %c0_i32, %c0_i32_0 : i32, i32
  }
  func.func @transform_2(%arg0: i32) -> (i32, i32) {
    %c0_i32 = arith.constant 0 : i32
    %c0_i32_0 = arith.constant 0 : i32
    %c0_i32_1 = arith.constant 0 : i32
    return %c0_i32, %c0_i32_0 : i32, i32
  }
  func.func @transform_3(%arg0: i32) -> (i32, i32) {
    %c0_i32 = arith.constant 0 : i32
    %c0_i32_0 = arith.constant 0 : i32
    %c0_i32_1 = arith.constant 0 : i32
    return %c0_i32, %c0_i32_0 : i32, i32
  }
  func.func @transform_4(%arg0: i32) -> (i32, i32, i32) {
    %c0_i32 = arith.constant 0 : i32
    %c0_i32_0 = arith.constant 0 : i32
    %c0_i32_1 = arith.constant 0 : i32
    %c0_i32_2 = arith.constant 0 : i32
    return %c0_i32, %c0_i32_0, %c0_i32_1 : i32, i32, i32
  }
  func.func @transform_5(%arg0: i32) -> (i32, i32, i32) {
    %c0_i32 = arith.constant 0 : i32
    %c0_i32_0 = arith.constant 0 : i32
    %c0_i32_1 = arith.constant 0 : i32
    %c0_i32_2 = arith.constant 0 : i32
    return %c0_i32, %c0_i32_0, %c0_i32_1 : i32, i32, i32
  }
  func.func @transform_6(%arg0: i32) -> (i32, i32, i32, i32) {
    %c0_i32 = arith.constant 0 : i32
    %c0_i32_0 = arith.constant 0 : i32
    %c0_i32_1 = arith.constant 0 : i32
    %c0_i32_2 = arith.constant 0 : i32
    %c0_i32_3 = arith.constant 0 : i32
    return %c0_i32, %c0_i32_0, %c0_i32_1, %c0_i32_2 : i32, i32, i32, i32
  }
  func.func @transform_7(%arg0: i32) -> (i32, i32, i32, i32) {
    %c0_i32 = arith.constant 0 : i32
    %c0_i32_0 = arith.constant 0 : i32
    %c0_i32_1 = arith.constant 0 : i32
    %c0_i32_2 = arith.constant 0 : i32
    %c0_i32_3 = arith.constant 0 : i32
    return %c0_i32, %c0_i32_0, %c0_i32_1, %c0_i32_2 : i32, i32, i32, i32
  }
  func.func @transform_8(%arg0: i32) -> (i32, i32, i32, i32) {
    %c0_i32 = arith.constant 0 : i32
    %c0_i32_0 = arith.constant 0 : i32
    %c0_i32_1 = arith.constant 0 : i32
    %c0_i32_2 = arith.constant 0 : i32
    %c0_i32_3 = arith.constant 0 : i32
    return %c0_i32, %c0_i32_0, %c0_i32_1, %c0_i32_2 : i32, i32, i32, i32
  }
  func.func @transform_9(%arg0: i32) -> (i32, i32, i32, i32) {
    %c0_i32 = arith.constant 0 : i32
    %c0_i32_0 = arith.constant 0 : i32
    %c0_i32_1 = arith.constant 0 : i32
    %c0_i32_2 = arith.constant 0 : i32
    %c0_i32_3 = arith.constant 0 : i32
    return %c0_i32, %c0_i32_0, %c0_i32_1, %c0_i32_2 : i32, i32, i32, i32
  }
  func.func @transform_10(%arg0: i32) -> (i32, i32, i32) {
    %c0_i32 = arith.constant 0 : i32
    %c0_i32_0 = arith.constant 0 : i32
    %c0_i32_1 = arith.constant 0 : i32
    %c0_i32_2 = arith.constant 0 : i32
    return %c0_i32, %c0_i32_0, %c0_i32_1 : i32, i32, i32
  }
  func.func @transform_11(%arg0: i32) -> (i32, i32, i32) {
    %c0_i32 = arith.constant 0 : i32
    %c0_i32_0 = arith.constant 0 : i32
    %c0_i32_1 = arith.constant 0 : i32
    %c0_i32_2 = arith.constant 0 : i32
    return %c0_i32, %c0_i32_0, %c0_i32_1 : i32, i32, i32
  }
  func.func @transform_12(%arg0: i32) -> (i32, i32) {
    %c0_i32 = arith.constant 0 : i32
    %c0_i32_0 = arith.constant 0 : i32
    %c0_i32_1 = arith.constant 0 : i32
    return %c0_i32, %c0_i32_0 : i32, i32
  }
  func.func @transform_13(%arg0: i32) -> (i32, i32) {
    %c0_i32 = arith.constant 0 : i32
    %c0_i32_0 = arith.constant 0 : i32
    %c0_i32_1 = arith.constant 0 : i32
    return %c0_i32, %c0_i32_0 : i32, i32
  }
  func.func @transform_14(%arg0: i32) -> (i32, i32) {
    %c0_i32 = arith.constant 0 : i32
    %c0_i32_0 = arith.constant 0 : i32
    %c0_i32_1 = arith.constant 0 : i32
    return %c0_i32, %c0_i32_0 : i32, i32
  }
  func.func @transform_15(%arg0: i32) -> (i32, i32) {
    %c0_i32 = arith.constant 0 : i32
    %c0_i32_0 = arith.constant 0 : i32
    %c0_i32_1 = arith.constant 0 : i32
    return %c0_i32, %c0_i32_0 : i32, i32
  }
  func.func @transform_16(%arg0: i32) -> (i32, i32) {
    %c0_i32 = arith.constant 0 : i32
    %c0_i32_0 = arith.constant 0 : i32
    return %arg0, %c0_i32 : i32, i32
  }
}

</mosaic_0001>

<bundles_post_ra>
// kernel: tpu_custom_call.1
= control target key start
LH: loop header
LB: loop body
LE: loop exit
PB: predicated region body
PF: predicated region fallthrough
CT: control target
= control target key end

     0   :  { %s14559_s0 = inlined_call_operand.vmem [shape: f32[128,24], index: 0, kind: input, shape index: {}]   ;;  %s14560_s1 = inlined_call_operand.vmem [shape: bf16[24,192], index: 1, kind: input, shape index: {}]   ;;  %s14561_s2 = inlined_call_operand.vmem [shape: f32[1,192], index: 2, kind: input, shape index: {}]   ;;  %s14562_s3 = inlined_call_operand.vmem [shape: bf16[192,32], index: 3, kind: input, shape index: {}]   ;;  %s14563_s4 = inlined_call_operand.vmem [shape: bf16[2,32,32], index: 4, kind: input, shape index: {}]   ;;  %s14564_s5 = inlined_call_operand.vmem [shape: f32[2,1,32], index: 5, kind: input, shape index: {}]   ;;  %s14565_s6 = inlined_call_operand.vmem [shape: bf16[2,14,96,32], index: 6, kind: input, shape index: {}]   ;;  %s14566_s7 = inlined_call_operand.vmem [shape: f32[2,14,1,32], index: 7, kind: input, shape index: {}]   ;;  %s14567_s8 = inlined_call_operand.vmem [shape: bf16[2,14,32,32], index: 8, kind: input, shape index: {}]   ;;  %s14568_s9 = inlined_call_operand.vmem [shape: f32[2,14,1,32], index: 9, kind: input, shape index: {}]   ;;  %s14569_s10 = inlined_call_operand.vmem [shape: bf16[2,32,32], index: 10, kind: input, shape index: {}]   ;;  %s14570_s11 = inlined_call_operand.vmem [shape: f32[2,1,32], index: 11, kind: input, shape index: {}]   ;;  %s14571_s12 = inlined_call_operand.vmem [shape: bf16[32,768], index: 12, kind: input, shape index: {}]   ;;  %s14572_s13 = inlined_call_operand.vmem [shape: f32[1,768], index: 13, kind: input, shape index: {}]   ;;  %s14573_s14 = inlined_call_operand.vmem [shape: bf16[768,96], index: 14, kind: input, shape index: {}]   ;;  %s14574_s15 = inlined_call_operand.vmem [shape: f32[1,96], index: 15, kind: input, shape index: {}]   ;;  %s14575_s16 = inlined_call_operand.hbm [shape: f32[128,128], index: 16, kind: output, shape index: {}]  }
   0x1   :  { %14607 = sst [smem:[#allocation23_spill]] %s14559_s0 }
   0x2   :  { %21 = vsyncpa [#allocation3], 0  ;;  %v73_v0 = vld [vmem:[%s14560_s1 + $0x10] sm:$0xff]  ;;  %vm134_vm0 = vcmask 1043456   ;;  %v10557_v3 = vld [vmem:[%s14560_s1 + $0x4] ss:$8 sps:$4 sm:$0xff]   ;;  %v84_v44 = vlaneseq }
   0x3   :  { %v8443_v1 = vcombine.high %v73_v0, %v73_v0  ;;  %v8442_v2 = vcombine.low %v73_v0, %v73_v0  ;;  %v11288_v4 = vmov 0   ;;  %v10559_v6 = vld [vmem:[%s14560_s1] ss:$8 sps:$4 sm:$0xff]   ;;  %s14608_s29 = sld [smem:[#allocation23_spill]]  ;;  %vm109_vm1 = vcmask 195584   ;;  %v10560_v10 = vld [vmem:[%s14562_s3 + $0x38] sm:$0xff]  }
   0x4   :  { %173 = vmatprep.mubr.bf16.mxu0 %v11288_v4  ;;  %423 = vmatprep.subr.bf16.mxu1 %v11288_v4  ;;  %v10561_v11 = vld [vmem:[%s14562_s3 + $0x30] sm:$0xff]   ;;  %v10562_v14 = vld [vmem:[%s14562_s3 + $0x28] sm:$0xff]   ;;  %v10563_v16 = vld [vmem:[%s14562_s3 + $0x20] sm:$0xff]   ;;  %v11505_v45 = vshrl.u32 %v84_v44, 7  ;;  %vm398_vm2 = vcmask 523264   ;;  %vm760_vm3 = vcmask 261120  }
   0x5   :  { %8444 = vmatprep.subr.msk.bf16.mxu0 %vm134_vm0, %v8443_v1  ;;  %v136_v5 = vsel %vm134_vm0, %v8442_v2, 0  ;;  %424 = vmatpush1.bf16.msra.mxu1 %v10560_v10  ;;  %v10564_v19 = vld [vmem:[%s14562_s3 + $0x18] sm:$0xff]   ;;  %v10565_v21 = vld [vmem:[%s14562_s3 + $0x10] sm:$0xff]   ;;  %v10566_v24 = vld [vmem:[%s14562_s3 + $0x8] sm:$0xff]   ;;  %vm979_vm4 = vcmask 1040384   ;;  %s11289_s24 = smov 64  }
   0x6   :  { %154 = vmatpush1.bf16.msra.mxu0 %v136_v5  ;;  %425 = vmatprep.subr.bf16.mxu1 %v11288_v4  ;;  %v10567_v26 = vld [vmem:[%s14562_s3] sm:$0xff]   ;;  %v10568_v29 = vld [vmem:[%s14562_s3 + $0x58] sm:$0xff]   ;;  %v10569_v40 = vld [vmem:[%s14562_s3 + $0x50] sm:$0xff]   ;;  %v90_v46 = vsub.s32 1, %v11505_v45  ;;  %v86_v47 = vsub.s32 0, %v11505_v45  ;;  %s11290_s25 = smov 32  }
   0x7   :  { %155 = vmatprep.subr.bf16.mxu0 %v10557_v3  ;;  %v10570_v41 = vld [vmem:[%s14562_s3 + $0x48] sm:$0xff]   ;;  %v10571_v42 = vld [vmem:[%s14562_s3 + $0x40] sm:$0xff]   ;;  %vm898_vm13 = vcmask 1041408  }
   0x8   :  { %v10572_v43 = vld [vmem:[%s14563_s4 + $0x8] sm:$0xff]   ;;  %v82_v48 = vld [vmem:[%s14561_s2] sm:$0x3]  ;;  %s12566_s2 = smov 4  }
   0x9   :  { %v55_v7 = vld [vmem:[%s14608_s29] sm:$0xff]  ;;  %v56_v8 = vld [vmem:[%s14608_s29 + $0x8] sm:$0xff]  ;;  %v57_v12 = vld [vmem:[%s14608_s29 + $0x10] sm:$0xff]  ;;  %426 = vmatpush1.bf16.msra.mxu1 %v10561_v11  ;;  %v11514_v50 = vrot.slane %v82_v48, %v90_v46  ;;  %v11518_v51 = vrot.slane %v82_v48, %v86_v47 }
   0xa   :  { %v74_v9 = vpack.c.bf16 %v56_v8, %v55_v7  ;;  %156 = vmatpush1.bf16.msra.mxu0 %v10559_v6  ;;  %v58_v13 = vld [vmem:[%s14608_s29 + $0x18] sm:$0xff]  ;;  %427 = vmatprep.subr.bf16.mxu1 %v11288_v4  ;;  %v59_v17 = vld [vmem:[%s14608_s29 + $0x20] sm:$0xff]  ;;  %v60_v18 = vld [vmem:[%s14608_s29 + $0x28] sm:$0xff] }
   0xb   :  { %v75_v15 = vpack.c.bf16 %v58_v13, %v57_v12  ;;  %v76_v20 = vpack.c.bf16 %v60_v18, %v59_v17  ;;  %v61_v22 = vld [vmem:[%s14608_s29 + $0x30] sm:$0xff]  ;;  %v62_v23 = vld [vmem:[%s14608_s29 + $0x38] sm:$0xff]  ;;  %v63_v27 = vld [vmem:[%s14608_s29 + $0x40] sm:$0xff]  ;;  %9457 = vmatprep.subr.bf16.mxu0 %v10572_v43 }
   0xc   :  { %v77_v25 = vpack.c.bf16 %v62_v23, %v61_v22  ;;  %v64_v28 = vld [vmem:[%s14608_s29 + $0x48] sm:$0xff]  ;;  %v65_v31 = vld [vmem:[%s14608_s29 + $0x50] sm:$0xff]  ;;  %v66_v32 = vld [vmem:[%s14608_s29 + $0x58] sm:$0xff] }
   0xd   :  { %8445 = vmatmul.mubr.msk.bf16.vlgmr.msra.gmra.mxu0 %vm109_vm1, %v74_v9  ;;  %428 = vmatpush1.bf16.msra.mxu1 %v10562_v14  ;;  %v78_v30 = vpack.c.bf16 %v64_v28, %v63_v27  ;;  %v79_v33 = vpack.c.bf16 %v66_v32, %v65_v31  ;;  %v67_v34 = vld [vmem:[%s14608_s29 + $0x60] sm:$0xff]  ;;  %v68_v35 = vld [vmem:[%s14608_s29 + $0x68] sm:$0xff]  ;;  %v69_v37 = vld [vmem:[%s14608_s29 + $0x70] sm:$0xff] }
   0xe   :  { %183 = vmatprep.mubr.bf16.mxu0 %v11288_v4  ;;  %429 = vmatprep.subr.bf16.mxu1 %v11288_v4  ;;  %v80_v36 = vpack.c.bf16 %v68_v35, %v67_v34  ;;  %v70_v38 = vld [vmem:[%s14608_s29 + $0x78] sm:$0xff] }
   0xf   :  { %v81_v39 = vpack.c.bf16 %v70_v38, %v69_v37  ;;  %9458 = vmatpush3.bf16.msra.mxu0 %v10572_v43 }
  0x11   :  { %430 = vmatpush1.bf16.msra.mxu1 %v10563_v16 }
  0x12   :  { %431 = vmatprep.subr.bf16.mxu1 %v11288_v4 }
  0x15   :  { %8446 = vmatmul.mubr.msk.bf16.gmra.mxu0 %vm109_vm1, %v75_v15  ;;  %432 = vmatpush1.bf16.msra.mxu1 %v10564_v19 }
  0x16   :  { %193 = vmatprep.mubr.bf16.mxu0 %v11288_v4  ;;  %433 = vmatprep.subr.bf16.mxu1 %v11288_v4 }
  0x19   :  { %434 = vmatpush1.bf16.msra.mxu1 %v10565_v21 }
  0x1a   :  { %435 = vmatprep.subr.bf16.mxu1 %v11288_v4 }
  0x1d   :  { %8447 = vmatmul.mubr.msk.bf16.gmra.mxu0 %vm109_vm1, %v76_v20  ;;  %436 = vmatpush1.bf16.msra.mxu1 %v10566_v24 }
  0x1e   :  { %203 = vmatprep.mubr.bf16.mxu0 %v11288_v4  ;;  %437 = vmatprep.subr.bf16.mxu1 %v11288_v4 }
  0x21   :  { %438 = vmatpush1.bf16.msra.mxu1 %v10567_v26 }
  0x22   :  { %447 = vmatprep.subr.bf16.mxu1 %v11288_v4 }
  0x25   :  { %8448 = vmatmul.mubr.msk.bf16.gmra.mxu0 %vm109_vm1, %v77_v25  ;;  %448 = vmatpush2.bf16.msra.mxu1 %v10568_v29 }
  0x26   :  { %213 = vmatprep.mubr.bf16.mxu0 %v11288_v4  ;;  %449 = vmatprep.subr.bf16.mxu1 %v11288_v4 }
  0x29   :  { %450 = vmatpush2.bf16.msra.mxu1 %v10569_v40 }
  0x2a   :  { %451 = vmatprep.subr.bf16.mxu1 %v11288_v4 }
  0x2d   :  { %8449 = vmatmul.mubr.msk.bf16.gmra.mxu0 %vm109_vm1, %v78_v30  ;;  %452 = vmatpush2.bf16.msra.mxu1 %v10570_v41 }
  0x2e   :  { %223 = vmatprep.mubr.bf16.mxu0 %v11288_v4  ;;  %453 = vmatprep.subr.bf16.mxu1 %v11288_v4 }
  0x31   :  { %454 = vmatpush2.bf16.msra.mxu1 %v10571_v42 }
  0x35   :  { %8450 = vmatmul.mubr.msk.bf16.gmra.mxu0 %vm109_vm1, %v79_v33 }
  0x36   :  { %233 = vmatprep.mubr.bf16.mxu0 %v11288_v4 }
  0x3d   :  { %8451 = vmatmul.mubr.msk.bf16.gmra.mxu0 %vm109_vm1, %v80_v36 }
  0x3e   :  { %243 = vmatprep.mubr.bf16.mxu0 %v11288_v4 }
  0x45   :  { %8452 = vmatmul.mubr.msk.bf16.gmra.mxu0 %vm109_vm1, %v81_v39  ;;  %vm1267_vm1 = vcmask 785408  }
  0xcd   :  { %v175_v49 = vpop.f32.mrf.mxu0 }
  0xce   :  { %v176_v56 = vadd.f32 %v175_v49, %v11518_v51 }
  0xcf   :  { %v177_v52 = vpop.f32.mrf.mxu0 }
  0xd0   :  { %v178_v54 = vadd.f32 %v177_v52, %v11514_v50  ;;  %v254_v63 = vmax.f32 %v176_v56, 0.0 }
  0xd1   :  { %v179_v53 = vpop.f32.mrf.mxu0 }
  0xd2   :  { %v180_v55 = vadd.f32 %v179_v53, %v11518_v51  ;;  %v255_v61 = vmax.f32 %v178_v54, 0.0 }
  0xd3   :  { %v181_v57 = vpop.f32.mrf.mxu0 }
  0xd4   :  { %v182_v58 = vadd.f32 %v181_v57, %v11514_v50  ;;  %v256_v59 = vmax.f32 %v180_v55, 0.0 }
  0xd5   :  { %v185_v60 = vpop.f32.mrf.mxu0 }
  0xd6   :  { %v257_v62 = vmax.f32 %v182_v58, 0.0  ;;  %v310_v2 = vpack.c.bf16 %v256_v59, %v254_v63  ;;  %v186_v7 = vadd.f32 %v185_v60, %v11518_v51 }
  0xd7   :  { %v187_v0 = vpop.f32.mrf.mxu0 }
  0xd8   :  { %v311_v1 = vpack.c.bf16 %v257_v62, %v255_v61  ;;  %v188_v5 = vadd.f32 %v187_v0, %v11514_v50  ;;  %v258_v14 = vmax.f32 %v186_v7, 0.0 }
  0xd9   :  { %v189_v3 = vpop.f32.mrf.mxu0 }
  0xda   :  { %v190_v6 = vadd.f32 %v189_v3, %v11518_v51  ;;  %8465 = vmatprep.mubr.msk.bf16.mxu1 %vm398_vm2, %v311_v1  ;;  %v259_v12 = vmax.f32 %v188_v5, 0.0 }
  0xdb   :  { %v191_v8 = vpop.f32.mrf.mxu0  ;;  %456 = vmatmul.mubr.bf16.vlgmr.msra.gmra.mxu1 %v310_v2 }
  0xdc   :  { %v192_v9 = vadd.f32 %v191_v8, %v11514_v50  ;;  %v260_v10 = vmax.f32 %v190_v6, 0.0 }
  0xdd   :  { %v195_v11 = vpop.f32.mrf.mxu0 }
  0xde   :  { %v261_v13 = vmax.f32 %v192_v9, 0.0  ;;  %v312_v17 = vpack.c.bf16 %v260_v10, %v258_v14  ;;  %v196_v21 = vadd.f32 %v195_v11, %v11518_v51 }
  0xdf   :  { %v197_v15 = vpop.f32.mrf.mxu0 }
  0xe0   :  { %v313_v16 = vpack.c.bf16 %v261_v13, %v259_v12  ;;  %v198_v19 = vadd.f32 %v197_v15, %v11514_v50  ;;  %v262_v28 = vmax.f32 %v196_v21, 0.0 }
  0xe1   :  { %v199_v18 = vpop.f32.mrf.mxu0 }
  0xe2   :  { %v200_v20 = vadd.f32 %v199_v18, %v11518_v51  ;;  %8466 = vmatprep.mubr.msk.bf16.mxu1 %vm398_vm2, %v313_v16  ;;  %v263_v26 = vmax.f32 %v198_v19, 0.0 }
  0xe3   :  { %v201_v22 = vpop.f32.mrf.mxu0  ;;  %464 = vmatmul.mubr.bf16.gmra.mxu1 %v312_v17 }
  0xe4   :  { %v202_v23 = vadd.f32 %v201_v22, %v11514_v50  ;;  %v264_v24 = vmax.f32 %v200_v20, 0.0 }
  0xe5   :  { %v205_v25 = vpop.f32.mrf.mxu0 }
  0xe6   :  { %v265_v27 = vmax.f32 %v202_v23, 0.0  ;;  %v314_v31 = vpack.c.bf16 %v264_v24, %v262_v28  ;;  %v206_v35 = vadd.f32 %v205_v25, %v11518_v51 }
  0xe7   :  { %v207_v29 = vpop.f32.mrf.mxu0 }
  0xe8   :  { %v315_v30 = vpack.c.bf16 %v265_v27, %v263_v26  ;;  %v208_v33 = vadd.f32 %v207_v29, %v11514_v50  ;;  %v266_v42 = vmax.f32 %v206_v35, 0.0 }
  0xe9   :  { %v209_v32 = vpop.f32.mrf.mxu0 }
  0xea   :  { %v210_v34 = vadd.f32 %v209_v32, %v11518_v51  ;;  %8467 = vmatprep.mubr.msk.bf16.mxu1 %vm398_vm2, %v315_v30  ;;  %v267_v40 = vmax.f32 %v208_v33, 0.0 }
  0xeb   :  { %v211_v36 = vpop.f32.mrf.mxu0  ;;  %472 = vmatmul.mubr.bf16.gmra.mxu1 %v314_v31 }
  0xec   :  { %v212_v37 = vadd.f32 %v211_v36, %v11514_v50  ;;  %v268_v38 = vmax.f32 %v210_v34, 0.0 }
  0xed   :  { %v215_v39 = vpop.f32.mrf.mxu0 }
  0xee   :  { %v269_v41 = vmax.f32 %v212_v37, 0.0  ;;  %v316_v48 = vpack.c.bf16 %v268_v38, %v266_v42  ;;  %v216_v54 = vadd.f32 %v215_v39, %v11518_v51  ;;  %v10573_v42 = vld [vmem:[%s14563_s4] sm:$0xff]  }
  0xef   :  { %v217_v43 = vpop.f32.mrf.mxu0  ;;  %9459 = vmatprep.subr.bf16.mxu0 %v10573_v42 }
  0xf0   :  { %v317_v44 = vpack.c.bf16 %v269_v41, %v267_v40  ;;  %v218_v52 = vadd.f32 %v217_v43, %v11514_v50  ;;  %v270_v61 = vmax.f32 %v216_v54, 0.0  ;;  %9460 = vmatpush3.bf16.msra.mxu0 %v10573_v42 }
  0xf1   :  { %v219_v49 = vpop.f32.mrf.mxu0 }
  0xf2   :  { %v220_v53 = vadd.f32 %v219_v49, %v11518_v51  ;;  %8468 = vmatprep.mubr.msk.bf16.mxu1 %vm398_vm2, %v317_v44  ;;  %v271_v59 = vmax.f32 %v218_v52, 0.0 }
  0xf3   :  { %v221_v55 = vpop.f32.mrf.mxu0  ;;  %480 = vmatmul.mubr.bf16.gmra.mxu1 %v316_v48 }
  0xf4   :  { %v222_v56 = vadd.f32 %v221_v55, %v11514_v50  ;;  %v272_v57 = vmax.f32 %v220_v53, 0.0 }
  0xf5   :  { %v225_v58 = vpop.f32.mrf.mxu0 }
  0xf6   :  { %v273_v60 = vmax.f32 %v222_v56, 0.0  ;;  %v318_v0 = vpack.c.bf16 %v272_v57, %v270_v61  ;;  %v226_v5 = vadd.f32 %v225_v58, %v11518_v51 }
  0xf7   :  { %v227_v62 = vpop.f32.mrf.mxu0 }
  0xf8   :  { %v319_v63 = vpack.c.bf16 %v273_v60, %v271_v59  ;;  %v228_v2 = vadd.f32 %v227_v62, %v11514_v50  ;;  %v274_v12 = vmax.f32 %v226_v5, 0.0 }
  0xf9   :  { %v229_v1 = vpop.f32.mrf.mxu0 }
  0xfa   :  { %v230_v3 = vadd.f32 %v229_v1, %v11518_v51  ;;  %8469 = vmatprep.mubr.msk.bf16.mxu1 %vm398_vm2, %v319_v63  ;;  %v275_v10 = vmax.f32 %v228_v2, 0.0 }
  0xfb   :  { %v231_v6 = vpop.f32.mrf.mxu0  ;;  %488 = vmatmul.mubr.bf16.gmra.mxu1 %v318_v0 }
  0xfc   :  { %v232_v7 = vadd.f32 %v231_v6, %v11514_v50  ;;  %v276_v8 = vmax.f32 %v230_v3, 0.0 }
  0xfd   :  { %v235_v9 = vpop.f32.mrf.mxu0 }
  0xfe   :  { %v277_v11 = vmax.f32 %v232_v7, 0.0  ;;  %v320_v15 = vpack.c.bf16 %v276_v8, %v274_v12  ;;  %v236_v19 = vadd.f32 %v235_v9, %v11518_v51 }
  0xff   :  { %v237_v13 = vpop.f32.mrf.mxu0 }
 0x100   :  { %v321_v14 = vpack.c.bf16 %v277_v11, %v275_v10  ;;  %v238_v17 = vadd.f32 %v237_v13, %v11514_v50  ;;  %v278_v26 = vmax.f32 %v236_v19, 0.0 }
 0x101   :  { %v239_v16 = vpop.f32.mrf.mxu0 }
 0x102   :  { %v240_v18 = vadd.f32 %v239_v16, %v11518_v51  ;;  %8470 = vmatprep.mubr.msk.bf16.mxu1 %vm398_vm2, %v321_v14  ;;  %v279_v24 = vmax.f32 %v238_v17, 0.0 }
 0x103   :  { %v241_v20 = vpop.f32.mrf.mxu0  ;;  %496 = vmatmul.mubr.bf16.gmra.mxu1 %v320_v15 }
 0x104   :  { %v242_v21 = vadd.f32 %v241_v20, %v11514_v50  ;;  %v280_v22 = vmax.f32 %v240_v18, 0.0 }
 0x105   :  { %v245_v23 = vpop.f32.mrf.mxu0 }
 0x106   :  { %v281_v25 = vmax.f32 %v242_v21, 0.0  ;;  %v322_v29 = vpack.c.bf16 %v280_v22, %v278_v26  ;;  %v246_v33 = vadd.f32 %v245_v23, %v11518_v51  ;;  %v10574_v23 = vld [vmem:[%s14565_s6 + $0x28] sm:$0xff]   ;;  %v10577_v26 = vld [vmem:[%s14565_s6 + $0x10] sm:$0xff]  }
 0x107   :  { %v247_v27 = vpop.f32.mrf.mxu0  ;;  %9477 = vmatprep.subr.bf16.mxu0 %v10574_v23 }
 0x108   :  { %v323_v28 = vpack.c.bf16 %v281_v25, %v279_v24  ;;  %v248_v31 = vadd.f32 %v247_v27, %v11514_v50  ;;  %v282_v39 = vmax.f32 %v246_v33, 0.0  ;;  %v10575_v24 = vld [vmem:[%s14565_s6 + $0x20] sm:$0xff]   ;;  %v10576_v25 = vld [vmem:[%s14565_s6 + $0x18] sm:$0xff]  }
 0x109   :  { %v249_v30 = vpop.f32.mrf.mxu0 }
 0x10a   :  { %v250_v32 = vadd.f32 %v249_v30, %v11518_v51  ;;  %8471 = vmatprep.mubr.msk.bf16.mxu1 %vm398_vm2, %v323_v28  ;;  %v283_v37 = vmax.f32 %v248_v31, 0.0  ;;  %v11586_v28 = vld [vmem:[%s14564_s5] ss:$0 sm:$0xff]  ;;  %v523_v30 = vadd.s32 16, %v11505_v45 }
 0x10b   :  { %v251_v34 = vpop.f32.mrf.mxu0  ;;  %504 = vmatmul.mubr.bf16.gmra.mxu1 %v322_v29 }
 0x10c   :  { %v252_v35 = vadd.f32 %v251_v34, %v11514_v50  ;;  %v284_v36 = vmax.f32 %v250_v32, 0.0  ;;  %v10578_v32 = vld [vmem:[%s14565_s6 + $0x8] sm:$0xff]   ;;  %v11596_v34 = vand.u32 15, %v11505_v45 }
 0x10e   :  { %v285_v38 = vmax.f32 %v252_v35, 0.0  ;;  %v324_v41 = vpack.c.bf16 %v284_v36, %v282_v39  ;;  %vm1028_vm5 = vcmp.lt.s32.totalorder %v11596_v34, 1  ;;  %vm14590_vm14 = vcmp.lt.s32.totalorder %v11596_v34, 2 }
 0x110   :  { %v325_v40 = vpack.c.bf16 %v285_v38, %v283_v37  ;;  %v11602_v38 = vand.u32 15, %v523_v30 }
 0x112   :  { %8472 = vmatprep.mubr.msk.bf16.mxu1 %vm398_vm2, %v325_v40  ;;  %vm1030_vm6 = vcmp.lt.s32.totalorder %v11602_v38, 1  ;;  %vm14589_vm15 = vcmp.lt.s32.totalorder %v11602_v38, 2 }
 0x113   :  { %512 = vmatmul.mubr.bf16.gmra.mxu1 %v324_v41  ;;  %v10579_v41 = vld [vmem:[%s14565_s6] sm:$0xff]  }
 0x19b   :  { %v457_v51 = vpop.f32.mrf.mxu1 }
 0x19d   :  { %v459_v43 = vpop.f32.mrf.mxu1 }
 0x19f   :  { %v460_v44 = vpop.f32.mrf.mxu1 }
 0x1a0   :  { %v733_v50 = vpack.c.bf16 %v460_v44, %v457_v51 }
 0x1a1   :  { %v462_v48 = vpop.f32.mrf.mxu1 }
 0x1a2   :  { %9461 = vmatprep.mubr.msk.bf16.mxu0 %vm760_vm3, %v733_v50 }
 0x1a3   :  { %v465_v49 = vpop.f32.mrf.mxu1 }
 0x1a5   :  { %v467_v52 = vpop.f32.mrf.mxu1 }
 0x1a7   :  { %v468_v53 = vpop.f32.mrf.mxu1 }
 0x1a8   :  { %v734_v54 = vpack.c.bf16 %v468_v53, %v465_v49 }
 0x1a9   :  { %v470_v55 = vpop.f32.mrf.mxu1 }
 0x1aa   :  { %9462 = vmatmul.mubr.msk.bf16.vlgmr.msra.gmra.mxu0 %vm760_vm3, %v734_v54 }
 0x1ab   :  { %v473_v56 = vpop.f32.mrf.mxu1  ;;  %9478 = vmatpush3.bf16.msra.mxu0 %v10574_v23  ;;  %v531_v23 = vadd.s32 80, %v11505_v45 }
 0x1ac   :  { %9479 = vmatprep.subr.bf16.mxu0 %v10575_v24 }
 0x1ad   :  { %v475_v57 = vpop.f32.mrf.mxu1 }
 0x1af   :  { %v476_v58 = vpop.f32.mrf.mxu1  ;;  %9480 = vmatpush3.bf16.msra.mxu0 %v10575_v24 }
 0x1b0   :  { %v735_v59 = vpack.c.bf16 %v476_v58, %v473_v56  ;;  %9481 = vmatprep.subr.bf16.mxu0 %v10576_v25 }
 0x1b1   :  { %v478_v60 = vpop.f32.mrf.mxu1 }
 0x1b2   :  { %9465 = vmatprep.mubr.msk.bf16.mxu0 %vm760_vm3, %v735_v59  ;;  %v525_v59 = vadd.s32 32, %v11505_v45  ;;  %v527_v60 = vadd.s32 48, %v11505_v45 }
 0x1b3   :  { %v481_v61 = vpop.f32.mrf.mxu1  ;;  %9482 = vmatpush3.bf16.msra.mxu0 %v10576_v25 }
 0x1b4   :  { %9483 = vmatprep.subr.bf16.mxu0 %v10577_v26 }
 0x1b5   :  { %v483_v62 = vpop.f32.mrf.mxu1 }
 0x1b7   :  { %v484_v63 = vpop.f32.mrf.mxu1  ;;  %9484 = vmatpush3.bf16.msra.mxu0 %v10577_v26 }
 0x1b8   :  { %v736_v0 = vpack.c.bf16 %v484_v63, %v481_v61  ;;  %9485 = vmatprep.subr.bf16.mxu0 %v10578_v32 }
 0x1b9   :  { %v486_v1 = vpop.f32.mrf.mxu1 }
 0x1ba   :  { %9466 = vmatmul.mubr.msk.bf16.gmra.mxu0 %vm760_vm3, %v736_v0  ;;  %v11639_v0 = vand.u32 15, %v525_v59  ;;  %v535_v59 = vadd.s32 112, %v11505_v45 }
 0x1bb   :  { %v489_v2 = vpop.f32.mrf.mxu1  ;;  %9486 = vmatpush3.bf16.msra.mxu0 %v10578_v32 }
 0x1bc   :  { %9487 = vmatprep.subr.bf16.mxu0 %v10579_v41  ;;  %vm14582_vm7 = vcmp.lt.s32.totalorder %v11639_v0, 1 }
 0x1bd   :  { %v491_v3 = vpop.f32.mrf.mxu1 }
 0x1bf   :  { %v492_v5 = vpop.f32.mrf.mxu1  ;;  %9488 = vmatpush3.bf16.msra.mxu0 %v10579_v41 }
 0x1c0   :  { %v737_v6 = vpack.c.bf16 %v492_v5, %v489_v2  ;;  %v11648_v5 = vand.u32 15, %v527_v60 }
 0x1c1   :  { %v494_v7 = vpop.f32.mrf.mxu1 }
 0x1c2   :  { %9469 = vmatprep.mubr.msk.bf16.mxu0 %vm760_vm3, %v737_v6  ;;  %vm14581_vm8 = vcmp.lt.s32.totalorder %v11648_v5, 1 }
 0x1c3   :  { %v497_v8 = vpop.f32.mrf.mxu1 }
 0x1c5   :  { %v499_v9 = vpop.f32.mrf.mxu1 }
 0x1c7   :  { %v500_v10 = vpop.f32.mrf.mxu1 }
 0x1c8   :  { %v738_v11 = vpack.c.bf16 %v500_v10, %v497_v8 }
 0x1c9   :  { %v502_v12 = vpop.f32.mrf.mxu1 }
 0x1ca   :  { %9470 = vmatmul.mubr.msk.bf16.gmra.mxu0 %vm760_vm3, %v738_v11 }
 0x1cb   :  { %v505_v13 = vpop.f32.mrf.mxu1 }
 0x1cd   :  { %v507_v14 = vpop.f32.mrf.mxu1 }
 0x1cf   :  { %v508_v15 = vpop.f32.mrf.mxu1 }
 0x1d0   :  { %v739_v16 = vpack.c.bf16 %v508_v15, %v505_v13 }
 0x1d1   :  { %v510_v17 = vpop.f32.mrf.mxu1 }
 0x1d2   :  { %9473 = vmatprep.mubr.msk.bf16.mxu0 %vm760_vm3, %v739_v16 }
 0x1d3   :  { %v513_v18 = vpop.f32.mrf.mxu1 }
 0x1d5   :  { %v515_v19 = vpop.f32.mrf.mxu1 }
 0x1d7   :  { %v516_v20 = vpop.f32.mrf.mxu1 }
 0x1d8   :  { %v740_v21 = vpack.c.bf16 %v516_v20, %v513_v18 }
 0x1d9   :  { %v518_v22 = vpop.f32.mrf.mxu1 }
 0x1da   :  { %9474 = vmatmul.mubr.msk.bf16.gmra.mxu0 %vm760_vm3, %v740_v21  ;;  %v529_v21 = vadd.s32 64, %v11505_v45 }
 0x26a   :  { %v9463_v27 = vpop.f32.mrf.mxu0 }
 0x26b   :  { %v11599_v35 = vadd.f32 %v9463_v27, %v11586_v28  ;;  %v11679_v27 = vand.u32 15, %v529_v21 }
 0x26c   :  { %v819_v29 = vpop.f32.mrf.mxu0 }
 0x26d   :  { %v11590_v31 = vadd.f32 %v11586_v28, %v819_v29  ;;  %v983_v51 = vrot.slane %v11599_v35, 7  ;;  %vm14580_vm9 = vcmp.lt.s32.totalorder %v11679_v27, 1 }
 0x26e   :  { %v9464_v33 = vpop.f32.mrf.mxu0 }
 0x26f   :  { %v980_v36 = vrot.slane %v11590_v31, 7  ;;  %v11605_v39 = vadd.f32 %v9464_v33, %v11586_v28  ;;  %v11688_v33 = vand.u32 15, %v531_v23 }
 0x270   :  { %v822_v37 = vpop.f32.mrf.mxu0 }
 0x271   :  { %v11608_v40 = vadd.f32 %v11586_v28, %v822_v37  ;;  %v1027_v42 = vsel %vm979_vm4, 0.0, %v980_v36  ;;  %v985_v50 = vrot.slane %v11605_v39, 7  ;;  %v10280_v54 = vpack.i.bf16 %v11605_v39, %v11599_v35 }
 0x272   :  { %v1044_v49 = vsel %vm1028_vm5, 0.0, %v1027_v42  ;;  %vm14579_vm10 = vcmp.lt.s32.totalorder %v11688_v33, 1 }
 0x273   :  { %v10275_v43 = vpack.i.bf16 %v11608_v40, %v11590_v31  ;;  %v981_v44 = vrot.slane %v11608_v40, 7  ;;  %v986_v56 = vsel %vm979_vm4, %v983_v51, %v985_v50 }
 0x275   :  { %10276 = vrot.lane.b32.xlu1 %v10275_v43, %s11289_s24  ;;  %v982_v48 = vsel %vm979_vm4, %v980_v36, %v981_v44  ;;  %v984_v52 = vsel %vm979_vm4, %v981_v44, %v983_v51 }
 0x276   :  { %v10285_v53 = vpack.i.bf16 %v982_v48, %v1044_v49  ;;  %v1046_v55 = vsel %vm1030_vm6, 0.0, %v984_v52 }
 0x277   :  { %v10290_v58 = vpack.i.bf16 %v986_v56, %v1046_v55 }
 0x278   :  { %10286 = vrot.lane.b32.xlu0 %v10285_v53, %s11290_s25 }
 0x279   :  { %10281 = vrot.lane.b32.xlu1 %v10280_v54, %s11289_s24 }
 0x27a   :  { %v9467_v57 = vpop.f32.mrf.mxu0 }
 0x27b   :  { %v11642_v1 = vadd.f32 %v9467_v57, %v11586_v28  ;;  %v533_v57 = vadd.s32 96, %v11505_v45 }
 0x27c   :  { %10291 = vrot.lane.b32.xlu0 %v10290_v58, %s11290_s25  ;;  %v835_v61 = vpop.f32.mrf.mxu0 }
 0x27d   :  { %v11637_v62 = vadd.f32 %v11586_v28, %v835_v61  ;;  %v991_v10 = vrot.slane %v11642_v1, 7 }
 0x27e   :  { %v9468_v63 = vpop.f32.mrf.mxu0 }
 0x27f   :  { %v987_v2 = vrot.slane %v11637_v62, 7  ;;  %v11646_v3 = vadd.f32 %v9468_v63, %v11586_v28 }
 0x280   :  { %v838_v6 = vpop.f32.mrf.mxu0 }
 0x281   :  { %v11651_v7 = vadd.f32 %v11586_v28, %v838_v6  ;;  %v993_v8 = vrot.slane %v11646_v3, 7  ;;  %v988_v9 = vsel %vm979_vm4, %v985_v50, %v987_v2  ;;  %v10310_v22 = vpack.i.bf16 %v11646_v3, %v11642_v1 }
 0x282   :  { %v1048_v13 = vsel %vm14582_vm7, 0.0, %v988_v9 }
 0x283   :  { %v989_v11 = vrot.slane %v11651_v7, 7  ;;  %v994_v16 = vsel %vm979_vm4, %v991_v10, %v993_v8  ;;  %v10300_v20 = vpack.i.bf16 %v11651_v7, %v11637_v62 }
 0x285   :  { %v990_v12 = vsel %vm979_vm4, %v987_v2, %v989_v11  ;;  %v992_v14 = vsel %vm979_vm4, %v989_v11, %v991_v10  ;;  %v11719_v2 = vand.u32 15, %v533_v57  ;;  %v11728_v10 = vand.u32 15, %v535_v59 }
 0x286   :  { %v10295_v15 = vpack.i.bf16 %v990_v12, %v1048_v13  ;;  %v1050_v17 = vsel %vm14581_vm8, 0.0, %v992_v14 }
 0x287   :  { %v10305_v18 = vpack.i.bf16 %v994_v16, %v1050_v17  ;;  %vm14578_vm11 = vcmp.lt.s32.totalorder %v11719_v2, 1  ;;  %vm14577_vm12 = vcmp.lt.s32.totalorder %v11728_v10, 1  ;;  %vm14584_vm8 = vcmp.lt.s32.totalorder %v11719_v2, 2 }
 0x288   :  { %10296 = vrot.lane.b32.xlu0 %v10295_v15, %s11290_s25  ;;  %vm14583_vm7 = vcmp.lt.s32.totalorder %v11728_v10, 2 }
 0x289   :  { %10306 = vrot.lane.b32.xlu1 %v10305_v18, %s11290_s25 }
 0x28a   :  { %v9471_v19 = vpop.f32.mrf.mxu0 }
 0x28b   :  { %v11682_v29 = vadd.f32 %v9471_v19, %v11586_v28  ;;  %v10580_v19 = vld [vmem:[%s14567_s8 + $0x8] sm:$0xff]  }
 0x28c   :  { %10301 = vrot.lane.b32.xlu0 %v10300_v20, %s11289_s24  ;;  %v851_v24 = vpop.f32.mrf.mxu0  ;;  %9505 = vmatprep.subr.bf16.mxu1 %v10580_v19 }
 0x28d   :  { %v11676_v25 = vadd.f32 %v11586_v28, %v851_v24  ;;  %10311 = vrot.lane.b32.xlu1 %v10310_v22, %s11289_s24  ;;  %v999_v51 = vrot.slane %v11682_v29, 7  ;;  %9506 = vmatpush3.bf16.msra.mxu1 %v10580_v19 }
 0x28e   :  { %v9472_v26 = vpop.f32.mrf.mxu0 }
 0x28f   :  { %v995_v30 = vrot.slane %v11676_v25, 7  ;;  %v11686_v32 = vadd.f32 %v9472_v26, %v11586_v28 }
 0x290   :  { %v854_v36 = vpop.f32.mrf.mxu0 }
 0x291   :  { %v11691_v37 = vadd.f32 %v11586_v28, %v854_v36  ;;  %v1001_v41 = vrot.slane %v11686_v32, 7  ;;  %v996_v42 = vsel %vm979_vm4, %v993_v8, %v995_v30  ;;  %v10330_v58 = vpack.i.bf16 %v11686_v32, %v11682_v29 }
 0x292   :  { %v1052_v50 = vsel %vm14580_vm9, 0.0, %v996_v42  ;;  %vm14585_vm9 = vcmp.lt.s32.totalorder %v11688_v33, 2 }
 0x293   :  { %v997_v43 = vrot.slane %v11691_v37, 7  ;;  %v1002_v52 = vsel %vm979_vm4, %v999_v51, %v1001_v41  ;;  %v10320_v56 = vpack.i.bf16 %v11691_v37, %v11676_v25 }
 0x295   :  { %v998_v44 = vsel %vm979_vm4, %v995_v30, %v997_v43  ;;  %v1000_v48 = vsel %vm979_vm4, %v997_v43, %v999_v51  ;;  %v899_v30 = vrot.slane %v11590_v31, 6  ;;  %v902_v43 = vrot.slane %v11599_v35, 6 }
 0x296   :  { %v10315_v49 = vpack.i.bf16 %v998_v44, %v1052_v50  ;;  %v1054_v53 = vsel %vm14579_vm10, 0.0, %v1000_v48  ;;  %v904_v44 = vrot.slane %v11605_v39, 6  ;;  %vm14586_vm10 = vcmp.lt.s32.totalorder %v11679_v27, 2 }
 0x297   :  { %v10325_v54 = vpack.i.bf16 %v1002_v52, %v1054_v53  ;;  %v946_v42 = vsel %vm898_vm13, 0.0, %v899_v30 }
 0x298   :  { %10316 = vrot.lane.b32.xlu0 %v10315_v49, %s11290_s25 }
 0x299   :  { %10326 = vrot.lane.b32.xlu1 %v10325_v54, %s11290_s25  ;;  %v963_v54 = vsel %vm14590_vm14, 0.0, %v946_v42 }
 0x29a   :  { %v9475_v55 = vpop.f32.mrf.mxu0 }
 0x29b   :  { %v11722_v6 = vadd.f32 %v9475_v55, %v11586_v28 }
 0x29c   :  { %10321 = vrot.lane.b32.xlu0 %v10320_v56, %s11289_s24  ;;  %v867_v60 = vpop.f32.mrf.mxu0 }
 0x29d   :  { %v11716_v61 = vadd.f32 %v11586_v28, %v867_v60  ;;  %10331 = vrot.lane.b32.xlu1 %v10330_v58, %s11289_s24  ;;  %v1007_v15 = vrot.slane %v11722_v6, 7 }
 0x29e   :  { %v9476_v63 = vpop.f32.mrf.mxu0 }
 0x29f   :  { %v1003_v8 = vrot.slane %v11716_v61, 7  ;;  %v11726_v9 = vadd.f32 %v9476_v63, %v11586_v28 }
 0x2a0   :  { %v870_v11 = vpop.f32.mrf.mxu0 }
 0x2a1   :  { %v11731_v12 = vadd.f32 %v11586_v28, %v870_v11  ;;  %v1009_v13 = vrot.slane %v11726_v9, 7  ;;  %v1004_v14 = vsel %vm979_vm4, %v1001_v41, %v1003_v8  ;;  %v10350_v26 = vpack.i.bf16 %v11726_v9, %v11722_v6 }
 0x2a2   :  { %v1056_v18 = vsel %vm14578_vm11, 0.0, %v1004_v14  ;;  %v900_v41 = vrot.slane %v11608_v40, 6  ;;  %vm14587_vm11 = vcmp.lt.s32.totalorder %v11648_v5, 2 }
 0x2a3   :  { %v1005_v16 = vrot.slane %v11731_v12, 7  ;;  %v1010_v21 = vsel %vm979_vm4, %v1007_v15, %v1009_v13  ;;  %v10340_v24 = vpack.i.bf16 %v11731_v12, %v11716_v61 }
 0x2a4   :  { %v901_v53 = vsel %vm898_vm13, %v899_v30, %v900_v41  ;;  %v903_v58 = vsel %vm898_vm13, %v900_v41, %v902_v43 }
 0x2a5   :  { %v1006_v17 = vsel %vm979_vm4, %v1003_v8, %v1005_v16  ;;  %v1008_v28 = vsel %vm979_vm4, %v1005_v16, %v1007_v15  ;;  %v905_v16 = vsel %vm898_vm13, %v902_v43, %v904_v44 }
 0x2a6   :  { %v10335_v20 = vpack.i.bf16 %v1006_v17, %v1056_v18  ;;  %v1058_v22 = vsel %vm14577_vm12, 0.0, %v1008_v28  ;;  %v965_v17 = vsel %vm14589_vm15, 0.0, %v903_v58  ;;  %vm14588_vm12 = vcmp.lt.s32.totalorder %v11639_v0, 2 }
 0x2a7   :  { %v10345_v23 = vpack.i.bf16 %v1010_v21, %v1058_v22  ;;  %v906_v22 = vrot.slane %v11637_v62, 6 }
 0x2a8   :  { %10336 = vrot.lane.b32.xlu0 %v10335_v20, %s11290_s25 }
 0x2a9   :  { %10346 = vrot.lane.b32.xlu1 %v10345_v23, %s11290_s25  ;;  %v908_v23 = vrot.slane %v11651_v7, 6 }
 0x2ac   :  { %10341 = vrot.lane.b32.xlu0 %v10340_v24, %s11289_s24  ;;  %v910_v24 = vrot.slane %v11642_v1, 6 }
 0x2ad   :  { %10351 = vrot.lane.b32.xlu1 %v10350_v26, %s11289_s24  ;;  %v912_v26 = vrot.slane %v11646_v3, 6 }
 0x2ae   :  { %v911_v43 = vsel %vm898_vm13, %v908_v23, %v910_v24 }
 0x2e7   :  { %v10277_v36 = vpop.permute.xlu1 %10276 }
 0x2e8   :  { %v10279_v49 = vunpack.i.h.bf16 %v10277_v36  ;;  %v10278_v52 = vunpack.i.l.bf16 %v10277_v36  ;;  %v907_v36 = vsel %vm898_vm13, %v904_v44, %v906_v22  ;;  %v969_v44 = vsel %vm14587_vm11, 0.0, %v911_v43 }
 0x2ea   :  { %v10287_v51 = vpop.permute.xlu0 %10286 }
 0x2eb   :  { %v10289_v50 = vunpack.i.h.bf16 %v10287_v51  ;;  %v10288_v48 = vunpack.i.l.bf16 %v10287_v51  ;;  %v10282_v57 = vpop.permute.xlu1 %10281 }
 0x2ec   :  { %v10284_v14 = vunpack.i.h.bf16 %v10282_v57  ;;  %v10283_v15 = vunpack.i.l.bf16 %v10282_v57 }
 0x2ed   :  { %v1172_v55 = vsel %vm760_vm3, %v963_v54, %v10288_v48  ;;  %v1173_v56 = vsel %vm760_vm3, %v901_v53, %v10289_v50  ;;  %v909_v54 = vsel %vm898_vm13, %v906_v22, %v908_v23 }
 0x2ee   :  { %v10292_v59 = vpop.permute.xlu0 %10291  ;;  %v1188_v60 = vsel %vm398_vm2, %v1172_v55, %v10278_v52  ;;  %v1189_v63 = vsel %vm398_vm2, %v1173_v56, %v10279_v49  ;;  %v967_v49 = vsel %vm14588_vm12, 0.0, %v907_v36  ;;  %v913_v52 = vsel %vm898_vm13, %v910_v24, %v912_v26 }
 0x2ef   :  { %v10294_v8 = vunpack.i.h.bf16 %v10292_v59  ;;  %v10293_v11 = vunpack.i.l.bf16 %v10292_v59  ;;  %v1216_v13 = vpack.c.bf16 %v1189_v63, %v1188_v60 }
 0x2f1   :  { %v1175_v18 = vsel %vm760_vm3, %v905_v16, %v10294_v8  ;;  %v1174_v28 = vsel %vm760_vm3, %v965_v17, %v10293_v11  ;;  %9489 = vmatprep.mubr.msk.bf16.mxu0 %vm1267_vm1, %v1216_v13 }
 0x2f2   :  { %v1191_v19 = vsel %vm398_vm2, %v1175_v18, %v10284_v14  ;;  %v1190_v20 = vsel %vm398_vm2, %v1174_v28, %v10283_v15  ;;  %v914_v28 = vrot.slane %v11676_v25, 6 }
 0x2f3   :  { %v1217_v21 = vpack.c.bf16 %v1191_v19, %v1190_v20  ;;  %v916_v19 = vrot.slane %v11691_v37, 6  ;;  %v918_v20 = vrot.slane %v11682_v29, 6 }
 0x2f4   :  { %v915_v23 = vsel %vm898_vm13, %v912_v26, %v914_v28 }
 0x2f5   :  { %9490 = vmatmul.mubr.msk.bf16.vlgmr.msra.gmra.mxu0 %vm1267_vm1, %v1217_v21  ;;  %v920_v21 = vrot.slane %v11686_v32, 6  ;;  %v971_v43 = vsel %vm14586_vm10, 0.0, %v915_v23 }
 0x2fa   :  { %v10297_v30 = vpop.permute.xlu0 %10296 }
 0x2fb   :  { %v10307_v41 = vpop.permute.xlu1 %10306  ;;  %v10299_v42 = vunpack.i.h.bf16 %v10297_v30  ;;  %v10298_v51 = vunpack.i.l.bf16 %v10297_v30 }
 0x2fc   :  { %v10309_v50 = vunpack.i.h.bf16 %v10307_v41  ;;  %v10308_v48 = vunpack.i.l.bf16 %v10307_v41  ;;  %v919_v41 = vsel %vm898_vm13, %v916_v19, %v918_v20 }
 0x2fd   :  { %v1176_v58 = vsel %vm760_vm3, %v967_v49, %v10298_v51  ;;  %v1177_v59 = vsel %vm760_vm3, %v909_v54, %v10299_v42  ;;  %v917_v49 = vsel %vm898_vm13, %v914_v28, %v916_v19  ;;  %v973_v26 = vsel %vm14585_vm9, 0.0, %v919_v41 }
 0x2fe   :  { %v10302_v53 = vpop.permute.xlu0 %10301  ;;  %v1179_v8 = vsel %vm760_vm3, %v913_v52, %v10309_v50  ;;  %v1178_v11 = vsel %vm760_vm3, %v969_v44, %v10308_v48  ;;  %v921_v50 = vsel %vm898_vm13, %v918_v20, %v920_v21 }
 0x2ff   :  { %v10304_v55 = vunpack.i.h.bf16 %v10302_v53  ;;  %v10303_v56 = vunpack.i.l.bf16 %v10302_v53  ;;  %v10312_v57 = vpop.permute.xlu1 %10311 }
 0x300   :  { %v10314_v60 = vunpack.i.h.bf16 %v10312_v57  ;;  %v10313_v63 = vunpack.i.l.bf16 %v10312_v57 }
 0x301   :  { %v1192_v13 = vsel %vm398_vm2, %v1176_v58, %v10303_v56  ;;  %v1193_v14 = vsel %vm398_vm2, %v1177_v59, %v10304_v55 }
 0x302   :  { %v1218_v15 = vpack.c.bf16 %v1193_v14, %v1192_v13  ;;  %v1194_v16 = vsel %vm398_vm2, %v1178_v11, %v10313_v63  ;;  %v1195_v17 = vsel %vm398_vm2, %v1179_v8, %v10314_v60 }
 0x303   :  { %v1219_v18 = vpack.c.bf16 %v1195_v17, %v1194_v16  ;;  %v924_v16 = vrot.slane %v11731_v12, 6  ;;  %v926_v17 = vrot.slane %v11722_v6, 6 }
 0x304   :  { %9493 = vmatprep.mubr.msk.bf16.mxu0 %vm1267_vm1, %v1218_v15  ;;  %v922_v15 = vrot.slane %v11716_v61, 6 }
 0x305   :  { %9494 = vmatmul.mubr.msk.bf16.gmra.mxu0 %vm1267_vm1, %v1219_v18  ;;  %v928_v18 = vrot.slane %v11726_v9, 6 }
 0x306   :  { %v923_v19 = vsel %vm898_vm13, %v920_v21, %v922_v15 }
 0x307   :  { %v975_v41 = vsel %vm14584_vm8, 0.0, %v923_v19 }
 0x30a   :  { %v10317_v22 = vpop.permute.xlu0 %10316 }
 0x30b   :  { %v10327_v24 = vpop.permute.xlu1 %10326  ;;  %v10319_v30 = vunpack.i.h.bf16 %v10317_v22  ;;  %v10318_v36 = vunpack.i.l.bf16 %v10317_v22 }
 0x30c   :  { %v10329_v42 = vunpack.i.h.bf16 %v10327_v24  ;;  %v10328_v51 = vunpack.i.l.bf16 %v10327_v24  ;;  %v927_v24 = vsel %vm898_vm13, %v924_v16, %v926_v17 }
 0x30d   :  { %v1180_v44 = vsel %vm760_vm3, %v971_v43, %v10318_v36  ;;  %v1181_v55 = vsel %vm760_vm3, %v917_v49, %v10319_v30  ;;  %v925_v43 = vsel %vm898_vm13, %v922_v15, %v924_v16  ;;  %v977_v21 = vsel %vm14583_vm7, 0.0, %v927_v24 }
 0x30e   :  { %v10322_v48 = vpop.permute.xlu0 %10321  ;;  %v1183_v58 = vsel %vm760_vm3, %v921_v50, %v10329_v42  ;;  %v1182_v59 = vsel %vm760_vm3, %v973_v26, %v10328_v51  ;;  %v929_v42 = vsel %vm898_vm13, %v926_v17, %v928_v18 }
 0x30f   :  { %v10324_v52 = vunpack.i.h.bf16 %v10322_v48  ;;  %v10323_v53 = vunpack.i.l.bf16 %v10322_v48  ;;  %v10332_v54 = vpop.permute.xlu1 %10331 }
 0x310   :  { %v10334_v56 = vunpack.i.h.bf16 %v10332_v54  ;;  %v10333_v57 = vunpack.i.l.bf16 %v10332_v54 }
 0x311   :  { %v1196_v60 = vsel %vm398_vm2, %v1180_v44, %v10323_v53  ;;  %v1197_v63 = vsel %vm398_vm2, %v1181_v55, %v10324_v52 }
 0x312   :  { %v1220_v8 = vpack.c.bf16 %v1197_v63, %v1196_v60  ;;  %v1198_v11 = vsel %vm398_vm2, %v1182_v59, %v10333_v57  ;;  %v1199_v13 = vsel %vm398_vm2, %v1183_v58, %v10334_v56 }
 0x313   :  { %v1221_v14 = vpack.c.bf16 %v1199_v13, %v1198_v11 }
 0x314   :  { %9497 = vmatprep.mubr.msk.bf16.mxu0 %vm1267_vm1, %v1220_v8  ;;  %v10581_v8 = vld [vmem:[%s14567_s8] sm:$0xff]  }
 0x315   :  { %9498 = vmatmul.mubr.msk.bf16.gmra.mxu0 %vm1267_vm1, %v1221_v14  ;;  %9507 = vmatprep.subr.bf16.mxu1 %v10581_v8  ;;  %v8484_v14 = vld [vmem:[%s14566_s7] ss:$0 sm:$0xff] }
 0x316   :  { %9508 = vmatpush3.bf16.msra.mxu1 %v10581_v8 }
 0x31a   :  { %v10337_v28 = vpop.permute.xlu0 %10336 }
 0x31b   :  { %v10347_v20 = vpop.permute.xlu1 %10346  ;;  %v10339_v22 = vunpack.i.h.bf16 %v10337_v28  ;;  %v10338_v23 = vunpack.i.l.bf16 %v10337_v28 }
 0x31c   :  { %v10349_v30 = vunpack.i.h.bf16 %v10347_v20  ;;  %v10348_v36 = vunpack.i.l.bf16 %v10347_v20 }
 0x31d   :  { %v1184_v26 = vsel %vm760_vm3, %v975_v41, %v10338_v23  ;;  %v1185_v52 = vsel %vm760_vm3, %v925_v43, %v10339_v22 }
 0x31e   :  { %v10342_v51 = vpop.permute.xlu0 %10341  ;;  %v1187_v44 = vsel %vm760_vm3, %v929_v42, %v10349_v30  ;;  %v1186_v55 = vsel %vm760_vm3, %v977_v21, %v10348_v36 }
 0x31f   :  { %v10344_v50 = vunpack.i.h.bf16 %v10342_v51  ;;  %v10343_v48 = vunpack.i.l.bf16 %v10342_v51  ;;  %v10352_v49 = vpop.permute.xlu1 %10351 }
 0x320   :  { %v10354_v53 = vunpack.i.h.bf16 %v10352_v49  ;;  %v10353_v54 = vunpack.i.l.bf16 %v10352_v49 }
 0x321   :  { %v1200_v56 = vsel %vm398_vm2, %v1184_v26, %v10343_v48  ;;  %v1201_v57 = vsel %vm398_vm2, %v1185_v52, %v10344_v50 }
 0x322   :  { %v1222_v58 = vpack.c.bf16 %v1201_v57, %v1200_v56  ;;  %v1202_v59 = vsel %vm398_vm2, %v1186_v55, %v10353_v54  ;;  %v1203_v60 = vsel %vm398_vm2, %v1187_v44, %v10354_v53 }
 0x323   :  { %v1223_v63 = vpack.c.bf16 %v1203_v60, %v1202_v59 }
 0x324   :  { %9501 = vmatprep.mubr.msk.bf16.mxu0 %vm1267_vm1, %v1222_v58 }
 0x325   :  { %9502 = vmatmul.mubr.msk.bf16.gmra.mxu0 %vm1267_vm1, %v1223_v63 }
 0x3b5   :  { %v9491_v11 = vpop.f32.mrf.mxu0 }
 0x3b6   :  { %v1335_v18 = vadd.f32 %v9491_v11, %v8484_v14 }
 0x3b7   :  { %v1326_v13 = vpop.f32.mrf.mxu0 }
 0x3b8   :  { %v1327_v16 = vadd.f32 %v8484_v14, %v1326_v13  ;;  %v1391_v24 = vmax.f32 %v1335_v18, 0.0 }
 0x3b9   :  { %v9492_v15 = vpop.f32.mrf.mxu0 }
 0x3ba   :  { %v1338_v17 = vadd.f32 %v9492_v15, %v8484_v14  ;;  %v1389_v22 = vmax.f32 %v1327_v16, 0.0 }
 0x3bb   :  { %v1329_v28 = vpop.f32.mrf.mxu0 }
 0x3bc   :  { %v1330_v19 = vadd.f32 %v8484_v14, %v1329_v28  ;;  %v1392_v20 = vmax.f32 %v1338_v17, 0.0 }
 0x3be   :  { %v1390_v23 = vmax.f32 %v1330_v19, 0.0  ;;  %v1410_v36 = vpack.c.bf16 %v1392_v20, %v1391_v24 }
 0x3c0   :  { %v1409_v30 = vpack.c.bf16 %v1390_v23, %v1389_v22 }
 0x3c2   :  { %9509 = vmatprep.mubr.msk.bf16.mxu1 %vm760_vm3, %v1409_v30 }
 0x3c3   :  { %9510 = vmatmul.mubr.msk.bf16.vlgmr.msra.gmra.mxu1 %vm760_vm3, %v1410_v36 }
 0x3c5   :  { %v9495_v41 = vpop.f32.mrf.mxu0 }
 0x3c6   :  { %v1351_v50 = vadd.f32 %v9495_v41, %v8484_v14 }
 0x3c7   :  { %v1342_v42 = vpop.f32.mrf.mxu0 }
 0x3c8   :  { %v1343_v43 = vadd.f32 %v8484_v14, %v1342_v42  ;;  %v1395_v54 = vmax.f32 %v1351_v50, 0.0 }
 0x3c9   :  { %v9496_v51 = vpop.f32.mrf.mxu0 }
 0x3ca   :  { %v1354_v21 = vadd.f32 %v9496_v51, %v8484_v14  ;;  %v1393_v52 = vmax.f32 %v1343_v43, 0.0 }
 0x3cb   :  { %v1345_v48 = vpop.f32.mrf.mxu0 }
 0x3cc   :  { %v1346_v49 = vadd.f32 %v8484_v14, %v1345_v48  ;;  %v1396_v26 = vmax.f32 %v1354_v21, 0.0 }
 0x3ce   :  { %v1394_v53 = vmax.f32 %v1346_v49, 0.0  ;;  %v1412_v55 = vpack.c.bf16 %v1396_v26, %v1395_v54  ;;  %v10582_v49 = vld [vmem:[%s14565_s6 + $0x58] sm:$0xff]   ;;  %v10583_v26 = vld [vmem:[%s14565_s6 + $0x50] sm:$0xff]   ;;  %v11882_v54 = vld [vmem:[%s14568_s9] ss:$0 sm:$0xff] }
 0x3cf   :  { %9525 = vmatprep.subr.bf16.mxu0 %v10582_v49 }
 0x3d0   :  { %v1411_v44 = vpack.c.bf16 %v1394_v53, %v1393_v52  ;;  %9526 = vmatpush3.bf16.msra.mxu0 %v10582_v49  ;;  %v10585_v52 = vld [vmem:[%s14565_s6 + $0x40] sm:$0xff]  }
 0x3d1   :  { %9527 = vmatprep.subr.bf16.mxu0 %v10583_v26 }
 0x3d2   :  { %9513 = vmatprep.mubr.msk.bf16.mxu1 %vm760_vm3, %v1411_v44 }
 0x3d3   :  { %9514 = vmatmul.mubr.msk.bf16.gmra.mxu1 %vm760_vm3, %v1412_v55 }
 0x3d4   :  { %9528 = vmatpush3.bf16.msra.mxu0 %v10583_v26 }
 0x3d5   :  { %v9499_v56 = vpop.f32.mrf.mxu0 }
 0x3d6   :  { %v1367_v63 = vadd.f32 %v9499_v56, %v8484_v14 }
 0x3d7   :  { %v1358_v57 = vpop.f32.mrf.mxu0 }
 0x3d8   :  { %v1359_v59 = vadd.f32 %v8484_v14, %v1358_v57  ;;  %v1399_v17 = vmax.f32 %v1367_v63, 0.0 }
 0x3d9   :  { %v9500_v58 = vpop.f32.mrf.mxu0 }
 0x3da   :  { %v1370_v60 = vadd.f32 %v9500_v58, %v8484_v14  ;;  %v1397_v15 = vmax.f32 %v1359_v59, 0.0 }
 0x3db   :  { %v1361_v8 = vpop.f32.mrf.mxu0 }
 0x3dc   :  { %v1362_v11 = vadd.f32 %v8484_v14, %v1361_v8  ;;  %v1400_v13 = vmax.f32 %v1370_v60, 0.0  ;;  %v10586_v60 = vld [vmem:[%s14565_s6 + $0x38] sm:$0xff]  }
 0x3de   :  { %v1398_v16 = vmax.f32 %v1362_v11, 0.0  ;;  %v1414_v28 = vpack.c.bf16 %v1400_v13, %v1399_v17 }
 0x3e0   :  { %v1413_v18 = vpack.c.bf16 %v1398_v16, %v1397_v15  ;;  %v10587_v16 = vld [vmem:[%s14565_s6 + $0x30] sm:$0xff]  }
 0x3e2   :  { %9517 = vmatprep.mubr.msk.bf16.mxu1 %vm760_vm3, %v1413_v18 }
 0x3e3   :  { %9518 = vmatmul.mubr.msk.bf16.gmra.mxu1 %vm760_vm3, %v1414_v28 }
 0x3e5   :  { %v9503_v19 = vpop.f32.mrf.mxu0 }
 0x3e6   :  { %v1383_v30 = vadd.f32 %v9503_v19, %v8484_v14 }
 0x3e7   :  { %v1374_v20 = vpop.f32.mrf.mxu0 }
 0x3e8   :  { %v1375_v23 = vadd.f32 %v8484_v14, %v1374_v20  ;;  %v1403_v21 = vmax.f32 %v1383_v30, 0.0 }
 0x3e9   :  { %v9504_v22 = vpop.f32.mrf.mxu0 }
 0x3ea   :  { %v1386_v24 = vadd.f32 %v9504_v22, %v8484_v14  ;;  %v1401_v51 = vmax.f32 %v1375_v23, 0.0 }
 0x3eb   :  { %v1377_v36 = vpop.f32.mrf.mxu0 }
 0x3ec   :  { %v1378_v41 = vadd.f32 %v8484_v14, %v1377_v36  ;;  %v1404_v42 = vmax.f32 %v1386_v24, 0.0  ;;  %v10584_v14 = vld [vmem:[%s14565_s6 + $0x48] sm:$0xff]  }
 0x3ed   :  { %9529 = vmatprep.subr.bf16.mxu0 %v10584_v14 }
 0x3ee   :  { %v1402_v43 = vmax.f32 %v1378_v41, 0.0  ;;  %v1416_v48 = vpack.c.bf16 %v1404_v42, %v1403_v21  ;;  %9530 = vmatpush3.bf16.msra.mxu0 %v10584_v14 }
 0x3ef   :  { %9531 = vmatprep.subr.bf16.mxu0 %v10585_v52 }
 0x3f0   :  { %v1415_v50 = vpack.c.bf16 %v1402_v43, %v1401_v51 }
 0x3f2   :  { %9521 = vmatprep.mubr.msk.bf16.mxu1 %vm760_vm3, %v1415_v50  ;;  %9532 = vmatpush3.bf16.msra.mxu0 %v10585_v52 }
 0x3f3   :  { %9522 = vmatmul.mubr.msk.bf16.gmra.mxu1 %vm760_vm3, %v1416_v48  ;;  %9533 = vmatprep.subr.bf16.mxu0 %v10586_v60 }
 0x3f6   :  { %9534 = vmatpush3.bf16.msra.mxu0 %v10586_v60 }
 0x3f7   :  { %9535 = vmatprep.subr.bf16.mxu0 %v10587_v16 }
 0x3fa   :  { %9536 = vmatpush3.bf16.msra.mxu0 %v10587_v16 }
 0x483   :  { %v9511_v53 = vpop.f32.mrf.mxu1 }
 0x484   :  { %v1503_v55 = vadd.f32 %v9511_v53, %v11882_v54 }
 0x485   :  { %v1494_v44 = vpop.f32.mrf.mxu1 }
 0x486   :  { %v1495_v56 = vadd.f32 %v11882_v54, %v1494_v44  ;;  %v11894_v8 = vadd.f32 %v1503_v55, %v11599_v35 }
 0x487   :  { %v9512_v57 = vpop.f32.mrf.mxu1 }
 0x488   :  { %v11887_v58 = vadd.f32 %v1495_v56, %v11590_v31  ;;  %v1506_v59 = vadd.f32 %v9512_v57, %v11882_v54  ;;  %v1672_v18 = vrot.slane %v11894_v8, 6 }
 0x489   :  { %v1497_v63 = vpop.f32.mrf.mxu1 }
 0x48a   :  { %v11897_v11 = vadd.f32 %v1506_v59, %v11605_v39  ;;  %v1498_v13 = vadd.f32 %v11882_v54, %v1497_v63  ;;  %v1669_v15 = vrot.slane %v11887_v58, 6 }
 0x48c   :  { %v11902_v31 = vadd.f32 %v1498_v13, %v11608_v40  ;;  %v1716_v17 = vsel %vm898_vm13, 0.0, %v1669_v15  ;;  %v1674_v35 = vrot.slane %v11897_v11, 6  ;;  %v10370_v43 = vpack.i.bf16 %v11897_v11, %v11894_v8 }
 0x48d   :  { %v1717_v40 = vsel %vm14590_vm14, 0.0, %v1716_v17  ;;  %vm1651_vm14 = vcmp.lt.s32.totalorder %v11728_v10, 4 }
 0x48e   :  { %v1670_v39 = vrot.slane %v11902_v31, 6  ;;  %v1675_v22 = vsel %vm898_vm13, %v1672_v18, %v1674_v35  ;;  %v10360_v41 = vpack.i.bf16 %v11902_v31, %v11887_v58 }
 0x490   :  { %v1671_v28 = vsel %vm898_vm13, %v1669_v15, %v1670_v39  ;;  %v1673_v19 = vsel %vm898_vm13, %v1670_v39, %v1672_v18 }
 0x491   :  { %v10355_v20 = vpack.i.bf16 %v1671_v28, %v1717_v40  ;;  %v1719_v23 = vsel %vm14589_vm15, 0.0, %v1673_v19  ;;  %vm1649_vm15 = vcmp.lt.s32.totalorder %v11719_v2, 4 }
 0x492   :  { %v10365_v24 = vpack.i.bf16 %v1675_v22, %v1719_v23 }
 0x493   :  { %v9515_v30 = vpop.f32.mrf.mxu1  ;;  %10356 = vrot.lane.b32.xlu0 %v10355_v20, %s11290_s25 }
 0x494   :  { %10366 = vrot.lane.b32.xlu1 %v10365_v24, %s11290_s25  ;;  %v1519_v42 = vadd.f32 %v9515_v30, %v11882_v54 }
 0x495   :  { %v1510_v36 = vpop.f32.mrf.mxu1 }
 0x496   :  { %v1511_v51 = vadd.f32 %v11882_v54, %v1510_v36  ;;  %v11933_v26 = vadd.f32 %v1519_v42, %v11642_v1 }
 0x497   :  { %v9516_v21 = vpop.f32.mrf.mxu1  ;;  %10361 = vrot.lane.b32.xlu0 %v10360_v41, %s11289_s24 }
 0x498   :  { %v11928_v50 = vadd.f32 %v1511_v51, %v11637_v62  ;;  %v1522_v48 = vadd.f32 %v9516_v21, %v11882_v54  ;;  %10371 = vrot.lane.b32.xlu1 %v10370_v43, %s11289_s24  ;;  %v1680_v57 = vrot.slane %v11933_v26, 6 }
 0x499   :  { %v1513_v49 = vpop.f32.mrf.mxu1 }
 0x49a   :  { %v11936_v14 = vadd.f32 %v1522_v48, %v11646_v3  ;;  %v1514_v52 = vadd.f32 %v11882_v54, %v1513_v49  ;;  %v1676_v53 = vrot.slane %v11928_v50, 6 }
 0x49c   :  { %v11941_v44 = vadd.f32 %v1514_v52, %v11651_v7  ;;  %v1677_v62 = vsel %vm898_vm13, %v1674_v35, %v1676_v53  ;;  %v1682_v55 = vrot.slane %v11936_v14, 6  ;;  %v10390_v18 = vpack.i.bf16 %v11936_v14, %v11933_v26 }
 0x49d   :  { %v1721_v3 = vsel %vm14588_vm12, 0.0, %v1677_v62  ;;  %vm1647_vm12 = vcmp.lt.s32.totalorder %v11688_v33, 4 }
 0x49e   :  { %v1678_v56 = vrot.slane %v11941_v44, 6  ;;  %v1683_v63 = vsel %vm898_vm13, %v1680_v57, %v1682_v55  ;;  %v10380_v17 = vpack.i.bf16 %v11941_v44, %v11928_v50 }
 0x4a0   :  { %v1679_v1 = vsel %vm898_vm13, %v1676_v53, %v1678_v56  ;;  %v1681_v59 = vsel %vm898_vm13, %v1678_v56, %v1680_v57 }
 0x4a1   :  { %v10375_v60 = vpack.i.bf16 %v1679_v1, %v1721_v3  ;;  %v1723_v7 = vsel %vm14587_vm11, 0.0, %v1681_v59  ;;  %vm1645_vm11 = vcmp.lt.s32.totalorder %v11679_v27, 4 }
 0x4a2   :  { %v10385_v13 = vpack.i.bf16 %v1683_v63, %v1723_v7 }
 0x4a3   :  { %v9519_v15 = vpop.f32.mrf.mxu1  ;;  %10376 = vrot.lane.b32.xlu0 %v10375_v60, %s11290_s25 }
 0x4a4   :  { %10386 = vrot.lane.b32.xlu1 %v10385_v13, %s11290_s25  ;;  %v1535_v35 = vadd.f32 %v9519_v15, %v11882_v54 }
 0x4a5   :  { %v1526_v16 = vpop.f32.mrf.mxu1 }
 0x4a6   :  { %v1527_v39 = vadd.f32 %v11882_v54, %v1526_v16  ;;  %v11969_v22 = vadd.f32 %v1535_v35, %v11682_v29 }
 0x4a7   :  { %v9520_v28 = vpop.f32.mrf.mxu1  ;;  %10381 = vrot.lane.b32.xlu0 %v10380_v17, %s11289_s24 }
 0x4a8   :  { %v11964_v40 = vadd.f32 %v1527_v39, %v11676_v25  ;;  %v1538_v19 = vadd.f32 %v9520_v28, %v11882_v54  ;;  %10391 = vrot.lane.b32.xlu1 %v10390_v18, %s11289_s24  ;;  %v1688_v51 = vrot.slane %v11969_v22, 6 }
 0x4a9   :  { %v1529_v20 = vpop.f32.mrf.mxu1 }
 0x4aa   :  { %v11972_v23 = vadd.f32 %v1538_v19, %v11686_v32  ;;  %v1530_v24 = vadd.f32 %v11882_v54, %v1529_v20  ;;  %v1684_v30 = vrot.slane %v11964_v40, 6 }
 0x4ac   :  { %v11977_v36 = vadd.f32 %v1530_v24, %v11691_v37  ;;  %v1685_v25 = vsel %vm898_vm13, %v1682_v55, %v1684_v30  ;;  %v1690_v41 = vrot.slane %v11972_v23, 6  ;;  %v10410_v57 = vpack.i.bf16 %v11972_v23, %v11969_v22 }
 0x4ad   :  { %v1725_v32 = vsel %vm14586_vm10, 0.0, %v1685_v25  ;;  %v1590_v25 = vrot.slane %v11902_v31, 4  ;;  %vm1643_vm10 = vcmp.lt.s32.totalorder %v11648_v5, 4 }
 0x4ae   :  { %v1686_v42 = vrot.slane %v11977_v36, 6  ;;  %v1691_v48 = vsel %vm898_vm13, %v1688_v51, %v1690_v41  ;;  %v10400_v62 = vpack.i.bf16 %v11977_v36, %v11964_v40 }
 0x4b0   :  { %v1687_v29 = vsel %vm898_vm13, %v1684_v30, %v1686_v42  ;;  %v1689_v43 = vsel %vm898_vm13, %v1686_v42, %v1688_v51  ;;  %v1589_v30 = vrot.slane %v11887_v58, 4  ;;  %v1594_v42 = vrot.slane %v11897_v11, 4 }
 0x4b1   :  { %v10395_v21 = vpack.i.bf16 %v1687_v29, %v1725_v32  ;;  %v1727_v37 = vsel %vm14585_vm9, 0.0, %v1689_v43  ;;  %vm1641_vm9 = vcmp.lt.s32.totalorder %v11639_v0, 4 }
 0x4b2   :  { %v10405_v49 = vpack.i.bf16 %v1691_v48, %v1727_v37  ;;  %v1636_v29 = vsel %vm134_vm0, 0.0, %v1589_v30 }
 0x4b3   :  { %v9523_v52 = vpop.f32.mrf.mxu1  ;;  %10396 = vrot.lane.b32.xlu0 %v10395_v21, %s11290_s25 }
 0x4b4   :  { %10406 = vrot.lane.b32.xlu1 %v10405_v49, %s11290_s25  ;;  %v1551_v55 = vadd.f32 %v9523_v52, %v11882_v54 }
 0x4b5   :  { %v1542_v53 = vpop.f32.mrf.mxu1 }
 0x4b6   :  { %v1543_v56 = vadd.f32 %v11882_v54, %v1542_v53  ;;  %v12005_v63 = vadd.f32 %v1551_v55, %v11722_v6  ;;  %v1591_v55 = vsel %vm134_vm0, %v1589_v30, %v1590_v25 }
 0x4b7   :  { %v9524_v1 = vpop.f32.mrf.mxu1  ;;  %10401 = vrot.lane.b32.xlu0 %v10400_v62, %s11289_s24 }
 0x4b8   :  { %v12000_v3 = vadd.f32 %v1543_v56, %v11716_v61  ;;  %v1554_v59 = vadd.f32 %v9524_v1, %v11882_v54  ;;  %10411 = vrot.lane.b32.xlu1 %v10410_v57, %s11289_s24  ;;  %v1696_v39 = vrot.slane %v12005_v63, 6 }
 0x4b9   :  { %v1545_v60 = vpop.f32.mrf.mxu1 }
 0x4ba   :  { %v12008_v7 = vadd.f32 %v1554_v59, %v11726_v9  ;;  %v1546_v13 = vadd.f32 %v11882_v54, %v1545_v60  ;;  %v1692_v15 = vrot.slane %v12000_v3, 6 }
 0x4bc   :  { %v12013_v16 = vadd.f32 %v1546_v13, %v11731_v12  ;;  %v1693_v61 = vsel %vm898_vm13, %v1690_v41, %v1692_v15  ;;  %v1698_v17 = vrot.slane %v12008_v7, 6  ;;  %v10430_v24 = vpack.i.bf16 %v12008_v7, %v12005_v63 }
 0x4bd   :  { %v1729_v9 = vsel %vm14584_vm8, 0.0, %v1693_v61  ;;  %v1592_v41 = vrot.slane %v11894_v8, 4  ;;  %vm1639_vm8 = vcmp.lt.s32.totalorder %v11602_v38, 4 }
 0x4be   :  { %v1694_v35 = vrot.slane %v12013_v16, 6  ;;  %v1699_v28 = vsel %vm898_vm13, %v1696_v39, %v1698_v17  ;;  %v10420_v20 = vpack.i.bf16 %v12013_v16, %v12000_v3 }
 0x4bf   :  { %v1593_v48 = vsel %vm134_vm0, %v1590_v25, %v1592_v41  ;;  %v1595_v53 = vsel %vm134_vm0, %v1592_v41, %v1594_v42 }
 0x4c0   :  { %v1695_v6 = vsel %vm898_vm13, %v1692_v15, %v1694_v35  ;;  %v1697_v54 = vsel %vm898_vm13, %v1694_v35, %v1696_v39  ;;  %v1655_v56 = vsel %vm1639_vm8, 0.0, %v1593_v48 }
 0x4c1   :  { %v10415_v18 = vpack.i.bf16 %v1695_v6, %v1729_v9  ;;  %v1731_v12 = vsel %vm14583_vm7, 0.0, %v1697_v54  ;;  %vm1637_vm7 = vcmp.lt.s32.totalorder %v11596_v34, 4 }
 0x4c2   :  { %v10425_v19 = vpack.i.bf16 %v1699_v28, %v1731_v12  ;;  %v1653_v52 = vsel %vm1637_vm7, 0.0, %v1636_v29  ;;  %v1596_v12 = vrot.slane %v11928_v50, 4 }
 0x4c3   :  { %10416 = vrot.lane.b32.xlu0 %v10415_v18, %s11290_s25 }
 0x4c4   :  { %10426 = vrot.lane.b32.xlu1 %v10425_v19, %s11290_s25  ;;  %v1598_v19 = vrot.slane %v11941_v44, 4  ;;  %v1597_v25 = vsel %vm134_vm0, %v1594_v42, %v1596_v12 }
 0x4c5   :  { %v1657_v48 = vsel %vm1641_vm9, 0.0, %v1597_v25 }
 0x4c7   :  { %10421 = vrot.lane.b32.xlu0 %v10420_v20, %s11289_s24  ;;  %v1600_v20 = vrot.slane %v11933_v26, 4 }
 0x4c8   :  { %10431 = vrot.lane.b32.xlu1 %v10430_v24, %s11289_s24  ;;  %v1602_v24 = vrot.slane %v11936_v14, 4 }
 0x505   :  { %v10357_v51 = vpop.permute.xlu0 %10356 }
 0x506   :  { %v10367_v32 = vpop.permute.xlu1 %10366  ;;  %v10359_v43 = vunpack.i.h.bf16 %v10357_v51  ;;  %v10358_v21 = vunpack.i.l.bf16 %v10357_v51 }
 0x507   :  { %v10369_v37 = vunpack.i.h.bf16 %v10367_v32  ;;  %v10368_v49 = vunpack.i.l.bf16 %v10367_v32  ;;  %v1601_v32 = vsel %vm134_vm0, %v1598_v19, %v1600_v20 }
 0x508   :  { %v1845_v60 = vsel %vm760_vm3, %v1653_v52, %v10358_v21  ;;  %v1846_v13 = vsel %vm760_vm3, %v1591_v55, %v10359_v43  ;;  %v1599_v52 = vsel %vm134_vm0, %v1596_v12, %v1598_v19  ;;  %v1659_v42 = vsel %vm1643_vm10, 0.0, %v1601_v32 }
 0x509   :  { %v10362_v62 = vpop.permute.xlu0 %10361  ;;  %v1848_v17 = vsel %vm760_vm3, %v1595_v53, %v10369_v37  ;;  %v1847_v35 = vsel %vm760_vm3, %v1655_v56, %v10368_v49  ;;  %v1603_v37 = vsel %vm134_vm0, %v1600_v20, %v1602_v24 }
 0x50a   :  { %v10364_v57 = vunpack.i.h.bf16 %v10362_v62  ;;  %v10363_v1 = vunpack.i.l.bf16 %v10362_v62  ;;  %v10372_v59 = vpop.permute.xlu1 %10371 }
 0x50b   :  { %v10374_v15 = vunpack.i.h.bf16 %v10372_v59  ;;  %v10373_v61 = vunpack.i.l.bf16 %v10372_v59 }
 0x50c   :  { %v1861_v39 = vsel %vm398_vm2, %v1845_v60, %v10363_v1  ;;  %v1862_v6 = vsel %vm398_vm2, %v1846_v13, %v10364_v57 }
 0x50d   :  { %v1890_v9 = vpack.c.bf16 %v1862_v6, %v1861_v39  ;;  %v1863_v54 = vsel %vm398_vm2, %v1847_v35, %v10373_v61  ;;  %v1864_v18 = vsel %vm398_vm2, %v1848_v17, %v10374_v15 }
 0x50e   :  { %v1891_v28 = vpack.c.bf16 %v1864_v18, %v1863_v54  ;;  %v1606_v54 = vrot.slane %v11977_v36, 4  ;;  %v1608_v18 = vrot.slane %v11969_v22, 4 }
 0x50f   :  { %9537 = vmatprep.mubr.msk.bf16.mxu0 %vm1267_vm1, %v1890_v9  ;;  %v1604_v9 = vrot.slane %v11964_v40, 4 }
 0x510   :  { %9538 = vmatmul.mubr.msk.bf16.vlgmr.msra.gmra.mxu0 %vm1267_vm1, %v1891_v28  ;;  %v1610_v28 = vrot.slane %v11972_v23, 4 }
 0x511   :  { %v1605_v19 = vsel %vm134_vm0, %v1602_v24, %v1604_v9 }
 0x512   :  { %v1661_v32 = vsel %vm1645_vm11, 0.0, %v1605_v19 }
 0x515   :  { %v10377_v30 = vpop.permute.xlu0 %10376 }
 0x516   :  { %v10387_v41 = vpop.permute.xlu1 %10386  ;;  %v10379_v51 = vunpack.i.h.bf16 %v10377_v30  ;;  %v10378_v29 = vunpack.i.l.bf16 %v10377_v30 }
 0x517   :  { %v10389_v43 = vunpack.i.h.bf16 %v10387_v41  ;;  %v10388_v21 = vunpack.i.l.bf16 %v10387_v41  ;;  %v1609_v41 = vsel %vm134_vm0, %v1606_v54, %v1608_v18 }
 0x518   :  { %v1850_v56 = vsel %vm760_vm3, %v1599_v52, %v10379_v51  ;;  %v1849_v57 = vsel %vm760_vm3, %v1657_v48, %v10378_v29  ;;  %v1607_v48 = vsel %vm134_vm0, %v1604_v9, %v1606_v54  ;;  %v1663_v24 = vsel %vm1647_vm12, 0.0, %v1609_v41 }
 0x519   :  { %v10382_v49 = vpop.permute.xlu0 %10381  ;;  %v1852_v60 = vsel %vm760_vm3, %v1603_v37, %v10389_v43  ;;  %v1851_v13 = vsel %vm760_vm3, %v1659_v42, %v10388_v21  ;;  %v1611_v43 = vsel %vm134_vm0, %v1608_v18, %v1610_v28 }
 0x51a   :  { %v10384_v53 = vunpack.i.h.bf16 %v10382_v49  ;;  %v10383_v62 = vunpack.i.l.bf16 %v10382_v49  ;;  %v10392_v55 = vpop.permute.xlu1 %10391 }
 0x51b   :  { %v10394_v1 = vunpack.i.h.bf16 %v10392_v55  ;;  %v10393_v59 = vunpack.i.l.bf16 %v10392_v55 }
 0x51c   :  { %v1865_v15 = vsel %vm398_vm2, %v1849_v57, %v10383_v62  ;;  %v1866_v61 = vsel %vm398_vm2, %v1850_v56, %v10384_v53 }
 0x51d   :  { %v1892_v17 = vpack.c.bf16 %v1866_v61, %v1865_v15  ;;  %v1867_v35 = vsel %vm398_vm2, %v1851_v13, %v10393_v59  ;;  %v1868_v39 = vsel %vm398_vm2, %v1852_v60, %v10394_v1 }
 0x51e   :  { %v1893_v6 = vpack.c.bf16 %v1868_v39, %v1867_v35  ;;  %v1614_v35 = vrot.slane %v12013_v16, 4  ;;  %v1616_v39 = vrot.slane %v12005_v63, 4 }
 0x51f   :  { %9541 = vmatprep.mubr.msk.bf16.mxu0 %vm1267_vm1, %v1892_v17  ;;  %v1612_v17 = vrot.slane %v12000_v3, 4 }
 0x520   :  { %9542 = vmatmul.mubr.msk.bf16.gmra.mxu0 %vm1267_vm1, %v1893_v6  ;;  %v1618_v6 = vrot.slane %v12008_v7, 4 }
 0x521   :  { %v1613_v54 = vsel %vm134_vm0, %v1610_v28, %v1612_v17 }
 0x522   :  { %v1665_v41 = vsel %vm1649_vm15, 0.0, %v1613_v54 }
 0x525   :  { %v10397_v12 = vpop.permute.xlu0 %10396 }
 0x526   :  { %v10407_v20 = vpop.permute.xlu1 %10406  ;;  %v10399_v30 = vunpack.i.h.bf16 %v10397_v12  ;;  %v10398_v25 = vunpack.i.l.bf16 %v10397_v12 }
 0x527   :  { %v10409_v51 = vunpack.i.h.bf16 %v10407_v20  ;;  %v10408_v29 = vunpack.i.l.bf16 %v10407_v20  ;;  %v1617_v20 = vsel %vm134_vm0, %v1614_v35, %v1616_v39 }
 0x528   :  { %v1854_v42 = vsel %vm760_vm3, %v1607_v48, %v10399_v30  ;;  %v1853_v53 = vsel %vm760_vm3, %v1661_v32, %v10398_v25  ;;  %v1615_v32 = vsel %vm134_vm0, %v1612_v17, %v1614_v35  ;;  %v1667_v28 = vsel %vm1651_vm14, 0.0, %v1617_v20  ;;  %v8523_v17 = vld [vmem:[%s14566_s7 + $0x1] ss:$0 sm:$0xff] }
 0x529   :  { %v10402_v21 = vpop.permute.xlu0 %10401  ;;  %v1856_v56 = vsel %vm760_vm3, %v1611_v43, %v10409_v51  ;;  %v1855_v57 = vsel %vm760_vm3, %v1663_v24, %v10408_v29  ;;  %v1619_v51 = vsel %vm134_vm0, %v1616_v39, %v1618_v6 }
 0x52a   :  { %v10404_v37 = vunpack.i.h.bf16 %v10402_v21  ;;  %v10403_v49 = vunpack.i.l.bf16 %v10402_v21  ;;  %v10412_v52 = vpop.permute.xlu1 %10411 }
 0x52b   :  { %v10414_v62 = vunpack.i.h.bf16 %v10412_v52  ;;  %v10413_v55 = vunpack.i.l.bf16 %v10412_v52 }
 0x52c   :  { %v1869_v1 = vsel %vm398_vm2, %v1853_v53, %v10403_v49  ;;  %v1870_v59 = vsel %vm398_vm2, %v1854_v42, %v10404_v37 }
 0x52d   :  { %v1894_v60 = vpack.c.bf16 %v1870_v59, %v1869_v1  ;;  %v1871_v13 = vsel %vm398_vm2, %v1855_v57, %v10413_v55  ;;  %v1872_v15 = vsel %vm398_vm2, %v1856_v56, %v10414_v62 }
 0x52e   :  { %v1895_v61 = vpack.c.bf16 %v1872_v15, %v1871_v13  ;;  %v10589_v13 = vld [vmem:[%s14567_s8 + $0x10] sm:$0xff]  }
 0x52f   :  { %9545 = vmatprep.mubr.msk.bf16.mxu0 %vm1267_vm1, %v1894_v60  ;;  %v10588_v60 = vld [vmem:[%s14567_s8 + $0x18] sm:$0xff]  }
 0x530   :  { %9546 = vmatmul.mubr.msk.bf16.gmra.mxu0 %vm1267_vm1, %v1895_v61  ;;  %9553 = vmatprep.subr.bf16.mxu1 %v10588_v60 }
 0x531   :  { %9554 = vmatpush3.bf16.msra.mxu1 %v10588_v60 }
 0x532   :  { %9555 = vmatprep.subr.bf16.mxu1 %v10589_v13 }
 0x535   :  { %v10417_v9 = vpop.permute.xlu0 %10416  ;;  %9556 = vmatpush3.bf16.msra.mxu1 %v10589_v13 }
 0x536   :  { %v10427_v18 = vpop.permute.xlu1 %10426  ;;  %v10419_v12 = vunpack.i.h.bf16 %v10417_v9  ;;  %v10418_v19 = vunpack.i.l.bf16 %v10417_v9 }
 0x537   :  { %v10429_v30 = vunpack.i.h.bf16 %v10427_v18  ;;  %v10428_v25 = vunpack.i.l.bf16 %v10427_v18 }
 0x538   :  { %v1858_v24 = vsel %vm760_vm3, %v1615_v32, %v10419_v12  ;;  %v1857_v37 = vsel %vm760_vm3, %v1665_v41, %v10418_v19 }
 0x539   :  { %v10422_v29 = vpop.permute.xlu0 %10421  ;;  %v1860_v42 = vsel %vm760_vm3, %v1619_v51, %v10429_v30  ;;  %v1859_v53 = vsel %vm760_vm3, %v1667_v28, %v10428_v25 }
 0x53a   :  { %v10424_v43 = vunpack.i.h.bf16 %v10422_v29  ;;  %v10423_v21 = vunpack.i.l.bf16 %v10422_v29  ;;  %v10432_v48 = vpop.permute.xlu1 %10431 }
 0x53b   :  { %v10434_v49 = vunpack.i.h.bf16 %v10432_v48  ;;  %v10433_v52 = vunpack.i.l.bf16 %v10432_v48 }
 0x53c   :  { %v1873_v62 = vsel %vm398_vm2, %v1857_v37, %v10423_v21  ;;  %v1874_v55 = vsel %vm398_vm2, %v1858_v24, %v10424_v43 }
 0x53d   :  { %v1896_v56 = vpack.c.bf16 %v1874_v55, %v1873_v62  ;;  %v1875_v57 = vsel %vm398_vm2, %v1859_v53, %v10433_v52  ;;  %v1876_v1 = vsel %vm398_vm2, %v1860_v42, %v10434_v49 }
 0x53e   :  { %v1897_v59 = vpack.c.bf16 %v1876_v1, %v1875_v57 }
 0x53f   :  { %9549 = vmatprep.mubr.msk.bf16.mxu0 %vm1267_vm1, %v1896_v56 }
 0x540   :  { %9550 = vmatmul.mubr.msk.bf16.gmra.mxu0 %vm1267_vm1, %v1897_v59 }
 0x5d0   :  { %v9539_v15 = vpop.f32.mrf.mxu0 }
 0x5d1   :  { %v2009_v9 = vadd.f32 %v9539_v15, %v8523_v17 }
 0x5d2   :  { %v2000_v61 = vpop.f32.mrf.mxu0 }
 0x5d3   :  { %v2001_v39 = vadd.f32 %v8523_v17, %v2000_v61  ;;  %v2065_v30 = vmax.f32 %v2009_v9, 0.0 }
 0x5d4   :  { %v9540_v35 = vpop.f32.mrf.mxu0 }
 0x5d5   :  { %v2012_v6 = vadd.f32 %v9540_v35, %v8523_v17  ;;  %v2063_v19 = vmax.f32 %v2001_v39, 0.0 }
 0x5d6   :  { %v2003_v54 = vpop.f32.mrf.mxu0 }
 0x5d7   :  { %v2004_v18 = vadd.f32 %v8523_v17, %v2003_v54  ;;  %v2066_v12 = vmax.f32 %v2012_v6, 0.0 }
 0x5d9   :  { %v2064_v20 = vmax.f32 %v2004_v18, 0.0  ;;  %v2085_v41 = vpack.c.bf16 %v2066_v12, %v2065_v30 }
 0x5db   :  { %v2084_v25 = vpack.c.bf16 %v2064_v20, %v2063_v19 }
 0x5dd   :  { %9557 = vmatprep.mubr.msk.bf16.mxu1 %vm760_vm3, %v2084_v25 }
 0x5de   :  { %9558 = vmatmul.mubr.msk.bf16.vlgmr.msra.gmra.mxu1 %vm760_vm3, %v2085_v41 }
 0x5e0   :  { %v9543_v51 = vpop.f32.mrf.mxu0 }
 0x5e1   :  { %v2025_v21 = vadd.f32 %v9543_v51, %v8523_v17 }
 0x5e2   :  { %v2016_v29 = vpop.f32.mrf.mxu0 }
 0x5e3   :  { %v2017_v28 = vadd.f32 %v8523_v17, %v2016_v29  ;;  %v2069_v42 = vmax.f32 %v2025_v21, 0.0 }
 0x5e4   :  { %v9544_v32 = vpop.f32.mrf.mxu0 }
 0x5e5   :  { %v2028_v43 = vadd.f32 %v9544_v32, %v8523_v17  ;;  %v2067_v49 = vmax.f32 %v2017_v28, 0.0 }
 0x5e6   :  { %v2019_v48 = vpop.f32.mrf.mxu0 }
 0x5e7   :  { %v2020_v24 = vadd.f32 %v8523_v17, %v2019_v48  ;;  %v2070_v37 = vmax.f32 %v2028_v43, 0.0 }
 0x5e9   :  { %v2068_v52 = vmax.f32 %v2020_v24, 0.0  ;;  %v2087_v62 = vpack.c.bf16 %v2070_v37, %v2069_v42  ;;  %v10590_v24 = vld [vmem:[%s14565_s6 + $0x88] sm:$0xff]   ;;  %v10591_v37 = vld [vmem:[%s14565_s6 + $0x80] sm:$0xff]  }
 0x5ea   :  { %9573 = vmatprep.subr.bf16.mxu0 %v10590_v24  ;;  %v12162_v42 = vld [vmem:[%s14568_s9 + $0x1] ss:$0 sm:$0xff] }
 0x5eb   :  { %v2086_v53 = vpack.c.bf16 %v2068_v52, %v2067_v49  ;;  %9574 = vmatpush3.bf16.msra.mxu0 %v10590_v24  ;;  %v10593_v49 = vld [vmem:[%s14565_s6 + $0x70] sm:$0xff]  }
 0x5ec   :  { %9575 = vmatprep.subr.bf16.mxu0 %v10591_v37 }
 0x5ed   :  { %9561 = vmatprep.mubr.msk.bf16.mxu1 %vm760_vm3, %v2086_v53 }
 0x5ee   :  { %9562 = vmatmul.mubr.msk.bf16.gmra.mxu1 %vm760_vm3, %v2087_v62 }
 0x5ef   :  { %9576 = vmatpush3.bf16.msra.mxu0 %v10591_v37 }
 0x5f0   :  { %v9547_v55 = vpop.f32.mrf.mxu0 }
 0x5f1   :  { %v2041_v60 = vadd.f32 %v9547_v55, %v8523_v17 }
 0x5f2   :  { %v2032_v56 = vpop.f32.mrf.mxu0 }
 0x5f3   :  { %v2033_v1 = vadd.f32 %v8523_v17, %v2032_v56  ;;  %v2073_v6 = vmax.f32 %v2041_v60, 0.0 }
 0x5f4   :  { %v9548_v57 = vpop.f32.mrf.mxu0 }
 0x5f5   :  { %v2044_v59 = vadd.f32 %v9548_v57, %v8523_v17  ;;  %v2071_v35 = vmax.f32 %v2033_v1, 0.0 }
 0x5f6   :  { %v2035_v13 = vpop.f32.mrf.mxu0 }
 0x5f7   :  { %v2036_v15 = vadd.f32 %v8523_v17, %v2035_v13  ;;  %v2074_v61 = vmax.f32 %v2044_v59, 0.0  ;;  %v10594_v59 = vld [vmem:[%s14565_s6 + $0x68] sm:$0xff]  }
 0x5f9   :  { %v2072_v39 = vmax.f32 %v2036_v15, 0.0  ;;  %v2089_v54 = vpack.c.bf16 %v2074_v61, %v2073_v6 }
 0x5fb   :  { %v2088_v9 = vpack.c.bf16 %v2072_v39, %v2071_v35  ;;  %v10595_v39 = vld [vmem:[%s14565_s6 + $0x60] sm:$0xff]  }
 0x5fd   :  { %9565 = vmatprep.mubr.msk.bf16.mxu1 %vm760_vm3, %v2088_v9 }
 0x5fe   :  { %9566 = vmatmul.mubr.msk.bf16.gmra.mxu1 %vm760_vm3, %v2089_v54 }
 0x600   :  { %v9551_v18 = vpop.f32.mrf.mxu0 }
 0x601   :  { %v2057_v25 = vadd.f32 %v9551_v18, %v8523_v17 }
 0x602   :  { %v2048_v12 = vpop.f32.mrf.mxu0 }
 0x603   :  { %v2049_v20 = vadd.f32 %v8523_v17, %v2048_v12  ;;  %v2077_v43 = vmax.f32 %v2057_v25, 0.0 }
 0x604   :  { %v9552_v19 = vpop.f32.mrf.mxu0 }
 0x605   :  { %v2060_v30 = vadd.f32 %v9552_v19, %v8523_v17  ;;  %v2075_v32 = vmax.f32 %v2049_v20, 0.0 }
 0x606   :  { %v2051_v41 = vpop.f32.mrf.mxu0 }
 0x607   :  { %v2052_v51 = vadd.f32 %v8523_v17, %v2051_v41  ;;  %v2078_v29 = vmax.f32 %v2060_v30, 0.0  ;;  %v10592_v17 = vld [vmem:[%s14565_s6 + $0x78] sm:$0xff]  }
 0x608   :  { %9577 = vmatprep.subr.bf16.mxu0 %v10592_v17 }
 0x609   :  { %v2076_v28 = vmax.f32 %v2052_v51, 0.0  ;;  %v2091_v48 = vpack.c.bf16 %v2078_v29, %v2077_v43  ;;  %9578 = vmatpush3.bf16.msra.mxu0 %v10592_v17 }
 0x60a   :  { %9579 = vmatprep.subr.bf16.mxu0 %v10593_v49 }
 0x60b   :  { %v2090_v21 = vpack.c.bf16 %v2076_v28, %v2075_v32 }
 0x60d   :  { %9569 = vmatprep.mubr.msk.bf16.mxu1 %vm760_vm3, %v2090_v21  ;;  %9580 = vmatpush3.bf16.msra.mxu0 %v10593_v49 }
 0x60e   :  { %9570 = vmatmul.mubr.msk.bf16.gmra.mxu1 %vm760_vm3, %v2091_v48  ;;  %9581 = vmatprep.subr.bf16.mxu0 %v10594_v59 }
 0x611   :  { %9582 = vmatpush3.bf16.msra.mxu0 %v10594_v59 }
 0x612   :  { %9583 = vmatprep.subr.bf16.mxu0 %v10595_v39 }
 0x615   :  { %9584 = vmatpush3.bf16.msra.mxu0 %v10595_v39 }
 0x69e   :  { %v9559_v52 = vpop.f32.mrf.mxu1 }
 0x69f   :  { %v2179_v62 = vadd.f32 %v9559_v52, %v12162_v42 }
 0x6a0   :  { %v2170_v53 = vpop.f32.mrf.mxu1 }
 0x6a1   :  { %v2171_v55 = vadd.f32 %v12162_v42, %v2170_v53  ;;  %v12174_v13 = vadd.f32 %v2179_v62, %v11894_v8 }
 0x6a2   :  { %v9560_v56 = vpop.f32.mrf.mxu1 }
 0x6a3   :  { %v12167_v57 = vadd.f32 %v2171_v55, %v11887_v58  ;;  %v2182_v1 = vadd.f32 %v9560_v56, %v12162_v42  ;;  %v2298_v9 = vrot.slane %v12174_v13, 4 }
 0x6a4   :  { %v2173_v60 = vpop.f32.mrf.mxu1 }
 0x6a5   :  { %v12177_v15 = vadd.f32 %v2182_v1, %v11897_v11  ;;  %v2174_v61 = vadd.f32 %v12162_v42, %v2173_v60  ;;  %v2295_v35 = vrot.slane %v12167_v57, 4 }
 0x6a7   :  { %v12182_v58 = vadd.f32 %v2174_v61, %v11902_v31  ;;  %v2300_v6 = vrot.slane %v12177_v15, 4  ;;  %v2342_v8 = vsel %vm134_vm0, 0.0, %v2295_v35  ;;  %v10450_v28 = vpack.i.bf16 %v12177_v15, %v12174_v13 }
 0x6a8   :  { %v2343_v31 = vsel %vm1637_vm7, 0.0, %v2342_v8 }
 0x6a9   :  { %v2296_v11 = vrot.slane %v12182_v58, 4  ;;  %v2301_v19 = vsel %vm134_vm0, %v2298_v9, %v2300_v6  ;;  %v10440_v51 = vpack.i.bf16 %v12182_v58, %v12167_v57 }
 0x6ab   :  { %v2297_v54 = vsel %vm134_vm0, %v2295_v35, %v2296_v11  ;;  %v2299_v18 = vsel %vm134_vm0, %v2296_v11, %v2298_v9 }
 0x6ac   :  { %v10435_v12 = vpack.i.bf16 %v2297_v54, %v2343_v31  ;;  %v2345_v20 = vsel %vm1639_vm8, 0.0, %v2299_v18 }
 0x6ad   :  { %v10445_v30 = vpack.i.bf16 %v2301_v19, %v2345_v20 }
 0x6ae   :  { %v9563_v25 = vpop.f32.mrf.mxu1  ;;  %10436 = vrot.lane.b32.xlu0 %v10435_v12, %s11290_s25 }
 0x6af   :  { %10446 = vrot.lane.b32.xlu1 %v10445_v30, %s11290_s25  ;;  %v2195_v29 = vadd.f32 %v9563_v25, %v12162_v42 }
 0x6b0   :  { %v2186_v41 = vpop.f32.mrf.mxu1 }
 0x6b1   :  { %v2187_v32 = vadd.f32 %v12162_v42, %v2186_v41  ;;  %v12213_v37 = vadd.f32 %v2195_v29, %v11933_v26 }
 0x6b2   :  { %v9564_v43 = vpop.f32.mrf.mxu1  ;;  %10441 = vrot.lane.b32.xlu0 %v10440_v51, %s11289_s24 }
 0x6b3   :  { %v12208_v21 = vadd.f32 %v2187_v32, %v11928_v50  ;;  %v2198_v48 = vadd.f32 %v9564_v43, %v12162_v42  ;;  %10451 = vrot.lane.b32.xlu1 %v10450_v28, %s11289_s24  ;;  %v2306_v56 = vrot.slane %v12213_v37, 4 }
 0x6b4   :  { %v2189_v24 = vpop.f32.mrf.mxu1 }
 0x6b5   :  { %v12216_v17 = vadd.f32 %v2198_v48, %v11936_v14  ;;  %v2190_v49 = vadd.f32 %v12162_v42, %v2189_v24  ;;  %v2302_v52 = vrot.slane %v12208_v21, 4 }
 0x6b7   :  { %v12221_v53 = vadd.f32 %v2190_v49, %v11941_v44  ;;  %v2308_v50 = vrot.slane %v12216_v17, 4  ;;  %v2303_v62 = vsel %vm134_vm0, %v2300_v6, %v2302_v52  ;;  %v10470_v9 = vpack.i.bf16 %v12216_v17, %v12213_v37 }
 0x6b8   :  { %v2347_v14 = vsel %vm1641_vm9, 0.0, %v2303_v62 }
 0x6b9   :  { %v2304_v55 = vrot.slane %v12221_v53, 4  ;;  %v2309_v60 = vsel %vm134_vm0, %v2306_v56, %v2308_v50  ;;  %v10460_v6 = vpack.i.bf16 %v12221_v53, %v12208_v21 }
 0x6bb   :  { %v2305_v26 = vsel %vm134_vm0, %v2302_v52, %v2304_v55  ;;  %v2307_v1 = vsel %vm134_vm0, %v2304_v55, %v2306_v56 }
 0x6bc   :  { %v10455_v59 = vpack.i.bf16 %v2305_v26, %v2347_v14  ;;  %v2349_v44 = vsel %vm1643_vm10, 0.0, %v2307_v1 }
 0x6bd   :  { %v10465_v61 = vpack.i.bf16 %v2309_v60, %v2349_v44 }
 0x6be   :  { %v9567_v35 = vpop.f32.mrf.mxu1  ;;  %10456 = vrot.lane.b32.xlu0 %v10455_v59, %s11290_s25 }
 0x6bf   :  { %10466 = vrot.lane.b32.xlu1 %v10465_v61, %s11290_s25  ;;  %v2211_v8 = vadd.f32 %v9567_v35, %v12162_v42 }
 0x6c0   :  { %v2202_v39 = vpop.f32.mrf.mxu1 }
 0x6c1   :  { %v2203_v11 = vadd.f32 %v12162_v42, %v2202_v39  ;;  %v12249_v19 = vadd.f32 %v2211_v8, %v11969_v22 }
 0x6c2   :  { %v9568_v54 = vpop.f32.mrf.mxu1  ;;  %10461 = vrot.lane.b32.xlu0 %v10460_v6, %s11289_s24 }
 0x6c3   :  { %v12244_v31 = vadd.f32 %v2203_v11, %v11964_v40  ;;  %v2214_v18 = vadd.f32 %v9568_v54, %v12162_v42  ;;  %10471 = vrot.lane.b32.xlu1 %v10470_v9, %s11289_s24  ;;  %v2314_v32 = vrot.slane %v12249_v19, 4 }
 0x6c4   :  { %v2205_v12 = vpop.f32.mrf.mxu1 }
 0x6c5   :  { %v12252_v20 = vadd.f32 %v2214_v18, %v11972_v23  ;;  %v2206_v30 = vadd.f32 %v12162_v42, %v2205_v12  ;;  %v2310_v25 = vrot.slane %v12244_v31, 4 }
 0x6c7   :  { %v12257_v41 = vadd.f32 %v2206_v30, %v11977_v36  ;;  %v2316_v40 = vrot.slane %v12252_v20, 4  ;;  %v2311_v51 = vsel %vm134_vm0, %v2308_v50, %v2310_v25  ;;  %v10490_v56 = vpack.i.bf16 %v12252_v20, %v12249_v19 }
 0x6c8   :  { %v2351_v23 = vsel %vm1645_vm11, 0.0, %v2311_v51 }
 0x6c9   :  { %v2312_v29 = vrot.slane %v12257_v41, 4  ;;  %v2317_v48 = vsel %vm134_vm0, %v2314_v32, %v2316_v40  ;;  %v10480_v50 = vpack.i.bf16 %v12257_v41, %v12244_v31 }
 0x6cb   :  { %v2313_v22 = vsel %vm134_vm0, %v2310_v25, %v2312_v29  ;;  %v2315_v28 = vsel %vm134_vm0, %v2312_v29, %v2314_v32 }
 0x6cc   :  { %v10475_v43 = vpack.i.bf16 %v2313_v22, %v2351_v23  ;;  %v2353_v36 = vsel %vm1647_vm12, 0.0, %v2315_v28 }
 0x6cd   :  { %v10485_v24 = vpack.i.bf16 %v2317_v48, %v2353_v36 }
 0x6ce   :  { %v9571_v49 = vpop.f32.mrf.mxu1  ;;  %10476 = vrot.lane.b32.xlu0 %v10475_v43, %s11290_s25 }
 0x6cf   :  { %10486 = vrot.lane.b32.xlu1 %v10485_v24, %s11290_s25  ;;  %v2227_v62 = vadd.f32 %v9571_v49, %v12162_v42 }
 0x6d0   :  { %v2218_v52 = vpop.f32.mrf.mxu1 }
 0x6d1   :  { %v2219_v55 = vadd.f32 %v12162_v42, %v2218_v52  ;;  %v12285_v60 = vadd.f32 %v2227_v62, %v12005_v63 }
 0x6d2   :  { %v9572_v26 = vpop.f32.mrf.mxu1  ;;  %10481 = vrot.lane.b32.xlu0 %v10480_v50, %s11289_s24 }
 0x6d3   :  { %v12280_v14 = vadd.f32 %v2219_v55, %v12000_v3  ;;  %v2230_v1 = vadd.f32 %v9572_v26, %v12162_v42  ;;  %10491 = vrot.lane.b32.xlu1 %v10490_v56, %s11289_s24  ;;  %v2322_v11 = vrot.slane %v12285_v60, 4 }
 0x6d4   :  { %v2221_v59 = vpop.f32.mrf.mxu1 }
 0x6d5   :  { %v12288_v44 = vadd.f32 %v2230_v1, %v12008_v7  ;;  %v2222_v61 = vadd.f32 %v12162_v42, %v2221_v59  ;;  %v2318_v35 = vrot.slane %v12280_v14, 4 }
 0x6d7   :  { %v12293_v39 = vadd.f32 %v2222_v61, %v12013_v16  ;;  %v2324_v3 = vrot.slane %v12288_v44, 4  ;;  %v2319_v6 = vsel %vm134_vm0, %v2316_v40, %v2318_v35  ;;  %v10510_v30 = vpack.i.bf16 %v12288_v44, %v12285_v60 }
 0x6d8   :  { %v2355_v7 = vsel %vm1649_vm15, 0.0, %v2319_v6 }
 0x6d9   :  { %v2320_v8 = vrot.slane %v12293_v39, 4  ;;  %v2325_v54 = vsel %vm134_vm0, %v2322_v11, %v2324_v3  ;;  %v10500_v12 = vpack.i.bf16 %v12293_v39, %v12280_v14 }
 0x6db   :  { %v2321_v63 = vsel %vm134_vm0, %v2318_v35, %v2320_v8  ;;  %v2323_v42 = vsel %vm134_vm0, %v2320_v8, %v2322_v11 }
 0x6dc   :  { %v10495_v9 = vpack.i.bf16 %v2321_v63, %v2355_v7  ;;  %v2357_v16 = vsel %vm1651_vm14, 0.0, %v2323_v42 }
 0x6dd   :  { %v10505_v18 = vpack.i.bf16 %v2325_v54, %v2357_v16 }
 0x6de   :  { %10496 = vrot.lane.b32.xlu0 %v10495_v9, %s11290_s25 }
 0x6df   :  { %10506 = vrot.lane.b32.xlu1 %v10505_v18, %s11290_s25 }
 0x6e2   :  { %10501 = vrot.lane.b32.xlu0 %v10500_v12, %s11289_s24 }
 0x6e3   :  { %10511 = vrot.lane.b32.xlu1 %v10510_v30, %s11289_s24 }
 0x720   :  { %v10437_v25 = vpop.permute.xlu0 %10436 }
 0x721   :  { %v10447_v40 = vpop.permute.xlu1 %10446  ;;  %v10439_v51 = vunpack.i.h.bf16 %v10437_v25  ;;  %v10438_v29 = vunpack.i.l.bf16 %v10437_v25 }
 0x722   :  { %v10449_v32 = vunpack.i.h.bf16 %v10447_v40  ;;  %v10448_v22 = vunpack.i.l.bf16 %v10447_v40 }
 0x723   :  { %v2472_v36 = vsel %vm760_vm3, %v12167_v57, %v10439_v51  ;;  %v2471_v24 = vsel %vm760_vm3, 0.0, %v10438_v29 }
 0x724   :  { %v10442_v23 = vpop.permute.xlu0 %10441  ;;  %v2474_v50 = vsel %vm760_vm3, %v12174_v13, %v10449_v32  ;;  %v2473_v62 = vsel %vm760_vm3, 0.0, %v10448_v22 }
 0x725   :  { %v10444_v28 = vunpack.i.h.bf16 %v10442_v23  ;;  %v10443_v43 = vunpack.i.l.bf16 %v10442_v23  ;;  %v10452_v48 = vpop.permute.xlu1 %10451 }
 0x726   :  { %v10454_v49 = vunpack.i.h.bf16 %v10452_v48  ;;  %v10453_v52 = vunpack.i.l.bf16 %v10452_v48 }
 0x727   :  { %v2487_v55 = vsel %vm398_vm2, %v2471_v24, %v10443_v43  ;;  %v2488_v56 = vsel %vm398_vm2, %v2472_v36, %v10444_v28 }
 0x728   :  { %v2516_v26 = vpack.c.bf16 %v2488_v56, %v2487_v55  ;;  %v2489_v1 = vsel %vm398_vm2, %v2473_v62, %v10453_v52  ;;  %v2490_v59 = vsel %vm398_vm2, %v2474_v50, %v10454_v49 }
 0x729   :  { %v2517_v61 = vpack.c.bf16 %v2490_v59, %v2489_v1 }
 0x72a   :  { %9585 = vmatprep.mubr.msk.bf16.mxu0 %vm1267_vm1, %v2516_v26 }
 0x72b   :  { %9586 = vmatmul.mubr.msk.bf16.vlgmr.msra.gmra.mxu0 %vm1267_vm1, %v2517_v61 }
 0x730   :  { %v10457_v35 = vpop.permute.xlu0 %10456 }
 0x731   :  { %v10467_v3 = vpop.permute.xlu1 %10466  ;;  %v10459_v6 = vunpack.i.h.bf16 %v10457_v35  ;;  %v10458_v8 = vunpack.i.l.bf16 %v10457_v35 }
 0x732   :  { %v10469_v11 = vunpack.i.h.bf16 %v10467_v3  ;;  %v10468_v63 = vunpack.i.l.bf16 %v10467_v3 }
 0x733   :  { %v2476_v16 = vsel %vm760_vm3, %v12208_v21, %v10459_v6  ;;  %v2475_v18 = vsel %vm760_vm3, 0.0, %v10458_v8 }
 0x734   :  { %v10462_v7 = vpop.permute.xlu0 %10461  ;;  %v2478_v25 = vsel %vm760_vm3, %v12213_v37, %v10469_v11  ;;  %v2477_v40 = vsel %vm760_vm3, 0.0, %v10468_v63 }
 0x735   :  { %v10464_v42 = vunpack.i.h.bf16 %v10462_v7  ;;  %v10463_v9 = vunpack.i.l.bf16 %v10462_v7  ;;  %v10472_v54 = vpop.permute.xlu1 %10471 }
 0x736   :  { %v10474_v12 = vunpack.i.h.bf16 %v10472_v54  ;;  %v10473_v30 = vunpack.i.l.bf16 %v10472_v54 }
 0x737   :  { %v2491_v51 = vsel %vm398_vm2, %v2475_v18, %v10463_v9  ;;  %v2492_v29 = vsel %vm398_vm2, %v2476_v16, %v10464_v42 }
 0x738   :  { %v2518_v32 = vpack.c.bf16 %v2492_v29, %v2491_v51  ;;  %v2493_v22 = vsel %vm398_vm2, %v2477_v40, %v10473_v30  ;;  %v2494_v23 = vsel %vm398_vm2, %v2478_v25, %v10474_v12 }
 0x739   :  { %v2519_v28 = vpack.c.bf16 %v2494_v23, %v2493_v22 }
 0x73a   :  { %9589 = vmatprep.mubr.msk.bf16.mxu0 %vm1267_vm1, %v2518_v32 }
 0x73b   :  { %9590 = vmatmul.mubr.msk.bf16.gmra.mxu0 %vm1267_vm1, %v2519_v28 }
 0x740   :  { %v10477_v43 = vpop.permute.xlu0 %10476 }
 0x741   :  { %v10487_v48 = vpop.permute.xlu1 %10486  ;;  %v10479_v36 = vunpack.i.h.bf16 %v10477_v43  ;;  %v10478_v24 = vunpack.i.l.bf16 %v10477_v43 }
 0x742   :  { %v10489_v49 = vunpack.i.h.bf16 %v10487_v48  ;;  %v10488_v52 = vunpack.i.l.bf16 %v10487_v48 }
 0x743   :  { %v2480_v26 = vsel %vm760_vm3, %v12244_v31, %v10479_v36  ;;  %v2479_v1 = vsel %vm760_vm3, 0.0, %v10478_v24 }
 0x744   :  { %v10482_v50 = vpop.permute.xlu0 %10481  ;;  %v2482_v35 = vsel %vm760_vm3, %v12249_v19, %v10489_v49  ;;  %v2481_v3 = vsel %vm760_vm3, 0.0, %v10488_v52 }
 0x745   :  { %v10484_v62 = vunpack.i.h.bf16 %v10482_v50  ;;  %v10483_v55 = vunpack.i.l.bf16 %v10482_v50  ;;  %v10492_v56 = vpop.permute.xlu1 %10491 }
 0x746   :  { %v10494_v59 = vunpack.i.h.bf16 %v10492_v56  ;;  %v10493_v61 = vunpack.i.l.bf16 %v10492_v56  ;;  %v10597_v56 = vld [vmem:[%s14567_s8 + $0x20] sm:$0xff]  }
 0x747   :  { %v2495_v6 = vsel %vm398_vm2, %v2479_v1, %v10483_v55  ;;  %v2496_v8 = vsel %vm398_vm2, %v2480_v26, %v10484_v62  ;;  %v10596_v55 = vld [vmem:[%s14567_s8 + $0x28] sm:$0xff]  }
 0x748   :  { %v2520_v11 = vpack.c.bf16 %v2496_v8, %v2495_v6  ;;  %v2497_v63 = vsel %vm398_vm2, %v2481_v3, %v10493_v61  ;;  %v2498_v7 = vsel %vm398_vm2, %v2482_v35, %v10494_v59  ;;  %9601 = vmatprep.subr.bf16.mxu1 %v10596_v55  ;;  %v8567_v59 = vld [vmem:[%s14566_s7 + $0x2] ss:$0 sm:$0xff] }
 0x749   :  { %v2521_v42 = vpack.c.bf16 %v2498_v7, %v2497_v63  ;;  %9602 = vmatpush3.bf16.msra.mxu1 %v10596_v55 }
 0x74a   :  { %9593 = vmatprep.mubr.msk.bf16.mxu0 %vm1267_vm1, %v2520_v11  ;;  %9603 = vmatprep.subr.bf16.mxu1 %v10597_v56 }
 0x74b   :  { %9594 = vmatmul.mubr.msk.bf16.gmra.mxu0 %vm1267_vm1, %v2521_v42 }
 0x74d   :  { %9604 = vmatpush3.bf16.msra.mxu1 %v10597_v56 }
 0x750   :  { %v10497_v9 = vpop.permute.xlu0 %10496 }
 0x751   :  { %v10507_v54 = vpop.permute.xlu1 %10506  ;;  %v10499_v16 = vunpack.i.h.bf16 %v10497_v9  ;;  %v10498_v18 = vunpack.i.l.bf16 %v10497_v9 }
 0x752   :  { %v10509_v12 = vunpack.i.h.bf16 %v10507_v54  ;;  %v10508_v30 = vunpack.i.l.bf16 %v10507_v54 }
 0x753   :  { %v2484_v32 = vsel %vm760_vm3, %v12280_v14, %v10499_v16  ;;  %v2483_v22 = vsel %vm760_vm3, 0.0, %v10498_v18 }
 0x754   :  { %v10502_v25 = vpop.permute.xlu0 %10501  ;;  %v2486_v43 = vsel %vm760_vm3, %v12285_v60, %v10509_v12  ;;  %v2485_v48 = vsel %vm760_vm3, 0.0, %v10508_v30 }
 0x755   :  { %v10504_v40 = vunpack.i.h.bf16 %v10502_v25  ;;  %v10503_v51 = vunpack.i.l.bf16 %v10502_v25  ;;  %v10512_v29 = vpop.permute.xlu1 %10511 }
 0x756   :  { %v10514_v23 = vunpack.i.h.bf16 %v10512_v29  ;;  %v10513_v28 = vunpack.i.l.bf16 %v10512_v29 }
 0x757   :  { %v2499_v36 = vsel %vm398_vm2, %v2483_v22, %v10503_v51  ;;  %v2500_v24 = vsel %vm398_vm2, %v2484_v32, %v10504_v40 }
 0x758   :  { %v2522_v49 = vpack.c.bf16 %v2500_v24, %v2499_v36  ;;  %v2501_v52 = vsel %vm398_vm2, %v2485_v48, %v10513_v28  ;;  %v2502_v50 = vsel %vm398_vm2, %v2486_v43, %v10514_v23 }
 0x759   :  { %v2523_v62 = vpack.c.bf16 %v2502_v50, %v2501_v52 }
 0x75a   :  { %9597 = vmatprep.mubr.msk.bf16.mxu0 %vm1267_vm1, %v2522_v49 }
 0x75b   :  { %9598 = vmatmul.mubr.msk.bf16.gmra.mxu0 %vm1267_vm1, %v2523_v62 }
 0x7eb   :  { %v9587_v26 = vpop.f32.mrf.mxu0 }
 0x7ec   :  { %v2635_v6 = vadd.f32 %v9587_v26, %v8567_v59 }
 0x7ed   :  { %v2626_v1 = vpop.f32.mrf.mxu0 }
 0x7ee   :  { %v2627_v35 = vadd.f32 %v8567_v59, %v2626_v1  ;;  %v2691_v9 = vmax.f32 %v2635_v6, 0.0 }
 0x7ef   :  { %v9588_v61 = vpop.f32.mrf.mxu0 }
 0x7f0   :  { %v2638_v3 = vadd.f32 %v9588_v61, %v8567_v59  ;;  %v2689_v7 = vmax.f32 %v2627_v35, 0.0 }
 0x7f1   :  { %v2629_v8 = vpop.f32.mrf.mxu0 }
 0x7f2   :  { %v2630_v11 = vadd.f32 %v8567_v59, %v2629_v8  ;;  %v2692_v63 = vmax.f32 %v2638_v3, 0.0 }
 0x7f4   :  { %v2690_v42 = vmax.f32 %v2630_v11, 0.0  ;;  %v2711_v16 = vpack.c.bf16 %v2692_v63, %v2691_v9 }
 0x7f6   :  { %v2710_v54 = vpack.c.bf16 %v2690_v42, %v2689_v7 }
 0x7f8   :  { %9605 = vmatprep.mubr.msk.bf16.mxu1 %vm760_vm3, %v2710_v54 }
 0x7f9   :  { %9606 = vmatmul.mubr.msk.bf16.vlgmr.msra.gmra.mxu1 %vm760_vm3, %v2711_v16 }
 0x7fb   :  { %v9591_v18 = vpop.f32.mrf.mxu0 }
 0x7fc   :  { %v2651_v51 = vadd.f32 %v9591_v18, %v8567_v59 }
 0x7fd   :  { %v2642_v12 = vpop.f32.mrf.mxu0 }
 0x7fe   :  { %v2643_v25 = vadd.f32 %v8567_v59, %v2642_v12  ;;  %v2695_v43 = vmax.f32 %v2651_v51, 0.0 }
 0x7ff   :  { %v9592_v30 = vpop.f32.mrf.mxu0 }
 0x800   :  { %v2654_v40 = vadd.f32 %v9592_v30, %v8567_v59  ;;  %v2693_v23 = vmax.f32 %v2643_v25, 0.0 }
 0x801   :  { %v2645_v29 = vpop.f32.mrf.mxu0 }
 0x802   :  { %v2646_v32 = vadd.f32 %v8567_v59, %v2645_v29  ;;  %v2696_v22 = vmax.f32 %v2654_v40, 0.0 }
 0x804   :  { %v2694_v28 = vmax.f32 %v2646_v32, 0.0  ;;  %v2713_v36 = vpack.c.bf16 %v2696_v22, %v2695_v43  ;;  %v10598_v32 = vld [vmem:[%s14565_s6 + $0xb8] sm:$0xff]   ;;  %v10599_v22 = vld [vmem:[%s14565_s6 + $0xb0] sm:$0xff]  }
 0x805   :  { %9621 = vmatprep.subr.bf16.mxu0 %v10598_v32 }
 0x806   :  { %v2712_v48 = vpack.c.bf16 %v2694_v28, %v2693_v23  ;;  %9622 = vmatpush3.bf16.msra.mxu0 %v10598_v32  ;;  %v8587_v28 = vld [vmem:[%s14568_s9 + $0x2] ss:$0 sm:$0xff] }
 0x807   :  { %9623 = vmatprep.subr.bf16.mxu0 %v10599_v22 }
 0x808   :  { %9609 = vmatprep.mubr.msk.bf16.mxu1 %vm760_vm3, %v2712_v48  ;;  %v10601_v48 = vld [vmem:[%s14565_s6 + $0xa0] sm:$0xff]  }
 0x809   :  { %9610 = vmatmul.mubr.msk.bf16.gmra.mxu1 %vm760_vm3, %v2713_v36 }
 0x80a   :  { %9624 = vmatpush3.bf16.msra.mxu0 %v10599_v22 }
 0x80b   :  { %v9595_v24 = vpop.f32.mrf.mxu0 }
 0x80c   :  { %v2667_v55 = vadd.f32 %v9595_v24, %v8567_v59 }
 0x80d   :  { %v2658_v49 = vpop.f32.mrf.mxu0 }
 0x80e   :  { %v2659_v50 = vadd.f32 %v8567_v59, %v2658_v49  ;;  %v2699_v3 = vmax.f32 %v2667_v55, 0.0 }
 0x80f   :  { %v9596_v52 = vpop.f32.mrf.mxu0 }
 0x810   :  { %v2670_v62 = vadd.f32 %v9596_v52, %v8567_v59  ;;  %v2697_v61 = vmax.f32 %v2659_v50, 0.0 }
 0x811   :  { %v2661_v56 = vpop.f32.mrf.mxu0 }
 0x812   :  { %v2662_v26 = vadd.f32 %v8567_v59, %v2661_v56  ;;  %v2700_v1 = vmax.f32 %v2670_v62, 0.0 }
 0x814   :  { %v2698_v35 = vmax.f32 %v2662_v26, 0.0  ;;  %v2715_v8 = vpack.c.bf16 %v2700_v1, %v2699_v3 }
 0x816   :  { %v2714_v6 = vpack.c.bf16 %v2698_v35, %v2697_v61 }
 0x818   :  { %9613 = vmatprep.mubr.msk.bf16.mxu1 %vm760_vm3, %v2714_v6 }
 0x819   :  { %9614 = vmatmul.mubr.msk.bf16.gmra.mxu1 %vm760_vm3, %v2715_v8 }
 0x81b   :  { %v9599_v11 = vpop.f32.mrf.mxu0 }
 0x81c   :  { %v2683_v54 = vadd.f32 %v9599_v11, %v8567_v59 }
 0x81d   :  { %v2674_v63 = vpop.f32.mrf.mxu0 }
 0x81e   :  { %v2675_v42 = vadd.f32 %v8567_v59, %v2674_v63  ;;  %v2703_v40 = vmax.f32 %v2683_v54, 0.0 }
 0x81f   :  { %v9600_v7 = vpop.f32.mrf.mxu0 }
 0x820   :  { %v2686_v9 = vadd.f32 %v9600_v7, %v8567_v59  ;;  %v2701_v30 = vmax.f32 %v2675_v42, 0.0 }
 0x821   :  { %v2677_v16 = vpop.f32.mrf.mxu0 }
 0x822   :  { %v2678_v18 = vadd.f32 %v8567_v59, %v2677_v16  ;;  %v2704_v12 = vmax.f32 %v2686_v9, 0.0  ;;  %v10600_v59 = vld [vmem:[%s14565_s6 + $0xa8] sm:$0xff]  }
 0x823   :  { %9625 = vmatprep.subr.bf16.mxu0 %v10600_v59 }
 0x824   :  { %v2702_v25 = vmax.f32 %v2678_v18, 0.0  ;;  %v2717_v29 = vpack.c.bf16 %v2704_v12, %v2703_v40  ;;  %9626 = vmatpush3.bf16.msra.mxu0 %v10600_v59 }
 0x825   :  { %9627 = vmatprep.subr.bf16.mxu0 %v10601_v48 }
 0x826   :  { %v2716_v51 = vpack.c.bf16 %v2702_v25, %v2701_v30 }
 0x828   :  { %9617 = vmatprep.mubr.msk.bf16.mxu1 %vm760_vm3, %v2716_v51  ;;  %9628 = vmatpush3.bf16.msra.mxu0 %v10601_v48 }
 0x829   :  { %9618 = vmatmul.mubr.msk.bf16.gmra.mxu1 %vm760_vm3, %v2717_v29 }
 0x8b9   :  { %v9607_v23 = vpop.f32.mrf.mxu1 }
 0x8ba   :  { %v2805_v36 = vadd.f32 %v9607_v23, %v8587_v28 }
 0x8bb   :  { %v2796_v43 = vpop.f32.mrf.mxu1 }
 0x8bc   :  { %v2797_v49 = vadd.f32 %v8587_v28, %v2796_v43  ;;  %v12395_v62 = vadd.f32 %v2805_v36, %v12174_v13 }
 0x8bd   :  { %v9608_v24 = vpop.f32.mrf.mxu1 }
 0x8be   :  { %v2808_v52 = vadd.f32 %v9608_v24, %v8587_v28  ;;  %v12401_v26 = vadd.f32 %v2797_v49, %v12167_v57 }
 0x8bf   :  { %v2799_v50 = vpop.f32.mrf.mxu1 }
 0x8c0   :  { %v12398_v55 = vadd.f32 %v2808_v52, %v12177_v15  ;;  %v2800_v56 = vadd.f32 %v8587_v28, %v2799_v50 }
 0x8c2   :  { %v12404_v1 = vadd.f32 %v2800_v56, %v12182_v58  ;;  %v10520_v61 = vpack.i.bf16 %v12398_v55, %v12395_v62 }
 0x8c4   :  { %10521 = vrot.lane.b32.xlu1 %v10520_v61, %s11290_s25  ;;  %v10515_v35 = vpack.i.bf16 %v12404_v1, %v12401_v26 }
 0x8c6   :  { %10516 = vrot.lane.b32.xlu0 %v10515_v35, %s11290_s25 }
 0x8c9   :  { %v9611_v13 = vpop.f32.mrf.mxu1 }
 0x8ca   :  { %v2821_v3 = vadd.f32 %v9611_v13, %v8587_v28 }
 0x8cb   :  { %v2812_v15 = vpop.f32.mrf.mxu1 }
 0x8cc   :  { %v2813_v8 = vadd.f32 %v8587_v28, %v2812_v15  ;;  %v12413_v58 = vadd.f32 %v2821_v3, %v12213_v37 }
 0x8cd   :  { %v9612_v6 = vpop.f32.mrf.mxu1 }
 0x8ce   :  { %v2824_v57 = vadd.f32 %v9612_v6, %v8587_v28  ;;  %v12419_v42 = vadd.f32 %v2813_v8, %v12208_v21 }
 0x8cf   :  { %v2815_v11 = vpop.f32.mrf.mxu1 }
 0x8d0   :  { %v12416_v63 = vadd.f32 %v2824_v57, %v12216_v17  ;;  %v2816_v7 = vadd.f32 %v8587_v28, %v2815_v11 }
 0x8d2   :  { %v12422_v9 = vadd.f32 %v2816_v7, %v12221_v53  ;;  %v10530_v54 = vpack.i.bf16 %v12416_v63, %v12413_v58 }
 0x8d4   :  { %10531 = vrot.lane.b32.xlu1 %v10530_v54, %s11290_s25  ;;  %v10525_v16 = vpack.i.bf16 %v12422_v9, %v12419_v42 }
 0x8d6   :  { %10526 = vrot.lane.b32.xlu0 %v10525_v16, %s11290_s25 }
 0x8d9   :  { %v9615_v37 = vpop.f32.mrf.mxu1 }
 0x8da   :  { %v2837_v18 = vadd.f32 %v9615_v37, %v8587_v28 }
 0x8db   :  { %v2828_v17 = vpop.f32.mrf.mxu1 }
 0x8dc   :  { %v2829_v30 = vadd.f32 %v8587_v28, %v2828_v17  ;;  %v12431_v53 = vadd.f32 %v2837_v18, %v12249_v19 }
 0x8dd   :  { %v9616_v12 = vpop.f32.mrf.mxu1 }
 0x8de   :  { %v2840_v21 = vadd.f32 %v9616_v12, %v8587_v28  ;;  %v12437_v29 = vadd.f32 %v2829_v30, %v12244_v31 }
 0x8df   :  { %v2831_v25 = vpop.f32.mrf.mxu1 }
 0x8e0   :  { %v12434_v40 = vadd.f32 %v2840_v21, %v12252_v20  ;;  %v2832_v51 = vadd.f32 %v8587_v28, %v2831_v25 }
 0x8e2   :  { %v12440_v32 = vadd.f32 %v2832_v51, %v12257_v41  ;;  %v10540_v22 = vpack.i.bf16 %v12434_v40, %v12431_v53 }
 0x8e4   :  { %10541 = vrot.lane.b32.xlu1 %v10540_v22, %s11290_s25  ;;  %v10535_v59 = vpack.i.bf16 %v12440_v32, %v12437_v29 }
 0x8e6   :  { %10536 = vrot.lane.b32.xlu0 %v10535_v59, %s11290_s25 }
 0x8e9   :  { %v9619_v19 = vpop.f32.mrf.mxu1 }
 0x8ea   :  { %v2853_v23 = vadd.f32 %v9619_v19, %v8587_v28 }
 0x8eb   :  { %v2844_v20 = vpop.f32.mrf.mxu1 }
 0x8ec   :  { %v2845_v48 = vadd.f32 %v8587_v28, %v2844_v20  ;;  %v12449_v41 = vadd.f32 %v2853_v23, %v12285_v60 }
 0x8ed   :  { %v9620_v43 = vpop.f32.mrf.mxu1 }
 0x8ee   :  { %v2856_v31 = vadd.f32 %v9620_v43, %v8587_v28  ;;  %v12455_v52 = vadd.f32 %v2845_v48, %v12280_v14 }
 0x8ef   :  { %v2847_v36 = vpop.f32.mrf.mxu1 }
 0x8f0   :  { %v12452_v24 = vadd.f32 %v2856_v31, %v12288_v44  ;;  %v2848_v49 = vadd.f32 %v8587_v28, %v2847_v36 }
 0x8f2   :  { %v12458_v50 = vadd.f32 %v2848_v49, %v12293_v39  ;;  %v10550_v56 = vpack.i.bf16 %v12452_v24, %v12449_v41 }
 0x8f4   :  { %10551 = vrot.lane.b32.xlu1 %v10550_v56, %s11290_s25  ;;  %v10545_v61 = vpack.i.bf16 %v12458_v50, %v12455_v52 }
 0x8f6   :  { %10546 = vrot.lane.b32.xlu0 %v10545_v61, %s11290_s25 }
 0x936   :  { %v10522_v60 = vpop.permute.xlu1 %10521 }
 0x937   :  { %v10524_v44 = vunpack.i.h.bf16 %v10522_v60  ;;  %v10523_v35 = vunpack.i.l.bf16 %v10522_v60 }
 0x938   :  { %v10517_v28 = vpop.permute.xlu0 %10516 }
 0x939   :  { %v10519_v13 = vunpack.i.h.bf16 %v10517_v28  ;;  %v10518_v14 = vunpack.i.l.bf16 %v10517_v28  ;;  %v2957_v39 = vsel %vm760_vm3, %v12395_v62, %v10524_v44  ;;  %v2956_v15 = vsel %vm760_vm3, 0.0, %v10523_v35 }
 0x93a   :  { %v2980_v57 = vpack.c.bf16 %v2957_v39, %v2956_v15 }
 0x93b   :  { %v2955_v3 = vsel %vm760_vm3, %v12401_v26, %v10519_v13  ;;  %v2954_v6 = vsel %vm760_vm3, 0.0, %v10518_v14 }
 0x93c   :  { %v2979_v8 = vpack.c.bf16 %v2955_v3, %v2954_v6 }
 0x93e   :  { %9629 = vmatprep.mubr.msk.bf16.mxu0 %vm398_vm2, %v2979_v8 }
 0x93f   :  { %9630 = vmatmul.mubr.msk.bf16.vlgmr.msra.gmra.mxu0 %vm398_vm2, %v2980_v57 }
 0x946   :  { %v10532_v11 = vpop.permute.xlu1 %10531 }
 0x947   :  { %v10534_v7 = vunpack.i.h.bf16 %v10532_v11  ;;  %v10533_v54 = vunpack.i.l.bf16 %v10532_v11  ;;  %v10602_v11 = vld [vmem:[%s14567_s8 + $0x38] sm:$0xff]  }
 0x948   :  { %v10527_v16 = vpop.permute.xlu0 %10526  ;;  %9645 = vmatprep.subr.bf16.mxu1 %v10602_v11 }
 0x949   :  { %v10529_v37 = vunpack.i.h.bf16 %v10527_v16  ;;  %v10528_v17 = vunpack.i.l.bf16 %v10527_v16  ;;  %v2961_v18 = vsel %vm760_vm3, %v12413_v58, %v10534_v7  ;;  %v2960_v12 = vsel %vm760_vm3, 0.0, %v10533_v54  ;;  %9646 = vmatpush3.bf16.msra.mxu1 %v10602_v11  ;;  %v10603_v7 = vld [vmem:[%s14567_s8 + $0x30] sm:$0xff]  }
 0x94a   :  { %v2982_v51 = vpack.c.bf16 %v2961_v18, %v2960_v12  ;;  %9647 = vmatprep.subr.bf16.mxu1 %v10603_v7 }
 0x94b   :  { %v2959_v30 = vsel %vm760_vm3, %v12419_v42, %v10529_v37  ;;  %v2958_v21 = vsel %vm760_vm3, 0.0, %v10528_v17  ;;  %v8607_v37 = vld [vmem:[%s14566_s7 + $0x3] ss:$0 sm:$0xff] }
 0x94c   :  { %v2981_v25 = vpack.c.bf16 %v2959_v30, %v2958_v21 }
 0x94d   :  { %9648 = vmatpush3.bf16.msra.mxu1 %v10603_v7 }
 0x94e   :  { %9633 = vmatprep.mubr.msk.bf16.mxu0 %vm398_vm2, %v2981_v25 }
 0x94f   :  { %9634 = vmatmul.mubr.msk.bf16.gmra.mxu0 %vm398_vm2, %v2982_v51 }
 0x956   :  { %v10542_v22 = vpop.permute.xlu1 %10541 }
 0x957   :  { %v10544_v59 = vunpack.i.h.bf16 %v10542_v22  ;;  %v10543_v19 = vunpack.i.l.bf16 %v10542_v22 }
 0x958   :  { %v10537_v20 = vpop.permute.xlu0 %10536 }
 0x959   :  { %v10539_v23 = vunpack.i.h.bf16 %v10537_v20  ;;  %v10538_v43 = vunpack.i.l.bf16 %v10537_v20  ;;  %v2965_v48 = vsel %vm760_vm3, %v12431_v53, %v10544_v59  ;;  %v2964_v31 = vsel %vm760_vm3, 0.0, %v10543_v19 }
 0x95a   :  { %v2984_v61 = vpack.c.bf16 %v2965_v48, %v2964_v31 }
 0x95b   :  { %v2963_v36 = vsel %vm760_vm3, %v12437_v29, %v10539_v23  ;;  %v2962_v49 = vsel %vm760_vm3, 0.0, %v10538_v43 }
 0x95c   :  { %v2983_v56 = vpack.c.bf16 %v2963_v36, %v2962_v49 }
 0x95e   :  { %9637 = vmatprep.mubr.msk.bf16.mxu0 %vm398_vm2, %v2983_v56 }
 0x95f   :  { %9638 = vmatmul.mubr.msk.bf16.gmra.mxu0 %vm398_vm2, %v2984_v61 }
 0x966   :  { %v10552_v60 = vpop.permute.xlu1 %10551 }
 0x967   :  { %v10554_v44 = vunpack.i.h.bf16 %v10552_v60  ;;  %v10553_v35 = vunpack.i.l.bf16 %v10552_v60 }
 0x968   :  { %v10547_v28 = vpop.permute.xlu0 %10546 }
 0x969   :  { %v10549_v13 = vunpack.i.h.bf16 %v10547_v28  ;;  %v10548_v14 = vunpack.i.l.bf16 %v10547_v28  ;;  %v2969_v39 = vsel %vm760_vm3, %v12449_v41, %v10554_v44  ;;  %v2968_v15 = vsel %vm760_vm3, 0.0, %v10553_v35 }
 0x96a   :  { %v2986_v57 = vpack.c.bf16 %v2969_v39, %v2968_v15 }
 0x96b   :  { %v2967_v3 = vsel %vm760_vm3, %v12455_v52, %v10549_v13  ;;  %v2966_v6 = vsel %vm760_vm3, 0.0, %v10548_v14 }
 0x96c   :  { %v2985_v8 = vpack.c.bf16 %v2967_v3, %v2966_v6 }
 0x96e   :  { %9641 = vmatprep.mubr.msk.bf16.mxu0 %vm398_vm2, %v2985_v8 }
 0x96f   :  { %9642 = vmatmul.mubr.msk.bf16.gmra.mxu0 %vm398_vm2, %v2986_v57 }
 0x9ff   :  { %v9631_v54 = vpop.f32.mrf.mxu0 }
 0xa00   :  { %v3086_v30 = vadd.f32 %v9631_v54, %v8607_v37 }
 0xa01   :  { %v3077_v16 = vpop.f32.mrf.mxu0 }
 0xa02   :  { %v3078_v18 = vadd.f32 %v8607_v37, %v3077_v16  ;;  %v3142_v19 = vmax.f32 %v3086_v30, 0.0 }
 0xa03   :  { %v9632_v17 = vpop.f32.mrf.mxu0 }
 0xa04   :  { %v3089_v12 = vadd.f32 %v9632_v17, %v8607_v37  ;;  %v3140_v22 = vmax.f32 %v3078_v18, 0.0 }
 0xa05   :  { %v3080_v21 = vpop.f32.mrf.mxu0 }
 0xa06   :  { %v3081_v25 = vadd.f32 %v8607_v37, %v3080_v21  ;;  %v3143_v51 = vmax.f32 %v3089_v12, 0.0 }
 0xa08   :  { %v3141_v59 = vmax.f32 %v3081_v25, 0.0  ;;  %v3162_v23 = vpack.c.bf16 %v3143_v51, %v3142_v19 }
 0xa0a   :  { %v3161_v20 = vpack.c.bf16 %v3141_v59, %v3140_v22 }
 0xa0c   :  { %9649 = vmatprep.mubr.msk.bf16.mxu1 %vm760_vm3, %v3161_v20 }
 0xa0d   :  { %9650 = vmatmul.mubr.msk.bf16.vlgmr.msra.gmra.mxu1 %vm760_vm3, %v3162_v23 }
 0xa0f   :  { %v9635_v43 = vpop.f32.mrf.mxu0 }
 0xa10   :  { %v3102_v56 = vadd.f32 %v9635_v43, %v8607_v37 }
 0xa11   :  { %v3093_v48 = vpop.f32.mrf.mxu0 }
 0xa12   :  { %v3094_v36 = vadd.f32 %v8607_v37, %v3093_v48  ;;  %v3146_v13 = vmax.f32 %v3102_v56, 0.0 }
 0xa13   :  { %v9636_v31 = vpop.f32.mrf.mxu0 }
 0xa14   :  { %v3105_v49 = vadd.f32 %v9636_v31, %v8607_v37  ;;  %v3144_v35 = vmax.f32 %v3094_v36, 0.0 }
 0xa15   :  { %v3096_v61 = vpop.f32.mrf.mxu0 }
 0xa16   :  { %v3097_v60 = vadd.f32 %v8607_v37, %v3096_v61  ;;  %v3147_v44 = vmax.f32 %v3105_v49, 0.0 }
 0xa18   :  { %v3145_v28 = vmax.f32 %v3097_v60, 0.0  ;;  %v3164_v39 = vpack.c.bf16 %v3147_v44, %v3146_v13  ;;  %v8625_v60 = vld [vmem:[%s14568_s9 + $0x3] ss:$0 sm:$0xff] }
 0xa1a   :  { %v3163_v14 = vpack.c.bf16 %v3145_v28, %v3144_v35 }
 0xa1c   :  { %9653 = vmatprep.mubr.msk.bf16.mxu1 %vm760_vm3, %v3163_v14 }
 0xa1d   :  { %9654 = vmatmul.mubr.msk.bf16.gmra.mxu1 %vm760_vm3, %v3164_v39 }
 0xa1f   :  { %v9639_v15 = vpop.f32.mrf.mxu0 }
 0xa20   :  { %v3118_v11 = vadd.f32 %v9639_v15, %v8607_v37 }
 0xa21   :  { %v3109_v3 = vpop.f32.mrf.mxu0 }
 0xa22   :  { %v3110_v8 = vadd.f32 %v8607_v37, %v3109_v3  ;;  %v3150_v12 = vmax.f32 %v3118_v11, 0.0 }
 0xa23   :  { %v9640_v6 = vpop.f32.mrf.mxu0 }
 0xa24   :  { %v3121_v57 = vadd.f32 %v9640_v6, %v8607_v37  ;;  %v3148_v17 = vmax.f32 %v3110_v8, 0.0 }
 0xa25   :  { %v3112_v7 = vpop.f32.mrf.mxu0 }
 0xa26   :  { %v3113_v54 = vadd.f32 %v8607_v37, %v3112_v7  ;;  %v3151_v16 = vmax.f32 %v3121_v57, 0.0 }
 0xa28   :  { %v3149_v18 = vmax.f32 %v3113_v54, 0.0  ;;  %v3166_v21 = vpack.c.bf16 %v3151_v16, %v3150_v12 }
 0xa2a   :  { %v3165_v30 = vpack.c.bf16 %v3149_v18, %v3148_v17 }
 0xa2c   :  { %9657 = vmatprep.mubr.msk.bf16.mxu1 %vm760_vm3, %v3165_v30 }
 0xa2d   :  { %9658 = vmatmul.mubr.msk.bf16.gmra.mxu1 %vm760_vm3, %v3166_v21 }
 0xa2f   :  { %v9643_v25 = vpop.f32.mrf.mxu0 }
 0xa30   :  { %v3134_v20 = vadd.f32 %v9643_v25, %v8607_v37 }
 0xa31   :  { %v3125_v51 = vpop.f32.mrf.mxu0 }
 0xa32   :  { %v3126_v59 = vadd.f32 %v8607_v37, %v3125_v51  ;;  %v3154_v49 = vmax.f32 %v3134_v20, 0.0 }
 0xa33   :  { %v9644_v22 = vpop.f32.mrf.mxu0 }
 0xa34   :  { %v3137_v19 = vadd.f32 %v9644_v22, %v8607_v37  ;;  %v3152_v31 = vmax.f32 %v3126_v59, 0.0 }
 0xa35   :  { %v3128_v23 = vpop.f32.mrf.mxu0 }
 0xa36   :  { %v3129_v43 = vadd.f32 %v8607_v37, %v3128_v23  ;;  %v3155_v48 = vmax.f32 %v3137_v19, 0.0 }
 0xa38   :  { %v3153_v36 = vmax.f32 %v3129_v43, 0.0  ;;  %v3168_v61 = vpack.c.bf16 %v3155_v48, %v3154_v49 }
 0xa3a   :  { %v3167_v56 = vpack.c.bf16 %v3153_v36, %v3152_v31 }
 0xa3c   :  { %9661 = vmatprep.mubr.msk.bf16.mxu1 %vm760_vm3, %v3167_v56 }
 0xa3d   :  { %9662 = vmatmul.mubr.msk.bf16.gmra.mxu1 %vm760_vm3, %v3168_v61 }
 0xacd   :  { %v9651_v44 = vpop.f32.mrf.mxu1 }
 0xace   :  { %v3256_v35 = vadd.f32 %v9651_v44, %v8625_v60 }
 0xacf   :  { %v3247_v28 = vpop.f32.mrf.mxu1 }
 0xad0   :  { %v3312_v13 = vadd.f32 %v3256_v35, %v12395_v62   ;;  %v3248_v37 = vadd.f32 %v8625_v60, %v3247_v28 }
 0xad1   :  { %v9652_v14 = vpop.f32.mrf.mxu1 }
 0xad2   :  { %v3310_v39 = vadd.f32 %v3248_v37, %v12401_v26   ;;  %v3259_v15 = vadd.f32 %v9652_v14, %v8625_v60 }
 0xad3   :  { %v3250_v3 = vpop.f32.mrf.mxu1 }
 0xad4   :  { %v3313_v6 = vadd.f32 %v3259_v15, %v12398_v55   ;;  %v3251_v8 = vadd.f32 %v8625_v60, %v3250_v3 }
 0xad6   :  { %v3311_v57 = vadd.f32 %v3251_v8, %v12404_v1  }
 0xadd   :  { %v9655_v11 = vpop.f32.mrf.mxu1 }
 0xade   :  { %v3272_v7 = vadd.f32 %v9655_v11, %v8625_v60 }
 0xadf   :  { %v3263_v54 = vpop.f32.mrf.mxu1 }
 0xae0   :  { %v3316_v16 = vadd.f32 %v3272_v7, %v12413_v58   ;;  %v3264_v17 = vadd.f32 %v8625_v60, %v3263_v54 }
 0xae1   :  { %v9656_v18 = vpop.f32.mrf.mxu1 }
 0xae2   :  { %v3314_v62 = vadd.f32 %v3264_v17, %v12419_v42   ;;  %v3275_v12 = vadd.f32 %v9656_v18, %v8625_v60 }
 0xae3   :  { %v3266_v30 = vpop.f32.mrf.mxu1 }
 0xae4   :  { %v3317_v26 = vadd.f32 %v3275_v12, %v12416_v63   ;;  %v3267_v21 = vadd.f32 %v8625_v60, %v3266_v30 }
 0xae6   :  { %v3315_v25 = vadd.f32 %v3267_v21, %v12422_v9  }
 0xaed   :  { %v9659_v55 = vpop.f32.mrf.mxu1 }
 0xaee   :  { %v3288_v51 = vadd.f32 %v9659_v55, %v8625_v60 }
 0xaef   :  { %v3279_v22 = vpop.f32.mrf.mxu1 }
 0xaf0   :  { %v3320_v1 = vadd.f32 %v3288_v51, %v12431_v53   ;;  %v3280_v59 = vadd.f32 %v8625_v60, %v3279_v22 }
 0xaf1   :  { %v9660_v19 = vpop.f32.mrf.mxu1 }
 0xaf2   :  { %v3318_v58 = vadd.f32 %v3280_v59, %v12437_v29   ;;  %v3291_v20 = vadd.f32 %v9660_v19, %v8625_v60 }
 0xaf3   :  { %v3282_v23 = vpop.f32.mrf.mxu1 }
 0xaf4   :  { %v3321_v42 = vadd.f32 %v3291_v20, %v12434_v40   ;;  %v3283_v43 = vadd.f32 %v8625_v60, %v3282_v23 }
 0xaf6   :  { %v3319_v48 = vadd.f32 %v3283_v43, %v12440_v32  }
 0xafd   :  { %v9663_v63 = vpop.f32.mrf.mxu1 }
 0xafe   :  { %v3304_v31 = vadd.f32 %v9663_v63, %v8625_v60 }
 0xaff   :  { %v3295_v36 = vpop.f32.mrf.mxu1 }
 0xb00   :  { %v3324_v9 = vadd.f32 %v3304_v31, %v12449_v41   ;;  %v3296_v49 = vadd.f32 %v8625_v60, %v3295_v36 }
 0xb01   :  { %v9664_v56 = vpop.f32.mrf.mxu1 }
 0xb02   :  { %v3322_v53 = vadd.f32 %v3296_v49, %v12455_v52   ;;  %v3307_v61 = vadd.f32 %v9664_v56, %v8625_v60 }
 0xb03   :  { %v3298_v44 = vpop.f32.mrf.mxu1 }
 0xb04   :  { %v3325_v29 = vadd.f32 %v3307_v61, %v12452_v24   ;;  %v3299_v35 = vadd.f32 %v8625_v60, %v3298_v44 }
 0xb06   :  { %v3323_v28 = vadd.f32 %v3299_v35, %v12458_v50  }
 0xb07 LB: > { %s8994_s3 = smul.u32 48, %s11218_s2  ;;  %v3355_v40 = vpack.c.bf16 %v11210_v57, %v11214_v39  ;;  %v3356_v24 = vpack.c.bf16 %v11202_v6, %v11206_v13  ;;  %v3357_v52 = vpack.c.bf16 %v11194_v25, %v11198_v62  ;;  %v3358_v50 = vpack.c.bf16 %v11186_v26, %v11190_v16  ;;  %s8995_s30 = sshll.u32 %s11218_s2, 4  ;;  %s11218_s2 = sphi %s12566_s2, %s3331_s2   ;;  %v11214_v39 = vphi %v3310_v39, %v14629_v39   ;;  %v11210_v57 = vphi %v3311_v57, %v14628_v57   ;;  %v11206_v13 = vphi %v3312_v13, %v14627_v13   ;;  %v11202_v6 = vphi %v3313_v6, %v14626_v6   ;;  %v11198_v62 = vphi %v3314_v62, %v14625_v62   ;;  %v11194_v25 = vphi %v3315_v25, %v14624_v25   ;;  %v11190_v16 = vphi %v3316_v16, %v14623_v16   ;;  %v11186_v26 = vphi %v3317_v26, %v14622_v26   ;;  %v11182_v58 = vphi %v3318_v58, %v14621_v58   ;;  %v11178_v48 = vphi %v3319_v48, %v14620_v48   ;;  %v11174_v1 = vphi %v3320_v1, %v14619_v1   ;;  %v11170_v42 = vphi %v3321_v42, %v14618_v42   ;;  %v11166_v53 = vphi %v3322_v53, %v14617_v53   ;;  %v11162_v28 = vphi %v3323_v28, %v14616_v28   ;;  %v11158_v9 = vphi %v3324_v9, %v14615_v9   ;;  %v11154_v29 = vphi %v3325_v29, %v14614_v29  }
 0xb08   : > { %v3359_v60 = vpack.c.bf16 %v11178_v48, %v11182_v58  ;;  %v3360_v37 = vpack.c.bf16 %v11170_v42, %v11174_v1  ;;  %v3361_v14 = vpack.c.bf16 %v11162_v28, %v11166_v53  ;;  %v3362_v15 = vpack.c.bf16 %v11154_v29, %v11158_v9  ;;  %s3522_s18 = scalar_lea.vmem %s14567_s8, %s8995_s30  ;;  %s3363_s1 = scalar_lea.vmem %s14566_s7, %s11218_s2 }
 0xb09   : > { %s3350_s28 = scalar_lea.vmem %s14565_s6, %s8994_s3  ;;  %9669 = vmatprep.mubr.msk.bf16.mxu0 %vm760_vm3, %v3355_v40  ;;  %v10606_v3 = vld [vmem:[%s3522_s18 + $0x8] sm:$0xff]   ;;  %v10607_v8 = vld [vmem:[%s3522_s18] sm:$0xff]   ;;  %s3535_s29 = scalar_lea.vmem %s14568_s9, %s11218_s2 }
 0xb0a   : > { %v10604_v32 = vld [vmem:[%s3350_s28 + $0x28] sm:$0xff]   ;;  %v10605_v41 = vld [vmem:[%s3350_s28 + $0x20] sm:$0xff]   ;;  %9685 = vmatprep.subr.bf16.mxu1 %v10606_v3  ;;  %s3331_s2 = sadd.s32 1, %s11218_s2  }
 0xb0b   : > { %9665 = vmatprep.subr.bf16.mxu0 %v10604_v32  ;;  %9686 = vmatpush3.bf16.msra.mxu1 %v10606_v3  ;;  %v8637_v54 = vld [vmem:[%s3363_s1] ss:$0 sm:$0xff]  ;;  %p12692_p0 = scmp.ge.s32.totalorder %s3331_s2, 14  }
 0xb0c   : > { %9666 = vmatpush3.bf16.msra.mxu0 %v10604_v32  ;;  %9687 = vmatprep.subr.bf16.mxu1 %v10607_v8  ;;  %s13718_s22 = smov (%p12692_p0), 4  }
 0xb0d   : > { %9667 = vmatprep.subr.bf16.mxu0 %v10605_v41 }
 0xb0f   : > { %9688 = vmatpush3.bf16.msra.mxu1 %v10607_v8 }
 0xb10   : > { %9668 = vmatpush3.bf16.msra.mxu0 %v10605_v41 }
 0xb13   : > { %9670 = vmatmul.mubr.msk.bf16.vlgmr.msra.gmra.mxu0 %vm760_vm3, %v3356_v24 }
 0xb14   : > { %9673 = vmatprep.mubr.msk.bf16.mxu0 %vm760_vm3, %v3357_v52 }
 0xb1b   : > { %9674 = vmatmul.mubr.msk.bf16.gmra.mxu0 %vm760_vm3, %v3358_v50 }
 0xb1c   : > { %9677 = vmatprep.mubr.msk.bf16.mxu0 %vm760_vm3, %v3359_v60 }
 0xb23   : > { %9678 = vmatmul.mubr.msk.bf16.gmra.mxu0 %vm760_vm3, %v3360_v37 }
 0xb24   : > { %9681 = vmatprep.mubr.msk.bf16.mxu0 %vm760_vm3, %v3361_v14 }
 0xb2b   : > { %9682 = vmatmul.mubr.msk.bf16.gmra.mxu0 %vm760_vm3, %v3362_v15 }
 0xbd3   : > { %v9671_v11 = vpop.f32.mrf.mxu0 }
 0xbd4   : > { %v3450_v30 = vadd.f32 %v9671_v11, %v8637_v54 }
 0xbd5   : > { %v3441_v7 = vpop.f32.mrf.mxu0 }
 0xbd6   : > { %v3442_v18 = vadd.f32 %v8637_v54, %v3441_v7  ;;  %v3506_v20 = vmax.f32 %v3450_v30, 0.0 }
 0xbd7   : > { %v9672_v17 = vpop.f32.mrf.mxu0 }
 0xbd8   : > { %v3453_v12 = vadd.f32 %v9672_v17, %v8637_v54  ;;  %v3504_v59 = vmax.f32 %v3442_v18, 0.0 }
 0xbd9   : > { %v3444_v21 = vpop.f32.mrf.mxu0 }
 0xbda   : > { %v3445_v55 = vadd.f32 %v8637_v54, %v3444_v21  ;;  %v3507_v51 = vmax.f32 %v3453_v12, 0.0 }
 0xbdb   : > { %v9675_v22 = vpop.f32.mrf.mxu0 }
 0xbdc   : > { %v3505_v19 = vmax.f32 %v3445_v55, 0.0  ;;  %v3528_v63 = vpack.c.bf16 %v3507_v51, %v3506_v20  ;;  %v3466_v56 = vadd.f32 %v9675_v22, %v8637_v54 }
 0xbdd   : > { %v3457_v23 = vpop.f32.mrf.mxu0 }
 0xbde   : > { %v3527_v43 = vpack.c.bf16 %v3505_v19, %v3504_v59  ;;  %v3458_v36 = vadd.f32 %v8637_v54, %v3457_v23  ;;  %v3510_v24 = vmax.f32 %v3466_v56, 0.0 }
 0xbdf   : > { %v9676_v31 = vpop.f32.mrf.mxu0 }
 0xbe0   : > { %v3469_v49 = vadd.f32 %v9676_v31, %v8637_v54  ;;  %9689 = vmatprep.mubr.msk.bf16.mxu1 %vm760_vm3, %v3527_v43  ;;  %v3508_v32 = vmax.f32 %v3458_v36, 0.0 }
 0xbe1   : > { %v3460_v61 = vpop.f32.mrf.mxu0  ;;  %9690 = vmatmul.mubr.msk.bf16.vlgmr.msra.gmra.mxu1 %vm760_vm3, %v3528_v63 }
 0xbe2   : > { %v3461_v44 = vadd.f32 %v8637_v54, %v3460_v61  ;;  %v3511_v35 = vmax.f32 %v3469_v49, 0.0 }
 0xbe3   : > { %v9679_v40 = vpop.f32.mrf.mxu0 }
 0xbe4   : > { %v3509_v41 = vmax.f32 %v3461_v44, 0.0  ;;  %v3530_v60 = vpack.c.bf16 %v3511_v35, %v3510_v24  ;;  %v3482_v3 = vadd.f32 %v9679_v40, %v8637_v54  ;;  %v8650_v44 = vld [vmem:[%s3535_s29] ss:$0 sm:$0xff] }
 0xbe5   : > { %v3473_v52 = vpop.f32.mrf.mxu0 }
 0xbe6   : > { %v3529_v50 = vpack.c.bf16 %v3509_v41, %v3508_v32  ;;  %v3474_v14 = vadd.f32 %v8637_v54, %v3473_v52  ;;  %v3514_v30 = vmax.f32 %v3482_v3, 0.0 }
 0xbe7   : > { %v9680_v37 = vpop.f32.mrf.mxu0 }
 0xbe8   : > { %v3485_v15 = vadd.f32 %v9680_v37, %v8637_v54  ;;  %9693 = vmatprep.mubr.msk.bf16.mxu1 %vm760_vm3, %v3529_v50  ;;  %v3512_v18 = vmax.f32 %v3474_v14, 0.0 }
 0xbe9   : > { %v3476_v8 = vpop.f32.mrf.mxu0  ;;  %9694 = vmatmul.mubr.msk.bf16.gmra.mxu1 %vm760_vm3, %v3530_v60 }
 0xbea   : > { %v3477_v11 = vadd.f32 %v8637_v54, %v3476_v8  ;;  %v3515_v7 = vmax.f32 %v3485_v15, 0.0 }
 0xbeb   : > { %v9683_v17 = vpop.f32.mrf.mxu0 }
 0xbec   : > { %v3513_v12 = vmax.f32 %v3477_v11, 0.0  ;;  %v3532_v51 = vpack.c.bf16 %v3515_v7, %v3514_v30  ;;  %v3498_v20 = vadd.f32 %v9683_v17, %v8637_v54 }
 0xbed   : > { %v3489_v21 = vpop.f32.mrf.mxu0 }
 0xbee   : > { %v3531_v55 = vpack.c.bf16 %v3513_v12, %v3512_v18  ;;  %v3490_v59 = vadd.f32 %v8637_v54, %v3489_v21  ;;  %v3518_v49 = vmax.f32 %v3498_v20, 0.0 }
 0xbef   : > { %v9684_v22 = vpop.f32.mrf.mxu0 }
 0xbf0   : > { %v3501_v19 = vadd.f32 %v9684_v22, %v8637_v54  ;;  %9697 = vmatprep.mubr.msk.bf16.mxu1 %vm760_vm3, %v3531_v55  ;;  %v3516_v31 = vmax.f32 %v3490_v59, 0.0 }
 0xbf1   : > { %v3492_v23 = vpop.f32.mrf.mxu0  ;;  %9698 = vmatmul.mubr.msk.bf16.gmra.mxu1 %vm760_vm3, %v3532_v51 }
 0xbf2   : > { %v3493_v43 = vadd.f32 %v8637_v54, %v3492_v23  ;;  %v3519_v63 = vmax.f32 %v3501_v19, 0.0 }
 0xbf4   : > { %v3517_v36 = vmax.f32 %v3493_v43, 0.0  ;;  %v3534_v61 = vpack.c.bf16 %v3519_v63, %v3518_v49 }
 0xbf6   : > { %v3533_v56 = vpack.c.bf16 %v3517_v36, %v3516_v31 }
 0xbf8   : > { %9701 = vmatprep.mubr.msk.bf16.mxu1 %vm760_vm3, %v3533_v56 }
 0xbf9   : > { %9702 = vmatmul.mubr.msk.bf16.gmra.mxu1 %vm760_vm3, %v3534_v61 }
 0xca1   : > { %v9691_v35 = vpop.f32.mrf.mxu1 }
 0xca2   : > { %v3622_v40 = vadd.f32 %v9691_v35, %v8650_v44 }
 0xca3   : > { %v3613_v32 = vpop.f32.mrf.mxu1 }
 0xca4   : > { %v12668_v13 = vadd.f32 %v11206_v13, %v3622_v40   ;;  %v3614_v41 = vadd.f32 %v8650_v44, %v3613_v32 }
 0xca5   : > { %v9692_v24 = vpop.f32.mrf.mxu1 }
 0xca6   : > { %v14609_v54 = vmov %v12668_v13  ;;  %v12671_v39 = vadd.f32 %v11214_v39, %v3614_v41   ;;  %v3625_v50 = vadd.f32 %v9692_v24, %v8650_v44  ;;  %v10889_v24 = vld [vmem:[%s14569_s10] sm:$0xff] (%p12692_p0)  }
 0xca7   : > { %v3616_v60 = vpop.f32.mrf.mxu1 }
 0xca8   : > { %v14610_v52 = vmov %v12671_v39  ;;  %v12674_v6 = vadd.f32 %v11202_v6, %v3625_v50   ;;  %v3617_v14 = vadd.f32 %v8650_v44, %v3616_v60 }
 0xca9   : > { %v9695_v15 = vpop.f32.mrf.mxu1 }
 0xcaa   : > { %v14611_v37 = vmov %v12674_v6  ;;  %v3677_v3 = vadd.f32 %v11210_v57, %v3617_v14   ;;  %v3638_v8 = vadd.f32 %v9695_v15, %v8650_v44  ;;  %v8661_v15 = vld [vmem:[%s14570_s11] ss:$0 sm:$0xff] (%p12692_p0) }
 0xcab   : > { %v3629_v11 = vpop.f32.mrf.mxu1  ;;  %v3697_v50 = vpack.c.bf16 (%p12692_p0), %v14611_v37, %v14609_v54 }
 0xcac   : > { %v12678_v16 = vadd.f32 %v11190_v16, %v3638_v8   ;;  %v3630_v13 = vadd.f32 %v8650_v44, %v3629_v11  ;;  %v3696_v41 = vpack.c.bf16 (%p12692_p0), %v3677_v3, %v14610_v52 }
 0xcad   : > { %v9696_v17 = vpop.f32.mrf.mxu1 }
 0xcae   : > { %v14612_v7 = vmov %v12678_v16  ;;  %v3680_v18 = vadd.f32 %v11198_v62, %v3630_v13   ;;  %v3641_v12 = vadd.f32 %v9696_v17, %v8650_v44  ;;  %v14627_v13 = vmov %v14609_v54  ;;  %9709 = vmatprep.mubr.msk.bf16.mxu0 (%p12692_p0), %vm760_vm3, %v3696_v41  ;;  %v10891_v54 = vld [vmem:[%s14563_s4 + $0x10] sm:$0xff] (%p12692_p0)   ;;  %v10892_v41 = vld [vmem:[%s14565_s6 + $0x2c8] sm:$0xff] (%p12692_p0)  }
 0xcaf   : > { %v3632_v39 = vpop.f32.mrf.mxu1 }
 0xcb0   : > { %v3683_v30 = vadd.f32 %v11186_v26, %v3641_v12   ;;  %v3633_v21 = vadd.f32 %v8650_v44, %v3632_v39  ;;  %v14629_v39 = vmov %v14610_v52 }
 0xcb1   : > { %v9699_v55 = vpop.f32.mrf.mxu1 }
 0xcb2   : > { %v3681_v51 = vadd.f32 %v11194_v25, %v3633_v21   ;;  %v3654_v6 = vadd.f32 %v9699_v55, %v8650_v44 }
 0xcb3   : > { %v3645_v22 = vpop.f32.mrf.mxu1 }
 0xcb4   : > { %v3686_v59 = vadd.f32 %v11174_v1, %v3654_v6   ;;  %v3646_v57 = vadd.f32 %v8650_v44, %v3645_v22  ;;  %v14626_v6 = vmov %v14611_v37  ;;  %v3698_v60 = vpack.c.bf16 (%p12692_p0), %v3681_v51, %v3680_v18 }
 0xcb5   : > { %v9700_v19 = vpop.f32.mrf.mxu1 }
 0xcb6   : > { %v3684_v20 = vadd.f32 %v11182_v58, %v3646_v57   ;;  %v3657_v16 = vadd.f32 %v9700_v19, %v8650_v44  ;;  %v14628_v57 = vmov %v3677_v3 }
 0xcb7   : > { %v3648_v23 = vpop.f32.mrf.mxu1 }
 0xcb8   : > { %v3687_v43 = vadd.f32 %v11170_v42, %v3657_v16   ;;  %v3649_v62 = vadd.f32 %v8650_v44, %v3648_v23  ;;  %v14623_v16 = vmov %v14612_v7 }
 0xcb9   : > { %v9703_v63 = vpop.f32.mrf.mxu1 }
 0xcba   : > { %v3685_v31 = vadd.f32 %v11178_v48, %v3649_v62   ;;  %v3670_v26 = vadd.f32 %v9703_v63, %v8650_v44  ;;  %v14618_v42 = vmov %v3687_v43  ;;  %v14625_v62 = vmov %v3680_v18 }
 0xcbb   : > { %v3661_v36 = vpop.f32.mrf.mxu1  ;;  %v3699_v42 = vpack.c.bf16 (%p12692_p0), %v3683_v30, %v14612_v7 }
 0xcbc   : > { %v3690_v49 = vadd.f32 %v11158_v9, %v3670_v26   ;;  %v3662_v25 = vadd.f32 %v8650_v44, %v3661_v36  ;;  %v14620_v48 = vmov %v3685_v31  ;;  %v14622_v26 = vmov %v3683_v30 }
 0xcbd   : > { %v9704_v56 = vpop.f32.mrf.mxu1  ;;  %v3700_v48 = vpack.c.bf16 (%p12692_p0), %v3685_v31, %v3684_v20 }
 0xcbe   : > { %v3688_v61 = vadd.f32 %v11166_v53, %v3662_v25   ;;  %v3673_v1 = vadd.f32 %v9704_v56, %v8650_v44  ;;  %v14615_v9 = vmov %v3690_v49  ;;  %v14624_v25 = vmov %v3681_v51 }
 0xcbf   : > { %v3664_v35 = vpop.f32.mrf.mxu1  ;;  %v3701_v9 = vpack.c.bf16 (%p12692_p0), %v3687_v43, %v3686_v59 }
 0xcc0   : > { %v3691_v40 = vadd.f32 %v11154_v29, %v3673_v1   ;;  %v3665_v58 = vadd.f32 %v8650_v44, %v3664_v35  ;;  %v14617_v53 = vmov %v3688_v61  ;;  %v14619_v1 = vmov %v3686_v59  ;;  %3330 = sbr.rel (!%p12692_p0) target bundleno = 2823 (0xb07), region = 138  ;;  %v10888_v44 = vld [vmem:[%s14569_s10 + $0x8] sm:$0xff] (%p12692_p0)  }
 0xcc1   :  { %9705 = vmatprep.subr.bf16.mxu0 (%p12692_p0), %v10888_v44 }
 0xcc2   : > { %v3689_v32 = vadd.f32 %v11162_v28, %v3665_v58   ;;  %v14614_v29 = vmov %v3691_v40  ;;  %v14621_v58 = vmov %v3684_v20  ;;  %9706 = vmatpush3.bf16.msra.mxu0 (%p12692_p0), %v10888_v44 }
 0xcc3   :  { %9707 = vmatprep.subr.bf16.mxu0 (%p12692_p0), %v10889_v24  ;;  %v3703_v29 = vpack.c.bf16 (%p12692_p0), %v3691_v40, %v3690_v49 }
 0xcc4   : > { %v14616_v28 = vmov %v3689_v32  ;;  %v3702_v53 = vpack.c.bf16 (%p12692_p0), %v3689_v32, %v3688_v61 }
 0xcc5   :  { %v10890_v28 = vld [vmem:[%s14563_s4 + $0x18] sm:$0xff]  }
 0xcc6   :  { %9708 = vmatpush3.bf16.msra.mxu0 %v10889_v24  ;;  %9725 = vmatprep.subr.bf16.mxu1 %v10890_v28  ;;  %v10893_v24 = vld [vmem:[%s14565_s6 + $0x2c0] sm:$0xff]  }
 0xcc7   :  { %9726 = vmatpush3.bf16.msra.mxu1 %v10890_v28  ;;  %9745 = vmatprep.subr.bf16.mxu0 %v10892_v41 }
 0xcc8   :  { %9727 = vmatprep.subr.bf16.mxu1 %v10891_v54 }
 0xcc9   :  { %9710 = vmatmul.mubr.msk.bf16.vlgmr.msra.gmra.mxu0 %vm760_vm3, %v3697_v50  ;;  %v10894_v50 = vld [vmem:[%s14565_s6 + $0x2b8] sm:$0xff]  }
 0xcca   :  { %9713 = vmatprep.mubr.msk.bf16.mxu0 %vm760_vm3, %v3698_v60  ;;  %9746 = vmatpush3.bf16.msra.mxu0 %v10892_v41  ;;  %v10895_v60 = vld [vmem:[%s14565_s6 + $0x2b0] sm:$0xff]  }
 0xccb   :  { %9728 = vmatpush3.bf16.msra.mxu1 %v10891_v54  ;;  %9747 = vmatprep.subr.bf16.mxu0 %v10893_v24 }
 0xcce   :  { %9748 = vmatpush3.bf16.msra.mxu0 %v10893_v24 }
 0xccf   :  { %9749 = vmatprep.subr.bf16.mxu0 %v10894_v50 }
 0xcd1   :  { %9714 = vmatmul.mubr.msk.bf16.gmra.mxu0 %vm760_vm3, %v3699_v42  ;;  %v10896_v42 = vld [vmem:[%s14565_s6 + $0x2a8] sm:$0xff]  }
 0xcd2   :  { %9717 = vmatprep.mubr.msk.bf16.mxu0 %vm760_vm3, %v3700_v48  ;;  %9750 = vmatpush3.bf16.msra.mxu0 %v10894_v50 }
 0xcd3   :  { %9751 = vmatprep.subr.bf16.mxu0 %v10895_v60 }
 0xcd6   :  { %9752 = vmatpush3.bf16.msra.mxu0 %v10895_v60 }
 0xcd7   :  { %9753 = vmatprep.subr.bf16.mxu0 %v10896_v42 }
 0xcd9   :  { %9718 = vmatmul.mubr.msk.bf16.gmra.mxu0 %vm760_vm3, %v3701_v9  ;;  %v12789_v9 = vld [vmem:[%s14564_s5 + $0x1] ss:$0 sm:$0xff] }
 0xcda   :  { %9721 = vmatprep.mubr.msk.bf16.mxu0 %vm760_vm3, %v3702_v53  ;;  %9754 = vmatpush3.bf16.msra.mxu0 %v10896_v42 }
 0xce1   :  { %9722 = vmatmul.mubr.msk.bf16.gmra.mxu0 %vm760_vm3, %v3703_v29 }
 0xd89   :  { %v9711_v52 = vpop.f32.mrf.mxu0 }
 0xd8a   :  { %v3790_v13 = vadd.f32 %v9711_v52, %v8661_v15 }
 0xd8b   :  { %v3781_v37 = vpop.f32.mrf.mxu0 }
 0xd8c   :  { %v3782_v11 = vadd.f32 %v8661_v15, %v3781_v37 }
 0xd8d   :  { %v9712_v14 = vpop.f32.mrf.mxu0 }
 0xd8e   :  { %v3793_v3 = vadd.f32 %v9712_v14, %v8661_v15 }
 0xd8f   :  { %v3784_v8 = vpop.f32.mrf.mxu0 }
 0xd90   :  { %v3785_v7 = vadd.f32 %v8661_v15, %v3784_v8  ;;  %v3850_v12 = vpack.c.bf16 %v3793_v3, %v3790_v13  ;;  %v10897_v3 = vld [vmem:[%s14565_s6 + $0x2a0] sm:$0xff]  }
 0xd91   :  { %v9715_v17 = vpop.f32.mrf.mxu0  ;;  %9755 = vmatprep.subr.bf16.mxu0 %v10897_v3 }
 0xd92   :  { %v3849_v18 = vpack.c.bf16 %v3785_v7, %v3782_v11  ;;  %v3806_v22 = vadd.f32 %v9715_v17, %v8661_v15  ;;  %9756 = vmatpush3.bf16.msra.mxu0 %v10897_v3 }
 0xd93   :  { %v3797_v39 = vpop.f32.mrf.mxu0 }
 0xd94   :  { %9729 = vmatprep.mubr.msk.bf16.mxu1 %vm760_vm3, %v3849_v18  ;;  %v3798_v51 = vadd.f32 %v8661_v15, %v3797_v39 }
 0xd95   :  { %v9716_v30 = vpop.f32.mrf.mxu0  ;;  %9730 = vmatmul.mubr.msk.bf16.vlgmr.msra.gmra.mxu1 %vm760_vm3, %v3850_v12 }
 0xd96   :  { %v3809_v21 = vadd.f32 %v9716_v30, %v8661_v15 }
 0xd97   :  { %v3800_v55 = vpop.f32.mrf.mxu0 }
 0xd98   :  { %v3801_v6 = vadd.f32 %v8661_v15, %v3800_v55  ;;  %v3852_v19 = vpack.c.bf16 %v3809_v21, %v3806_v22 }
 0xd99   :  { %v9719_v59 = vpop.f32.mrf.mxu0 }
 0xd9a   :  { %v3851_v57 = vpack.c.bf16 %v3801_v6, %v3798_v51  ;;  %v3822_v31 = vadd.f32 %v9719_v59, %v8661_v15 }
 0xd9b   :  { %v3813_v20 = vpop.f32.mrf.mxu0 }
 0xd9c   :  { %9733 = vmatprep.mubr.msk.bf16.mxu1 %vm760_vm3, %v3851_v57  ;;  %v3814_v62 = vadd.f32 %v8661_v15, %v3813_v20 }
 0xd9d   :  { %v9720_v16 = vpop.f32.mrf.mxu0  ;;  %9734 = vmatmul.mubr.msk.bf16.gmra.mxu1 %vm760_vm3, %v3852_v19 }
 0xd9e   :  { %v3825_v23 = vadd.f32 %v9720_v16, %v8661_v15 }
 0xd9f   :  { %v3816_v43 = vpop.f32.mrf.mxu0 }
 0xda0   :  { %v3817_v63 = vadd.f32 %v8661_v15, %v3816_v43  ;;  %v3854_v49 = vpack.c.bf16 %v3825_v23, %v3822_v31 }
 0xda1   :  { %v9723_v26 = vpop.f32.mrf.mxu0 }
 0xda2   :  { %v3853_v36 = vpack.c.bf16 %v3817_v63, %v3814_v62  ;;  %v3838_v58 = vadd.f32 %v9723_v26, %v8661_v15 }
 0xda3   :  { %v3829_v25 = vpop.f32.mrf.mxu0 }
 0xda4   :  { %9737 = vmatprep.mubr.msk.bf16.mxu1 %vm760_vm3, %v3853_v36  ;;  %v3830_v35 = vadd.f32 %v8661_v15, %v3829_v25 }
 0xda5   :  { %v9724_v56 = vpop.f32.mrf.mxu0  ;;  %9738 = vmatmul.mubr.msk.bf16.gmra.mxu1 %vm760_vm3, %v3854_v49 }
 0xda6   :  { %v3841_v61 = vadd.f32 %v9724_v56, %v8661_v15 }
 0xda7   :  { %v3832_v1 = vpop.f32.mrf.mxu0 }
 0xda8   :  { %v3833_v40 = vadd.f32 %v8661_v15, %v3832_v1  ;;  %v3856_v44 = vpack.c.bf16 %v3841_v61, %v3838_v58 }
 0xdaa   :  { %v3855_v32 = vpack.c.bf16 %v3833_v40, %v3830_v35 }
 0xdac   :  { %9741 = vmatprep.mubr.msk.bf16.mxu1 %vm760_vm3, %v3855_v32 }
 0xdad   :  { %9742 = vmatmul.mubr.msk.bf16.gmra.mxu1 %vm760_vm3, %v3856_v44 }
 0xe55   :  { %v9731_v48 = vpop.f32.mrf.mxu1 }
 0xe56   :  { %v12795_v54 = vadd.f32 %v9731_v48, %v12789_v9 }
 0xe57   :  { %v3935_v53 = vpop.f32.mrf.mxu1 }
 0xe58   :  { %v12792_v29 = vadd.f32 %v12789_v9, %v3935_v53  ;;  %v4081_v17 = vrot.slane %v12795_v54, 7 }
 0xe59   :  { %v9732_v28 = vpop.f32.mrf.mxu1 }
 0xe5a   :  { %v4078_v52 = vrot.slane %v12792_v29, 7  ;;  %v12799_v37 = vadd.f32 %v9732_v28, %v12789_v9 }
 0xe5b   :  { %v3938_v14 = vpop.f32.mrf.mxu1 }
 0xe5c   :  { %v12802_v15 = vadd.f32 %v12789_v9, %v3938_v14  ;;  %v4125_v11 = vsel %vm979_vm4, 0.0, %v4078_v52  ;;  %v4083_v12 = vrot.slane %v12799_v37, 7  ;;  %v10613_v22 = vpack.i.bf16 %v12799_v37, %v12795_v54 }
 0xe5d   :  { %v9735_v8 = vpop.f32.mrf.mxu1  ;;  %v4126_v21 = vsel %vm1028_vm5, 0.0, %v4125_v11  ;;  %vm14630_vm5 = vcmp.lt.s32.totalorder %v11639_v0, 1 }
 0xe5e   :  { %v10608_v7 = vpack.i.bf16 %v12802_v15, %v12792_v29  ;;  %v4079_v13 = vrot.slane %v12802_v15, 7  ;;  %v12824_v59 = vadd.f32 %v9735_v8, %v12789_v9  ;;  %v4084_v43 = vsel %vm979_vm4, %v4081_v17, %v4083_v12 }
 0xe5f   :  { %v3951_v18 = vpop.f32.mrf.mxu1 }
 0xe60   :  { %v12814_v39 = vadd.f32 %v12789_v9, %v3951_v18  ;;  %10609 = vrot.lane.b32.xlu1 %v10608_v7, %s11289_s24  ;;  %v4080_v30 = vsel %vm979_vm4, %v4078_v52, %v4079_v13  ;;  %v4082_v55 = vsel %vm979_vm4, %v4079_v13, %v4081_v17  ;;  %v4089_v49 = vrot.slane %v12824_v59, 7 }
 0xe61   :  { %v9736_v51 = vpop.f32.mrf.mxu1  ;;  %v10618_v6 = vpack.i.bf16 %v4080_v30, %v4126_v21  ;;  %v4128_v19 = vsel %vm1030_vm6, 0.0, %v4082_v55  ;;  %vm14631_vm6 = vcmp.lt.s32.totalorder %v11648_v5, 1 }
 0xe62   :  { %v12827_v57 = vadd.f32 %v9736_v51, %v12789_v9  ;;  %v4085_v20 = vrot.slane %v12814_v39, 7  ;;  %v10623_v63 = vpack.i.bf16 %v4084_v43, %v4128_v19 }
 0xe63   :  { %v3954_v16 = vpop.f32.mrf.mxu1  ;;  %10619 = vrot.lane.b32.xlu0 %v10618_v6, %s11290_s25 }
 0xe64   :  { %v12834_v23 = vadd.f32 %v12789_v9, %v3954_v16  ;;  %10614 = vrot.lane.b32.xlu1 %v10613_v22, %s11289_s24  ;;  %v4086_v31 = vsel %vm979_vm4, %v4083_v12, %v4085_v20  ;;  %v4091_v26 = vrot.slane %v12827_v57, 7  ;;  %v10643_v3 = vpack.i.bf16 %v12827_v57, %v12824_v59 }
 0xe65   :  { %v9739_v62 = vpop.f32.mrf.mxu1  ;;  %v4130_v1 = vsel %vm14630_vm5, 0.0, %v4086_v31  ;;  %vm14632_vm5 = vcmp.lt.s32.totalorder %v11679_v27, 1 }
 0xe66   :  { %v4087_v36 = vrot.slane %v12834_v23, 7  ;;  %v4092_v32 = vsel %vm979_vm4, %v4089_v49, %v4091_v26  ;;  %v12854_v41 = vadd.f32 %v9739_v62, %v12789_v9  ;;  %v10633_v28 = vpack.i.bf16 %v12834_v23, %v12814_v39 }
 0xe67   :  { %v3967_v25 = vpop.f32.mrf.mxu1  ;;  %10624 = vrot.lane.b32.xlu0 %v10623_v63, %s11290_s25 }
 0xe68   :  { %v12844_v56 = vadd.f32 %v12789_v9, %v3967_v25  ;;  %v4088_v61 = vsel %vm979_vm4, %v4085_v20, %v4087_v36  ;;  %v4090_v35 = vsel %vm979_vm4, %v4087_v36, %v4089_v49  ;;  %v4097_v11 = vrot.slane %v12854_v41, 7 }
 0xe69   :  { %v9740_v40 = vpop.f32.mrf.mxu1  ;;  %v10628_v58 = vpack.i.bf16 %v4088_v61, %v4130_v1  ;;  %v4132_v44 = vsel %vm14631_vm6, 0.0, %v4090_v35  ;;  %vm14633_vm6 = vcmp.lt.s32.totalorder %v11688_v33, 1  ;;  %v10898_v1 = vld [vmem:[%s14567_s8 + $0xe8] sm:$0xff]   ;;  %v10899_v35 = vld [vmem:[%s14567_s8 + $0xe0] sm:$0xff]  }
 0xe6a   :  { %v12857_v24 = vadd.f32 %v9740_v40, %v12789_v9  ;;  %v10638_v50 = vpack.i.bf16 %v4092_v32, %v4132_v44  ;;  %v4093_v60 = vrot.slane %v12844_v56, 7  ;;  %9773 = vmatprep.subr.bf16.mxu1 %v10898_v1 }
 0xe6b   :  { %v3970_v42 = vpop.f32.mrf.mxu1  ;;  %10629 = vrot.lane.b32.xlu0 %v10628_v58, %s11290_s25  ;;  %9774 = vmatpush3.bf16.msra.mxu1 %v10898_v1 }
 0xe6c   :  { %v12862_v48 = vadd.f32 %v12789_v9, %v3970_v42  ;;  %10639 = vrot.lane.b32.xlu1 %v10638_v50, %s11290_s25  ;;  %v4094_v52 = vsel %vm979_vm4, %v4091_v26, %v4093_v60  ;;  %v4099_v14 = vrot.slane %v12857_v24, 7  ;;  %v10663_v26 = vpack.i.bf16 %v12857_v24, %v12854_v41  ;;  %9775 = vmatprep.subr.bf16.mxu1 %v10899_v35 }
 0xe6d   :  { %v9743_v53 = vpop.f32.mrf.mxu1  ;;  %v4134_v18 = vsel %vm14632_vm5, 0.0, %v4094_v52  ;;  %vm14634_vm5 = vcmp.lt.s32.totalorder %v11719_v2, 1  ;;  %v4014_v42 = vrot.slane %v12792_v29, 6 }
 0xe6e   :  { %v4095_v8 = vrot.slane %v12862_v48, 7  ;;  %v4100_v55 = vsel %vm979_vm4, %v4097_v11, %v4099_v14  ;;  %v12886_v6 = vadd.f32 %v9743_v53, %v12789_v9  ;;  %v10653_v62 = vpack.i.bf16 %v12862_v48, %v12844_v56 }
 0xe6f   :  { %v3983_v7 = vpop.f32.mrf.mxu1  ;;  %10634 = vrot.lane.b32.xlu0 %v10633_v28, %s11289_s24  ;;  %9776 = vmatpush3.bf16.msra.mxu1 %v10899_v35  ;;  %v4015_v28 = vrot.slane %v12802_v15, 6  ;;  %v4061_v52 = vsel %vm898_vm13, 0.0, %v4014_v42 }
 0xe70   :  { %v12875_v13 = vadd.f32 %v12789_v9, %v3983_v7  ;;  %10644 = vrot.lane.b32.xlu1 %v10643_v3, %s11289_s24  ;;  %v4096_v17 = vsel %vm979_vm4, %v4093_v60, %v4095_v8  ;;  %v4098_v12 = vsel %vm979_vm4, %v4095_v8, %v4097_v11  ;;  %v4105_v49 = vrot.slane %v12886_v6, 7 }
 0xe71   :  { %v9744_v30 = vpop.f32.mrf.mxu1  ;;  %v10648_v21 = vpack.i.bf16 %v4096_v17, %v4134_v18  ;;  %v4136_v51 = vsel %vm14633_vm6, 0.0, %v4098_v12  ;;  %vm14635_vm6 = vcmp.lt.s32.totalorder %v11728_v10, 1  ;;  %v4017_v11 = vrot.slane %v12795_v54, 6 }
 0xe72   :  { %v12889_v22 = vadd.f32 %v9744_v30, %v12789_v9  ;;  %v10658_v19 = vpack.i.bf16 %v4100_v55, %v4136_v51  ;;  %v4101_v20 = vrot.slane %v12875_v13, 7  ;;  %v4019_v7 = vrot.slane %v12799_v37, 6 }
 0xe73   :  { %v3986_v16 = vpop.f32.mrf.mxu1  ;;  %10649 = vrot.lane.b32.xlu0 %v10648_v21, %s11290_s25  ;;  %v4016_v12 = vsel %vm898_vm13, %v4014_v42, %v4015_v28  ;;  %v4027_v42 = vrot.slane %v12827_v57, 6 }
 0xe74   :  { %v12894_v43 = vadd.f32 %v12789_v9, %v3986_v16  ;;  %10659 = vrot.lane.b32.xlu1 %v10658_v19, %s11290_s25  ;;  %v4102_v63 = vsel %vm979_vm4, %v4099_v14, %v4101_v20  ;;  %v4107_v31 = vrot.slane %v12889_v22, 7  ;;  %v10683_v60 = vpack.i.bf16 %v12889_v22, %v12886_v6 }
 0xe75   :  { %v4138_v25 = vsel %vm14634_vm5, 0.0, %v4102_v63  ;;  %v4018_v19 = vsel %vm898_vm13, %v4015_v28, %v4017_v11  ;;  %v4021_v63 = vrot.slane %v12814_v39, 6  ;;  %vm14637_vm5 = vcmp.lt.s32.totalorder %v11602_v38, 2 }
 0xe76   :  { %v4103_v36 = vrot.slane %v12894_v43, 7  ;;  %v4108_v58 = vsel %vm979_vm4, %v4105_v49, %v4107_v31  ;;  %v10673_v50 = vpack.i.bf16 %v12894_v43, %v12875_v13  ;;  %v4064_v1 = vsel %vm14637_vm5, 0.0, %v4018_v19 }
 0xe77   :  { %10654 = vrot.lane.b32.xlu0 %v10653_v62, %s11289_s24  ;;  %vm14640_vm5 = vcmp.lt.s32.totalorder %v11679_v27, 2 }
 0xe78   :  { %10664 = vrot.lane.b32.xlu1 %v10663_v26, %s11289_s24  ;;  %v4104_v9 = vsel %vm979_vm4, %v4101_v20, %v4103_v36  ;;  %v4106_v61 = vsel %vm979_vm4, %v4103_v36, %v4105_v49  ;;  %vm14636_vm4 = vcmp.lt.s32.totalorder %v11596_v34, 2  ;;  %v4023_v49 = vrot.slane %v12834_v23, 6 }
 0xe79   :  { %v10668_v40 = vpack.i.bf16 %v4104_v9, %v4138_v25  ;;  %v4140_v32 = vsel %vm14635_vm6, 0.0, %v4106_v61  ;;  %v4062_v30 = vsel %vm14636_vm4, 0.0, %v4061_v52  ;;  %v4020_v61 = vsel %vm898_vm13, %v4017_v11, %v4019_v7 }
 0xe7a   :  { %v10678_v44 = vpack.i.bf16 %v4108_v58, %v4140_v32  ;;  %v4025_v58 = vrot.slane %v12824_v59, 6  ;;  %vm14638_vm6 = vcmp.lt.s32.totalorder %v11639_v0, 2  ;;  %vm14639_vm4 = vcmp.lt.s32.totalorder %v11648_v5, 2 }
 0xe7b   :  { %10669 = vrot.lane.b32.xlu0 %v10668_v40, %s11290_s25 }
 0xe7c   :  { %10679 = vrot.lane.b32.xlu1 %v10678_v44, %s11290_s25  ;;  %v4026_v28 = vsel %vm898_vm13, %v4023_v49, %v4025_v58 }
 0xe7f   :  { %10674 = vrot.lane.b32.xlu0 %v10673_v50, %s11289_s24  ;;  %v4022_v50 = vsel %vm898_vm13, %v4019_v7, %v4021_v63  ;;  %v4024_v7 = vsel %vm898_vm13, %v4021_v63, %v4023_v49 }
 0xe80   :  { %10684 = vrot.lane.b32.xlu1 %v10683_v60, %s11289_s24  ;;  %v4066_v11 = vsel %vm14638_vm6, 0.0, %v4022_v50  ;;  %vm14641_vm6 = vcmp.lt.s32.totalorder %v11688_v33, 2 }
 0xed2   :  { %v10610_v53 = vpop.permute.xlu1 %10609 }
 0xed3   :  { %v10612_v17 = vunpack.i.h.bf16 %v10610_v53  ;;  %v10611_v18 = vunpack.i.l.bf16 %v10610_v53 }
 0xed5   :  { %v10620_v14 = vpop.permute.xlu0 %10619 }
 0xed6   :  { %v10622_v3 = vunpack.i.h.bf16 %v10620_v14  ;;  %v10621_v8 = vunpack.i.l.bf16 %v10620_v14  ;;  %v10615_v51 = vpop.permute.xlu1 %10614  ;;  %v4029_v14 = vrot.slane %v12844_v56, 6 }
 0xed7   :  { %v10617_v9 = vunpack.i.h.bf16 %v10615_v51  ;;  %v10616_v25 = vunpack.i.l.bf16 %v10615_v51 }
 0xed8   :  { %v4254_v21 = vsel %vm760_vm3, %v4062_v30, %v10621_v8  ;;  %v4255_v55 = vsel %vm760_vm3, %v4016_v12, %v10622_v3  ;;  %v4028_v12 = vsel %vm898_vm13, %v4025_v58, %v4027_v42  ;;  %v4068_v30 = vsel %vm14639_vm4, 0.0, %v4026_v28 }
 0xed9   :  { %v4270_v20 = vsel %vm398_vm2, %v4254_v21, %v10611_v18  ;;  %v4271_v16 = vsel %vm398_vm2, %v4255_v55, %v10612_v17  ;;  %v10625_v62 = vpop.permute.xlu0 %10624  ;;  %v4033_v55 = vrot.slane %v12854_v41, 6  ;;  %v4035_v58 = vrot.slane %v12857_v24, 6 }
 0xeda   :  { %v10627_v31 = vunpack.i.h.bf16 %v10625_v62  ;;  %v10626_v26 = vunpack.i.l.bf16 %v10625_v62  ;;  %v4299_v36 = vpack.c.bf16 %v4271_v16, %v4270_v20  ;;  %v4030_v16 = vsel %vm898_vm13, %v4027_v42, %v4029_v14 }
 0xedb   :  { %v4031_v62 = vrot.slane %v12862_v48, 6  ;;  %v4070_v28 = vsel %vm14640_vm5, 0.0, %v4030_v16  ;;  %vm14642_vm4 = vcmp.lt.s32.totalorder %v11719_v2, 2  ;;  %vm14643_vm5 = vcmp.lt.s32.totalorder %v11728_v10, 2 }
 0xedc   :  { %v4257_v35 = vsel %vm760_vm3, %v4020_v61, %v10627_v31  ;;  %v4256_v40 = vsel %vm760_vm3, %v4064_v1, %v10626_v26  ;;  %9757 = vmatprep.mubr.msk.bf16.mxu0 %vm1267_vm1, %v4299_v36 }
 0xedd   :  { %v4273_v32 = vsel %vm398_vm2, %v4257_v35, %v10617_v9  ;;  %v4272_v44 = vsel %vm398_vm2, %v4256_v40, %v10616_v25  ;;  %v10630_v60 = vpop.permute.xlu0 %10629 }
 0xede   :  { %v4300_v53 = vpack.c.bf16 %v4273_v32, %v4272_v44  ;;  %v10640_v52 = vpop.permute.xlu1 %10639  ;;  %v10632_v3 = vunpack.i.h.bf16 %v10630_v60  ;;  %v10631_v8 = vunpack.i.l.bf16 %v10630_v60  ;;  %v4034_v44 = vsel %vm898_vm13, %v4031_v62, %v4033_v55 }
 0xedf   :  { %v10642_v17 = vunpack.i.h.bf16 %v10640_v52  ;;  %v10641_v18 = vunpack.i.l.bf16 %v10640_v52 }
 0xee0   :  { %9758 = vmatmul.mubr.msk.bf16.vlgmr.msra.gmra.mxu0 %vm1267_vm1, %v4300_v53  ;;  %v4259_v31 = vsel %vm760_vm3, %v4024_v7, %v10632_v3  ;;  %v4258_v26 = vsel %vm760_vm3, %v4066_v11, %v10631_v8  ;;  %v4032_v8 = vsel %vm898_vm13, %v4029_v14, %v4031_v62  ;;  %v4036_v11 = vsel %vm898_vm13, %v4033_v55, %v4035_v58 }
 0xee1   :  { %v10635_v21 = vpop.permute.xlu0 %10634  ;;  %v4261_v49 = vsel %vm760_vm3, %v4028_v12, %v10642_v17  ;;  %v4260_v9 = vsel %vm760_vm3, %v4068_v30, %v10641_v18  ;;  %v4072_v17 = vsel %vm14641_vm6, 0.0, %v4034_v44  ;;  %v4037_v7 = vrot.slane %v12875_v13, 6 }
 0xee2   :  { %v10637_v51 = vunpack.i.h.bf16 %v10635_v21  ;;  %v10636_v19 = vunpack.i.l.bf16 %v10635_v21  ;;  %v10645_v20 = vpop.permute.xlu1 %10644  ;;  %vm14644_vm6 = vcmp.lt.s32.totalorder %v11596_v34, 2 }
 0xee3   :  { %v10647_v63 = vunpack.i.h.bf16 %v10645_v20  ;;  %v10646_v36 = vunpack.i.l.bf16 %v10645_v20 }
 0xee4   :  { %v4274_v25 = vsel %vm398_vm2, %v4258_v26, %v10636_v19  ;;  %v4275_v61 = vsel %vm398_vm2, %v4259_v31, %v10637_v51  ;;  %v4039_v51 = vrot.slane %v12894_v43, 6  ;;  %v4041_v19 = vrot.slane %v12886_v6, 6 }
 0xee5   :  { %v4276_v1 = vsel %vm398_vm2, %v4260_v9, %v10646_v36  ;;  %v4277_v35 = vsel %vm398_vm2, %v4261_v49, %v10647_v63  ;;  %v10650_v40 = vpop.permute.xlu0 %10649  ;;  %v4301_v32 = vpack.c.bf16 %v4275_v61, %v4274_v25  ;;  %v4043_v25 = vrot.slane %v12889_v22, 6 }
 0xee6   :  { %v10660_v50 = vpop.permute.xlu1 %10659  ;;  %v4302_v60 = vpack.c.bf16 %v4277_v35, %v4276_v1  ;;  %v10652_v42 = vunpack.i.h.bf16 %v10650_v40  ;;  %v10651_v53 = vunpack.i.l.bf16 %v10650_v40  ;;  %v4038_v1 = vsel %vm898_vm13, %v4035_v58, %v4037_v7 }
 0xee7   :  { %9761 = vmatprep.mubr.msk.bf16.mxu0 %vm1267_vm1, %v4301_v32  ;;  %v10662_v52 = vunpack.i.h.bf16 %v10660_v50  ;;  %v10661_v3 = vunpack.i.l.bf16 %v10660_v50  ;;  %v4042_v50 = vsel %vm898_vm13, %v4039_v51, %v4041_v19  ;;  %v4040_v58 = vsel %vm898_vm13, %v4037_v7, %v4039_v51 }
 0xee8   :  { %9762 = vmatmul.mubr.msk.bf16.gmra.mxu0 %vm1267_vm1, %v4302_v60  ;;  %v4263_v20 = vsel %vm760_vm3, %v4032_v8, %v10652_v42  ;;  %v4262_v16 = vsel %vm760_vm3, %v4070_v28, %v10651_v53  ;;  %v4074_v53 = vsel %vm14642_vm4, 0.0, %v4038_v1  ;;  %v4044_v28 = vsel %vm898_vm13, %v4041_v19, %v4043_v25 }
 0xee9   :  { %v10655_v18 = vpop.permute.xlu0 %10654  ;;  %v4265_v55 = vsel %vm760_vm3, %v4036_v11, %v10662_v52  ;;  %v4264_v31 = vsel %vm760_vm3, %v4072_v17, %v10661_v3  ;;  %v4076_v3 = vsel %vm14643_vm5, 0.0, %v4042_v50  ;;  %vm14645_vm4 = vcmp.lt.s32.totalorder %v11602_v38, 2 }
 0xeea   :  { %v10657_v12 = vunpack.i.h.bf16 %v10655_v18  ;;  %v10656_v30 = vunpack.i.l.bf16 %v10655_v18  ;;  %v10665_v21 = vpop.permute.xlu1 %10664  ;;  %vm14646_vm5 = vcmp.lt.s32.totalorder %v11639_v0, 2 }
 0xeeb   :  { %v10667_v14 = vunpack.i.h.bf16 %v10665_v21  ;;  %v10666_v62 = vunpack.i.l.bf16 %v10665_v21 }
 0xeec   :  { %v4278_v26 = vsel %vm398_vm2, %v4262_v16, %v10656_v30  ;;  %v4279_v63 = vsel %vm398_vm2, %v4263_v20, %v10657_v12 }
 0xeed   :  { %v4280_v36 = vsel %vm398_vm2, %v4264_v31, %v10666_v62  ;;  %v4281_v49 = vsel %vm398_vm2, %v4265_v55, %v10667_v14  ;;  %v10670_v9 = vpop.permute.xlu0 %10669  ;;  %v4303_v61 = vpack.c.bf16 %v4279_v63, %v4278_v26  ;;  %v8701_v63 = vld [vmem:[%s14566_s7 + $0xe] ss:$0 sm:$0xff] }
 0xeee   :  { %v10680_v35 = vpop.permute.xlu1 %10679  ;;  %v4304_v40 = vpack.c.bf16 %v4281_v49, %v4280_v36  ;;  %v10672_v32 = vunpack.i.h.bf16 %v10670_v9  ;;  %v10671_v44 = vunpack.i.l.bf16 %v10670_v9 }
 0xeef   :  { %9765 = vmatprep.mubr.msk.bf16.mxu0 %vm1267_vm1, %v4303_v61  ;;  %v10682_v60 = vunpack.i.h.bf16 %v10680_v35  ;;  %v10681_v42 = vunpack.i.l.bf16 %v10680_v35 }
 0xef0   :  { %9766 = vmatmul.mubr.msk.bf16.gmra.mxu0 %vm1267_vm1, %v4304_v40  ;;  %v4267_v18 = vsel %vm760_vm3, %v4040_v58, %v10672_v32  ;;  %v4266_v12 = vsel %vm760_vm3, %v4074_v53, %v10671_v44 }
 0xef1   :  { %v10675_v52 = vpop.permute.xlu0 %10674  ;;  %v4269_v20 = vsel %vm760_vm3, %v4044_v28, %v10682_v60  ;;  %v4268_v16 = vsel %vm760_vm3, %v4076_v3, %v10681_v42 }
 0xef2   :  { %v10677_v8 = vunpack.i.h.bf16 %v10675_v52  ;;  %v10676_v11 = vunpack.i.l.bf16 %v10675_v52  ;;  %v10685_v17 = vpop.permute.xlu1 %10684 }
 0xef3   :  { %v10687_v30 = vunpack.i.h.bf16 %v10685_v17  ;;  %v10686_v21 = vunpack.i.l.bf16 %v10685_v17 }
 0xef4   :  { %v4282_v19 = vsel %vm398_vm2, %v4266_v12, %v10676_v11  ;;  %v4283_v7 = vsel %vm398_vm2, %v4267_v18, %v10677_v8 }
 0xef5   :  { %v4284_v51 = vsel %vm398_vm2, %v4268_v16, %v10686_v21  ;;  %v4285_v14 = vsel %vm398_vm2, %v4269_v20, %v10687_v30  ;;  %v4305_v62 = vpack.c.bf16 %v4283_v7, %v4282_v19 }
 0xef6   :  { %v4306_v55 = vpack.c.bf16 %v4285_v14, %v4284_v51 }
 0xef7   :  { %9769 = vmatprep.mubr.msk.bf16.mxu0 %vm1267_vm1, %v4305_v62 }
 0xef8   :  { %9770 = vmatmul.mubr.msk.bf16.gmra.mxu0 %vm1267_vm1, %v4306_v55 }
 0xfa0   :  { %v9759_v31 = vpop.f32.mrf.mxu0 }
 0xfa1   :  { %v4418_v25 = vadd.f32 %v9759_v31, %v8701_v63 }
 0xfa2   :  { %v4409_v26 = vpop.f32.mrf.mxu0 }
 0xfa3   :  { %v4410_v49 = vadd.f32 %v8701_v63, %v4409_v26  ;;  %v4474_v50 = vmax.f32 %v4418_v25, 0.0 }
 0xfa4   :  { %v9760_v36 = vpop.f32.mrf.mxu0 }
 0xfa5   :  { %v4421_v9 = vadd.f32 %v9760_v36, %v8701_v63  ;;  %v4472_v32 = vmax.f32 %v4410_v49, 0.0 }
 0xfa6   :  { %v4412_v61 = vpop.f32.mrf.mxu0 }
 0xfa7   :  { %v4413_v1 = vadd.f32 %v8701_v63, %v4412_v61  ;;  %v4475_v35 = vmax.f32 %v4421_v9, 0.0 }
 0xfa8   :  { %v9763_v40 = vpop.f32.mrf.mxu0 }
 0xfa9   :  { %v4473_v44 = vmax.f32 %v4413_v1, 0.0  ;;  %v4494_v53 = vpack.c.bf16 %v4475_v35, %v4474_v50  ;;  %v4434_v3 = vadd.f32 %v9763_v40, %v8701_v63 }
 0xfaa   :  { %v4425_v60 = vpop.f32.mrf.mxu0 }
 0xfab   :  { %v4493_v42 = vpack.c.bf16 %v4473_v44, %v4472_v32  ;;  %v4426_v52 = vadd.f32 %v8701_v63, %v4425_v60  ;;  %v4478_v21 = vmax.f32 %v4434_v3, 0.0 }
 0xfac   :  { %v9764_v28 = vpop.f32.mrf.mxu0 }
 0xfad   :  { %v4437_v58 = vadd.f32 %v9764_v28, %v8701_v63  ;;  %9777 = vmatprep.mubr.msk.bf16.mxu1 %vm760_vm3, %v4493_v42  ;;  %v4476_v12 = vmax.f32 %v4426_v52, 0.0 }
 0xfae   :  { %v4428_v8 = vpop.f32.mrf.mxu0  ;;  %9778 = vmatmul.mubr.msk.bf16.vlgmr.msra.gmra.mxu1 %vm760_vm3, %v4494_v53 }
 0xfaf   :  { %v4429_v11 = vadd.f32 %v8701_v63, %v4428_v8  ;;  %v4479_v17 = vmax.f32 %v4437_v58, 0.0 }
 0xfb0   :  { %v9767_v18 = vpop.f32.mrf.mxu0 }
 0xfb1   :  { %v4477_v30 = vmax.f32 %v4429_v11, 0.0  ;;  %v4496_v19 = vpack.c.bf16 %v4479_v17, %v4478_v21  ;;  %v4450_v62 = vadd.f32 %v9767_v18, %v8701_v63  ;;  %v10900_v11 = vld [vmem:[%s14565_s6 + $0x2f8] sm:$0xff]   ;;  %v10901_v17 = vld [vmem:[%s14565_s6 + $0x2f0] sm:$0xff]   ;;  %v10903_v18 = vld [vmem:[%s14565_s6 + $0x2e0] sm:$0xff]  }
 0xfb2   :  { %v4441_v20 = vpop.f32.mrf.mxu0  ;;  %9793 = vmatprep.subr.bf16.mxu0 %v10900_v11  ;;  %v13045_v21 = vld [vmem:[%s14568_s9 + $0xe] ss:$0 sm:$0xff] }
 0xfb3   :  { %v4495_v16 = vpack.c.bf16 %v4477_v30, %v4476_v12  ;;  %v4442_v51 = vadd.f32 %v8701_v63, %v4441_v20  ;;  %v4482_v25 = vmax.f32 %v4450_v62, 0.0  ;;  %9794 = vmatpush3.bf16.msra.mxu0 %v10900_v11  ;;  %v10904_v12 = vld [vmem:[%s14565_s6 + $0x2d8] sm:$0xff]  }
 0xfb4   :  { %v9768_v7 = vpop.f32.mrf.mxu0  ;;  %9795 = vmatprep.subr.bf16.mxu0 %v10901_v17 }
 0xfb5   :  { %v4453_v14 = vadd.f32 %v9768_v7, %v8701_v63  ;;  %9781 = vmatprep.mubr.msk.bf16.mxu1 %vm760_vm3, %v4495_v16  ;;  %v4480_v49 = vmax.f32 %v4442_v51, 0.0 }
 0xfb6   :  { %v4444_v55 = vpop.f32.mrf.mxu0  ;;  %9782 = vmatmul.mubr.msk.bf16.gmra.mxu1 %vm760_vm3, %v4496_v19 }
 0xfb7   :  { %v4445_v31 = vadd.f32 %v8701_v63, %v4444_v55  ;;  %v4483_v26 = vmax.f32 %v4453_v14, 0.0  ;;  %9796 = vmatpush3.bf16.msra.mxu0 %v10901_v17 }
 0xfb8   :  { %v9771_v36 = vpop.f32.mrf.mxu0 }
 0xfb9   :  { %v4481_v9 = vmax.f32 %v4445_v31, 0.0  ;;  %v4498_v35 = vpack.c.bf16 %v4483_v26, %v4482_v25  ;;  %v4466_v50 = vadd.f32 %v9771_v36, %v8701_v63  ;;  %v10905_v25 = vld [vmem:[%s14565_s6 + $0x2d0] sm:$0xff]  }
 0xfba   :  { %v4457_v61 = vpop.f32.mrf.mxu0 }
 0xfbb   :  { %v4497_v1 = vpack.c.bf16 %v4481_v9, %v4480_v49  ;;  %v4458_v32 = vadd.f32 %v8701_v63, %v4457_v61  ;;  %v4486_v58 = vmax.f32 %v4466_v50, 0.0 }
 0xfbc   :  { %v9772_v40 = vpop.f32.mrf.mxu0 }
 0xfbd   :  { %v4469_v44 = vadd.f32 %v9772_v40, %v8701_v63  ;;  %9785 = vmatprep.mubr.msk.bf16.mxu1 %vm760_vm3, %v4497_v1  ;;  %v4484_v28 = vmax.f32 %v4458_v32, 0.0 }
 0xfbe   :  { %v4460_v60 = vpop.f32.mrf.mxu0  ;;  %9786 = vmatmul.mubr.msk.bf16.gmra.mxu1 %vm760_vm3, %v4498_v35 }
 0xfbf   :  { %v4461_v42 = vadd.f32 %v8701_v63, %v4460_v60  ;;  %v4487_v53 = vmax.f32 %v4469_v44, 0.0  ;;  %v10902_v63 = vld [vmem:[%s14565_s6 + $0x2e8] sm:$0xff]  }
 0xfc0   :  { %9797 = vmatprep.subr.bf16.mxu0 %v10902_v63 }
 0xfc1   :  { %v4485_v52 = vmax.f32 %v4461_v42, 0.0  ;;  %v4500_v8 = vpack.c.bf16 %v4487_v53, %v4486_v58  ;;  %9798 = vmatpush3.bf16.msra.mxu0 %v10902_v63 }
 0xfc2   :  { %9799 = vmatprep.subr.bf16.mxu0 %v10903_v18 }
 0xfc3   :  { %v4499_v3 = vpack.c.bf16 %v4485_v52, %v4484_v28 }
 0xfc5   :  { %9789 = vmatprep.mubr.msk.bf16.mxu1 %vm760_vm3, %v4499_v3  ;;  %9800 = vmatpush3.bf16.msra.mxu0 %v10903_v18 }
 0xfc6   :  { %9790 = vmatmul.mubr.msk.bf16.gmra.mxu1 %vm760_vm3, %v4500_v8  ;;  %9801 = vmatprep.subr.bf16.mxu0 %v10904_v12 }
 0xfc9   :  { %9802 = vmatpush3.bf16.msra.mxu0 %v10904_v12 }
 0xfca   :  { %9803 = vmatprep.subr.bf16.mxu0 %v10905_v25 }
 0xfcd   :  { %9804 = vmatpush3.bf16.msra.mxu0 %v10905_v25 }
0x106e   :  { %v9779_v30 = vpop.f32.mrf.mxu1 }
0x106f   :  { %v4588_v16 = vadd.f32 %v9779_v30, %v13045_v21 }
0x1070   :  { %v4579_v20 = vpop.f32.mrf.mxu1 }
0x1071   :  { %v4580_v19 = vadd.f32 %v13045_v21, %v4579_v20  ;;  %v13054_v55 = vadd.f32 %v4588_v16, %v12795_v54 }
0x1072   :  { %v9780_v7 = vpop.f32.mrf.mxu1 }
0x1073   :  { %v13050_v51 = vadd.f32 %v4580_v19, %v12792_v29  ;;  %v4591_v14 = vadd.f32 %v9780_v7, %v13045_v21  ;;  %v4741_v40 = vrot.slane %v13054_v55, 6 }
0x1074   :  { %v4582_v62 = vpop.f32.mrf.mxu1 }
0x1075   :  { %v13057_v31 = vadd.f32 %v4591_v14, %v12799_v37  ;;  %v4583_v26 = vadd.f32 %v13045_v21, %v4582_v62  ;;  %v4738_v36 = vrot.slane %v13050_v51, 6 }
0x1076   :  { %v9783_v49 = vpop.f32.mrf.mxu1 }
0x1077   :  { %v13062_v9 = vadd.f32 %v4583_v26, %v12802_v15  ;;  %v4785_v29 = vsel %vm898_vm13, 0.0, %v4738_v36  ;;  %v4604_v54 = vadd.f32 %v9783_v49, %v13045_v21  ;;  %v4743_v37 = vrot.slane %v13057_v31, 6 }
0x1078   :  { %v4595_v61 = vpop.f32.mrf.mxu1  ;;  %v4786_v32 = vsel %vm14644_vm6, 0.0, %v4785_v29  ;;  %v10703_v19 = vpack.i.bf16 %v13057_v31, %v13054_v55  ;;  %vm14647_vm6 = vcmp.lt.s32.totalorder %v11648_v5, 2 }
0x1079   :  { %v4596_v1 = vadd.f32 %v13045_v21, %v4595_v61  ;;  %v4739_v35 = vrot.slane %v13062_v9, 6  ;;  %v13082_v53 = vadd.f32 %v4604_v54, %v12824_v59  ;;  %v4744_v58 = vsel %vm898_vm13, %v4741_v40, %v4743_v37 }
0x107a   :  { %v9784_v15 = vpop.f32.mrf.mxu1 }
0x107b   :  { %v13076_v44 = vadd.f32 %v4596_v1, %v12814_v39  ;;  %v4607_v50 = vadd.f32 %v9784_v15, %v13045_v21  ;;  %v4740_v60 = vsel %vm898_vm13, %v4738_v36, %v4739_v35  ;;  %v4742_v42 = vsel %vm898_vm13, %v4739_v35, %v4741_v40 }
0x107c   :  { %v4598_v28 = vpop.f32.mrf.mxu1  ;;  %v10688_v52 = vpack.i.bf16 %v4740_v60, %v4786_v32  ;;  %v4788_v3 = vsel %vm14645_vm4, 0.0, %v4742_v42  ;;  %v4749_v7 = vrot.slane %v13082_v53, 6  ;;  %vm14648_vm4 = vcmp.lt.s32.totalorder %v11679_v27, 2 }
0x107d   :  { %v13088_v8 = vadd.f32 %v4607_v50, %v12827_v57  ;;  %v4599_v39 = vadd.f32 %v13045_v21, %v4598_v28  ;;  %v10698_v11 = vpack.i.bf16 %v4744_v58, %v4788_v3  ;;  %v4745_v17 = vrot.slane %v13076_v44, 6 }
0x107e   :  { %v9787_v63 = vpop.f32.mrf.mxu1  ;;  %10689 = vrot.lane.b32.xlu0 %v10688_v52, %s11290_s25  ;;  %v10693_v57 = vpack.i.bf16 %v13062_v9, %v13050_v51 }
0x107f   :  { %v13094_v59 = vadd.f32 %v4599_v39, %v12834_v23  ;;  %10699 = vrot.lane.b32.xlu1 %v10698_v11, %s11290_s25  ;;  %v4746_v18 = vsel %vm898_vm13, %v4743_v37, %v4745_v17  ;;  %v4620_v12 = vadd.f32 %v9787_v63, %v13045_v21  ;;  %v4751_v20 = vrot.slane %v13088_v8, 6 }
0x1080   :  { %v4611_v30 = vpop.f32.mrf.mxu1  ;;  %v4790_v62 = vsel %vm14646_vm5, 0.0, %v4746_v18  ;;  %v10723_v58 = vpack.i.bf16 %v13088_v8, %v13082_v53  ;;  %vm14649_vm5 = vcmp.lt.s32.totalorder %v11688_v33, 2 }
0x1081   :  { %v4612_v16 = vadd.f32 %v13045_v21, %v4611_v30  ;;  %v4747_v23 = vrot.slane %v13094_v59, 6  ;;  %v13118_v25 = vadd.f32 %v4620_v12, %v12854_v41  ;;  %v4752_v37 = vsel %vm898_vm13, %v4749_v7, %v4751_v20 }
0x1082   :  { %v9788_v14 = vpop.f32.mrf.mxu1  ;;  %10694 = vrot.lane.b32.xlu0 %v10693_v57, %s11289_s24 }
0x1083   :  { %v13111_v26 = vadd.f32 %v4612_v16, %v12844_v56  ;;  %v4623_v36 = vadd.f32 %v9788_v14, %v13045_v21  ;;  %10704 = vrot.lane.b32.xlu1 %v10703_v19, %s11289_s24  ;;  %v4748_v49 = vsel %vm898_vm13, %v4745_v17, %v4747_v23  ;;  %v4750_v29 = vsel %vm898_vm13, %v4747_v23, %v4749_v7 }
0x1084   :  { %v4614_v54 = vpop.f32.mrf.mxu1  ;;  %v10708_v61 = vpack.i.bf16 %v4748_v49, %v4790_v62  ;;  %v4792_v1 = vsel %vm14647_vm6, 0.0, %v4750_v29  ;;  %v4757_v3 = vrot.slane %v13118_v25, 6  ;;  %vm14650_vm6 = vcmp.lt.s32.totalorder %v11719_v2, 2 }
0x1085   :  { %v13124_v56 = vadd.f32 %v4623_v36, %v12857_v24  ;;  %v4615_v35 = vadd.f32 %v13045_v21, %v4614_v54  ;;  %v10718_v40 = vpack.i.bf16 %v4752_v37, %v4792_v1  ;;  %v4753_v15 = vrot.slane %v13111_v26, 6  ;;  %v10906_v37 = vld [vmem:[%s14567_s8 + $0xf8] sm:$0xff]   ;;  %v10907_v1 = vld [vmem:[%s14567_s8 + $0xf0] sm:$0xff]  }
0x1086   :  { %v9791_v32 = vpop.f32.mrf.mxu1  ;;  %10709 = vrot.lane.b32.xlu0 %v10708_v61, %s11290_s25  ;;  %v10713_v24 = vpack.i.bf16 %v13094_v59, %v13076_v44  ;;  %9821 = vmatprep.subr.bf16.mxu1 %v10906_v37 }
0x1087   :  { %v13130_v41 = vadd.f32 %v4615_v35, %v12862_v48  ;;  %10719 = vrot.lane.b32.xlu1 %v10718_v40, %s11290_s25  ;;  %v4754_v50 = vsel %vm898_vm13, %v4751_v20, %v4753_v15  ;;  %v4636_v60 = vadd.f32 %v9791_v32, %v13045_v21  ;;  %v4759_v28 = vrot.slane %v13124_v56, 6  ;;  %9822 = vmatpush3.bf16.msra.mxu1 %v10906_v37 }
0x1088   :  { %v4627_v42 = vpop.f32.mrf.mxu1  ;;  %v4794_v11 = vsel %vm14648_vm4, 0.0, %v4754_v50  ;;  %vm14651_vm4 = vcmp.lt.s32.totalorder %v11728_v10, 2  ;;  %9823 = vmatprep.subr.bf16.mxu1 %v10907_v1 }
0x1089   :  { %v4628_v52 = vadd.f32 %v13045_v21, %v4627_v42  ;;  %v4755_v48 = vrot.slane %v13130_v41, 6  ;;  %v13154_v30 = vadd.f32 %v4636_v60, %v12886_v6  ;;  %v4760_v16 = vsel %vm898_vm13, %v4757_v3, %v4759_v28 }
0x108a   :  { %v9792_v39 = vpop.f32.mrf.mxu1  ;;  %10714 = vrot.lane.b32.xlu0 %v10713_v24, %s11289_s24  ;;  %v10733_v62 = vpack.i.bf16 %v13130_v41, %v13111_v26  ;;  %v4674_v42 = vrot.slane %v13050_v51, 4  ;;  %v4675_v24 = vrot.slane %v13062_v9, 4 }
0x108b   :  { %v13147_v17 = vadd.f32 %v4628_v52, %v12875_v13  ;;  %v4639_v63 = vadd.f32 %v9792_v39, %v13045_v21  ;;  %10724 = vrot.lane.b32.xlu1 %v10723_v58, %s11289_s24  ;;  %v4756_v18 = vsel %vm898_vm13, %v4753_v15, %v4755_v48  ;;  %v4758_v12 = vsel %vm898_vm13, %v4755_v48, %v4757_v3 }
0x108c   :  { %v4630_v57 = vpop.f32.mrf.mxu1  ;;  %v10728_v20 = vpack.i.bf16 %v4756_v18, %v4794_v11  ;;  %v4796_v19 = vsel %vm14649_vm5, 0.0, %v4758_v12  ;;  %v4765_v29 = vrot.slane %v13154_v30, 6  ;;  %9824 = vmatpush3.bf16.msra.mxu1 %v10907_v1  ;;  %v4721_v58 = vsel %vm134_vm0, 0.0, %v4674_v42 }
0x108d   :  { %v13160_v13 = vadd.f32 %v4639_v63, %v12889_v22  ;;  %v4631_v23 = vadd.f32 %v13045_v21, %v4630_v57  ;;  %v10738_v7 = vpack.i.bf16 %v4760_v16, %v4796_v19  ;;  %v4761_v14 = vrot.slane %v13147_v17, 6 }
0x108e   :  { %10729 = vrot.lane.b32.xlu0 %v10728_v20, %s11290_s25  ;;  %v10743_v21 = vpack.i.bf16 %v13124_v56, %v13118_v25  ;;  %v4679_v48 = vrot.slane %v13057_v31, 4  ;;  %v4681_v11 = vrot.slane %v13076_v44, 4  ;;  %v4722_v12 = vsel %vm1637_vm7, 0.0, %v4721_v58 }
0x108f   :  { %v13166_v6 = vadd.f32 %v4631_v23, %v12894_v43  ;;  %10739 = vrot.lane.b32.xlu1 %v10738_v7, %s11290_s25  ;;  %v4762_v36 = vsel %vm898_vm13, %v4759_v28, %v4761_v14  ;;  %v4767_v22 = vrot.slane %v13160_v13, 6  ;;  %v10763_v60 = vpack.i.bf16 %v13160_v13, %v13154_v30 }
0x1090   :  { %v4798_v54 = vsel %vm14650_vm6, 0.0, %v4762_v36  ;;  %v4677_v28 = vrot.slane %v13054_v55, 4  ;;  %v4676_v16 = vsel %vm134_vm0, %v4674_v42, %v4675_v24  ;;  %v4689_v58 = vrot.slane %v13111_v26, 4 }
0x1091   :  { %v4763_v49 = vrot.slane %v13166_v6, 6  ;;  %v4768_v40 = vsel %vm898_vm13, %v4765_v29, %v4767_v22  ;;  %v10753_v50 = vpack.i.bf16 %v13166_v6, %v13147_v17 }
0x1092   :  { %10734 = vrot.lane.b32.xlu0 %v10733_v62, %s11289_s24  ;;  %v4678_v39 = vsel %vm134_vm0, %v4675_v24, %v4677_v28  ;;  %v4680_v19 = vsel %vm134_vm0, %v4677_v28, %v4679_v48 }
0x1093   :  { %10744 = vrot.lane.b32.xlu1 %v10743_v21, %s11289_s24  ;;  %v4764_v43 = vsel %vm898_vm13, %v4761_v14, %v4763_v49  ;;  %v4766_v61 = vsel %vm898_vm13, %v4763_v49, %v4765_v29  ;;  %v4724_v23 = vsel %vm1639_vm8, 0.0, %v4678_v39  ;;  %v4685_v14 = vrot.slane %v13082_v53, 4 }
0x1094   :  { %v10748_v35 = vpack.i.bf16 %v4764_v43, %v4798_v54  ;;  %v4800_v15 = vsel %vm14651_vm4, 0.0, %v4766_v61  ;;  %v4682_v21 = vsel %vm134_vm0, %v4679_v48, %v4681_v11  ;;  %v4683_v49 = vrot.slane %v13094_v59, 4 }
0x1095   :  { %v10758_v32 = vpack.i.bf16 %v4768_v40, %v4800_v15  ;;  %v4726_v39 = vsel %vm1641_vm9, 0.0, %v4682_v21 }
0x1096   :  { %10749 = vrot.lane.b32.xlu0 %v10748_v35, %s11290_s25  ;;  %v4686_v28 = vsel %vm134_vm0, %v4683_v49, %v4685_v14 }
0x1097   :  { %10759 = vrot.lane.b32.xlu1 %v10758_v32, %s11290_s25 }
0x109a   :  { %10754 = vrot.lane.b32.xlu0 %v10753_v50, %s11289_s24 }
0x109b   :  { %10764 = vrot.lane.b32.xlu1 %v10763_v60, %s11289_s24  ;;  %v4687_v60 = vrot.slane %v13088_v8, 4 }
0x10f0   :  { %v10690_v52 = vpop.permute.xlu0 %10689 }
0x10f1   :  { %v10700_v3 = vpop.permute.xlu1 %10699  ;;  %v10692_v63 = vunpack.i.h.bf16 %v10690_v52  ;;  %v10691_v18 = vunpack.i.l.bf16 %v10690_v52 }
0x10f2   :  { %v10702_v57 = vunpack.i.h.bf16 %v10700_v3  ;;  %v10701_v20 = vunpack.i.l.bf16 %v10700_v3 }
0x10f3   :  { %v4914_v29 = vsel %vm760_vm3, %v4722_v12, %v10691_v18  ;;  %v4915_v43 = vsel %vm760_vm3, %v4676_v16, %v10692_v63  ;;  %v4684_v12 = vsel %vm134_vm0, %v4681_v11, %v4683_v49 }
0x10f4   :  { %v10695_v7 = vpop.permute.xlu0 %10694  ;;  %v4917_v37 = vsel %vm760_vm3, %v4680_v19, %v10702_v57  ;;  %v4916_v1 = vsel %vm760_vm3, %v4724_v23, %v10701_v20  ;;  %v4688_v57 = vsel %vm134_vm0, %v4685_v14, %v4687_v60  ;;  %v4728_v20 = vsel %vm1643_vm10, 0.0, %v4686_v28 }
0x10f5   :  { %v10697_v62 = vunpack.i.h.bf16 %v10695_v7  ;;  %v10696_v36 = vunpack.i.l.bf16 %v10695_v7  ;;  %v10705_v22 = vpop.permute.xlu1 %10704  ;;  %v4693_v19 = vrot.slane %v13118_v25, 4 }
0x10f6   :  { %v10707_v54 = vunpack.i.h.bf16 %v10705_v22  ;;  %v10706_v61 = vunpack.i.l.bf16 %v10705_v22  ;;  %v4691_v22 = vrot.slane %v13130_v41, 4 }
0x10f7   :  { %v4930_v35 = vsel %vm398_vm2, %v4914_v29, %v10696_v36  ;;  %v4931_v40 = vsel %vm398_vm2, %v4915_v43, %v10697_v62  ;;  %v4690_v36 = vsel %vm134_vm0, %v4687_v60, %v4689_v58 }
0x10f8   :  { %v4932_v15 = vsel %vm398_vm2, %v4916_v1, %v10706_v61  ;;  %v4933_v32 = vsel %vm398_vm2, %v4917_v37, %v10707_v54  ;;  %v10710_v50 = vpop.permute.xlu0 %10709  ;;  %v4959_v42 = vpack.c.bf16 %v4931_v40, %v4930_v35  ;;  %v4695_v40 = vrot.slane %v13124_v56, 4 }
0x10f9   :  { %v4960_v24 = vpack.c.bf16 %v4933_v32, %v4932_v15  ;;  %v10720_v52 = vpop.permute.xlu1 %10719  ;;  %v10712_v48 = vunpack.i.h.bf16 %v10710_v50  ;;  %v10711_v3 = vunpack.i.l.bf16 %v10710_v50  ;;  %v4730_v28 = vsel %vm1645_vm11, 0.0, %v4690_v36 }
0x10fa   :  { %9805 = vmatprep.mubr.msk.bf16.mxu0 %vm1267_vm1, %v4959_v42  ;;  %v10722_v63 = vunpack.i.h.bf16 %v10720_v52  ;;  %v10721_v18 = vunpack.i.l.bf16 %v10720_v52 }
0x10fb   :  { %9806 = vmatmul.mubr.msk.bf16.vlgmr.msra.gmra.mxu0 %vm1267_vm1, %v4960_v24  ;;  %v4919_v21 = vsel %vm760_vm3, %v4684_v12, %v10712_v48  ;;  %v4918_v29 = vsel %vm760_vm3, %v4726_v39, %v10711_v3  ;;  %v4694_v24 = vsel %vm134_vm0, %v4691_v22, %v4693_v19  ;;  %v4692_v3 = vsel %vm134_vm0, %v4689_v58, %v4691_v22 }
0x10fc   :  { %v10715_v16 = vpop.permute.xlu0 %10714  ;;  %v4921_v14 = vsel %vm760_vm3, %v4688_v57, %v10722_v63  ;;  %v4920_v43 = vsel %vm760_vm3, %v4728_v20, %v10721_v18  ;;  %v4696_v39 = vsel %vm134_vm0, %v4693_v19, %v4695_v40  ;;  %v4697_v18 = vrot.slane %v13147_v17, 4 }
0x10fd   :  { %v10717_v23 = vunpack.i.h.bf16 %v10715_v16  ;;  %v10716_v7 = vunpack.i.l.bf16 %v10715_v16  ;;  %v10725_v62 = vpop.permute.xlu1 %10724  ;;  %v4701_v12 = vrot.slane %v13154_v30, 4  ;;  %v4732_v57 = vsel %vm1647_vm12, 0.0, %v4694_v24 }
0x10fe   :  { %v10727_v11 = vunpack.i.h.bf16 %v10725_v62  ;;  %v10726_v49 = vunpack.i.l.bf16 %v10725_v62 }
0x10ff   :  { %v4934_v54 = vsel %vm398_vm2, %v4918_v29, %v10716_v7  ;;  %v4935_v61 = vsel %vm398_vm2, %v4919_v21, %v10717_v23  ;;  %v4699_v7 = vrot.slane %v13166_v6, 4 }
0x1100   :  { %v4936_v37 = vsel %vm398_vm2, %v4920_v43, %v10726_v49  ;;  %v4937_v1 = vsel %vm398_vm2, %v4921_v14, %v10727_v11  ;;  %v10730_v35 = vpop.permute.xlu0 %10729  ;;  %v4961_v15 = vpack.c.bf16 %v4935_v61, %v4934_v54  ;;  %v4703_v54 = vrot.slane %v13160_v13, 4 }
0x1101   :  { %v10740_v32 = vpop.permute.xlu1 %10739  ;;  %v4962_v50 = vpack.c.bf16 %v4937_v1, %v4936_v37  ;;  %v10732_v60 = vunpack.i.h.bf16 %v10730_v35  ;;  %v10731_v42 = vunpack.i.l.bf16 %v10730_v35  ;;  %v4698_v37 = vsel %vm134_vm0, %v4695_v40, %v4697_v18 }
0x1102   :  { %9809 = vmatprep.mubr.msk.bf16.mxu0 %vm1267_vm1, %v4961_v15  ;;  %v10742_v52 = vunpack.i.h.bf16 %v10740_v32  ;;  %v10741_v48 = vunpack.i.l.bf16 %v10740_v32  ;;  %v4734_v24 = vsel %vm1649_vm15, 0.0, %v4698_v37  ;;  %v4700_v40 = vsel %vm134_vm0, %v4697_v18, %v4699_v7 }
0x1103   :  { %9810 = vmatmul.mubr.msk.bf16.gmra.mxu0 %vm1267_vm1, %v4962_v50  ;;  %v4923_v62 = vsel %vm760_vm3, %v4692_v3, %v10732_v60  ;;  %v4922_v36 = vsel %vm760_vm3, %v4730_v28, %v10731_v42  ;;  %v4702_v50 = vsel %vm134_vm0, %v4699_v7, %v4701_v12  ;;  %v4704_v28 = vsel %vm134_vm0, %v4701_v12, %v4703_v54 }
0x1104   :  { %v10735_v63 = vpop.permute.xlu0 %10734  ;;  %v4925_v19 = vsel %vm760_vm3, %v4696_v39, %v10742_v52  ;;  %v4924_v21 = vsel %vm760_vm3, %v4732_v57, %v10741_v48  ;;  %v4736_v48 = vsel %vm1651_vm14, 0.0, %v4702_v50 }
0x1105   :  { %v10737_v20 = vunpack.i.h.bf16 %v10735_v63  ;;  %v10736_v16 = vunpack.i.l.bf16 %v10735_v63  ;;  %v10745_v23 = vpop.permute.xlu1 %10744 }
0x1106   :  { %v10747_v58 = vunpack.i.h.bf16 %v10745_v23  ;;  %v10746_v22 = vunpack.i.l.bf16 %v10745_v23 }
0x1107   :  { %v4938_v29 = vsel %vm398_vm2, %v4922_v36, %v10736_v16  ;;  %v4939_v11 = vsel %vm398_vm2, %v4923_v62, %v10737_v20 }
0x1108   :  { %v4940_v49 = vsel %vm398_vm2, %v4924_v21, %v10746_v22  ;;  %v4941_v14 = vsel %vm398_vm2, %v4925_v19, %v10747_v58  ;;  %v10750_v43 = vpop.permute.xlu0 %10749  ;;  %v4963_v61 = vpack.c.bf16 %v4939_v11, %v4938_v29  ;;  %v8745_v11 = vld [vmem:[%s14566_s7 + $0xf] ss:$0 sm:$0xff] }
0x1109   :  { %v10760_v1 = vpop.permute.xlu1 %10759  ;;  %v4964_v35 = vpack.c.bf16 %v4941_v14, %v4940_v49  ;;  %v10752_v15 = vunpack.i.h.bf16 %v10750_v43  ;;  %v10751_v32 = vunpack.i.l.bf16 %v10750_v43 }
0x110a   :  { %9813 = vmatprep.mubr.msk.bf16.mxu0 %vm1267_vm1, %v4963_v61  ;;  %v10762_v60 = vunpack.i.h.bf16 %v10760_v1  ;;  %v10761_v42 = vunpack.i.l.bf16 %v10760_v1 }
0x110b   :  { %9814 = vmatmul.mubr.msk.bf16.gmra.mxu0 %vm1267_vm1, %v4964_v35  ;;  %v4927_v57 = vsel %vm760_vm3, %v4700_v40, %v10752_v15  ;;  %v4926_v20 = vsel %vm760_vm3, %v4734_v24, %v10751_v32 }
0x110c   :  { %v10755_v52 = vpop.permute.xlu0 %10754  ;;  %v4929_v62 = vsel %vm760_vm3, %v4704_v28, %v10762_v60  ;;  %v4928_v36 = vsel %vm760_vm3, %v4736_v48, %v10761_v42 }
0x110d   :  { %v10757_v3 = vunpack.i.h.bf16 %v10755_v52  ;;  %v10756_v39 = vunpack.i.l.bf16 %v10755_v52  ;;  %v10765_v63 = vpop.permute.xlu1 %10764 }
0x110e   :  { %v10767_v16 = vunpack.i.h.bf16 %v10765_v63  ;;  %v10766_v23 = vunpack.i.l.bf16 %v10765_v63 }
0x110f   :  { %v4942_v12 = vsel %vm398_vm2, %v4926_v20, %v10756_v39  ;;  %v4943_v18 = vsel %vm398_vm2, %v4927_v57, %v10757_v3 }
0x1110   :  { %v4944_v7 = vsel %vm398_vm2, %v4928_v36, %v10766_v23  ;;  %v4945_v58 = vsel %vm398_vm2, %v4929_v62, %v10767_v16  ;;  %v4965_v22 = vpack.c.bf16 %v4943_v18, %v4942_v12 }
0x1111   :  { %v4966_v19 = vpack.c.bf16 %v4945_v58, %v4944_v7 }
0x1112   :  { %9817 = vmatprep.mubr.msk.bf16.mxu0 %vm1267_vm1, %v4965_v22 }
0x1113   :  { %9818 = vmatmul.mubr.msk.bf16.gmra.mxu0 %vm1267_vm1, %v4966_v19 }
0x11bb   :  { %v9807_v21 = vpop.f32.mrf.mxu0 }
0x11bc   :  { %v5078_v54 = vadd.f32 %v9807_v21, %v8745_v11 }
0x11bd   :  { %v5069_v29 = vpop.f32.mrf.mxu0 }
0x11be   :  { %v5070_v14 = vadd.f32 %v8745_v11, %v5069_v29  ;;  %v5134_v50 = vmax.f32 %v5078_v54, 0.0 }
0x11bf   :  { %v9808_v49 = vpop.f32.mrf.mxu0 }
0x11c0   :  { %v5081_v43 = vadd.f32 %v9808_v49, %v8745_v11  ;;  %v5132_v15 = vmax.f32 %v5070_v14, 0.0 }
0x11c1   :  { %v5072_v61 = vpop.f32.mrf.mxu0 }
0x11c2   :  { %v5073_v37 = vadd.f32 %v8745_v11, %v5072_v61  ;;  %v5135_v1 = vmax.f32 %v5081_v43, 0.0 }
0x11c3   :  { %v9811_v35 = vpop.f32.mrf.mxu0 }
0x11c4   :  { %v5133_v32 = vmax.f32 %v5073_v37, 0.0  ;;  %v5154_v24 = vpack.c.bf16 %v5135_v1, %v5134_v50  ;;  %v5094_v48 = vadd.f32 %v9811_v35, %v8745_v11 }
0x11c5   :  { %v5085_v60 = vpop.f32.mrf.mxu0 }
0x11c6   :  { %v5153_v42 = vpack.c.bf16 %v5133_v32, %v5132_v15  ;;  %v5086_v52 = vadd.f32 %v8745_v11, %v5085_v60  ;;  %v5138_v23 = vmax.f32 %v5094_v48, 0.0 }
0x11c7   :  { %v9812_v28 = vpop.f32.mrf.mxu0 }
0x11c8   :  { %v5097_v40 = vadd.f32 %v9812_v28, %v8745_v11  ;;  %9825 = vmatprep.mubr.msk.bf16.mxu1 %vm760_vm3, %v5153_v42  ;;  %v5136_v20 = vmax.f32 %v5086_v52, 0.0 }
0x11c9   :  { %v5088_v3 = vpop.f32.mrf.mxu0  ;;  %9826 = vmatmul.mubr.msk.bf16.vlgmr.msra.gmra.mxu1 %vm760_vm3, %v5154_v24 }
0x11ca   :  { %v5089_v39 = vadd.f32 %v8745_v11, %v5088_v3  ;;  %v5139_v63 = vmax.f32 %v5097_v40, 0.0 }
0x11cb   :  { %v9815_v57 = vpop.f32.mrf.mxu0 }
0x11cc   :  { %v5137_v16 = vmax.f32 %v5089_v39, 0.0  ;;  %v5156_v12 = vpack.c.bf16 %v5139_v63, %v5138_v23  ;;  %v5110_v22 = vadd.f32 %v9815_v57, %v8745_v11  ;;  %v10908_v39 = vld [vmem:[%s14565_s6 + $0x328] sm:$0xff]   ;;  %v10909_v63 = vld [vmem:[%s14565_s6 + $0x320] sm:$0xff]   ;;  %v10911_v57 = vld [vmem:[%s14565_s6 + $0x310] sm:$0xff]  }
0x11cd   :  { %v5101_v62 = vpop.f32.mrf.mxu0  ;;  %9841 = vmatprep.subr.bf16.mxu0 %v10908_v39  ;;  %v13317_v23 = vld [vmem:[%s14568_s9 + $0xf] ss:$0 sm:$0xff] }
0x11ce   :  { %v5155_v36 = vpack.c.bf16 %v5137_v16, %v5136_v20  ;;  %v5102_v7 = vadd.f32 %v8745_v11, %v5101_v62  ;;  %v5142_v54 = vmax.f32 %v5110_v22, 0.0  ;;  %9842 = vmatpush3.bf16.msra.mxu0 %v10908_v39  ;;  %v10912_v20 = vld [vmem:[%s14565_s6 + $0x308] sm:$0xff]  }
0x11cf   :  { %v9816_v18 = vpop.f32.mrf.mxu0  ;;  %9843 = vmatprep.subr.bf16.mxu0 %v10909_v63 }
0x11d0   :  { %v5113_v58 = vadd.f32 %v9816_v18, %v8745_v11  ;;  %9829 = vmatprep.mubr.msk.bf16.mxu1 %vm760_vm3, %v5155_v36  ;;  %v5140_v14 = vmax.f32 %v5102_v7, 0.0 }
0x11d1   :  { %v5104_v19 = vpop.f32.mrf.mxu0  ;;  %9830 = vmatmul.mubr.msk.bf16.gmra.mxu1 %vm760_vm3, %v5156_v12 }
0x11d2   :  { %v5105_v21 = vadd.f32 %v8745_v11, %v5104_v19  ;;  %v5143_v29 = vmax.f32 %v5113_v58, 0.0  ;;  %9844 = vmatpush3.bf16.msra.mxu0 %v10909_v63 }
0x11d3   :  { %v9819_v49 = vpop.f32.mrf.mxu0 }
0x11d4   :  { %v5141_v43 = vmax.f32 %v5105_v21, 0.0  ;;  %v5158_v1 = vpack.c.bf16 %v5143_v29, %v5142_v54  ;;  %v5126_v50 = vadd.f32 %v9819_v49, %v8745_v11  ;;  %v10913_v54 = vld [vmem:[%s14565_s6 + $0x300] sm:$0xff]  }
0x11d5   :  { %v5117_v61 = vpop.f32.mrf.mxu0 }
0x11d6   :  { %v5157_v37 = vpack.c.bf16 %v5141_v43, %v5140_v14  ;;  %v5118_v15 = vadd.f32 %v8745_v11, %v5117_v61  ;;  %v5146_v40 = vmax.f32 %v5126_v50, 0.0 }
0x11d7   :  { %v9820_v35 = vpop.f32.mrf.mxu0 }
0x11d8   :  { %v5129_v32 = vadd.f32 %v9820_v35, %v8745_v11  ;;  %9833 = vmatprep.mubr.msk.bf16.mxu1 %vm760_vm3, %v5157_v37  ;;  %v5144_v28 = vmax.f32 %v5118_v15, 0.0 }
0x11d9   :  { %v5120_v60 = vpop.f32.mrf.mxu0  ;;  %9834 = vmatmul.mubr.msk.bf16.gmra.mxu1 %vm760_vm3, %v5158_v1 }
0x11da   :  { %v5121_v42 = vadd.f32 %v8745_v11, %v5120_v60  ;;  %v5147_v24 = vmax.f32 %v5129_v32, 0.0  ;;  %v10910_v11 = vld [vmem:[%s14565_s6 + $0x318] sm:$0xff]  }
0x11db   :  { %9845 = vmatprep.subr.bf16.mxu0 %v10910_v11 }
0x11dc   :  { %v5145_v52 = vmax.f32 %v5121_v42, 0.0  ;;  %v5160_v3 = vpack.c.bf16 %v5147_v24, %v5146_v40  ;;  %9846 = vmatpush3.bf16.msra.mxu0 %v10910_v11 }
0x11dd   :  { %9847 = vmatprep.subr.bf16.mxu0 %v10911_v57 }
0x11de   :  { %v5159_v48 = vpack.c.bf16 %v5145_v52, %v5144_v28 }
0x11e0   :  { %9837 = vmatprep.mubr.msk.bf16.mxu1 %vm760_vm3, %v5159_v48  ;;  %9848 = vmatpush3.bf16.msra.mxu0 %v10911_v57 }
0x11e1   :  { %9838 = vmatmul.mubr.msk.bf16.gmra.mxu1 %vm760_vm3, %v5160_v3  ;;  %9849 = vmatprep.subr.bf16.mxu0 %v10912_v20 }
0x11e4   :  { %9850 = vmatpush3.bf16.msra.mxu0 %v10912_v20 }
0x11e5   :  { %9851 = vmatprep.subr.bf16.mxu0 %v10913_v54 }
0x11e8   :  { %9852 = vmatpush3.bf16.msra.mxu0 %v10913_v54 }
0x1289   :  { %v9827_v16 = vpop.f32.mrf.mxu1 }
0x128a   :  { %v5248_v36 = vadd.f32 %v9827_v16, %v13317_v23 }
0x128b   :  { %v5239_v62 = vpop.f32.mrf.mxu1 }
0x128c   :  { %v5240_v12 = vadd.f32 %v13317_v23, %v5239_v62  ;;  %v13326_v19 = vadd.f32 %v5248_v36, %v13054_v55 }
0x128d   :  { %v9828_v18 = vpop.f32.mrf.mxu1 }
0x128e   :  { %v13322_v7 = vadd.f32 %v5240_v12, %v13050_v51  ;;  %v5251_v58 = vadd.f32 %v9828_v18, %v13317_v23  ;;  %v5352_v35 = vrot.slane %v13326_v19, 4 }
0x128f   :  { %v5242_v22 = vpop.f32.mrf.mxu1 }
0x1290   :  { %v13329_v21 = vadd.f32 %v5251_v58, %v13057_v31  ;;  %v5243_v29 = vadd.f32 %v13317_v23, %v5242_v22  ;;  %v5349_v49 = vrot.slane %v13322_v7, 4 }
0x1291   :  { %v9831_v14 = vpop.f32.mrf.mxu1 }
0x1292   :  { %v13334_v43 = vadd.f32 %v5243_v29, %v13062_v9  ;;  %v5396_v51 = vsel %vm134_vm0, 0.0, %v5349_v49  ;;  %v5264_v55 = vadd.f32 %v9831_v14, %v13317_v23  ;;  %v5354_v31 = vrot.slane %v13329_v21, 4 }
0x1293   :  { %v5255_v61 = vpop.f32.mrf.mxu1  ;;  %v5397_v15 = vsel %vm1637_vm7, 0.0, %v5396_v51  ;;  %v10783_v62 = vpack.i.bf16 %v13329_v21, %v13326_v19 }
0x1294   :  { %v5256_v37 = vadd.f32 %v13317_v23, %v5255_v61  ;;  %v5350_v1 = vrot.slane %v13334_v43, 4  ;;  %v13354_v24 = vadd.f32 %v5264_v55, %v13082_v53  ;;  %v5355_v40 = vsel %vm134_vm0, %v5352_v35, %v5354_v31 }
0x1295   :  { %v9832_v9 = vpop.f32.mrf.mxu1 }
0x1296   :  { %v13348_v32 = vadd.f32 %v5256_v37, %v13076_v44  ;;  %v5267_v50 = vadd.f32 %v9832_v9, %v13317_v23  ;;  %v5351_v60 = vsel %vm134_vm0, %v5349_v49, %v5350_v1  ;;  %v5353_v42 = vsel %vm134_vm0, %v5350_v1, %v5352_v35 }
0x1297   :  { %v5258_v28 = vpop.f32.mrf.mxu1  ;;  %v10768_v52 = vpack.i.bf16 %v5351_v60, %v5397_v15  ;;  %v5399_v34 = vsel %vm1639_vm8, 0.0, %v5353_v42  ;;  %v5360_v36 = vrot.slane %v13354_v24, 4 }
0x1298   :  { %v13360_v48 = vadd.f32 %v5267_v50, %v13088_v8  ;;  %v5259_v44 = vadd.f32 %v13317_v23, %v5258_v28  ;;  %v10778_v3 = vpack.i.bf16 %v5355_v40, %v5399_v34  ;;  %v5356_v39 = vrot.slane %v13348_v32, 4 }
0x1299   :  { %v9835_v63 = vpop.f32.mrf.mxu1  ;;  %10769 = vrot.lane.b32.xlu0 %v10768_v52, %s11290_s25  ;;  %v10773_v8 = vpack.i.bf16 %v13334_v43, %v13322_v7 }
0x129a   :  { %v13366_v53 = vadd.f32 %v5259_v44, %v13094_v59  ;;  %10779 = vrot.lane.b32.xlu1 %v10778_v3, %s11290_s25  ;;  %v5357_v11 = vsel %vm134_vm0, %v5354_v31, %v5356_v39  ;;  %v5280_v38 = vadd.f32 %v9835_v63, %v13317_v23  ;;  %v5362_v20 = vrot.slane %v13360_v48, 4 }
0x129b   :  { %v5271_v57 = vpop.f32.mrf.mxu1  ;;  %v5401_v18 = vsel %vm1641_vm9, 0.0, %v5357_v11  ;;  %v10803_v60 = vpack.i.bf16 %v13360_v48, %v13354_v24 }
0x129c   :  { %v5272_v16 = vadd.f32 %v13317_v23, %v5271_v57  ;;  %v5358_v59 = vrot.slane %v13366_v53, 4  ;;  %v13390_v14 = vadd.f32 %v5280_v38, %v13118_v25  ;;  %v5363_v55 = vsel %vm134_vm0, %v5360_v36, %v5362_v20 }
0x129d   :  { %v9836_v12 = vpop.f32.mrf.mxu1  ;;  %10774 = vrot.lane.b32.xlu0 %v10773_v8, %s11289_s24 }
0x129e   :  { %v13383_v58 = vadd.f32 %v5272_v16, %v13111_v26  ;;  %v5283_v22 = vadd.f32 %v9836_v12, %v13317_v23  ;;  %10784 = vrot.lane.b32.xlu1 %v10783_v62, %s11289_s24  ;;  %v5359_v29 = vsel %vm134_vm0, %v5356_v39, %v5358_v59  ;;  %v5361_v49 = vsel %vm134_vm0, %v5358_v59, %v5360_v36 }
0x129f   :  { %v5274_v51 = vpop.f32.mrf.mxu1  ;;  %v10788_v54 = vpack.i.bf16 %v5359_v29, %v5401_v18  ;;  %v5403_v0 = vsel %vm1643_vm10, 0.0, %v5361_v49  ;;  %v5368_v42 = vrot.slane %v13390_v14, 4  ;;  %v10914_v18 = vld [vmem:[%s14567_s8 + $0x108] sm:$0xff]  }
0x12a0   :  { %v13396_v26 = vadd.f32 %v5283_v22, %v13124_v56  ;;  %v5275_v61 = vadd.f32 %v13317_v23, %v5274_v51  ;;  %v10798_v31 = vpack.i.bf16 %v5363_v55, %v5403_v0  ;;  %v5364_v37 = vrot.slane %v13383_v58, 4  ;;  %v10915_v22 = vld [vmem:[%s14567_s8 + $0x100] sm:$0xff]   ;;  %9869 = vmatprep.subr.bf16.mxu1 %v10914_v18 }
0x12a1   :  { %v9839_v1 = vpop.f32.mrf.mxu1  ;;  %10789 = vrot.lane.b32.xlu0 %v10788_v54, %s11290_s25  ;;  %v10793_v56 = vpack.i.bf16 %v13366_v53, %v13348_v32  ;;  %9870 = vmatpush3.bf16.msra.mxu1 %v10914_v18 }
0x12a2   :  { %v13402_v25 = vadd.f32 %v5275_v61, %v13130_v41  ;;  %10799 = vrot.lane.b32.xlu1 %v10798_v31, %s11290_s25  ;;  %v5365_v35 = vsel %vm134_vm0, %v5362_v20, %v5364_v37  ;;  %v5296_v5 = vadd.f32 %v9839_v1, %v13317_v23  ;;  %v5370_v15 = vrot.slane %v13396_v26, 4  ;;  %9871 = vmatprep.subr.bf16.mxu1 %v10915_v22 }
0x12a3   :  { %v5287_v9 = vpop.f32.mrf.mxu1  ;;  %v5405_v52 = vsel %vm1645_vm11, 0.0, %v5365_v35 }
0x12a4   :  { %v5288_v50 = vadd.f32 %v13317_v23, %v5287_v9  ;;  %v5366_v41 = vrot.slane %v13402_v25, 4  ;;  %v13426_v39 = vadd.f32 %v5296_v5, %v13154_v30  ;;  %v5371_v38 = vsel %vm134_vm0, %v5368_v42, %v5370_v15 }
0x12a5   :  { %v9840_v28 = vpop.f32.mrf.mxu1  ;;  %10794 = vrot.lane.b32.xlu0 %v10793_v56, %s11289_s24  ;;  %v10813_v16 = vpack.i.bf16 %v13402_v25, %v13383_v58  ;;  %9872 = vmatpush3.bf16.msra.mxu1 %v10915_v22 }
0x12a6   :  { %v13419_v40 = vadd.f32 %v5288_v50, %v13147_v17  ;;  %v5299_v34 = vadd.f32 %v9840_v28, %v13317_v23  ;;  %10804 = vrot.lane.b32.xlu1 %v10803_v60, %s11289_s24  ;;  %v5367_v44 = vsel %vm134_vm0, %v5364_v37, %v5366_v41  ;;  %v5369_v3 = vsel %vm134_vm0, %v5366_v41, %v5368_v42 }
0x12a7   :  { %v5290_v63 = vpop.f32.mrf.mxu1  ;;  %v10808_v11 = vpack.i.bf16 %v5367_v44, %v5405_v52  ;;  %v5407_v27 = vsel %vm1647_vm12, 0.0, %v5369_v3  ;;  %v5376_v59 = vrot.slane %v13426_v39, 4 }
0x12a8   :  { %v13432_v17 = vadd.f32 %v5299_v34, %v13160_v13  ;;  %v5291_v57 = vadd.f32 %v13317_v23, %v5290_v63  ;;  %v10818_v8 = vpack.i.bf16 %v5371_v38, %v5407_v27  ;;  %v5372_v20 = vrot.slane %v13419_v40, 4 }
0x12a9   :  { %10809 = vrot.lane.b32.xlu0 %v10808_v11, %s11290_s25  ;;  %v10823_v23 = vpack.i.bf16 %v13396_v26, %v13390_v14 }
0x12aa   :  { %v13438_v30 = vadd.f32 %v5291_v57, %v13166_v6  ;;  %10819 = vrot.lane.b32.xlu1 %v10818_v8, %s11290_s25  ;;  %v5373_v33 = vsel %vm134_vm0, %v5370_v15, %v5372_v20  ;;  %v5378_v13 = vrot.slane %v13432_v17, 4  ;;  %v10843_v55 = vpack.i.bf16 %v13432_v17, %v13426_v39 }
0x12ab   :  { %v5409_v36 = vsel %vm1649_vm15, 0.0, %v5373_v33 }
0x12ac   :  { %v5374_v62 = vrot.slane %v13438_v30, 4  ;;  %v5379_v49 = vsel %vm134_vm0, %v5376_v59, %v5378_v13  ;;  %v10833_v2 = vpack.i.bf16 %v13438_v30, %v13419_v40 }
0x12ad   :  { %10814 = vrot.lane.b32.xlu0 %v10813_v16, %s11289_s24 }
0x12ae   :  { %10824 = vrot.lane.b32.xlu1 %v10823_v23, %s11289_s24  ;;  %v5375_v6 = vsel %vm134_vm0, %v5372_v20, %v5374_v62  ;;  %v5377_v12 = vsel %vm134_vm0, %v5374_v62, %v5376_v59 }
0x12af   :  { %v10828_v29 = vpack.i.bf16 %v5375_v6, %v5409_v36  ;;  %v5411_v51 = vsel %vm1651_vm14, 0.0, %v5377_v12 }
0x12b0   :  { %v10838_v54 = vpack.i.bf16 %v5379_v49, %v5411_v51 }
0x12b1   :  { %10829 = vrot.lane.b32.xlu0 %v10828_v29, %s11290_s25 }
0x12b2   :  { %10839 = vrot.lane.b32.xlu1 %v10838_v54, %s11290_s25 }
0x12b5   :  { %10834 = vrot.lane.b32.xlu0 %v10833_v2, %s11289_s24 }
0x12b6   :  { %10844 = vrot.lane.b32.xlu1 %v10843_v55, %s11289_s24 }
0x130b   :  { %v10770_v10 = vpop.permute.xlu0 %10769 }
0x130c   :  { %v10780_v0 = vpop.permute.xlu1 %10779  ;;  %v10772_v61 = vunpack.i.h.bf16 %v10770_v10  ;;  %v10771_v31 = vunpack.i.l.bf16 %v10770_v10 }
0x130d   :  { %v10782_v37 = vunpack.i.h.bf16 %v10780_v0  ;;  %v10781_v1 = vunpack.i.l.bf16 %v10780_v0 }
0x130e   :  { %v5526_v15 = vsel %vm760_vm3, %v13322_v7, %v10772_v61  ;;  %v5525_v50 = vsel %vm760_vm3, 0.0, %v10771_v31 }
0x130f   :  { %v10775_v35 = vpop.permute.xlu0 %10774  ;;  %v5528_v42 = vsel %vm760_vm3, %v13326_v19, %v10782_v37  ;;  %v5527_v28 = vsel %vm760_vm3, 0.0, %v10781_v1 }
0x1310   :  { %v10777_v5 = vunpack.i.h.bf16 %v10775_v35  ;;  %v10776_v9 = vunpack.i.l.bf16 %v10775_v35  ;;  %v10785_v56 = vpop.permute.xlu1 %10784 }
0x1311   :  { %v10787_v60 = vunpack.i.h.bf16 %v10785_v56  ;;  %v10786_v41 = vunpack.i.l.bf16 %v10785_v56 }
0x1312   :  { %v5541_v52 = vsel %vm398_vm2, %v5525_v50, %v10776_v9  ;;  %v5542_v34 = vsel %vm398_vm2, %v5526_v15, %v10777_v5 }
0x1313   :  { %v5543_v44 = vsel %vm398_vm2, %v5527_v28, %v10786_v41  ;;  %v5544_v3 = vsel %vm398_vm2, %v5528_v42, %v10787_v60  ;;  %v10790_v63 = vpop.permute.xlu0 %10789  ;;  %v5570_v11 = vpack.c.bf16 %v5542_v34, %v5541_v52 }
0x1314   :  { %v5571_v38 = vpack.c.bf16 %v5544_v3, %v5543_v44  ;;  %v10800_v27 = vpop.permute.xlu1 %10799  ;;  %v10792_v57 = vunpack.i.h.bf16 %v10790_v63  ;;  %v10791_v8 = vunpack.i.l.bf16 %v10790_v63 }
0x1315   :  { %9853 = vmatprep.mubr.msk.bf16.mxu0 %vm1267_vm1, %v5570_v11  ;;  %v10802_v20 = vunpack.i.h.bf16 %v10800_v27  ;;  %v10801_v16 = vunpack.i.l.bf16 %v10800_v27 }
0x1316   :  { %9854 = vmatmul.mubr.msk.bf16.vlgmr.msra.gmra.mxu0 %vm1267_vm1, %v5571_v38  ;;  %v5530_v59 = vsel %vm760_vm3, %v13348_v32, %v10792_v57  ;;  %v5529_v6 = vsel %vm760_vm3, 0.0, %v10791_v8 }
0x1317   :  { %v10795_v33 = vpop.permute.xlu0 %10794  ;;  %v5532_v18 = vsel %vm760_vm3, %v13354_v24, %v10802_v20  ;;  %v5531_v22 = vsel %vm760_vm3, 0.0, %v10801_v16 }
0x1318   :  { %v10797_v13 = vunpack.i.h.bf16 %v10795_v33  ;;  %v10796_v23 = vunpack.i.l.bf16 %v10795_v33  ;;  %v10805_v62 = vpop.permute.xlu1 %10804 }
0x1319   :  { %v10807_v36 = vunpack.i.h.bf16 %v10805_v62  ;;  %v10806_v12 = vunpack.i.l.bf16 %v10805_v62 }
0x131a   :  { %v5545_v29 = vsel %vm398_vm2, %v5529_v6, %v10796_v23  ;;  %v5546_v49 = vsel %vm398_vm2, %v5530_v59, %v10797_v13 }
0x131b   :  { %v5547_v51 = vsel %vm398_vm2, %v5531_v22, %v10806_v12  ;;  %v5548_v54 = vsel %vm398_vm2, %v5532_v18, %v10807_v36  ;;  %v10810_v2 = vpop.permute.xlu0 %10809  ;;  %v5572_v55 = vpack.c.bf16 %v5546_v49, %v5545_v29 }
0x131c   :  { %v10820_v10 = vpop.permute.xlu1 %10819  ;;  %v5573_v0 = vpack.c.bf16 %v5548_v54, %v5547_v51  ;;  %v10812_v61 = vunpack.i.h.bf16 %v10810_v2  ;;  %v10811_v31 = vunpack.i.l.bf16 %v10810_v2 }
0x131d   :  { %9857 = vmatprep.mubr.msk.bf16.mxu0 %vm1267_vm1, %v5572_v55  ;;  %v10822_v37 = vunpack.i.h.bf16 %v10820_v10  ;;  %v10821_v1 = vunpack.i.l.bf16 %v10820_v10 }
0x131e   :  { %9858 = vmatmul.mubr.msk.bf16.gmra.mxu0 %vm1267_vm1, %v5573_v0  ;;  %v5534_v15 = vsel %vm760_vm3, %v13383_v58, %v10812_v61  ;;  %v5533_v50 = vsel %vm760_vm3, 0.0, %v10811_v31  ;;  %v8789_v61 = vld [vmem:[%s14566_s7 + $0x10] ss:$0 sm:$0xff] }
0x131f   :  { %v10815_v35 = vpop.permute.xlu0 %10814  ;;  %v5536_v42 = vsel %vm760_vm3, %v13390_v14, %v10822_v37  ;;  %v5535_v28 = vsel %vm760_vm3, 0.0, %v10821_v1 }
0x1320   :  { %v10817_v5 = vunpack.i.h.bf16 %v10815_v35  ;;  %v10816_v9 = vunpack.i.l.bf16 %v10815_v35  ;;  %v10825_v56 = vpop.permute.xlu1 %10824 }
0x1321   :  { %v10827_v60 = vunpack.i.h.bf16 %v10825_v56  ;;  %v10826_v41 = vunpack.i.l.bf16 %v10825_v56 }
0x1322   :  { %v5549_v52 = vsel %vm398_vm2, %v5533_v50, %v10816_v9  ;;  %v5550_v34 = vsel %vm398_vm2, %v5534_v15, %v10817_v5 }
0x1323   :  { %v5551_v44 = vsel %vm398_vm2, %v5535_v28, %v10826_v41  ;;  %v5552_v3 = vsel %vm398_vm2, %v5536_v42, %v10827_v60  ;;  %v10830_v63 = vpop.permute.xlu0 %10829  ;;  %v5574_v11 = vpack.c.bf16 %v5550_v34, %v5549_v52 }
0x1324   :  { %v10840_v38 = vpop.permute.xlu1 %10839  ;;  %v5575_v27 = vpack.c.bf16 %v5552_v3, %v5551_v44  ;;  %v10832_v57 = vunpack.i.h.bf16 %v10830_v63  ;;  %v10831_v8 = vunpack.i.l.bf16 %v10830_v63 }
0x1325   :  { %9861 = vmatprep.mubr.msk.bf16.mxu0 %vm1267_vm1, %v5574_v11  ;;  %v10842_v20 = vunpack.i.h.bf16 %v10840_v38  ;;  %v10841_v16 = vunpack.i.l.bf16 %v10840_v38 }
0x1326   :  { %9862 = vmatmul.mubr.msk.bf16.gmra.mxu0 %vm1267_vm1, %v5575_v27  ;;  %v5538_v59 = vsel %vm760_vm3, %v13419_v40, %v10832_v57  ;;  %v5537_v6 = vsel %vm760_vm3, 0.0, %v10831_v8 }
0x1327   :  { %v10835_v33 = vpop.permute.xlu0 %10834  ;;  %v5540_v18 = vsel %vm760_vm3, %v13426_v39, %v10842_v20  ;;  %v5539_v22 = vsel %vm760_vm3, 0.0, %v10841_v16 }
0x1328   :  { %v10837_v13 = vunpack.i.h.bf16 %v10835_v33  ;;  %v10836_v23 = vunpack.i.l.bf16 %v10835_v33  ;;  %v10845_v62 = vpop.permute.xlu1 %10844 }
0x1329   :  { %v10847_v36 = vunpack.i.h.bf16 %v10845_v62  ;;  %v10846_v12 = vunpack.i.l.bf16 %v10845_v62 }
0x132a   :  { %v5553_v29 = vsel %vm398_vm2, %v5537_v6, %v10836_v23  ;;  %v5554_v49 = vsel %vm398_vm2, %v5538_v59, %v10837_v13 }
0x132b   :  { %v5555_v51 = vsel %vm398_vm2, %v5539_v22, %v10846_v12  ;;  %v5556_v54 = vsel %vm398_vm2, %v5540_v18, %v10847_v36  ;;  %v5576_v2 = vpack.c.bf16 %v5554_v49, %v5553_v29 }
0x132c   :  { %v5577_v55 = vpack.c.bf16 %v5556_v54, %v5555_v51 }
0x132d   :  { %9865 = vmatprep.mubr.msk.bf16.mxu0 %vm1267_vm1, %v5576_v2 }
0x132e   :  { %9866 = vmatmul.mubr.msk.bf16.gmra.mxu0 %vm1267_vm1, %v5577_v55 }
0x13d6   :  { %v9855_v10 = vpop.f32.mrf.mxu0 }
0x13d7   :  { %v5689_v35 = vadd.f32 %v9855_v10, %v8789_v61 }
0x13d8   :  { %v5680_v0 = vpop.f32.mrf.mxu0 }
0x13d9   :  { %v5681_v37 = vadd.f32 %v8789_v61, %v5680_v0  ;;  %v5745_v41 = vmax.f32 %v5689_v35, 0.0 }
0x13da   :  { %v9856_v31 = vpop.f32.mrf.mxu0 }
0x13db   :  { %v5692_v1 = vadd.f32 %v9856_v31, %v8789_v61  ;;  %v5743_v50 = vmax.f32 %v5681_v37, 0.0 }
0x13dc   :  { %v5683_v5 = vpop.f32.mrf.mxu0 }
0x13dd   :  { %v5684_v9 = vadd.f32 %v8789_v61, %v5683_v5  ;;  %v5746_v56 = vmax.f32 %v5692_v1, 0.0 }
0x13de   :  { %v9859_v15 = vpop.f32.mrf.mxu0 }
0x13df   :  { %v5744_v60 = vmax.f32 %v5684_v9, 0.0  ;;  %v5765_v52 = vpack.c.bf16 %v5746_v56, %v5745_v41  ;;  %v5705_v63 = vadd.f32 %v9859_v15, %v8789_v61 }
0x13e0   :  { %v5696_v42 = vpop.f32.mrf.mxu0 }
0x13e1   :  { %v5764_v28 = vpack.c.bf16 %v5744_v60, %v5743_v50  ;;  %v5697_v44 = vadd.f32 %v8789_v61, %v5696_v42  ;;  %v5749_v16 = vmax.f32 %v5705_v63, 0.0  ;;  %v10916_v42 = vld [vmem:[%s14565_s6 + $0x358] sm:$0xff]  }
0x13e2   :  { %v9860_v34 = vpop.f32.mrf.mxu0  ;;  %9889 = vmatprep.subr.bf16.mxu0 %v10916_v42 }
0x13e3   :  { %v5708_v3 = vadd.f32 %v9860_v34, %v8789_v61  ;;  %9873 = vmatprep.mubr.msk.bf16.mxu1 %vm760_vm3, %v5764_v28  ;;  %v5747_v8 = vmax.f32 %v5697_v44, 0.0  ;;  %v10917_v28 = vld [vmem:[%s14565_s6 + $0x350] sm:$0xff]   ;;  %9890 = vmatpush3.bf16.msra.mxu0 %v10916_v42 }
0x13e4   :  { %v5699_v11 = vpop.f32.mrf.mxu0  ;;  %9874 = vmatmul.mubr.msk.bf16.vlgmr.msra.gmra.mxu1 %vm760_vm3, %v5765_v52  ;;  %9891 = vmatprep.subr.bf16.mxu0 %v10917_v28  ;;  %v10919_v52 = vld [vmem:[%s14565_s6 + $0x340] sm:$0xff]   ;;  %v8809_v44 = vld [vmem:[%s14568_s9 + $0x10] ss:$0 sm:$0xff] }
0x13e5   :  { %v5700_v38 = vadd.f32 %v8789_v61, %v5699_v11  ;;  %v5750_v27 = vmax.f32 %v5708_v3, 0.0 }
0x13e6   :  { %v9863_v57 = vpop.f32.mrf.mxu0 }
0x13e7   :  { %v5748_v20 = vmax.f32 %v5700_v38, 0.0  ;;  %v5767_v23 = vpack.c.bf16 %v5750_v27, %v5749_v16  ;;  %v5721_v36 = vadd.f32 %v9863_v57, %v8789_v61  ;;  %9892 = vmatpush3.bf16.msra.mxu0 %v10917_v28 }
0x13e8   :  { %v5712_v33 = vpop.f32.mrf.mxu0 }
0x13e9   :  { %v5766_v13 = vpack.c.bf16 %v5748_v20, %v5747_v8  ;;  %v5713_v59 = vadd.f32 %v8789_v61, %v5712_v33  ;;  %v5753_v54 = vmax.f32 %v5721_v36, 0.0 }
0x13ea   :  { %v9864_v62 = vpop.f32.mrf.mxu0 }
0x13eb   :  { %v5724_v6 = vadd.f32 %v9864_v62, %v8789_v61  ;;  %9877 = vmatprep.mubr.msk.bf16.mxu1 %vm760_vm3, %v5766_v13  ;;  %v5751_v49 = vmax.f32 %v5713_v59, 0.0 }
0x13ec   :  { %v5715_v12 = vpop.f32.mrf.mxu0  ;;  %9878 = vmatmul.mubr.msk.bf16.gmra.mxu1 %vm760_vm3, %v5767_v23 }
0x13ed   :  { %v5716_v18 = vadd.f32 %v8789_v61, %v5715_v12  ;;  %v5754_v22 = vmax.f32 %v5724_v6, 0.0 }
0x13ee   :  { %v9867_v29 = vpop.f32.mrf.mxu0 }
0x13ef   :  { %v5752_v51 = vmax.f32 %v5716_v18, 0.0  ;;  %v5769_v10 = vpack.c.bf16 %v5754_v22, %v5753_v54  ;;  %v5737_v1 = vadd.f32 %v9867_v29, %v8789_v61 }
0x13f0   :  { %v5728_v2 = vpop.f32.mrf.mxu0 }
0x13f1   :  { %v5768_v55 = vpack.c.bf16 %v5752_v51, %v5751_v49  ;;  %v5729_v31 = vadd.f32 %v8789_v61, %v5728_v2  ;;  %v5757_v50 = vmax.f32 %v5737_v1, 0.0 }
0x13f2   :  { %v9868_v0 = vpop.f32.mrf.mxu0 }
0x13f3   :  { %v5740_v37 = vadd.f32 %v9868_v0, %v8789_v61  ;;  %9881 = vmatprep.mubr.msk.bf16.mxu1 %vm760_vm3, %v5768_v55  ;;  %v5755_v56 = vmax.f32 %v5729_v31, 0.0 }
0x13f4   :  { %v5731_v35 = vpop.f32.mrf.mxu0  ;;  %9882 = vmatmul.mubr.msk.bf16.gmra.mxu1 %vm760_vm3, %v5769_v10 }
0x13f5   :  { %v5732_v5 = vadd.f32 %v8789_v61, %v5731_v35  ;;  %v5758_v9 = vmax.f32 %v5740_v37, 0.0  ;;  %v10918_v61 = vld [vmem:[%s14565_s6 + $0x348] sm:$0xff]  }
0x13f6   :  { %9893 = vmatprep.subr.bf16.mxu0 %v10918_v61 }
0x13f7   :  { %v5756_v15 = vmax.f32 %v5732_v5, 0.0  ;;  %v5771_v41 = vpack.c.bf16 %v5758_v9, %v5757_v50  ;;  %9894 = vmatpush3.bf16.msra.mxu0 %v10918_v61 }
0x13f8   :  { %9895 = vmatprep.subr.bf16.mxu0 %v10919_v52 }
0x13f9   :  { %v5770_v60 = vpack.c.bf16 %v5756_v15, %v5755_v56 }
0x13fb   :  { %9885 = vmatprep.mubr.msk.bf16.mxu1 %vm760_vm3, %v5770_v60  ;;  %9896 = vmatpush3.bf16.msra.mxu0 %v10919_v52 }
0x13fc   :  { %9886 = vmatmul.mubr.msk.bf16.gmra.mxu1 %vm760_vm3, %v5771_v41  ;;  %v10921_v41 = vld [vmem:[%s14567_s8 + $0x110] sm:$0xff]  }
0x14a4   :  { %v9875_v34 = vpop.f32.mrf.mxu1 }
0x14a5   :  { %v5859_v63 = vadd.f32 %v9875_v34, %v8809_v44 }
0x14a6   :  { %v5850_v3 = vpop.f32.mrf.mxu1 }
0x14a7   :  { %v5851_v38 = vadd.f32 %v8809_v44, %v5850_v3  ;;  %v13547_v8 = vadd.f32 %v5859_v63, %v13326_v19 }
0x14a8   :  { %v9876_v11 = vpop.f32.mrf.mxu1 }
0x14a9   :  { %v5862_v27 = vadd.f32 %v9876_v11, %v8809_v44  ;;  %v13553_v13 = vadd.f32 %v5851_v38, %v13322_v7 }
0x14aa   :  { %v5853_v57 = vpop.f32.mrf.mxu1 }
0x14ab   :  { %v13550_v20 = vadd.f32 %v5862_v27, %v13329_v21  ;;  %v5854_v16 = vadd.f32 %v8809_v44, %v5853_v57 }
0x14ac   :  { %v9879_v33 = vpop.f32.mrf.mxu1 }
0x14ad   :  { %v13556_v23 = vadd.f32 %v5854_v16, %v13334_v43  ;;  %v10853_v62 = vpack.i.bf16 %v13550_v20, %v13547_v8  ;;  %v5875_v6 = vadd.f32 %v9879_v33, %v8809_v44 }
0x14ae   :  { %v5866_v59 = vpop.f32.mrf.mxu1 }
0x14af   :  { %10854 = vrot.lane.b32.xlu1 %v10853_v62, %s11290_s25  ;;  %v10848_v19 = vpack.i.bf16 %v13556_v23, %v13553_v13  ;;  %v5867_v36 = vadd.f32 %v8809_v44, %v5866_v59  ;;  %v13565_v18 = vadd.f32 %v5875_v6, %v13354_v24 }
0x14b0   :  { %v9880_v21 = vpop.f32.mrf.mxu1 }
0x14b1   :  { %v5878_v12 = vadd.f32 %v9880_v21, %v8809_v44  ;;  %10849 = vrot.lane.b32.xlu0 %v10848_v19, %s11290_s25  ;;  %v13571_v49 = vadd.f32 %v5867_v36, %v13348_v32 }
0x14b2   :  { %v5869_v7 = vpop.f32.mrf.mxu1 }
0x14b3   :  { %v13568_v43 = vadd.f32 %v5878_v12, %v13360_v48  ;;  %v5870_v22 = vadd.f32 %v8809_v44, %v5869_v7 }
0x14b4   :  { %v9883_v29 = vpop.f32.mrf.mxu1 }
0x14b5   :  { %v13574_v51 = vadd.f32 %v5870_v22, %v13366_v53  ;;  %v10863_v54 = vpack.i.bf16 %v13568_v43, %v13565_v18  ;;  %v5891_v55 = vadd.f32 %v9883_v29, %v8809_v44 }
0x14b6   :  { %v5882_v2 = vpop.f32.mrf.mxu1 }
0x14b7   :  { %10864 = vrot.lane.b32.xlu1 %v10863_v54, %s11290_s25  ;;  %v10858_v24 = vpack.i.bf16 %v13574_v51, %v13571_v49  ;;  %v5883_v10 = vadd.f32 %v8809_v44, %v5882_v2  ;;  %v13583_v31 = vadd.f32 %v5891_v55, %v13390_v14 }
0x14b8   :  { %v9884_v48 = vpop.f32.mrf.mxu1 }
0x14b9   :  { %v5894_v0 = vadd.f32 %v9884_v48, %v8809_v44  ;;  %10859 = vrot.lane.b32.xlu0 %v10858_v24, %s11290_s25  ;;  %v13589_v35 = vadd.f32 %v5883_v10, %v13383_v58 }
0x14ba   :  { %v5885_v32 = vpop.f32.mrf.mxu1 }
0x14bb   :  { %v13586_v53 = vadd.f32 %v5894_v0, %v13396_v26  ;;  %v5886_v37 = vadd.f32 %v8809_v44, %v5885_v32 }
0x14bc   :  { %v9887_v1 = vpop.f32.mrf.mxu1 }
0x14bd   :  { %v13592_v5 = vadd.f32 %v5886_v37, %v13402_v25  ;;  %v10873_v9 = vpack.i.bf16 %v13586_v53, %v13583_v31  ;;  %v5907_v15 = vadd.f32 %v9887_v1, %v8809_v44  ;;  %v10920_v25 = vld [vmem:[%s14567_s8 + $0x118] sm:$0xff]  }
0x14be   :  { %v5898_v56 = vpop.f32.mrf.mxu1  ;;  %9913 = vmatprep.subr.bf16.mxu1 %v10920_v25 }
0x14bf   :  { %10874 = vrot.lane.b32.xlu1 %v10873_v9, %s11290_s25  ;;  %v10868_v14 = vpack.i.bf16 %v13592_v5, %v13589_v35  ;;  %v5899_v50 = vadd.f32 %v8809_v44, %v5898_v56  ;;  %v13607_v42 = vadd.f32 %v5907_v15, %v13426_v39  ;;  %9914 = vmatpush3.bf16.msra.mxu1 %v10920_v25 }
0x14c0   :  { %v9888_v26 = vpop.f32.mrf.mxu1  ;;  %9915 = vmatprep.subr.bf16.mxu1 %v10921_v41 }
0x14c1   :  { %v5910_v60 = vadd.f32 %v9888_v26, %v8809_v44  ;;  %10869 = vrot.lane.b32.xlu0 %v10868_v14, %s11290_s25  ;;  %v13613_v52 = vadd.f32 %v5899_v50, %v13419_v40 }
0x14c2   :  { %v5901_v58 = vpop.f32.mrf.mxu1 }
0x14c3   :  { %v13610_v28 = vadd.f32 %v5910_v60, %v13432_v17  ;;  %v5902_v61 = vadd.f32 %v8809_v44, %v5901_v58  ;;  %9916 = vmatpush3.bf16.msra.mxu1 %v10921_v41 }
0x14c5   :  { %v13616_v34 = vadd.f32 %v5902_v61, %v13438_v30  ;;  %v10883_v3 = vpack.i.bf16 %v13610_v28, %v13607_v42 }
0x14c7   :  { %10884 = vrot.lane.b32.xlu1 %v10883_v3, %s11290_s25  ;;  %v10878_v39 = vpack.i.bf16 %v13616_v34, %v13613_v52 }
0x14c9   :  { %10879 = vrot.lane.b32.xlu0 %v10878_v39, %s11290_s25 }
0x1521   :  { %v10855_v17 = vpop.permute.xlu1 %10854 }
0x1522   :  { %v10857_v44 = vunpack.i.h.bf16 %v10855_v17  ;;  %v10856_v40 = vunpack.i.l.bf16 %v10855_v17 }
0x1523   :  { %v10850_v63 = vpop.permute.xlu0 %10849 }
0x1524   :  { %v10852_v11 = vunpack.i.h.bf16 %v10850_v63  ;;  %v10851_v30 = vunpack.i.l.bf16 %v10850_v63  ;;  %v6011_v38 = vsel %vm760_vm3, %v13547_v8, %v10857_v44  ;;  %v6010_v27 = vsel %vm760_vm3, 0.0, %v10856_v40 }
0x1525   :  { %v6034_v62 = vpack.c.bf16 %v6011_v38, %v6010_v27  ;;  %v8829_v38 = vld [vmem:[%s14566_s7 + $0x11] ss:$0 sm:$0xff] }
0x1526   :  { %v6009_v57 = vsel %vm760_vm3, %v13553_v13, %v10852_v11  ;;  %v6008_v16 = vsel %vm760_vm3, 0.0, %v10851_v30 }
0x1527   :  { %v6033_v33 = vpack.c.bf16 %v6009_v57, %v6008_v16 }
0x1529   :  { %v10865_v59 = vpop.permute.xlu1 %10864  ;;  %9897 = vmatprep.mubr.msk.bf16.mxu0 %vm398_vm2, %v6033_v33 }
0x152a   :  { %v10867_v6 = vunpack.i.h.bf16 %v10865_v59  ;;  %v10866_v19 = vunpack.i.l.bf16 %v10865_v59  ;;  %9898 = vmatmul.mubr.msk.bf16.vlgmr.msra.gmra.mxu0 %vm398_vm2, %v6034_v62 }
0x152b   :  { %v10860_v21 = vpop.permute.xlu0 %10859 }
0x152c   :  { %v10862_v36 = vunpack.i.h.bf16 %v10860_v21  ;;  %v10861_v12 = vunpack.i.l.bf16 %v10860_v21  ;;  %v6015_v7 = vsel %vm760_vm3, %v13565_v18, %v10867_v6  ;;  %v6014_v22 = vsel %vm760_vm3, 0.0, %v10866_v19 }
0x152d   :  { %v6036_v55 = vpack.c.bf16 %v6015_v7, %v6014_v22 }
0x152e   :  { %v6013_v29 = vsel %vm760_vm3, %v13571_v49, %v10862_v36  ;;  %v6012_v54 = vsel %vm760_vm3, 0.0, %v10861_v12 }
0x152f   :  { %v6035_v2 = vpack.c.bf16 %v6013_v29, %v6012_v54 }
0x1531   :  { %v10875_v24 = vpop.permute.xlu1 %10874  ;;  %9901 = vmatprep.mubr.msk.bf16.mxu0 %vm398_vm2, %v6035_v2 }
0x1532   :  { %v10877_v48 = vunpack.i.h.bf16 %v10875_v24  ;;  %v10876_v10 = vunpack.i.l.bf16 %v10875_v24  ;;  %9902 = vmatmul.mubr.msk.bf16.gmra.mxu0 %vm398_vm2, %v6036_v55 }
0x1533   :  { %v10870_v0 = vpop.permute.xlu0 %10869 }
0x1534   :  { %v10872_v32 = vunpack.i.h.bf16 %v10870_v0  ;;  %v10871_v37 = vunpack.i.l.bf16 %v10870_v0  ;;  %v6019_v1 = vsel %vm760_vm3, %v13583_v31, %v10877_v48  ;;  %v6018_v9 = vsel %vm760_vm3, 0.0, %v10876_v10 }
0x1535   :  { %v6038_v26 = vpack.c.bf16 %v6019_v1, %v6018_v9 }
0x1536   :  { %v6017_v56 = vsel %vm760_vm3, %v13589_v35, %v10872_v32  ;;  %v6016_v15 = vsel %vm760_vm3, 0.0, %v10871_v37 }
0x1537   :  { %v6037_v14 = vpack.c.bf16 %v6017_v56, %v6016_v15 }
0x1539   :  { %v10885_v50 = vpop.permute.xlu1 %10884  ;;  %9905 = vmatprep.mubr.msk.bf16.mxu0 %vm398_vm2, %v6037_v14 }
0x153a   :  { %v10887_v60 = vunpack.i.h.bf16 %v10885_v50  ;;  %v10886_v58 = vunpack.i.l.bf16 %v10885_v50  ;;  %9906 = vmatmul.mubr.msk.bf16.gmra.mxu0 %vm398_vm2, %v6038_v26 }
0x153b   :  { %v10880_v25 = vpop.permute.xlu0 %10879 }
0x153c   :  { %v10882_v41 = vunpack.i.h.bf16 %v10880_v25  ;;  %v10881_v61 = vunpack.i.l.bf16 %v10880_v25  ;;  %v6023_v3 = vsel %vm760_vm3, %v13607_v42, %v10887_v60  ;;  %v6022_v39 = vsel %vm760_vm3, 0.0, %v10886_v58 }
0x153d   :  { %v6040_v63 = vpack.c.bf16 %v6023_v3, %v6022_v39 }
0x153e   :  { %v6021_v17 = vsel %vm760_vm3, %v13613_v52, %v10882_v41  ;;  %v6020_v44 = vsel %vm760_vm3, 0.0, %v10881_v61 }
0x153f   :  { %v6039_v40 = vpack.c.bf16 %v6021_v17, %v6020_v44 }
0x1541   :  { %9909 = vmatprep.mubr.msk.bf16.mxu0 %vm398_vm2, %v6039_v40 }
0x1542   :  { %9910 = vmatmul.mubr.msk.bf16.gmra.mxu0 %vm398_vm2, %v6040_v63 }
0x15ea   :  { %v9899_v11 = vpop.f32.mrf.mxu0 }
0x15eb   :  { %v6140_v33 = vadd.f32 %v9899_v11, %v8829_v38 }
0x15ec   :  { %v6131_v30 = vpop.f32.mrf.mxu0 }
0x15ed   :  { %v6132_v57 = vadd.f32 %v8829_v38, %v6131_v30  ;;  %v6196_v12 = vmax.f32 %v6140_v33, 0.0 }
0x15ee   :  { %v9900_v27 = vpop.f32.mrf.mxu0 }
0x15ef   :  { %v6143_v16 = vadd.f32 %v9900_v27, %v8829_v38  ;;  %v6194_v21 = vmax.f32 %v6132_v57, 0.0 }
0x15f0   :  { %v6134_v62 = vpop.f32.mrf.mxu0 }
0x15f1   :  { %v6135_v59 = vadd.f32 %v8829_v38, %v6134_v62  ;;  %v6197_v6 = vmax.f32 %v6143_v16, 0.0 }
0x15f2   :  { %v9903_v19 = vpop.f32.mrf.mxu0 }
0x15f3   :  { %v6195_v36 = vmax.f32 %v6135_v59, 0.0  ;;  %v6216_v29 = vpack.c.bf16 %v6197_v6, %v6196_v12  ;;  %v6156_v24 = vadd.f32 %v9903_v19, %v8829_v38 }
0x15f4   :  { %v6147_v7 = vpop.f32.mrf.mxu0 }
0x15f5   :  { %v6215_v22 = vpack.c.bf16 %v6195_v36, %v6194_v21  ;;  %v6148_v2 = vadd.f32 %v8829_v38, %v6147_v7  ;;  %v6200_v9 = vmax.f32 %v6156_v24, 0.0  ;;  %v8847_v7 = vld [vmem:[%s14568_s9 + $0x11] ss:$0 sm:$0xff] }
0x15f6   :  { %v9904_v54 = vpop.f32.mrf.mxu0 }
0x15f7   :  { %v6159_v55 = vadd.f32 %v9904_v54, %v8829_v38  ;;  %9917 = vmatprep.mubr.msk.bf16.mxu1 %vm760_vm3, %v6215_v22  ;;  %v6198_v37 = vmax.f32 %v6148_v2, 0.0 }
0x15f8   :  { %v6150_v48 = vpop.f32.mrf.mxu0  ;;  %9918 = vmatmul.mubr.msk.bf16.vlgmr.msra.gmra.mxu1 %vm760_vm3, %v6216_v29 }
0x15f9   :  { %v6151_v10 = vadd.f32 %v8829_v38, %v6150_v48  ;;  %v6201_v0 = vmax.f32 %v6159_v55, 0.0 }
0x15fa   :  { %v9907_v32 = vpop.f32.mrf.mxu0 }
0x15fb   :  { %v6199_v1 = vmax.f32 %v6151_v10, 0.0  ;;  %v6218_v14 = vpack.c.bf16 %v6201_v0, %v6200_v9  ;;  %v6172_v58 = vadd.f32 %v9907_v32, %v8829_v38 }
0x15fc   :  { %v6163_v56 = vpop.f32.mrf.mxu0 }
0x15fd   :  { %v6217_v15 = vpack.c.bf16 %v6199_v1, %v6198_v37  ;;  %v6164_v50 = vadd.f32 %v8829_v38, %v6163_v56  ;;  %v6204_v44 = vmax.f32 %v6172_v58, 0.0 }
0x15fe   :  { %v9908_v26 = vpop.f32.mrf.mxu0 }
0x15ff   :  { %v6175_v60 = vadd.f32 %v9908_v26, %v8829_v38  ;;  %9921 = vmatprep.mubr.msk.bf16.mxu1 %vm760_vm3, %v6217_v15  ;;  %v6202_v39 = vmax.f32 %v6164_v50, 0.0 }
0x1600   :  { %v6166_v25 = vpop.f32.mrf.mxu0  ;;  %9922 = vmatmul.mubr.msk.bf16.gmra.mxu1 %vm760_vm3, %v6218_v14 }
0x1601   :  { %v6167_v41 = vadd.f32 %v8829_v38, %v6166_v25  ;;  %v6205_v61 = vmax.f32 %v6175_v60, 0.0 }
0x1602   :  { %v9911_v3 = vpop.f32.mrf.mxu0 }
0x1603   :  { %v6203_v17 = vmax.f32 %v6167_v41, 0.0  ;;  %v6220_v11 = vpack.c.bf16 %v6205_v61, %v6204_v44  ;;  %v6188_v16 = vadd.f32 %v9911_v3, %v8829_v38 }
0x1604   :  { %v6179_v40 = vpop.f32.mrf.mxu0 }
0x1605   :  { %v6219_v63 = vpack.c.bf16 %v6203_v17, %v6202_v39  ;;  %v6180_v27 = vadd.f32 %v8829_v38, %v6179_v40  ;;  %v6208_v21 = vmax.f32 %v6188_v16, 0.0 }
0x1606   :  { %v9912_v30 = vpop.f32.mrf.mxu0 }
0x1607   :  { %v6191_v57 = vadd.f32 %v9912_v30, %v8829_v38  ;;  %9925 = vmatprep.mubr.msk.bf16.mxu1 %vm760_vm3, %v6219_v63  ;;  %v6206_v6 = vmax.f32 %v6180_v27, 0.0 }
0x1608   :  { %v6182_v33 = vpop.f32.mrf.mxu0  ;;  %9926 = vmatmul.mubr.msk.bf16.gmra.mxu1 %vm760_vm3, %v6220_v11 }
0x1609   :  { %v6183_v62 = vadd.f32 %v8829_v38, %v6182_v33  ;;  %v6209_v59 = vmax.f32 %v6191_v57, 0.0 }
0x160b   :  { %v6207_v19 = vmax.f32 %v6183_v62, 0.0  ;;  %v6222_v12 = vpack.c.bf16 %v6209_v59, %v6208_v21 }
0x160d   :  { %v6221_v36 = vpack.c.bf16 %v6207_v19, %v6206_v6 }
0x160f   :  { %9929 = vmatprep.mubr.msk.bf16.mxu1 %vm760_vm3, %v6221_v36 }
0x1610   :  { %9930 = vmatmul.mubr.msk.bf16.gmra.mxu1 %vm760_vm3, %v6222_v12 }
0x16b8   :  { %v9919_v22 = vpop.f32.mrf.mxu1 }
0x16b9   :  { %v6310_v29 = vadd.f32 %v9919_v22, %v8847_v7 }
0x16ba   :  { %v6301_v54 = vpop.f32.mrf.mxu1 }
0x16bb   :  { %v6366_v2 = vadd.f32 %v6310_v29, %v13547_v8   ;;  %v6302_v38 = vadd.f32 %v8847_v7, %v6301_v54 }
0x16bc   :  { %v9920_v55 = vpop.f32.mrf.mxu1 }
0x16bd   :  { %v6364_v24 = vadd.f32 %v6302_v38, %v13553_v13   ;;  %v6313_v48 = vadd.f32 %v9920_v55, %v8847_v7 }
0x16be   :  { %v6304_v10 = vpop.f32.mrf.mxu1 }
0x16bf   :  { %v6367_v0 = vadd.f32 %v6313_v48, %v13550_v20   ;;  %v6305_v32 = vadd.f32 %v8847_v7, %v6304_v10 }
0x16c0   :  { %v9923_v37 = vpop.f32.mrf.mxu1 }
0x16c1   :  { %v6365_v1 = vadd.f32 %v6305_v32, %v13556_v23   ;;  %v6326_v9 = vadd.f32 %v9923_v37, %v8847_v7 }
0x16c2   :  { %v6317_v56 = vpop.f32.mrf.mxu1 }
0x16c3   :  { %v6370_v15 = vadd.f32 %v6326_v9, %v13565_v18   ;;  %v6318_v14 = vadd.f32 %v8847_v7, %v6317_v56 }
0x16c4   :  { %v9924_v26 = vpop.f32.mrf.mxu1 }
0x16c5   :  { %v6368_v8 = vadd.f32 %v6318_v14, %v13571_v49   ;;  %v6329_v50 = vadd.f32 %v9924_v26, %v8847_v7 }
0x16c6   :  { %v6320_v60 = vpop.f32.mrf.mxu1 }
0x16c7   :  { %v6371_v13 = vadd.f32 %v6329_v50, %v13568_v43   ;;  %v6321_v58 = vadd.f32 %v8847_v7, %v6320_v60 }
0x16c8   :  { %v9927_v25 = vpop.f32.mrf.mxu1 }
0x16c9   :  { %v6369_v20 = vadd.f32 %v6321_v58, %v13574_v51   ;;  %v6342_v41 = vadd.f32 %v9927_v25, %v8847_v7 }
0x16ca   :  { %v6333_v61 = vpop.f32.mrf.mxu1 }
0x16cb   :  { %v6374_v23 = vadd.f32 %v6342_v41, %v13583_v31   ;;  %v6334_v3 = vadd.f32 %v8847_v7, %v6333_v61 }
0x16cc   :  { %v9928_v39 = vpop.f32.mrf.mxu1 }
0x16cd   :  { %v6372_v18 = vadd.f32 %v6334_v3, %v13589_v35   ;;  %v6345_v17 = vadd.f32 %v9928_v39, %v8847_v7 }
0x16ce   :  { %v6336_v44 = vpop.f32.mrf.mxu1 }
0x16cf   :  { %v6375_v49 = vadd.f32 %v6345_v17, %v13586_v53   ;;  %v6337_v40 = vadd.f32 %v8847_v7, %v6336_v44 }
0x16d0   :  { %v9931_v63 = vpop.f32.mrf.mxu1 }
0x16d1   :  { %v6373_v43 = vadd.f32 %v6337_v40, %v13592_v5   ;;  %v6358_v11 = vadd.f32 %v9931_v63, %v8847_v7 }
0x16d2   :  { %v6349_v30 = vpop.f32.mrf.mxu1 }
0x16d3   :  { %v6378_v51 = vadd.f32 %v6358_v11, %v13607_v42   ;;  %v6350_v27 = vadd.f32 %v8847_v7, %v6349_v30 }
0x16d4   :  { %v9932_v57 = vpop.f32.mrf.mxu1 }
0x16d5   :  { %v6376_v31 = vadd.f32 %v6350_v27, %v13613_v52   ;;  %v6361_v16 = vadd.f32 %v9932_v57, %v8847_v7 }
0x16d6   :  { %v6352_v33 = vpop.f32.mrf.mxu1 }
0x16d7   :  { %v6379_v35 = vadd.f32 %v6361_v16, %v13610_v28   ;;  %v6353_v62 = vadd.f32 %v8847_v7, %v6352_v33 }
0x16d9   :  { %v6377_v59 = vadd.f32 %v6353_v62, %v13616_v34  }
0x16da LB: > { %s8858_s29 = smul.u32 48, %s11286_s22  ;;  %v6410_v53 = vpack.c.bf16 %v11278_v1, %v11282_v24  ;;  %v6411_v28 = vpack.c.bf16 %v11270_v0, %v11274_v2  ;;  %v6412_v52 = vpack.c.bf16 %v11262_v20, %v11266_v8  ;;  %v6413_v34 = vpack.c.bf16 %v11254_v13, %v11258_v15  ;;  %s8996_s27 = sshll.u32 %s11286_s22, 4  ;;  %s11286_s22 = sphi %s13718_s22, %s6385_s22   ;;  %v11282_v24 = vphi %v6364_v24, %v14676_v24   ;;  %v11278_v1 = vphi %v6365_v1, %v14675_v1   ;;  %v11274_v2 = vphi %v6366_v2, %v14674_v2   ;;  %v11270_v0 = vphi %v6367_v0, %v14673_v0   ;;  %v11266_v8 = vphi %v6368_v8, %v14672_v8   ;;  %v11262_v20 = vphi %v6369_v20, %v14671_v20   ;;  %v11258_v15 = vphi %v6370_v15, %v14670_v15   ;;  %v11254_v13 = vphi %v6371_v13, %v14669_v13   ;;  %v11250_v18 = vphi %v6372_v18, %v14668_v18   ;;  %v11246_v43 = vphi %v6373_v43, %v14667_v43   ;;  %v11242_v23 = vphi %v6374_v23, %v14666_v23   ;;  %v11238_v49 = vphi %v6375_v49, %v14665_v49   ;;  %v11234_v31 = vphi %v6376_v31, %v14664_v31   ;;  %v11230_v59 = vphi %v6377_v59, %v14663_v59   ;;  %v11226_v51 = vphi %v6378_v51, %v14662_v51   ;;  %v11222_v35 = vphi %v6379_v35, %v14661_v35  }
0x16db   : > { %v6414_v6 = vpack.c.bf16 %v11246_v43, %v11250_v18  ;;  %v6415_v19 = vpack.c.bf16 %v11238_v49, %v11242_v23  ;;  %v6416_v21 = vpack.c.bf16 %v11230_v59, %v11234_v31  ;;  %v6417_v36 = vpack.c.bf16 %v11222_v35, %v11226_v51  ;;  %s8330_s30 = scalar_lea.vmem %s14567_s8, %s8996_s27  ;;  %s8326_s17 = scalar_lea.vmem %s14566_s7, %s11286_s22 }
0x16dc   : > { %s8324_s26 = scalar_lea.vmem %s14565_s6, %s8858_s29  ;;  %9937 = vmatprep.mubr.msk.bf16.mxu0 %vm760_vm3, %v6410_v53  ;;  %v10924_v12 = vld [vmem:[%s8330_s30 + $0xe8] sm:$0xff]   ;;  %v10925_v7 = vld [vmem:[%s8330_s30 + $0xe0] sm:$0xff]   ;;  %s8332_s4 = scalar_lea.vmem %s14568_s9, %s11286_s22 }
0x16dd   : > { %v10922_v5 = vld [vmem:[%s8324_s26 + $0x2c8] sm:$0xff]   ;;  %v10923_v42 = vld [vmem:[%s8324_s26 + $0x2c0] sm:$0xff]   ;;  %9953 = vmatprep.subr.bf16.mxu1 %v10924_v12  ;;  %s6385_s22 = sadd.s32 1, %s11286_s22  }
0x16de   : > { %9933 = vmatprep.subr.bf16.mxu0 %v10922_v5  ;;  %9954 = vmatpush3.bf16.msra.mxu1 %v10924_v12  ;;  %v8864_v54 = vld [vmem:[%s8326_s17 + $0xe] ss:$0 sm:$0xff]  ;;  %p13852_p1 = scmp.ge.s32.totalorder %s6385_s22, 14  }
0x16df   : > { %9934 = vmatpush3.bf16.msra.mxu0 %v10922_v5  ;;  %9955 = vmatprep.subr.bf16.mxu1 %v10925_v7 }
0x16e0   : > { %9935 = vmatprep.subr.bf16.mxu0 %v10923_v42 }
0x16e2   : > { %9956 = vmatpush3.bf16.msra.mxu1 %v10925_v7 }
0x16e3   : > { %9936 = vmatpush3.bf16.msra.mxu0 %v10923_v42 }
0x16e6   : > { %9938 = vmatmul.mubr.msk.bf16.vlgmr.msra.gmra.mxu0 %vm760_vm3, %v6411_v28 }
0x16e7   : > { %9941 = vmatprep.mubr.msk.bf16.mxu0 %vm760_vm3, %v6412_v52 }
0x16ee   : > { %9942 = vmatmul.mubr.msk.bf16.gmra.mxu0 %vm760_vm3, %v6413_v34 }
0x16ef   : > { %9945 = vmatprep.mubr.msk.bf16.mxu0 %vm760_vm3, %v6414_v6 }
0x16f6   : > { %9946 = vmatmul.mubr.msk.bf16.gmra.mxu0 %vm760_vm3, %v6415_v19 }
0x16f7   : > { %9949 = vmatprep.mubr.msk.bf16.mxu0 %vm760_vm3, %v6416_v21 }
0x16fe   : > { %9950 = vmatmul.mubr.msk.bf16.gmra.mxu0 %vm760_vm3, %v6417_v36 }
0x17a6   : > { %v9939_v22 = vpop.f32.mrf.mxu0 }
0x17a7   : > { %v6506_v10 = vadd.f32 %v9939_v22, %v8864_v54 }
0x17a8   : > { %v6497_v29 = vpop.f32.mrf.mxu0 }
0x17a9   : > { %v6498_v55 = vadd.f32 %v8864_v54, %v6497_v29  ;;  %v6562_v50 = vmax.f32 %v6506_v10, 0.0 }
0x17aa   : > { %v9940_v38 = vpop.f32.mrf.mxu0 }
0x17ab   : > { %v6509_v48 = vadd.f32 %v9940_v38, %v8864_v54  ;;  %v6560_v14 = vmax.f32 %v6498_v55, 0.0 }
0x17ac   : > { %v6500_v32 = vpop.f32.mrf.mxu0 }
0x17ad   : > { %v6501_v37 = vadd.f32 %v8864_v54, %v6500_v32  ;;  %v6563_v9 = vmax.f32 %v6509_v48, 0.0 }
0x17ae   : > { %v9943_v56 = vpop.f32.mrf.mxu0 }
0x17af   : > { %v6561_v26 = vmax.f32 %v6501_v37, 0.0  ;;  %v6585_v25 = vpack.c.bf16 %v6563_v9, %v6562_v50  ;;  %v6522_v39 = vadd.f32 %v9943_v56, %v8864_v54 }
0x17b0   : > { %v6513_v60 = vpop.f32.mrf.mxu0 }
0x17b1   : > { %v6584_v58 = vpack.c.bf16 %v6561_v26, %v6560_v14  ;;  %v6514_v61 = vadd.f32 %v8864_v54, %v6513_v60  ;;  %v6566_v27 = vmax.f32 %v6522_v39, 0.0  ;;  %v8882_v60 = vld [vmem:[%s8332_s4 + $0xe] ss:$0 sm:$0xff] }
0x17b2   : > { %v9944_v41 = vpop.f32.mrf.mxu0 }
0x17b3   : > { %v6525_v3 = vadd.f32 %v9944_v41, %v8864_v54  ;;  %9957 = vmatprep.mubr.msk.bf16.mxu1 %vm760_vm3, %v6584_v58  ;;  %v6564_v11 = vmax.f32 %v6514_v61, 0.0 }
0x17b4   : > { %v6516_v17 = vpop.f32.mrf.mxu0  ;;  %9958 = vmatmul.mubr.msk.bf16.vlgmr.msra.gmra.mxu1 %vm760_vm3, %v6585_v25 }
0x17b5   : > { %v6517_v44 = vadd.f32 %v8864_v54, %v6516_v17  ;;  %v6567_v40 = vmax.f32 %v6525_v3, 0.0 }
0x17b6   : > { %v9947_v63 = vpop.f32.mrf.mxu0 }
0x17b7   : > { %v6565_v30 = vmax.f32 %v6517_v44, 0.0  ;;  %v6587_v33 = vpack.c.bf16 %v6567_v40, %v6566_v27  ;;  %v6538_v42 = vadd.f32 %v9947_v63, %v8864_v54 }
0x17b8   : > { %v6529_v57 = vpop.f32.mrf.mxu0 }
0x17b9   : > { %v6586_v16 = vpack.c.bf16 %v6565_v30, %v6564_v11  ;;  %v6530_v53 = vadd.f32 %v8864_v54, %v6529_v57  ;;  %v6570_v36 = vmax.f32 %v6538_v42, 0.0 }
0x17ba   : > { %v9948_v62 = vpop.f32.mrf.mxu0 }
0x17bb   : > { %v6541_v5 = vadd.f32 %v9948_v62, %v8864_v54  ;;  %9961 = vmatprep.mubr.msk.bf16.mxu1 %vm760_vm3, %v6586_v16  ;;  %v6568_v19 = vmax.f32 %v6530_v53, 0.0 }
0x17bc   : > { %v6532_v28 = vpop.f32.mrf.mxu0  ;;  %9962 = vmatmul.mubr.msk.bf16.gmra.mxu1 %vm760_vm3, %v6587_v33 }
0x17bd   : > { %v6533_v52 = vadd.f32 %v8864_v54, %v6532_v28  ;;  %v6571_v34 = vmax.f32 %v6541_v5, 0.0 }
0x17be   : > { %v9951_v6 = vpop.f32.mrf.mxu0 }
0x17bf   : > { %v6569_v21 = vmax.f32 %v6533_v52, 0.0  ;;  %v6589_v22 = vpack.c.bf16 %v6571_v34, %v6570_v36  ;;  %v6554_v48 = vadd.f32 %v9951_v6, %v8864_v54 }
0x17c0   : > { %v6545_v12 = vpop.f32.mrf.mxu0 }
0x17c1   : > { %v6588_v7 = vpack.c.bf16 %v6569_v21, %v6568_v19  ;;  %v6546_v38 = vadd.f32 %v8864_v54, %v6545_v12  ;;  %v6574_v14 = vmax.f32 %v6554_v48, 0.0 }
0x17c2   : > { %v9952_v29 = vpop.f32.mrf.mxu0 }
0x17c3   : > { %v6557_v55 = vadd.f32 %v9952_v29, %v8864_v54  ;;  %9965 = vmatprep.mubr.msk.bf16.mxu1 %vm760_vm3, %v6588_v7  ;;  %v6572_v9 = vmax.f32 %v6546_v38, 0.0 }
0x17c4   : > { %v6548_v10 = vpop.f32.mrf.mxu0  ;;  %9966 = vmatmul.mubr.msk.bf16.gmra.mxu1 %vm760_vm3, %v6589_v22 }
0x17c5   : > { %v6549_v32 = vadd.f32 %v8864_v54, %v6548_v10  ;;  %v6575_v37 = vmax.f32 %v6557_v55, 0.0 }
0x17c7   : > { %v6573_v56 = vmax.f32 %v6549_v32, 0.0  ;;  %v6591_v50 = vpack.c.bf16 %v6575_v37, %v6574_v14  ;;  %v10927_v14 = vld [vmem:[%s14569_s10 + $0x10] sm:$0xff] (%p13852_p1)  }
0x17c9   : > { %v6590_v26 = vpack.c.bf16 %v6573_v56, %v6572_v9  ;;  %v10926_v9 = vld [vmem:[%s14569_s10 + $0x18] sm:$0xff] (%p13852_p1)  }
0x17ca   :  { %9973 = vmatprep.subr.bf16.mxu0 (%p13852_p1), %v10926_v9  ;;  %9993 = vmatprep.subr.bf16.mxu1 (%p13852_p1), %v10926_v9 }
0x17cb   : > { %9969 = vmatprep.mubr.msk.bf16.mxu1 %vm760_vm3, %v6590_v26  ;;  %9974 = vmatpush3.bf16.msra.mxu0 (%p13852_p1), %v10926_v9 }
0x17cc   : > { %9970 = vmatmul.mubr.msk.bf16.gmra.mxu1 %vm760_vm3, %v6591_v50  ;;  %v10930_v50 = vld [vmem:[%s14571_s12 + $0x34] ss:$24 sps:$4 sm:$0xff] (%p13852_p1)   ;;  %9975 = vmatprep.subr.bf16.mxu0 (%p13852_p1), %v10927_v14 }
0x17cd   :  { %9995 = vmatpush3.bf16.msra.mxu1 (%p13852_p1), %v10926_v9 }
0x17ce   :  { %9994 = vmatprep.subr.bf16.mxu1 (%p13852_p1), %v10927_v14 }
0x17cf   :  { %9976 = vmatpush3.bf16.msra.mxu0 (%p13852_p1), %v10927_v14 }
0x17d1   :  { %9996 = vmatpush3.bf16.msra.mxu1 (%p13852_p1), %v10927_v14 }
0x17d2   :  { %7051 = vmatprep.subr.bf16.mxu1 (%p13852_p1), %v10930_v50 }
0x1874   : > { %v9959_v58 = vpop.f32.mrf.mxu1 }
0x1875   : > { %v6679_v25 = vadd.f32 %v9959_v58, %v8882_v60  ;;  %v10936_v58 = vld [vmem:[%s14571_s12 + $0x3c] ss:$24 sps:$4 sm:$0xff] (%p13852_p1)  }
0x1876   : > { %v6670_v41 = vpop.f32.mrf.mxu1  ;;  %7164 = vmatprep.subr.bf16.mxu0 (%p13852_p1), %v10936_v58 }
0x1877   : > { %v13820_v2 = vadd.f32 %v11274_v2, %v6679_v25   ;;  %v6671_v61 = vadd.f32 %v8882_v60, %v6670_v41  ;;  %v10934_v25 = vld [vmem:[%s14571_s12 + $0x38] ss:$24 sps:$4 sm:$0xff] (%p13852_p1)  }
0x1878   : > { %v9960_v3 = vpop.f32.mrf.mxu1  ;;  %v10931_v41 = vld [vmem:[%s14571_s12] ss:$24 sps:$4 sm:$0xff] (%p13852_p1)  }
0x1879   : > { %v14652_v54 = vmov %v13820_v2  ;;  %v13823_v24 = vadd.f32 %v11282_v24, %v6671_v61   ;;  %v6682_v17 = vadd.f32 %v9960_v3, %v8882_v60  ;;  %v10939_v61 = vld [vmem:[%s14571_s12 + $0xc] ss:$24 sps:$4 sm:$0xff] (%p13852_p1)   ;;  %v10937_v3 = vld [vmem:[%s14571_s12 + $0x8] ss:$24 sps:$4 sm:$0xff] (%p13852_p1)  }
0x187a   : > { %v6673_v44 = vpop.f32.mrf.mxu1 }
0x187b   : > { %v14653_v39 = vmov %v13823_v24  ;;  %v13826_v0 = vadd.f32 %v11270_v0, %v6682_v17   ;;  %v6674_v63 = vadd.f32 %v8882_v60, %v6673_v44 }
0x187c   : > { %v9963_v11 = vpop.f32.mrf.mxu1 }
0x187d   : > { %v14654_v40 = vmov %v13826_v0  ;;  %v6734_v30 = vadd.f32 %v11278_v1, %v6674_v63   ;;  %v6695_v27 = vadd.f32 %v9963_v11, %v8882_v60  ;;  %v13957_v11 = vld [vmem:[%s14570_s11 + $0x1] ss:$0 sm:$0xff] (%p13852_p1) }
0x187e   : > { %v6686_v57 = vpop.f32.mrf.mxu1 }
0x187f   : > { %v13830_v15 = vadd.f32 %v11258_v15, %v6695_v27   ;;  %v6687_v2 = vadd.f32 %v8882_v60, %v6686_v57  ;;  %v6754_v56 = vpack.c.bf16 (%p13852_p1), %v6734_v30, %v14653_v39 }
0x1880   : > { %v9964_v33 = vpop.f32.mrf.mxu1 }
0x1881   : > { %v14655_v16 = vmov %v13830_v15  ;;  %v13833_v8 = vadd.f32 %v11266_v8, %v6687_v2   ;;  %v6698_v24 = vadd.f32 %v9964_v33, %v8882_v60  ;;  %v14674_v2 = vmov %v14652_v54  ;;  %9977 = vmatprep.mubr.msk.bf16.mxu0 (%p13852_p1), %vm760_vm3, %v6754_v56  ;;  %v10967_v56 = vld [vmem:[%s14573_s14 + $0x8] sm:$0xff] (%p13852_p1)  }
0x1882   : > { %v6689_v53 = vpop.f32.mrf.mxu1  ;;  %v10940_v2 = vld [vmem:[%s14571_s12 + $0x40] ss:$24 sps:$4 sm:$0xff] (%p13852_p1)  }
0x1883   : > { %v14656_v62 = vmov %v13833_v8  ;;  %v13836_v13 = vadd.f32 %v11254_v13, %v6698_v24   ;;  %v6690_v0 = vadd.f32 %v8882_v60, %v6689_v53  ;;  %v14676_v24 = vmov %v14653_v39  ;;  %v10942_v39 = vld [vmem:[%s14571_s12 + $0x44] ss:$24 sps:$4 sm:$0xff] (%p13852_p1)  }
0x1884   : > { %v9967_v42 = vpop.f32.mrf.mxu1  ;;  %v10947_v53 = vld [vmem:[%s14573_s14 + $0x38] sm:$0xff] (%p13852_p1)  }
0x1885   : > { %v14657_v5 = vmov %v13836_v13  ;;  %v13839_v20 = vadd.f32 %v11262_v20, %v6690_v0   ;;  %v6711_v1 = vadd.f32 %v9967_v42, %v8882_v60  ;;  %v14673_v0 = vmov %v14654_v40 }
0x1886   : > { %v6702_v52 = vpop.f32.mrf.mxu1  ;;  %v10943_v0 = vld [vmem:[%s14571_s12 + $0x10] ss:$24 sps:$4 sm:$0xff] (%p13852_p1)  }
0x1887   : > { %v14658_v28 = vmov %v13839_v20  ;;  %v13842_v23 = vadd.f32 %v11242_v23, %v6711_v1   ;;  %v6703_v15 = vadd.f32 %v8882_v60, %v6702_v52  ;;  %v14675_v1 = vmov %v6734_v30  ;;  %v10949_v52 = vld [vmem:[%s14573_s14 + $0x30] sm:$0xff] (%p13852_p1)  }
0x1888   : > { %v9968_v6 = vpop.f32.mrf.mxu1 }
0x1889   : > { %v14659_v34 = vmov %v13842_v23  ;;  %v6741_v19 = vadd.f32 %v11250_v18, %v6703_v15   ;;  %v6714_v8 = vadd.f32 %v9968_v6, %v8882_v60  ;;  %v14670_v15 = vmov %v14655_v16  ;;  %v10950_v6 = vld [vmem:[%s14573_s14 + $0x68] sm:$0xff] (%p13852_p1)  }
0x188a   : > { %v6705_v21 = vpop.f32.mrf.mxu1 }
0x188b   : > { %v6744_v36 = vadd.f32 %v11238_v49, %v6714_v8   ;;  %v6706_v12 = vadd.f32 %v8882_v60, %v6705_v21  ;;  %v14672_v8 = vmov %v14656_v62  ;;  %v10952_v21 = vld [vmem:[%s14573_s14 + $0x60] sm:$0xff] (%p13852_p1)  }
0x188c   : > { %v9971_v13 = vpop.f32.mrf.mxu1  ;;  %v10951_v8 = vld [vmem:[%s14573_s14 + $0x28] sm:$0xff] (%p13852_p1)  }
0x188d   : > { %v6742_v7 = vadd.f32 %v11246_v43, %v6706_v12   ;;  %v6727_v22 = vadd.f32 %v9971_v13, %v8882_v60  ;;  %v14665_v49 = vmov %v6744_v36  ;;  %v14669_v13 = vmov %v14657_v5 }
0x188e   : > { %v6718_v29 = vpop.f32.mrf.mxu1  ;;  %v6755_v49 = vpack.c.bf16 (%p13852_p1), %v14654_v40, %v14652_v54  ;;  %v10933_v54 = vld [vmem:[%s14571_s12 + $0x4] ss:$24 sps:$4 sm:$0xff] (%p13852_p1)  }
0x188f   : > { %v6747_v38 = vadd.f32 %v11226_v51, %v6727_v22   ;;  %v6719_v20 = vadd.f32 %v8882_v60, %v6718_v29  ;;  %v14667_v43 = vmov %v6742_v7  ;;  %v6758_v26 = vpack.c.bf16 (%p13852_p1), %v6742_v7, %v6741_v19  ;;  %v10946_v40 = vld [vmem:[%s14573_s14 + $0x78] sm:$0xff] (%p13852_p1)   ;;  %v10953_v7 = vld [vmem:[%s14573_s14 + $0x20] sm:$0xff] (%p13852_p1)  }
0x1890   : > { %v9972_v55 = vpop.f32.mrf.mxu1  ;;  %v10928_v43 = vld [vmem:[%s14571_s12 + $0x30] ss:$24 sps:$4 sm:$0xff] (%p13852_p1)   ;;  %9978 = vmatmul.mubr.msk.bf16.vlgmr.msra.gmra.mxu0 (%p13852_p1), %vm760_vm3, %v6755_v49  ;;  %v10954_v29 = vld [vmem:[%s14573_s14 + $0x58] sm:$0xff] (%p13852_p1)  }
0x1891   : > { %v6745_v48 = vadd.f32 %v11234_v31, %v6719_v20   ;;  %v6730_v23 = vadd.f32 %v9972_v55, %v8882_v60  ;;  %v14662_v51 = vmov %v6747_v38  ;;  %v14671_v20 = vmov %v14658_v28  ;;  %9985 = vmatprep.mubr.msk.bf16.mxu1 (%p13852_p1), %vm760_vm3, %v6758_v26  ;;  %7165 = vmatpush1.bf16.msra.mxu0 (%p13852_p1), %v10934_v25  ;;  %v10960_v55 = vld [vmem:[%s14573_s14 + $0x50] sm:$0xff] (%p13852_p1)  }
0x1892   : > { %v6721_v10 = vpop.f32.mrf.mxu1  ;;  %v6756_v51 = vpack.c.bf16 (%p13852_p1), %v14658_v28, %v14656_v62  ;;  %7166 = vmatprep.subr.bf16.mxu0 (%p13852_p1), %v10939_v61  ;;  %v10945_v62 = vld [vmem:[%s14571_s12 + $0x14] ss:$24 sps:$4 sm:$0xff] (%p13852_p1)   ;;  %v10956_v28 = vld [vmem:[%s14573_s14 + $0xf8] sm:$0xff] (%p13852_p1)  }
0x1893   : > { %v6748_v32 = vadd.f32 %v11222_v35, %v6730_v23   ;;  %v6722_v18 = vadd.f32 %v8882_v60, %v6721_v10  ;;  %v14664_v31 = vmov %v6745_v48  ;;  %v14666_v23 = vmov %v14659_v34  ;;  %6384 = sbr.rel (!%p13852_p1) target bundleno = 5850 (0x16da), region = 149  ;;  %v10955_v20 = vld [vmem:[%s14573_s14 + $0x18] sm:$0xff] (%p13852_p1)  }
0x1894   :  { %v6759_v31 = vpack.c.bf16 (%p13852_p1), %v6744_v36, %v14659_v34  ;;  %9981 = vmatprep.mubr.msk.bf16.mxu0 (%p13852_p1), %vm760_vm3, %v6756_v51 }
0x1895   : > { %v6746_v37 = vadd.f32 %v11230_v59, %v6722_v18   ;;  %v14661_v35 = vmov %v6748_v32  ;;  %v14668_v18 = vmov %v6741_v19  ;;  %v6761_v60 = vpack.c.bf16 (%p13852_p1), %v6748_v32, %v6747_v38  ;;  %7167 = vmatpush1.bf16.msra.mxu0 (%p13852_p1), %v10937_v3  ;;  %v10961_v32 = vld [vmem:[%s14573_s14 + $0x10] sm:$0xff] (%p13852_p1)  }
0x1896   :  { %9986 = vmatmul.mubr.msk.bf16.vlgmr.msra.gmra.mxu1 (%p13852_p1), %vm760_vm3, %v6759_v31  ;;  %9265 = vmatprep.subr.bf16.mxu0 (%p13852_p1), %v10946_v40  ;;  %v10962_v40 = vld [vmem:[%s14573_s14 + $0xe8] sm:$0xff] (%p13852_p1)  }
0x1897   : > { %v14663_v59 = vmov %v6746_v37  ;;  %v6760_v35 = vpack.c.bf16 (%p13852_p1), %v6746_v37, %v6745_v48  ;;  %7052 = vmatpush1.bf16.msra.mxu1 (%p13852_p1), %v10928_v43  ;;  %v10966_v37 = vld [vmem:[%s14573_s14 + $0x48] sm:$0xff] (%p13852_p1)  }
0x1898   :  { %v6757_v59 = vpack.c.bf16 %v14657_v5, %v14655_v16  ;;  %7053 = vmatprep.subr.bf16.mxu1 %v10933_v54  ;;  %v10948_v5 = vld [vmem:[%s14573_s14 + $0x70] sm:$0xff]  }
0x1899   :  { %9989 = vmatprep.mubr.msk.bf16.mxu1 %vm760_vm3, %v6760_v35 }
0x189a   :  { %9982 = vmatmul.mubr.msk.bf16.gmra.mxu0 %vm760_vm3, %v6757_v59 }
0x189b   :  { %7184 = vmatprep.mubr.bf16.mxu0 %v11288_v4  ;;  %7054 = vmatpush1.bf16.msra.mxu1 %v10931_v41 }
0x189c   :  { %7277 = vmatprep.subr.bf16.mxu1 %v10942_v39  ;;  %v10957_v39 = vld [vmem:[%s14573_s14 + $0xb8] sm:$0xff]  }
0x189e   :  { %9990 = vmatmul.mubr.msk.bf16.gmra.mxu1 %vm760_vm3, %v6761_v60 }
0x189f   :  { %7071 = vmatprep.mubr.bf16.mxu1 %v11288_v4 }
0x1950   :  { %v9979_v17 = vpop.f32.mrf.mxu0 }
0x1951   :  { %v14000_v34 = vadd.f32 %v9979_v17, %v13957_v11  ;;  %v10958_v17 = vld [vmem:[%s14573_s14 + $0xf0] sm:$0xff]  }
0x1952   :  { %v6840_v44 = vpop.f32.mrf.mxu0 }
0x1953   :  { %v13960_v27 = vadd.f32 %v13957_v11, %v6840_v44  ;;  %14680 = vst [vmem:[#allocation8_spill] sm:$0xff] %v14000_v34  ;;  %v10959_v44 = vld [vmem:[%s14573_s14 + $0xb0] sm:$0xff]  }
0x1954   :  { %v9980_v63 = vpop.f32.mrf.mxu0 }
0x1955   :  { %14677 = vst [vmem:[#allocation5_spill] sm:$0xff] %v13960_v27  ;;  %v13990_v42 = vadd.f32 %v9980_v63, %v13957_v11  ;;  %v10963_v63 = vld [vmem:[%s14573_s14 + $0xa8] sm:$0xff]  }
0x1956   :  { %v6843_v30 = vpop.f32.mrf.mxu0  ;;  %v9987_v13 = vpop.f32.mrf.mxu1 }
0x1957   :  { %v13963_v57 = vadd.f32 %v13957_v11, %v6843_v30  ;;  %14679 = vst [vmem:[#allocation7_spill] sm:$0xff] %v13990_v42  ;;  %v14004_v15 = vpack.c.bf16 %v13990_v42, %v14000_v34  ;;  %v14091_v51 = vadd.f32 %v9987_v13, %v13957_v11  ;;  %v10972_v30 = vld [vmem:[%s14573_s14 + $0x40] sm:$0xff]  }
0x1958   :  { %v6872_v38 = vpop.f32.mrf.mxu1 }
0x1959   :  { %14678 = vst [vmem:[#allocation6_spill] sm:$0xff] %v13963_v57  ;;  %v13970_v33 = vpack.c.bf16 %v13963_v57, %v13960_v27  ;;  %v14075_v14 = vadd.f32 %v13957_v11, %v6872_v38  ;;  %14687 = vst [vmem:[#allocation15_spill] sm:$0xff] %v14091_v51 }
0x195a   :  { %v9983_v16 = vpop.f32.mrf.mxu0  ;;  %v9988_v10 = vpop.f32.mrf.mxu1 }
0x195b   :  { %8921 = vmatmul.mubr.msk.bf16.vlgmr.msra.gmra.mxu1 %vm760_vm3, %v13970_v33  ;;  %8929 = vmatmul.mubr.msk.bf16.vlgmr.msra.gmra.mxu0 %vm760_vm3, %v13970_v33  ;;  %v14050_v48 = vadd.f32 %v9983_v16, %v13957_v11  ;;  %14685 = vst [vmem:[#allocation13_spill] sm:$0xff] %v14075_v14  ;;  %v14094_v31 = vadd.f32 %v9988_v10, %v13957_v11  ;;  %v10965_v16 = vld [vmem:[%s14573_s14 + $0xa0] sm:$0xff]  }
0x195c   :  { %v6856_v24 = vpop.f32.mrf.mxu0  ;;  %7278 = vmatpush1.bf16.msra.mxu1 %v10940_v2  ;;  %7081 = vmatprep.mubr.bf16.mxu1 %v11288_v4  ;;  %v6875_v9 = vpop.f32.mrf.mxu1  ;;  %v10973_v2 = vld [vmem:[%s14573_s14] sm:$0xff]  }
0x195d   :  { %7194 = vmatprep.mubr.bf16.mxu0 %v11288_v4  ;;  %7279 = vmatprep.subr.bf16.mxu1 %v10945_v62  ;;  %v14022_v36 = vadd.f32 %v13957_v11, %v6856_v24  ;;  %14683 = vst [vmem:[#allocation11_spill] sm:$0xff] %v14050_v48  ;;  %v14078_v26 = vadd.f32 %v13957_v11, %v6875_v9  ;;  %14688 = vst [vmem:[#allocation16_spill] sm:$0xff] %v14094_v31  ;;  %v10969_v62 = vld [vmem:[%s14573_s14 + $0x98] sm:$0xff]   ;;  %v10970_v24 = vld [vmem:[%s14573_s14 + $0xd0] sm:$0xff]  }
0x195e   :  { %v9984_v1 = vpop.f32.mrf.mxu0  ;;  %9266 = vmatpush3.bf16.msra.mxu0 %v10947_v53  ;;  %v9991_v50 = vpop.f32.mrf.mxu1  ;;  %v14098_v59 = vpack.c.bf16 %v14094_v31, %v14091_v51  ;;  %v10971_v53 = vld [vmem:[%s14573_s14 + $0x90] sm:$0xff]  }
0x195f   :  { %9267 = vmatprep.subr.bf16.mxu0 %v10948_v5  ;;  %14681 = vst [vmem:[#allocation9_spill] sm:$0xff] %v14022_v36  ;;  %v14053_v23 = vadd.f32 %v9984_v1, %v13957_v11  ;;  %14686 = vst [vmem:[#allocation14_spill] sm:$0xff] %v14078_v26  ;;  %v14082_v49 = vpack.c.bf16 %v14078_v26, %v14075_v14  ;;  %v14119_v54 = vadd.f32 %v9991_v50, %v13957_v11  ;;  %v10978_v5 = vld [vmem:[%s14573_s14 + $0x178] sm:$0xff]   ;;  %v10976_v1 = vld [vmem:[%s14573_s14 + $0xc0] sm:$0xff]  }
0x1960   :  { %7280 = vmatpush1.bf16.msra.mxu1 %v10943_v0  ;;  %v6859_v19 = vpop.f32.mrf.mxu0  ;;  %v6888_v43 = vpop.f32.mrf.mxu1  ;;  %v10974_v0 = vld [vmem:[%s14573_s14 + $0xc8] sm:$0xff]  }
0x1961   :  { %9329 = vmatprep.subr.bf16.mxu1 %v10956_v28  ;;  %v14025_v12 = vadd.f32 %v13957_v11, %v6859_v19  ;;  %14684 = vst [vmem:[#allocation12_spill] sm:$0xff] %v14053_v23  ;;  %v14060_v18 = vpack.c.bf16 %v14053_v23, %v14050_v48  ;;  %v14107_v58 = vadd.f32 %v13957_v11, %v6888_v43  ;;  %14691 = vst [vmem:[#allocation19_spill] sm:$0xff] %v14119_v54  ;;  %v10975_v28 = vld [vmem:[%s14573_s14 + $0x88] sm:$0xff]   ;;  %v14209_v19 = vld [vmem:[%s14572_s13] sm:$0x3f] }
0x1962   :  { %9268 = vmatpush3.bf16.msra.mxu0 %v10949_v52  ;;  %v9992_v35 = vpop.f32.mrf.mxu1  ;;  %v10977_v52 = vld [vmem:[%s14573_s14 + $0x80] sm:$0xff]   ;;  %v14214_v13 = vrot.slane %v14209_v19, %v90_v46 }
0x1963   :  { %8922 = vmatmul.mubr.msk.bf16.gmra.mxu1 %vm760_vm3, %v14004_v15  ;;  %8930 = vmatmul.mubr.msk.bf16.gmra.mxu0 %vm760_vm3, %v14004_v15  ;;  %14682 = vst [vmem:[#allocation10_spill] sm:$0xff] %v14025_v12  ;;  %v14032_v22 = vpack.c.bf16 %v14025_v12, %v14022_v36  ;;  %14689 = vst [vmem:[#allocation17_spill] sm:$0xff] %v14107_v58  ;;  %v14122_v61 = vadd.f32 %v9992_v35, %v13957_v11 }
0x1964   :  { %7091 = vmatprep.mubr.bf16.mxu1 %v11288_v4  ;;  %7204 = vmatprep.mubr.bf16.mxu0 %v11288_v4  ;;  %v6891_v60 = vpop.f32.mrf.mxu1 }
0x1965   :  { %9269 = vmatprep.subr.bf16.mxu0 %v10950_v6  ;;  %v14110_v25 = vadd.f32 %v13957_v11, %v6891_v60  ;;  %14692 = vst [vmem:[#allocation20_spill] sm:$0xff] %v14122_v61  ;;  %v6922_v3 = vpack.c.bf16 %v14122_v61, %v14119_v54  ;;  %v10964_v11 = vld [vmem:[%s14573_s14 + $0xe0] sm:$0xff]   ;;  %v6935_v6 = vsub.s32 2, %v11505_v45 }
0x1966   :  { %9270 = vmatpush3.bf16.msra.mxu0 %v10951_v8 }
0x1967   :  { %9271 = vmatprep.subr.bf16.mxu0 %v10952_v21  ;;  %14690 = vst [vmem:[#allocation18_spill] sm:$0xff] %v14110_v25  ;;  %v6921_v41 = vpack.c.bf16 %v14110_v25, %v14107_v58 }
0x196a   :  { %9272 = vmatpush3.bf16.msra.mxu0 %v10953_v7  ;;  %v14222_v7 = vrot.slane %v14209_v19, %v86_v47 }
0x196b   :  { %8923 = vmatmul.mubr.msk.bf16.gmra.mxu1 %vm760_vm3, %v14032_v22  ;;  %8931 = vmatmul.mubr.msk.bf16.gmra.mxu0 %vm760_vm3, %v14032_v22 }
0x196c   :  { %7101 = vmatprep.mubr.bf16.mxu1 %v11288_v4  ;;  %7214 = vmatprep.mubr.bf16.mxu0 %v11288_v4 }
0x196d   :  { %9273 = vmatprep.subr.bf16.mxu0 %v10954_v29 }
0x196e   :  { %9274 = vmatpush3.bf16.msra.mxu0 %v10955_v20 }
0x196f   :  { %9275 = vmatprep.subr.bf16.mxu0 %v10960_v55 }
0x1972   :  { %9276 = vmatpush3.bf16.msra.mxu0 %v10961_v32 }
0x1973   :  { %8924 = vmatmul.mubr.msk.bf16.gmra.mxu1 %vm760_vm3, %v14060_v18  ;;  %8932 = vmatmul.mubr.msk.bf16.gmra.mxu0 %vm760_vm3, %v14060_v18 }
0x1974   :  { %7111 = vmatprep.mubr.bf16.mxu1 %v11288_v4  ;;  %7224 = vmatprep.mubr.bf16.mxu0 %v11288_v4 }
0x1975   :  { %9277 = vmatprep.subr.bf16.mxu0 %v10966_v37 }
0x1976   :  { %9278 = vmatpush3.bf16.msra.mxu0 %v10967_v56 }
0x1977   :  { %9279 = vmatprep.subr.bf16.mxu0 %v10972_v30 }
0x197a   :  { %9280 = vmatpush3.bf16.msra.mxu0 %v10973_v2  ;;  %v10979_v2 = vld [vmem:[%s14573_s14 + $0x138] sm:$0xff]  }
0x197b   :  { %8925 = vmatmul.mubr.msk.bf16.gmra.mxu1 %vm760_vm3, %v14082_v49  ;;  %8933 = vmatmul.mubr.msk.bf16.gmra.mxu0 %vm760_vm3, %v14082_v49 }
0x197c   :  { %7121 = vmatprep.mubr.bf16.mxu1 %v11288_v4  ;;  %7234 = vmatprep.mubr.bf16.mxu0 %v11288_v4 }
0x197d   :  { %9393 = vmatprep.subr.bf16.mxu0 %v10978_v5 }
0x1983   :  { %8926 = vmatmul.mubr.msk.bf16.gmra.mxu1 %vm760_vm3, %v14098_v59  ;;  %8934 = vmatmul.mubr.msk.bf16.gmra.mxu0 %vm760_vm3, %v14098_v59 }
0x1984   :  { %7131 = vmatprep.mubr.bf16.mxu1 %v11288_v4  ;;  %7244 = vmatprep.mubr.bf16.mxu0 %v11288_v4 }
0x198b   :  { %8927 = vmatmul.mubr.msk.bf16.gmra.mxu1 %vm760_vm3, %v6921_v41  ;;  %8935 = vmatmul.mubr.msk.bf16.gmra.mxu0 %vm760_vm3, %v6921_v41 }
0x198c   :  { %7141 = vmatprep.mubr.bf16.mxu1 %v11288_v4  ;;  %7254 = vmatprep.mubr.bf16.mxu0 %v11288_v4 }
0x1993   :  { %8928 = vmatmul.mubr.msk.bf16.gmra.mxu1 %vm760_vm3, %v6922_v3  ;;  %8936 = vmatmul.mubr.msk.bf16.gmra.mxu0 %vm760_vm3, %v6922_v3 }
0x1994   :  { %7297 = vmatprep.mubr.bf16.mxu1 %v11288_v4 }
0x199b   :  { %8937 = vmatmul.mubr.msk.bf16.vlgmr.msra.gmra.mxu1 %vm760_vm3, %v13970_v33  ;;  %v10968_v33 = vld [vmem:[%s14573_s14 + $0xd8] sm:$0xff]  }
0x199c   :  { %7307 = vmatprep.mubr.bf16.mxu1 %v11288_v4  ;;  %9330 = vmatpush3.bf16.msra.mxu1 %v10957_v39 }
0x199d   :  { %9331 = vmatprep.subr.bf16.mxu1 %v10958_v17 }
0x19a0   :  { %9332 = vmatpush3.bf16.msra.mxu1 %v10959_v44 }
0x19a1   :  { %9333 = vmatprep.subr.bf16.mxu1 %v10962_v40 }
0x19a3   :  { %8938 = vmatmul.mubr.msk.bf16.gmra.mxu1 %vm760_vm3, %v14004_v15  ;;  %v6939_v15 = vsub.s32 3, %v11505_v45 }
0x19a4   :  { %7317 = vmatprep.mubr.bf16.mxu1 %v11288_v4  ;;  %9334 = vmatpush3.bf16.msra.mxu1 %v10963_v63 }
0x19a5   :  { %9335 = vmatprep.subr.bf16.mxu1 %v10964_v11 }
0x19a8   :  { %9336 = vmatpush3.bf16.msra.mxu1 %v10965_v16 }
0x19a9   :  { %9337 = vmatprep.subr.bf16.mxu1 %v10968_v33 }
0x19ab   :  { %8939 = vmatmul.mubr.msk.bf16.gmra.mxu1 %vm760_vm3, %v14032_v22  ;;  %v14225_v22 = vrot.slane %v14209_v19, %v6935_v6 }
0x19ac   :  { %7327 = vmatprep.mubr.bf16.mxu1 %v11288_v4  ;;  %9338 = vmatpush3.bf16.msra.mxu1 %v10969_v62 }
0x19ad   :  { %9339 = vmatprep.subr.bf16.mxu1 %v10970_v24 }
0x19b0   :  { %9340 = vmatpush3.bf16.msra.mxu1 %v10971_v53 }
0x19b1   :  { %9341 = vmatprep.subr.bf16.mxu1 %v10974_v0  ;;  %v10980_v0 = vld [vmem:[%s14573_s14 + $0x170] sm:$0xff]  }
0x19b3   :  { %8940 = vmatmul.mubr.msk.bf16.gmra.mxu1 %vm760_vm3, %v14060_v18 }
0x19b4   :  { %7337 = vmatprep.mubr.bf16.mxu1 %v11288_v4  ;;  %9342 = vmatpush3.bf16.msra.mxu1 %v10975_v28 }
0x19b5   :  { %9343 = vmatprep.subr.bf16.mxu1 %v10976_v1 }
0x19b8   :  { %9344 = vmatpush3.bf16.msra.mxu1 %v10977_v52 }
0x19bb   :  { %8941 = vmatmul.mubr.msk.bf16.gmra.mxu1 %vm760_vm3, %v14082_v49 }
0x19bc   :  { %7347 = vmatprep.mubr.bf16.mxu1 %v11288_v4 }
0x19c3   :  { %8942 = vmatmul.mubr.msk.bf16.gmra.mxu1 %vm760_vm3, %v14098_v59 }
0x19c4   :  { %7357 = vmatprep.mubr.bf16.mxu1 %v11288_v4 }
0x19cb   :  { %8943 = vmatmul.mubr.msk.bf16.gmra.mxu1 %vm760_vm3, %v6921_v41 }
0x19cc   :  { %7367 = vmatprep.mubr.bf16.mxu1 %v11288_v4  ;;  %v14217_v4 = vrot.slane %v14209_v19, %v6939_v15 }
0x19d3   :  { %8944 = vmatmul.mubr.msk.bf16.gmra.mxu1 %vm760_vm3, %v6922_v3 }
0x1a1b   :  { %v7073_v8 = vpop.f32.mrf.mxu1  ;;  %v7186_v21 = vpop.f32.mrf.mxu0 }
0x1a1c   :  { %v7074_v37 = vadd.f32 %v7073_v8, %v14222_v7  ;;  %v7187_v47 = vadd.f32 %v7186_v21, %v14225_v22 }
0x1a1d   :  { %v7075_v29 = vpop.f32.mrf.mxu1  ;;  %v7188_v38 = vpop.f32.mrf.mxu0 }
0x1a1e   :  { %v7076_v10 = vadd.f32 %v7075_v29, %v14214_v13  ;;  %v7189_v46 = vadd.f32 %v7188_v38, %v14217_v4  ;;  %v7378_v44 = vmax.f32 %v7074_v37, 0.0  ;;  %v7380_v40 = vmax.f32 %v7187_v47, 0.0 }
0x1a1f   :  { %v7077_v20 = vpop.f32.mrf.mxu1  ;;  %v7190_v55 = vpop.f32.mrf.mxu0 }
0x1a20   :  { %v7078_v32 = vadd.f32 %v7077_v20, %v14222_v7  ;;  %v7191_v18 = vadd.f32 %v7190_v55, %v14225_v22  ;;  %v7379_v41 = vmax.f32 %v7076_v10, 0.0  ;;  %v7381_v3 = vmax.f32 %v7189_v46, 0.0  ;;  %v10981_v20 = vld [vmem:[%s14573_s14 + $0x130] sm:$0xff]  }
0x1a21   :  { %v7079_v9 = vpop.f32.mrf.mxu1  ;;  %v7192_v56 = vpop.f32.mrf.mxu0 }
0x1a22   :  { %v7080_v50 = vadd.f32 %v7079_v9, %v14214_v13  ;;  %v7193_v49 = vadd.f32 %v7192_v56, %v14217_v4  ;;  %v7384_v43 = vmax.f32 %v7078_v32, 0.0  ;;  %v7386_v35 = vmax.f32 %v7191_v18, 0.0  ;;  %v10982_v18 = vld [vmem:[%s14573_s14 + $0x168] sm:$0xff]  }
0x1a23   :  { %v7083_v59 = vpop.f32.mrf.mxu1  ;;  %v7196_v60 = vpop.f32.mrf.mxu0 }
0x1a24   :  { %v7385_v39 = vmax.f32 %v7080_v50, 0.0  ;;  %v7387_v17 = vmax.f32 %v7193_v49, 0.0  ;;  %v7570_v33 = vpack.c.bf16 %v7384_v43, %v7378_v44  ;;  %v7572_v62 = vpack.c.bf16 %v7386_v35, %v7380_v40 }
0x1a25   :  { %v7085_v63 = vpop.f32.mrf.mxu1  ;;  %v7198_v11 = vpop.f32.mrf.mxu0  ;;  %v7084_v15 = vadd.f32 %v7083_v59, %v14222_v7  ;;  %v7197_v6 = vadd.f32 %v7196_v60, %v14225_v22 }
0x1a26   :  { %v7571_v30 = vpack.c.bf16 %v7385_v39, %v7379_v41  ;;  %v7573_v16 = vpack.c.bf16 %v7387_v17, %v7381_v3  ;;  %v7086_v24 = vadd.f32 %v7085_v63, %v14214_v13  ;;  %v7199_v28 = vadd.f32 %v7198_v11, %v14217_v4  ;;  %v10983_v41 = vld [vmem:[%s14573_s14 + $0x128] sm:$0xff]   ;;  %v10984_v63 = vld [vmem:[%s14573_s14 + $0x160] sm:$0xff]  }
0x1a27   :  { %v7087_v53 = vpop.f32.mrf.mxu1  ;;  %v7200_v5 = vpop.f32.mrf.mxu0  ;;  %v7390_v50 = vmax.f32 %v7084_v15, 0.0  ;;  %v7392_v49 = vmax.f32 %v7197_v6, 0.0  ;;  %v10986_v6 = vld [vmem:[%s14573_s14 + $0x158] sm:$0xff]  }
0x1a28   :  { %v7088_v1 = vadd.f32 %v7087_v53, %v14222_v7  ;;  %v7201_v52 = vadd.f32 %v7200_v5, %v14225_v22  ;;  %7945 = vmatprep.mubr.bf16.mxu0 %v7571_v30  ;;  %8042 = vmatprep.mubr.bf16.mxu1 %v7573_v16  ;;  %v7391_v37 = vmax.f32 %v7086_v24, 0.0  ;;  %v7393_v47 = vmax.f32 %v7199_v28, 0.0 }
0x1a29   :  { %v7089_v8 = vpop.f32.mrf.mxu1  ;;  %v7202_v21 = vpop.f32.mrf.mxu0  ;;  %7946 = vmatmul.mubr.bf16.vlgmr.msra.gmra.mxu0 %v7570_v33  ;;  %8043 = vmatmul.mubr.bf16.vlgmr.msra.gmra.mxu1 %v7572_v62 }
0x1a2a   :  { %v7090_v29 = vadd.f32 %v7089_v8, %v14214_v13  ;;  %v7203_v38 = vadd.f32 %v7202_v21, %v14217_v4  ;;  %9394 = vmatpush3.bf16.msra.mxu0 %v10979_v2  ;;  %v7396_v55 = vmax.f32 %v7088_v1, 0.0  ;;  %v7398_v10 = vmax.f32 %v7201_v52, 0.0 }
0x1a2b   :  { %v7093_v46 = vpop.f32.mrf.mxu1  ;;  %v7206_v32 = vpop.f32.mrf.mxu0  ;;  %9395 = vmatprep.subr.bf16.mxu0 %v10980_v0  ;;  %v10985_v0 = vld [vmem:[%s14573_s14 + $0x120] sm:$0xff]  }
0x1a2c   :  { %v7397_v9 = vmax.f32 %v7090_v29, 0.0  ;;  %v7399_v56 = vmax.f32 %v7203_v38, 0.0  ;;  %v7576_v3 = vpack.c.bf16 %v7396_v55, %v7390_v50  ;;  %v7578_v39 = vpack.c.bf16 %v7398_v10, %v7392_v49 }
0x1a2d   :  { %v7095_v43 = vpop.f32.mrf.mxu1  ;;  %v7208_v35 = vpop.f32.mrf.mxu0  ;;  %v7094_v2 = vadd.f32 %v7093_v46, %v14222_v7  ;;  %v7207_v33 = vadd.f32 %v7206_v32, %v14225_v22 }
0x1a2e   :  { %v7577_v59 = vpack.c.bf16 %v7397_v9, %v7391_v37  ;;  %v7579_v60 = vpack.c.bf16 %v7399_v56, %v7393_v47  ;;  %9396 = vmatpush3.bf16.msra.mxu0 %v10981_v20  ;;  %v7096_v17 = vadd.f32 %v7095_v43, %v14214_v13  ;;  %v7209_v11 = vadd.f32 %v7208_v35, %v14217_v4  ;;  %v10987_v37 = vld [vmem:[%s14573_s14 + $0x118] sm:$0xff]   ;;  %v10988_v43 = vld [vmem:[%s14573_s14 + $0x150] sm:$0xff]  }
0x1a2f   :  { %v7097_v44 = vpop.f32.mrf.mxu1  ;;  %v7210_v40 = vpop.f32.mrf.mxu0  ;;  %9397 = vmatprep.subr.bf16.mxu0 %v10982_v18  ;;  %v7402_v20 = vmax.f32 %v7094_v2, 0.0  ;;  %v7404_v55 = vmax.f32 %v7207_v33, 0.0  ;;  %v10990_v33 = vld [vmem:[%s14573_s14 + $0x148] sm:$0xff]  }
0x1a30   :  { %v7098_v30 = vadd.f32 %v7097_v44, %v14222_v7  ;;  %v7211_v16 = vadd.f32 %v7210_v40, %v14225_v22  ;;  %7953 = vmatprep.mubr.bf16.mxu0 %v7577_v59  ;;  %8050 = vmatprep.mubr.bf16.mxu1 %v7579_v60  ;;  %v7403_v8 = vmax.f32 %v7096_v17, 0.0  ;;  %v7405_v21 = vmax.f32 %v7209_v11, 0.0 }
0x1a31   :  { %v7099_v62 = vpop.f32.mrf.mxu1  ;;  %v7212_v24 = vpop.f32.mrf.mxu0  ;;  %7954 = vmatmul.mubr.bf16.gmra.mxu0 %v7576_v3  ;;  %8051 = vmatmul.mubr.bf16.gmra.mxu1 %v7578_v39 }
0x1a32   :  { %v7100_v53 = vadd.f32 %v7099_v62, %v14214_v13  ;;  %v7213_v5 = vadd.f32 %v7212_v24, %v14217_v4  ;;  %9398 = vmatpush3.bf16.msra.mxu0 %v10983_v41  ;;  %v7408_v28 = vmax.f32 %v7098_v30, 0.0  ;;  %v7410_v1 = vmax.f32 %v7211_v16, 0.0 }
0x1a33   :  { %v7103_v52 = vpop.f32.mrf.mxu1  ;;  %v7216_v15 = vpop.f32.mrf.mxu0  ;;  %9399 = vmatprep.subr.bf16.mxu0 %v10984_v63  ;;  %v10989_v63 = vld [vmem:[%s14573_s14 + $0x110] sm:$0xff]  }
0x1a34   :  { %v7409_v29 = vmax.f32 %v7100_v53, 0.0  ;;  %v7411_v38 = vmax.f32 %v7213_v5, 0.0  ;;  %v7582_v47 = vpack.c.bf16 %v7408_v28, %v7402_v20  ;;  %v7584_v9 = vpack.c.bf16 %v7410_v1, %v7404_v55 }
0x1a35   :  { %v7105_v10 = vpop.f32.mrf.mxu1  ;;  %v7218_v46 = vpop.f32.mrf.mxu0  ;;  %v7104_v41 = vadd.f32 %v7103_v52, %v14222_v7  ;;  %v7217_v3 = vadd.f32 %v7216_v15, %v14225_v22 }
0x1a36   :  { %v7583_v32 = vpack.c.bf16 %v7409_v29, %v7403_v8  ;;  %v7585_v18 = vpack.c.bf16 %v7411_v38, %v7405_v21  ;;  %9400 = vmatpush3.bf16.msra.mxu0 %v10985_v0  ;;  %v7106_v56 = vadd.f32 %v7105_v10, %v14214_v13  ;;  %v7219_v35 = vadd.f32 %v7218_v46, %v14217_v4  ;;  %v10991_v8 = vld [vmem:[%s14573_s14 + $0x108] sm:$0xff]   ;;  %v10992_v10 = vld [vmem:[%s14573_s14 + $0x140] sm:$0xff]  }
0x1a37   :  { %v7107_v50 = vpop.f32.mrf.mxu1  ;;  %v7220_v49 = vpop.f32.mrf.mxu0  ;;  %9401 = vmatprep.subr.bf16.mxu0 %v10986_v6  ;;  %v7414_v0 = vmax.f32 %v7104_v41, 0.0  ;;  %v7416_v28 = vmax.f32 %v7217_v3, 0.0 }
0x1a38   :  { %v7108_v59 = vadd.f32 %v7107_v50, %v14222_v7  ;;  %v7221_v60 = vadd.f32 %v7220_v49, %v14225_v22  ;;  %7961 = vmatprep.mubr.bf16.mxu0 %v7583_v32  ;;  %8058 = vmatprep.mubr.bf16.mxu1 %v7585_v18  ;;  %v7415_v62 = vmax.f32 %v7106_v56, 0.0  ;;  %v7417_v24 = vmax.f32 %v7219_v35, 0.0 }
0x1a39   :  { %v7109_v39 = vpop.f32.mrf.mxu1  ;;  %v7222_v17 = vpop.f32.mrf.mxu0  ;;  %7962 = vmatmul.mubr.bf16.gmra.mxu0 %v7582_v47  ;;  %8059 = vmatmul.mubr.bf16.gmra.mxu1 %v7584_v9 }
0x1a3a   :  { %v7110_v44 = vadd.f32 %v7109_v39, %v14214_v13  ;;  %v7223_v40 = vadd.f32 %v7222_v17, %v14217_v4  ;;  %9402 = vmatpush3.bf16.msra.mxu0 %v10987_v37  ;;  %v7420_v11 = vmax.f32 %v7108_v59, 0.0  ;;  %v7422_v30 = vmax.f32 %v7221_v60, 0.0 }
0x1a3b   :  { %v7113_v16 = vpop.f32.mrf.mxu1  ;;  %v7226_v2 = vpop.f32.mrf.mxu0  ;;  %9403 = vmatprep.subr.bf16.mxu0 %v10988_v43  ;;  %v10993_v43 = vld [vmem:[%s14573_s14 + $0x100] sm:$0xff]  }
0x1a3c   :  { %v7421_v53 = vmax.f32 %v7110_v44, 0.0  ;;  %v7423_v5 = vmax.f32 %v7223_v40, 0.0  ;;  %v7588_v21 = vpack.c.bf16 %v7420_v11, %v7414_v0  ;;  %v7590_v29 = vpack.c.bf16 %v7422_v30, %v7416_v28 }
0x1a3d   :  { %v7115_v1 = vpop.f32.mrf.mxu1  ;;  %v7228_v52 = vpop.f32.mrf.mxu0  ;;  %v7114_v37 = vadd.f32 %v7113_v16, %v14222_v7  ;;  %v7227_v47 = vadd.f32 %v7226_v2, %v14225_v22 }
0x1a3e   :  { %v7589_v15 = vpack.c.bf16 %v7421_v53, %v7415_v62  ;;  %v7591_v6 = vpack.c.bf16 %v7423_v5, %v7417_v24  ;;  %9404 = vmatpush3.bf16.msra.mxu0 %v10989_v63  ;;  %v7116_v38 = vadd.f32 %v7115_v1, %v14214_v13  ;;  %v7229_v46 = vadd.f32 %v7228_v52, %v14217_v4 }
0x1a3f   :  { %v7117_v20 = vpop.f32.mrf.mxu1  ;;  %v7230_v55 = vpop.f32.mrf.mxu0  ;;  %9405 = vmatprep.subr.bf16.mxu0 %v10990_v33  ;;  %v7426_v40 = vmax.f32 %v7114_v37, 0.0  ;;  %v7428_v63 = vmax.f32 %v7227_v47, 0.0 }
0x1a40   :  { %v7118_v32 = vadd.f32 %v7117_v20, %v14222_v7  ;;  %v7231_v18 = vadd.f32 %v7230_v55, %v14225_v22  ;;  %7969 = vmatprep.mubr.bf16.mxu0 %v7589_v15  ;;  %8066 = vmatprep.mubr.bf16.mxu1 %v7591_v6  ;;  %v7427_v3 = vmax.f32 %v7116_v38, 0.0  ;;  %v7429_v39 = vmax.f32 %v7229_v46, 0.0 }
0x1a41   :  { %v7119_v9 = vpop.f32.mrf.mxu1  ;;  %v7232_v56 = vpop.f32.mrf.mxu0  ;;  %7970 = vmatmul.mubr.bf16.gmra.mxu0 %v7588_v21  ;;  %8067 = vmatmul.mubr.bf16.gmra.mxu1 %v7590_v29 }
0x1a42   :  { %v7120_v50 = vadd.f32 %v7119_v9, %v14214_v13  ;;  %v7233_v49 = vadd.f32 %v7232_v56, %v14217_v4  ;;  %9406 = vmatpush3.bf16.msra.mxu0 %v10991_v8  ;;  %v7432_v35 = vmax.f32 %v7118_v32, 0.0  ;;  %v7434_v59 = vmax.f32 %v7231_v18, 0.0 }
0x1a43   :  { %v7123_v60 = vpop.f32.mrf.mxu1  ;;  %v7236_v41 = vpop.f32.mrf.mxu0  ;;  %9407 = vmatprep.subr.bf16.mxu0 %v10992_v10 }
0x1a44   :  { %v7433_v17 = vmax.f32 %v7120_v50, 0.0  ;;  %v7435_v44 = vmax.f32 %v7233_v49, 0.0  ;;  %v7594_v33 = vpack.c.bf16 %v7432_v35, %v7426_v40  ;;  %v7596_v62 = vpack.c.bf16 %v7434_v59, %v7428_v63 }
0x1a45   :  { %v7125_v11 = vpop.f32.mrf.mxu1  ;;  %v7238_v30 = vpop.f32.mrf.mxu0  ;;  %v7124_v52 = vadd.f32 %v7123_v60, %v14222_v7  ;;  %v7237_v15 = vadd.f32 %v7236_v41, %v14225_v22 }
0x1a46   :  { %v7595_v16 = vpack.c.bf16 %v7433_v17, %v7427_v3  ;;  %v7597_v2 = vpack.c.bf16 %v7435_v44, %v7429_v39  ;;  %9408 = vmatpush3.bf16.msra.mxu0 %v10993_v43  ;;  %v7126_v24 = vadd.f32 %v7125_v11, %v14214_v13  ;;  %v7239_v0 = vadd.f32 %v7238_v30, %v14217_v4 }
0x1a47   :  { %v7127_v53 = vpop.f32.mrf.mxu1  ;;  %v7240_v5 = vpop.f32.mrf.mxu0  ;;  %v7438_v47 = vmax.f32 %v7124_v52, 0.0  ;;  %v7440_v9 = vmax.f32 %v7237_v15, 0.0 }
0x1a48   :  { %v7128_v28 = vadd.f32 %v7127_v53, %v14222_v7  ;;  %v7241_v1 = vadd.f32 %v7240_v5, %v14225_v22  ;;  %7977 = vmatprep.mubr.bf16.mxu0 %v7595_v16  ;;  %8074 = vmatprep.mubr.bf16.mxu1 %v7597_v2  ;;  %v7439_v46 = vmax.f32 %v7126_v24, 0.0  ;;  %v7441_v32 = vmax.f32 %v7239_v0, 0.0 }
0x1a49   :  { %v7129_v6 = vpop.f32.mrf.mxu1  ;;  %v7242_v8 = vpop.f32.mrf.mxu0  ;;  %7978 = vmatmul.mubr.bf16.gmra.mxu0 %v7594_v33  ;;  %8075 = vmatmul.mubr.bf16.gmra.mxu1 %v7596_v62 }
0x1a4a   :  { %v7130_v21 = vadd.f32 %v7129_v6, %v14214_v13  ;;  %v7243_v29 = vadd.f32 %v7242_v8, %v14217_v4  ;;  %v7444_v38 = vmax.f32 %v7128_v28, 0.0  ;;  %v7446_v20 = vmax.f32 %v7241_v1, 0.0 }
0x1a4b   :  { %v7133_v55 = vpop.f32.mrf.mxu1  ;;  %v7246_v10 = vpop.f32.mrf.mxu0 }
0x1a4c   :  { %v7445_v18 = vmax.f32 %v7130_v21, 0.0  ;;  %v7447_v37 = vmax.f32 %v7243_v29, 0.0  ;;  %v7600_v35 = vpack.c.bf16 %v7444_v38, %v7438_v47  ;;  %v7602_v59 = vpack.c.bf16 %v7446_v20, %v7440_v9 }
0x1a4d   :  { %v7135_v56 = vpop.f32.mrf.mxu1  ;;  %v7248_v50 = vpop.f32.mrf.mxu0  ;;  %v7134_v40 = vadd.f32 %v7133_v55, %v14222_v7  ;;  %v7247_v63 = vadd.f32 %v7246_v10, %v14225_v22 }
0x1a4e   :  { %v7601_v49 = vpack.c.bf16 %v7445_v18, %v7439_v46  ;;  %v7603_v43 = vpack.c.bf16 %v7447_v37, %v7441_v32  ;;  %v7136_v60 = vadd.f32 %v7135_v56, %v14214_v13  ;;  %v7249_v39 = vadd.f32 %v7248_v50, %v14217_v4 }
0x1a4f   :  { %v7137_v41 = vpop.f32.mrf.mxu1  ;;  %v7250_v3 = vpop.f32.mrf.mxu0  ;;  %v7450_v52 = vmax.f32 %v7134_v40, 0.0  ;;  %v7452_v15 = vmax.f32 %v7247_v63, 0.0  ;;  %v6947_v32 = vsub.s32 5, %v11505_v45 }
0x1a50   :  { %v7138_v17 = vadd.f32 %v7137_v41, %v14222_v7  ;;  %v7251_v44 = vadd.f32 %v7250_v3, %v14225_v22  ;;  %7985 = vmatprep.mubr.bf16.mxu0 %v7601_v49  ;;  %8082 = vmatprep.mubr.bf16.mxu1 %v7603_v43  ;;  %v7451_v5 = vmax.f32 %v7136_v60, 0.0  ;;  %v7453_v0 = vmax.f32 %v7249_v39, 0.0 }
0x1a51   :  { %v7139_v11 = vpop.f32.mrf.mxu1  ;;  %v7252_v30 = vpop.f32.mrf.mxu0  ;;  %7986 = vmatmul.mubr.bf16.gmra.mxu0 %v7600_v35  ;;  %8083 = vmatmul.mubr.bf16.gmra.mxu1 %v7602_v59  ;;  %v6943_v43 = vsub.s32 4, %v11505_v45  ;;  %v14339_v39 = vrot.slane %v14209_v19, %v6947_v32 }
0x1a52   :  { %v7140_v16 = vadd.f32 %v7139_v11, %v14214_v13  ;;  %v7253_v2 = vadd.f32 %v7252_v30, %v14217_v4  ;;  %v7456_v33 = vmax.f32 %v7138_v17, 0.0  ;;  %v7458_v62 = vmax.f32 %v7251_v44, 0.0 }
0x1a53   :  { %v7143_v24 = vpop.f32.mrf.mxu1  ;;  %v7256_v53 = vpop.f32.mrf.mxu0  ;;  %v14342_v11 = vrot.slane %v14209_v19, %v6943_v43 }
0x1a54   :  { %v7457_v28 = vmax.f32 %v7140_v16, 0.0  ;;  %v7459_v1 = vmax.f32 %v7253_v2, 0.0  ;;  %v7606_v38 = vpack.c.bf16 %v7456_v33, %v7450_v52  ;;  %v7608_v20 = vpack.c.bf16 %v7458_v62, %v7452_v15 }
0x1a55   :  { %v7145_v6 = vpop.f32.mrf.mxu1  ;;  %v7258_v8 = vpop.f32.mrf.mxu0  ;;  %v7144_v9 = vadd.f32 %v7143_v24, %v14222_v7  ;;  %v7257_v56 = vadd.f32 %v7256_v53, %v14225_v22 }
0x1a56   :  { %v7607_v21 = vpack.c.bf16 %v7457_v28, %v7451_v5  ;;  %v7609_v29 = vpack.c.bf16 %v7459_v1, %v7453_v0  ;;  %v7146_v55 = vadd.f32 %v7145_v6, %v14214_v13  ;;  %v7259_v18 = vadd.f32 %v7258_v8, %v14217_v4 }
0x1a57   :  { %v7147_v10 = vpop.f32.mrf.mxu1  ;;  %v7260_v46 = vpop.f32.mrf.mxu0  ;;  %v7462_v40 = vmax.f32 %v7144_v9, 0.0  ;;  %v7464_v63 = vmax.f32 %v7257_v56, 0.0 }
0x1a58   :  { %v7148_v37 = vadd.f32 %v7147_v10, %v14222_v7  ;;  %v7261_v47 = vadd.f32 %v7260_v46, %v14225_v22  ;;  %7993 = vmatprep.mubr.bf16.mxu0 %v7607_v21  ;;  %8090 = vmatprep.mubr.bf16.mxu1 %v7609_v29  ;;  %v7463_v17 = vmax.f32 %v7146_v55, 0.0  ;;  %v7465_v7 = vmax.f32 %v7259_v18, 0.0 }
0x1a59   :  { %v7149_v50 = vpop.f32.mrf.mxu1  ;;  %v7262_v49 = vpop.f32.mrf.mxu0  ;;  %7994 = vmatmul.mubr.bf16.gmra.mxu0 %v7606_v38  ;;  %8091 = vmatmul.mubr.bf16.gmra.mxu1 %v7608_v20 }
0x1a5a   :  { %v7150_v35 = vadd.f32 %v7149_v50, %v14214_v13  ;;  %v7263_v59 = vadd.f32 %v7262_v49, %v14217_v4  ;;  %v7468_v60 = vmax.f32 %v7148_v37, 0.0  ;;  %v7470_v41 = vmax.f32 %v7261_v47, 0.0 }
0x1a5b   :  { %v7299_v3 = vpop.f32.mrf.mxu1 }
0x1a5c   :  { %v7469_v44 = vmax.f32 %v7150_v35, 0.0  ;;  %v7471_v22 = vmax.f32 %v7263_v59, 0.0  ;;  %v7612_v16 = vpack.c.bf16 %v7468_v60, %v7462_v40  ;;  %v7614_v4 = vpack.c.bf16 %v7470_v41, %v7464_v63 }
0x1a5d   :  { %v7301_v45 = vpop.f32.mrf.mxu1  ;;  %v7300_v24 = vadd.f32 %v7299_v3, %v14342_v11 }
0x1a5e   :  { %v7613_v30 = vpack.c.bf16 %v7469_v44, %v7463_v17  ;;  %v7615_v13 = vpack.c.bf16 %v7471_v22, %v7465_v7  ;;  %v7302_v33 = vadd.f32 %v7301_v45, %v14339_v39 }
0x1a5f   :  { %v7303_v2 = vpop.f32.mrf.mxu1  ;;  %v7382_v52 = vmax.f32 %v7300_v24, 0.0 }
0x1a60   :  { %v7304_v62 = vadd.f32 %v7303_v2, %v14342_v11  ;;  %8001 = vmatprep.mubr.bf16.mxu0 %v7613_v30  ;;  %8098 = vmatprep.mubr.bf16.mxu1 %v7615_v13  ;;  %v7383_v28 = vmax.f32 %v7302_v33, 0.0 }
0x1a61   :  { %v7305_v53 = vpop.f32.mrf.mxu1  ;;  %8002 = vmatmul.mubr.bf16.gmra.mxu0 %v7612_v16  ;;  %8099 = vmatmul.mubr.bf16.gmra.mxu1 %v7614_v4 }
0x1a62   :  { %v7306_v19 = vadd.f32 %v7305_v53, %v14339_v39  ;;  %v7388_v5 = vmax.f32 %v7304_v62, 0.0 }
0x1a63   :  { %v7309_v0 = vpop.f32.mrf.mxu1 }
0x1a64   :  { %v7389_v1 = vmax.f32 %v7306_v19, 0.0  ;;  %v7574_v8 = vpack.c.bf16 %v7388_v5, %v7382_v52  ;;  %v7310_v20 = vadd.f32 %v7309_v0, %v14342_v11 }
0x1a65   :  { %v7311_v15 = vpop.f32.mrf.mxu1 }
0x1a66   :  { %v7575_v6 = vpack.c.bf16 %v7389_v1, %v7383_v28  ;;  %v7312_v29 = vadd.f32 %v7311_v15, %v14339_v39  ;;  %v7394_v47 = vmax.f32 %v7310_v20, 0.0 }
0x1a67   :  { %v7313_v21 = vpop.f32.mrf.mxu1 }
0x1a68   :  { %v7314_v38 = vadd.f32 %v7313_v21, %v14342_v11  ;;  %8139 = vmatprep.mubr.bf16.mxu0 %v7575_v6  ;;  %v7395_v18 = vmax.f32 %v7312_v29, 0.0 }
0x1a69   :  { %v7315_v55 = vpop.f32.mrf.mxu1  ;;  %8140 = vmatmul.mubr.bf16.vlgmr.msra.gmra.mxu0 %v7574_v8 }
0x1a6a   :  { %v7316_v10 = vadd.f32 %v7315_v55, %v14339_v39  ;;  %v7400_v46 = vmax.f32 %v7314_v38, 0.0 }
0x1a6b   :  { %v7319_v32 = vpop.f32.mrf.mxu1 }
0x1a6c   :  { %v7401_v37 = vmax.f32 %v7316_v10, 0.0  ;;  %v7580_v50 = vpack.c.bf16 %v7400_v46, %v7394_v47  ;;  %v7320_v59 = vadd.f32 %v7319_v32, %v14342_v11 }
0x1a6d   :  { %v7321_v9 = vpop.f32.mrf.mxu1 }
0x1a6e   :  { %v7581_v56 = vpack.c.bf16 %v7401_v37, %v7395_v18  ;;  %v7322_v43 = vadd.f32 %v7321_v9, %v14339_v39  ;;  %v7406_v22 = vmax.f32 %v7320_v59, 0.0 }
0x1a6f   :  { %v7323_v49 = vpop.f32.mrf.mxu1 }
0x1a70   :  { %v7324_v35 = vadd.f32 %v7323_v49, %v14342_v11  ;;  %8147 = vmatprep.mubr.bf16.mxu0 %v7581_v56  ;;  %v7407_v7 = vmax.f32 %v7322_v43, 0.0 }
0x1a71   :  { %v7325_v60 = vpop.f32.mrf.mxu1  ;;  %8148 = vmatmul.mubr.bf16.gmra.mxu0 %v7580_v50 }
0x1a72   :  { %v7326_v41 = vadd.f32 %v7325_v60, %v14339_v39  ;;  %v7412_v3 = vmax.f32 %v7324_v35, 0.0 }
0x1a73   :  { %v7329_v17 = vpop.f32.mrf.mxu1 }
0x1a74   :  { %v7413_v44 = vmax.f32 %v7326_v41, 0.0  ;;  %v7586_v45 = vpack.c.bf16 %v7412_v3, %v7406_v22  ;;  %v7330_v4 = vadd.f32 %v7329_v17, %v14342_v11 }
0x1a75   :  { %v7331_v40 = vpop.f32.mrf.mxu1 }
0x1a76   :  { %v7587_v63 = vpack.c.bf16 %v7413_v44, %v7407_v7  ;;  %v7332_v13 = vadd.f32 %v7331_v40, %v14339_v39  ;;  %v7418_v5 = vmax.f32 %v7330_v4, 0.0 }
0x1a77   :  { %v7333_v30 = vpop.f32.mrf.mxu1 }
0x1a78   :  { %v7334_v16 = vadd.f32 %v7333_v30, %v14342_v11  ;;  %8155 = vmatprep.mubr.bf16.mxu0 %v7587_v63  ;;  %v7419_v53 = vmax.f32 %v7332_v13, 0.0 }
0x1a79   :  { %v7335_v2 = vpop.f32.mrf.mxu1  ;;  %8156 = vmatmul.mubr.bf16.gmra.mxu0 %v7586_v45 }
0x1a7a   :  { %v7336_v33 = vadd.f32 %v7335_v2, %v14339_v39  ;;  %v7424_v62 = vmax.f32 %v7334_v16, 0.0 }
0x1a7b   :  { %v7339_v24 = vpop.f32.mrf.mxu1 }
0x1a7c   :  { %v7425_v19 = vmax.f32 %v7336_v33, 0.0  ;;  %v7592_v1 = vpack.c.bf16 %v7424_v62, %v7418_v5  ;;  %v7340_v8 = vadd.f32 %v7339_v24, %v14342_v11 }
0x1a7d   :  { %v7341_v0 = vpop.f32.mrf.mxu1 }
0x1a7e   :  { %v7593_v28 = vpack.c.bf16 %v7425_v19, %v7419_v53  ;;  %v7342_v15 = vadd.f32 %v7341_v0, %v14339_v39  ;;  %v7430_v46 = vmax.f32 %v7340_v8, 0.0 }
0x1a7f   :  { %v7343_v52 = vpop.f32.mrf.mxu1 }
0x1a80   :  { %v7344_v6 = vadd.f32 %v7343_v52, %v14342_v11  ;;  %8163 = vmatprep.mubr.bf16.mxu0 %v7593_v28  ;;  %v7431_v55 = vmax.f32 %v7342_v15, 0.0 }
0x1a81   :  { %v7345_v21 = vpop.f32.mrf.mxu1  ;;  %8164 = vmatmul.mubr.bf16.gmra.mxu0 %v7592_v1 }
0x1a82   :  { %v7346_v29 = vadd.f32 %v7345_v21, %v14339_v39  ;;  %v7436_v38 = vmax.f32 %v7344_v6, 0.0 }
0x1a83   :  { %v7349_v20 = vpop.f32.mrf.mxu1 }
0x1a84   :  { %v7437_v10 = vmax.f32 %v7346_v29, 0.0  ;;  %v7598_v37 = vpack.c.bf16 %v7436_v38, %v7430_v46  ;;  %v7350_v50 = vadd.f32 %v7349_v20, %v14342_v11 }
0x1a85   :  { %v7351_v32 = vpop.f32.mrf.mxu1 }
0x1a86   :  { %v7599_v18 = vpack.c.bf16 %v7437_v10, %v7431_v55  ;;  %v7352_v9 = vadd.f32 %v7351_v32, %v14339_v39  ;;  %v7442_v3 = vmax.f32 %v7350_v50, 0.0 }
0x1a87   :  { %v7353_v47 = vpop.f32.mrf.mxu1 }
0x1a88   :  { %v7354_v56 = vadd.f32 %v7353_v47, %v14342_v11  ;;  %8171 = vmatprep.mubr.bf16.mxu0 %v7599_v18  ;;  %v7443_v60 = vmax.f32 %v7352_v9, 0.0 }
0x1a89   :  { %v7355_v49 = vpop.f32.mrf.mxu1  ;;  %8172 = vmatmul.mubr.bf16.gmra.mxu0 %v7598_v37 }
0x1a8a   :  { %v7356_v43 = vadd.f32 %v7355_v49, %v14339_v39  ;;  %v7448_v35 = vmax.f32 %v7354_v56, 0.0 }
0x1a8b   :  { %v7359_v59 = vpop.f32.mrf.mxu1 }
0x1a8c   :  { %v7449_v41 = vmax.f32 %v7356_v43, 0.0  ;;  %v7604_v44 = vpack.c.bf16 %v7448_v35, %v7442_v3  ;;  %v7360_v45 = vadd.f32 %v7359_v59, %v14342_v11 }
0x1a8d   :  { %v7361_v17 = vpop.f32.mrf.mxu1 }
0x1a8e   :  { %v7605_v7 = vpack.c.bf16 %v7449_v41, %v7443_v60  ;;  %v7362_v40 = vadd.f32 %v7361_v17, %v14339_v39  ;;  %v7454_v62 = vmax.f32 %v7360_v45, 0.0 }
0x1a8f   :  { %v7363_v22 = vpop.f32.mrf.mxu1 }
0x1a90   :  { %v7364_v63 = vadd.f32 %v7363_v22, %v14342_v11  ;;  %8179 = vmatprep.mubr.bf16.mxu0 %v7605_v7  ;;  %v7455_v2 = vmax.f32 %v7362_v40, 0.0 }
0x1a91   :  { %v7365_v30 = vpop.f32.mrf.mxu1  ;;  %8180 = vmatmul.mubr.bf16.gmra.mxu0 %v7604_v44 }
0x1a92   :  { %v7366_v13 = vadd.f32 %v7365_v30, %v14339_v39  ;;  %v7460_v16 = vmax.f32 %v7364_v63, 0.0 }
0x1a93   :  { %v7369_v4 = vpop.f32.mrf.mxu1 }
0x1a94   :  { %v7461_v33 = vmax.f32 %v7366_v13, 0.0  ;;  %v7610_v19 = vpack.c.bf16 %v7460_v16, %v7454_v62  ;;  %v7370_v1 = vadd.f32 %v7369_v4, %v14342_v11 }
0x1a95   :  { %v7371_v24 = vpop.f32.mrf.mxu1 }
0x1a96   :  { %v7611_v53 = vpack.c.bf16 %v7461_v33, %v7455_v2  ;;  %v7372_v0 = vadd.f32 %v7371_v24, %v14339_v39  ;;  %v7466_v29 = vmax.f32 %v7370_v1, 0.0 }
0x1a97   :  { %v7373_v5 = vpop.f32.mrf.mxu1 }
0x1a98   :  { %v7374_v28 = vadd.f32 %v7373_v5, %v14342_v11  ;;  %8187 = vmatprep.mubr.bf16.mxu0 %v7611_v53  ;;  %v7467_v8 = vmax.f32 %v7372_v0, 0.0 }
0x1a99   :  { %v7375_v52 = vpop.f32.mrf.mxu1  ;;  %8188 = vmatmul.mubr.bf16.gmra.mxu0 %v7610_v19 }
0x1a9a   :  { %v7376_v15 = vadd.f32 %v7375_v52, %v14339_v39  ;;  %v7472_v6 = vmax.f32 %v7374_v28, 0.0 }
0x1a9c   :  { %v7473_v21 = vmax.f32 %v7376_v15, 0.0  ;;  %v7616_v20 = vpack.c.bf16 %v7472_v6, %v7466_v29 }
0x1a9e   :  { %v7617_v38 = vpack.c.bf16 %v7473_v21, %v7467_v8 }
0x1aa0   :  { %8195 = vmatprep.mubr.bf16.mxu0 %v7617_v38 }
0x1aa1   :  { %8196 = vmatmul.mubr.bf16.gmra.mxu0 %v7616_v20  ;;  %v14439_v20 = vld [vmem:[%s14574_s15] ss:$0 sm:$0xff]  ;;  %s11291_s15 = smov [#allocation2]  }
0x1ae9   :  { %v9281_v55 = vpop.f32.mrf.mxu0  ;;  %v9345_v10 = vpop.f32.mrf.mxu1 }
0x1aeb   :  { %v9282_v46 = vpop.f32.mrf.mxu0  ;;  %v9346_v32 = vpop.f32.mrf.mxu1 }
0x1aec   :  { %v9283_v38 = vadd.f32 %v9282_v46, %v9281_v55  ;;  %v9347_v26 = vadd.f32 %v9346_v32, %v9345_v10 }
0x1aed   :  { %v9284_v18 = vpop.f32.mrf.mxu0  ;;  %v9348_v37 = vpop.f32.mrf.mxu1 }
0x1aee   :  { %v7948_v58 = vadd.f32 %v9283_v38, %v14439_v20 }
0x1aef   :  { %v9285_v47 = vpop.f32.mrf.mxu0  ;;  %v9349_v9 = vpop.f32.mrf.mxu1 }
0x1af0   :  { %v9286_v31 = vadd.f32 %v9285_v47, %v9284_v18  ;;  %v8045_v12 = vadd.f32 %v9347_v26, %v7948_v58  ;;  %v9350_v42 = vadd.f32 %v9349_v9, %v9348_v37 }
0x1af1   :  { %v9287_v11 = vpop.f32.mrf.mxu0  ;;  %v9351_v39 = vpop.f32.mrf.mxu1 }
0x1af2   :  { %v7951_v55 = vadd.f32 %v9286_v31, %v14439_v20 }
0x1af3   :  { %v9288_v56 = vpop.f32.mrf.mxu0  ;;  %v9352_v35 = vpop.f32.mrf.mxu1 }
0x1af4   :  { %v9289_v46 = vadd.f32 %v9288_v56, %v9287_v11  ;;  %v9353_v32 = vadd.f32 %v9352_v35, %v9351_v39 }
0x1af5   :  { %v9290_v50 = vpop.f32.mrf.mxu0  ;;  %v14380_v41 = vpop.f32.mrf.mxu1 }
0x1af6   :  { %v7956_v38 = vadd.f32 %v9289_v46, %v14439_v20 }
0x1af7   :  { %v9291_v49 = vpop.f32.mrf.mxu0  ;;  %v9355_v7 = vpop.f32.mrf.mxu1 }
0x1af8   :  { %v9292_v18 = vadd.f32 %v9291_v49, %v9290_v50  ;;  %v9356_v58 = vadd.f32 %v9355_v7, %v14380_v41 }
0x1af9   :  { %v14376_v43 = vpop.f32.mrf.mxu0  ;;  %v14390_v40 = vpop.f32.mrf.mxu1 }
0x1afa   :  { %v7959_v26 = vadd.f32 %v9292_v18, %v14439_v20 }
0x1afb   :  { %v9294_v59 = vpop.f32.mrf.mxu0  ;;  %v14396_v30 = vpop.f32.mrf.mxu1 }
0x1afc   :  { %v8056_v37 = vadd.f32 %v9356_v58, %v7959_v26 }
0x1afd   :  { %v14378_v60 = vpop.f32.mrf.mxu0  ;;  %v14402_v4 = vpop.f32.mrf.mxu1 }
0x1aff   :  { %v14382_v3 = vpop.f32.mrf.mxu0  ;;  %v14408_v62 = vpop.f32.mrf.mxu1 }
0x1b00   :  { %v9298_v11 = vadd.f32 %v14382_v3, %v14378_v60  ;;  %v9362_v3 = vadd.f32 %v14408_v62, %v14402_v4 }
0x1b01   :  { %v14384_v17 = vpop.f32.mrf.mxu0  ;;  %v14414_v19 = vpop.f32.mrf.mxu1 }
0x1b02   :  { %v7967_v35 = vadd.f32 %v9298_v11, %v14439_v20 }
0x1b03   :  { %v14386_v44 = vpop.f32.mrf.mxu0  ;;  %v14420_v28 = vpop.f32.mrf.mxu1 }
0x1b05   :  { %v14388_v22 = vpop.f32.mrf.mxu0  ;;  %v14426_v15 = vpop.f32.mrf.mxu1 }
0x1b07   :  { %v14392_v63 = vpop.f32.mrf.mxu0  ;;  %v14432_v21 = vpop.f32.mrf.mxu1 }
0x1b09   :  { %v14394_v45 = vpop.f32.mrf.mxu0  ;;  %v14443_v54 = vpop.f32.mrf.mxu1 }
0x1b0b   :  { %v14398_v13 = vpop.f32.mrf.mxu0  ;;  %v14448_v14 = vpop.f32.mrf.mxu1 }
0x1b0d   :  { %v14400_v16 = vpop.f32.mrf.mxu0  ;;  %v14451_v57 = vpop.f32.mrf.mxu1 }
0x1b0f   :  { %v14404_v2 = vpop.f32.mrf.mxu0  ;;  %v14455_v31 = vpop.f32.mrf.mxu1 }
0x1b11   :  { %v14406_v33 = vpop.f32.mrf.mxu0 }
0x1b13   :  { %v14410_v24 = vpop.f32.mrf.mxu0 }
0x1b15   :  { %v14412_v53 = vpop.f32.mrf.mxu0 }
0x1b17   :  { %v14416_v5 = vpop.f32.mrf.mxu0 }
0x1b19   :  { %v14418_v0 = vpop.f32.mrf.mxu0 }
0x1b1b   :  { %v14422_v1 = vpop.f32.mrf.mxu0 }
0x1b1d   :  { %v14424_v52 = vpop.f32.mrf.mxu0 }
0x1b1f   :  { %v14428_v6 = vpop.f32.mrf.mxu0 }
0x1b21   :  { %v14430_v8 = vpop.f32.mrf.mxu0 }
0x1b23   :  { %v14434_v29 = vpop.f32.mrf.mxu0 }
0x1b25   :  { %v14441_v61 = vpop.f32.mrf.mxu0 }
0x1b26   :  { %14693 = vst [vmem:[#allocation21_spill] sm:$0xff] %v14441_v61 }
0x1b27   :  { %v14445_v25 = vpop.f32.mrf.mxu0 }
0x1b28   :  { %14694 = vst [vmem:[#allocation22_spill] sm:$0xff] %v14445_v25  ;;  %v8048_v25 = vadd.f32 %v9350_v42, %v7951_v55  ;;  %v8053_v42 = vadd.f32 %v9353_v32, %v7956_v38  ;;  %v9304_v38 = vadd.f32 %v14392_v63, %v14388_v22  ;;  %v9368_v63 = vadd.f32 %v14432_v21, %v14426_v15 }
0x1b29   :  { %v9409_v51 = vpop.f32.mrf.mxu0 }
0x1b2a   :  { %v7975_v62 = vadd.f32 %v9304_v38, %v14439_v20 }
0x1b2b   :  { %v9410_v23 = vpop.f32.mrf.mxu0 }
0x1b2c   :  { %v9411_v48 = vadd.f32 %v9410_v23, %v9409_v51 }
0x1b2d   :  { %v9412_v36 = vpop.f32.mrf.mxu0 }
0x1b2e   :  { %v8142_v34 = vadd.f32 %v9411_v48, %v8045_v12  ;;  %v9295_v12 = vadd.f32 %v9294_v59, %v14376_v43  ;;  %v9301_v59 = vadd.f32 %v14386_v44, %v14384_v17  ;;  %v9365_v44 = vadd.f32 %v14420_v28, %v14414_v19 }
0x1b2f   :  { %v9413_v27 = vpop.f32.mrf.mxu0  ;;  %v8072_v19 = vadd.f32 %v9368_v63, %v7975_v62  ;;  %v14696_v63 = vld [vmem:[#allocation22_spill] sm:$0xff] }
0x1b30   :  { %v9414_v47 = vadd.f32 %v9413_v27, %v9412_v36  ;;  %8220 = vrot.lane.b32.xlu0 %v8142_v34, %s11290_s25  ;;  %v14461_v36 = vpop.f32.mrf.mxu1 }
0x1b31   :  { %v9415_v10 = vpop.f32.mrf.mxu0 }
0x1b32   :  { %v8145_v61 = vadd.f32 %v9414_v47, %v8048_v25  ;;  %v7964_v25 = vadd.f32 %v9295_v12, %v14439_v20  ;;  %v9376_v39 = vpop.f32.mrf.mxu1 }
0x1b33   :  { %v9416_v23 = vpop.f32.mrf.mxu0 }
0x1b34   :  { %v9417_v48 = vadd.f32 %v9416_v23, %v9415_v10  ;;  %8222 = vrot.lane.b32.xlu0 %v8145_v61, %s11290_s25  ;;  %v9359_v61 = vadd.f32 %v14396_v30, %v14390_v40  ;;  %v9378_v55 = vpop.f32.mrf.mxu1  ;;  %v8064_v40 = vadd.f32 %v9362_v3, %v7967_v35  ;;  %v7972_v30 = vadd.f32 %v9301_v59, %v14439_v20 }
0x1b35   :  { %v9418_v51 = vpop.f32.mrf.mxu0  ;;  %v9307_v23 = vadd.f32 %v14398_v13, %v14394_v45  ;;  %v9371_v13 = vadd.f32 %v14448_v14, %v14443_v54 }
0x1b36   :  { %v8150_v27 = vadd.f32 %v9417_v48, %v8053_v42  ;;  %v8061_v43 = vadd.f32 %v9359_v61, %v7964_v25  ;;  %v9379_v10 = vpop.f32.mrf.mxu1  ;;  %v8069_v4 = vadd.f32 %v9365_v44, %v7972_v30  ;;  %v9313_v25 = vadd.f32 %v14410_v24, %v14406_v33 }
0x1b37   :  { %v9419_v34 = vpop.f32.mrf.mxu0  ;;  %v7980_v28 = vadd.f32 %v9307_v23, %v14439_v20  ;;  %v9377_v24 = vadd.f32 %v9376_v39, %v14461_v36  ;;  %v9322_v39 = vadd.f32 %v14428_v6, %v14424_v52 }
0x1b38   :  { %v9420_v9 = vadd.f32 %v9419_v34, %v9418_v51  ;;  %8224 = vrot.lane.b32.xlu1 %v8150_v27, %s11290_s25  ;;  %v9381_v48 = vpop.f32.mrf.mxu1  ;;  %v9310_v51 = vadd.f32 %v14404_v2, %v14400_v16  ;;  %v9374_v2 = vadd.f32 %v14455_v31, %v14451_v57  ;;  %v7988_v54 = vadd.f32 %v9313_v25, %v14439_v20 }
0x1b39   :  { %v9421_v56 = vpop.f32.mrf.mxu0  ;;  %v8077_v15 = vadd.f32 %v9371_v13, %v7980_v28  ;;  %v9319_v31 = vadd.f32 %v14422_v1, %v14418_v0 }
0x1b3a   :  { %v8153_v50 = vadd.f32 %v9420_v9, %v8056_v37  ;;  %v9382_v34 = vpop.f32.mrf.mxu1  ;;  %v7983_v21 = vadd.f32 %v9310_v51, %v14439_v20 }
0x1b3b   :  { %v9422_v49 = vpop.f32.mrf.mxu0  ;;  %v7996_v36 = vadd.f32 %v9319_v31, %v14439_v20 }
0x1b3c   :  { %v9423_v41 = vadd.f32 %v9422_v49, %v9421_v56  ;;  %8226 = vrot.lane.b32.xlu1 %v8153_v50, %s11290_s25  ;;  %v9384_v56 = vpop.f32.mrf.mxu1  ;;  %v8080_v14 = vadd.f32 %v9374_v2, %v7983_v21  ;;  %v9316_v50 = vadd.f32 %v14416_v5, %v14412_v53  ;;  %v9380_v53 = vadd.f32 %v9379_v10, %v9378_v55 }
0x1b3d   :  { %v9424_v60 = vpop.f32.mrf.mxu0  ;;  %v7999_v55 = vadd.f32 %v9322_v39, %v14439_v20 }
0x1b3e   :  { %v8158_v7 = vadd.f32 %v9423_v41, %v8061_v43  ;;  %v9385_v35 = vpop.f32.mrf.mxu1  ;;  %v8085_v41 = vadd.f32 %v9377_v24, %v7988_v54  ;;  %v7991_v57 = vadd.f32 %v9316_v50, %v14439_v20 }
0x1b3f   :  { %v9425_v46 = vpop.f32.mrf.mxu0 }
0x1b40   :  { %v9426_v18 = vadd.f32 %v9425_v46, %v9424_v60  ;;  %8228 = vrot.lane.b32.xlu0 %v8158_v7, %s11290_s25  ;;  %v9387_v7 = vpop.f32.mrf.mxu1 }
0x1b41   :  { %v9427_v17 = vpop.f32.mrf.mxu0 }
0x1b42   :  { %v8161_v47 = vadd.f32 %v9426_v18, %v8064_v40  ;;  %v8088_v40 = vadd.f32 %v9380_v53, %v7991_v57  ;;  %v9383_v18 = vadd.f32 %v9382_v34, %v9381_v48  ;;  %v9388_v1 = vpop.f32.mrf.mxu1 }
0x1b43   :  { %v9428_v32 = vpop.f32.mrf.mxu0 }
0x1b44   :  { %v9429_v26 = vadd.f32 %v9428_v32, %v9427_v17  ;;  %8230 = vrot.lane.b32.xlu1 %v8161_v47, %s11290_s25  ;;  %v8093_v44 = vadd.f32 %v9383_v18, %v7996_v36  ;;  %v9325_v47 = vadd.f32 %v14434_v29, %v14430_v8  ;;  %v9390_v6 = vpop.f32.mrf.mxu1 }
0x1b45   :  { %v9430_v22 = vpop.f32.mrf.mxu0 }
0x1b46   :  { %v8166_v12 = vadd.f32 %v9429_v26, %v8069_v4  ;;  %v9386_v4 = vadd.f32 %v9385_v35, %v9384_v56  ;;  %v8004_v26 = vadd.f32 %v9325_v47, %v14439_v20  ;;  %v9391_v29 = vpop.f32.mrf.mxu1 }
0x1b47   :  { %v9431_v42 = vpop.f32.mrf.mxu0 }
0x1b48   :  { %v9432_v58 = vadd.f32 %v9431_v42, %v9430_v22  ;;  %8232 = vrot.lane.b32.xlu0 %v8166_v12, %s11290_s25  ;;  %v8096_v23 = vadd.f32 %v9386_v4, %v7999_v55  ;;  %v14695_v22 = vld [vmem:[#allocation21_spill] sm:$0xff] }
0x1b49   :  { %v9433_v45 = vpop.f32.mrf.mxu0  ;;  %v9328_v12 = vadd.f32 %v14696_v63, %v14695_v22  ;;  %v14712_v63 = vld [vmem:[#allocation20_spill] sm:$0xff] }
0x1b4a   :  { %v8169_v27 = vadd.f32 %v9432_v58, %v8072_v19  ;;  %v9389_v19 = vadd.f32 %v9388_v1, %v9387_v7 }
0x1b4b   :  { %v9434_v37 = vpop.f32.mrf.mxu0  ;;  %v8007_v58 = vadd.f32 %v9328_v12, %v14439_v20 }
0x1b4c   :  { %v9435_v11 = vadd.f32 %v9434_v37, %v9433_v45  ;;  %8234 = vrot.lane.b32.xlu1 %v8169_v27, %s11290_s25  ;;  %v8101_v51 = vadd.f32 %v9389_v19, %v8004_v26  ;;  %v9392_v27 = vadd.f32 %v9391_v29, %v9390_v6 }
0x1b4d   :  { %v9436_v16 = vpop.f32.mrf.mxu0 }
0x1b4e   :  { %v8174_v9 = vadd.f32 %v9435_v11, %v8077_v15  ;;  %v8104_v15 = vadd.f32 %v9392_v27, %v8007_v58 }
0x1b4f   :  { %v9437_v61 = vpop.f32.mrf.mxu0 }
0x1b50   :  { %v9438_v49 = vadd.f32 %v9437_v61, %v9436_v16  ;;  %8236 = vrot.lane.b32.xlu0 %v8174_v9, %s11290_s25  ;;  %v14697_v16 = vld [vmem:[#allocation5_spill] sm:$0xff]  ;;  %v14698_v9 = vld [vmem:[#allocation6_spill] sm:$0xff] }
0x1b51   :  { %v9439_v33 = vpop.f32.mrf.mxu0 }
0x1b52   :  { %v8177_v43 = vadd.f32 %v9438_v49, %v8080_v14  ;;  %v14699_v14 = vld [vmem:[#allocation8_spill] sm:$0xff]  ;;  %v14700_v49 = vld [vmem:[#allocation7_spill] sm:$0xff] }
0x1b53   :  { %v9440_v59 = vpop.f32.mrf.mxu0 }
0x1b54   :  { %v9441_v60 = vadd.f32 %v9440_v59, %v9439_v33  ;;  %8238 = vrot.lane.b32.xlu1 %v8177_v43, %s11290_s25  ;;  %v14701_v43 = vld [vmem:[#allocation9_spill] sm:$0xff] }
0x1b55   :  { %v9442_v3 = vpop.f32.mrf.mxu0 }
0x1b56   :  { %v8182_v5 = vadd.f32 %v9441_v60, %v8085_v41  ;;  %v14702_v41 = vld [vmem:[#allocation10_spill] sm:$0xff]  ;;  %v14703_v60 = vld [vmem:[#allocation11_spill] sm:$0xff] }
0x1b57   :  { %v9443_v46 = vpop.f32.mrf.mxu0 }
0x1b58   :  { %v9444_v30 = vadd.f32 %v9443_v46, %v9442_v3  ;;  %8240 = vrot.lane.b32.xlu0 %v8182_v5, %s11290_s25  ;;  %v14704_v5 = vld [vmem:[#allocation12_spill] sm:$0xff] }
0x1b59   :  { %v9445_v38 = vpop.f32.mrf.mxu0 }
0x1b5a   :  { %v8185_v0 = vadd.f32 %v9444_v30, %v8088_v40  ;;  %v14705_v40 = vld [vmem:[#allocation13_spill] sm:$0xff]  ;;  %v14706_v30 = vld [vmem:[#allocation14_spill] sm:$0xff] }
0x1b5b   :  { %v9446_v17 = vpop.f32.mrf.mxu0 }
0x1b5c   :  { %v9447_v10 = vadd.f32 %v9446_v17, %v9445_v38  ;;  %8242 = vrot.lane.b32.xlu1 %v8185_v0, %s11290_s25  ;;  %v14707_v0 = vld [vmem:[#allocation15_spill] sm:$0xff] }
0x1b5d   :  { %v9448_v32 = vpop.f32.mrf.mxu0 }
0x1b5e   :  { %v8190_v52 = vadd.f32 %v9447_v10, %v8093_v44  ;;  %v14708_v44 = vld [vmem:[#allocation16_spill] sm:$0xff]  ;;  %v14709_v10 = vld [vmem:[#allocation17_spill] sm:$0xff] }
0x1b5f   :  { %v9449_v62 = vpop.f32.mrf.mxu0 }
0x1b60   :  { %v9450_v48 = vadd.f32 %v9449_v62, %v9448_v32  ;;  %8244 = vrot.lane.b32.xlu0 %v8190_v52, %s11290_s25  ;;  %v14710_v52 = vld [vmem:[#allocation18_spill] sm:$0xff] }
0x1b61   :  { %v9451_v42 = vpop.f32.mrf.mxu0 }
0x1b62   :  { %v8193_v8 = vadd.f32 %v9450_v48, %v8096_v23  ;;  %v14711_v23 = vld [vmem:[#allocation19_spill] sm:$0xff] }
0x1b63   :  { %v9452_v28 = vpop.f32.mrf.mxu0 }
0x1b64   :  { %v9453_v45 = vadd.f32 %v9452_v28, %v9451_v42  ;;  %8246 = vrot.lane.b32.xlu1 %v8193_v8, %s11290_s25 }
0x1b65   :  { %v9454_v13 = vpop.f32.mrf.mxu0 }
0x1b66   :  { %v8198_v34 = vadd.f32 %v9453_v45, %v8101_v51 }
0x1b67   :  { %v9455_v37 = vpop.f32.mrf.mxu0 }
0x1b68   :  { %v9456_v21 = vadd.f32 %v9455_v37, %v9454_v13  ;;  %8248 = vrot.lane.b32.xlu0 %v8198_v34, %s11290_s25 }
0x1b6a   :  { %v8201_v25 = vadd.f32 %v9456_v21, %v8104_v15 }
0x1b6c   :  { %8250 = vrot.lane.b32.xlu1 %v8201_v25, %s11290_s25  ;;  %s8305_s25 = sshll.u32 %s11291_s15, 4  ;;  %s8306_s25 = int_to_ptr.vmem [resolvable:$true] %s8305_s25 }
0x1b6d   :  { %s10994_s20 = scalar_lea.vmem %s8306_s25, 2048  ;;  %p10999_p3 = scmp.lt.s32.totalorder %s8306_s25, %s8306_s25 }
0x1b6e   :  { %p10995_p2 = scmp.ne.s32.totalorder %s8306_s25, %s10994_s20  ;;  %p11000_p4 = scmp.lt.s32.totalorder %s10994_s20, %s10994_s20 }
0x1b70   :  { %p11001_p5 = por %p11000_p4, %p10999_p3 }
0x1b72   :  { %p11002_p6 = pnand %p11001_p5, %p10995_p2 }
0x1ba2   :  { %v8221_v11 = vpop.permute.xlu0 %8220 }
0x1ba3   :  { %v8268_v2 = vsel %vm760_vm3, %v14697_v16, %v8221_v11 }
0x1ba4   :  { %8284 = vst [vmem:[#allocation2] sm:$0xff] %v8268_v2 }
0x1ba6   :  { %v8223_v20 = vpop.permute.xlu0 %8222 }
0x1ba7   :  { %v8269_v56 = vsel %vm760_vm3, %v14698_v9, %v8223_v20 }
0x1ba8   :  { %8285 = vst [vmem:[#allocation2 + $0x8] sm:$0xff] %v8269_v56 }
0x1baa   :  { %v8225_v61 = vpop.permute.xlu1 %8224 }
0x1bab   :  { %v8270_v54 = vsel %vm760_vm3, %v14699_v14, %v8225_v61 }
0x1bac   :  { %8286 = vst [vmem:[#allocation2 + $0x10] sm:$0xff] %v8270_v54 }
0x1bae   :  { %v8227_v50 = vpop.permute.xlu1 %8226 }
0x1baf   :  { %v8271_v33 = vsel %vm760_vm3, %v14700_v49, %v8227_v50 }
0x1bb0   :  { %8287 = vst [vmem:[#allocation2 + $0x18] sm:$0xff] %v8271_v33 }
0x1bb2   :  { %v8229_v24 = vpop.permute.xlu0 %8228 }
0x1bb3   :  { %v8272_v35 = vsel %vm760_vm3, %v14701_v43, %v8229_v24 }
0x1bb4   :  { %8288 = vst [vmem:[#allocation2 + $0x20] sm:$0xff] %v8272_v35 }
0x1bb6   :  { %v8231_v59 = vpop.permute.xlu1 %8230 }
0x1bb7   :  { %v8273_v57 = vsel %vm760_vm3, %v14702_v41, %v8231_v59 }
0x1bb8   :  { %8289 = vst [vmem:[#allocation2 + $0x28] sm:$0xff] %v8273_v57 }
0x1bba   :  { %v8233_v31 = vpop.permute.xlu0 %8232 }
0x1bbb   :  { %v8274_v3 = vsel %vm760_vm3, %v14703_v60, %v8233_v31 }
0x1bbc   :  { %8290 = vst [vmem:[#allocation2 + $0x30] sm:$0xff] %v8274_v3 }
0x1bbe   :  { %v8235_v53 = vpop.permute.xlu1 %8234 }
0x1bbf   :  { %v8275_v7 = vsel %vm760_vm3, %v14704_v5, %v8235_v53 }
0x1bc0   :  { %8291 = vst [vmem:[#allocation2 + $0x38] sm:$0xff] %v8275_v7 }
0x1bc2   :  { %v8237_v46 = vpop.permute.xlu0 %8236 }
0x1bc3   :  { %v8276_v36 = vsel %vm760_vm3, %v14705_v40, %v8237_v46 }
0x1bc4   :  { %8292 = vst [vmem:[#allocation2 + $0x40] sm:$0xff] %v8276_v36 }
0x1bc6   :  { %v8239_v39 = vpop.permute.xlu1 %8238 }
0x1bc7   :  { %v8277_v38 = vsel %vm760_vm3, %v14706_v30, %v8239_v39 }
0x1bc8   :  { %8293 = vst [vmem:[#allocation2 + $0x48] sm:$0xff] %v8277_v38 }
0x1bca   :  { %v8241_v18 = vpop.permute.xlu0 %8240 }
0x1bcb   :  { %v8278_v1 = vsel %vm760_vm3, %v14707_v0, %v8241_v18 }
0x1bcc   :  { %8294 = vst [vmem:[#allocation2 + $0x50] sm:$0xff] %v8278_v1 }
0x1bce   :  { %v8243_v17 = vpop.permute.xlu1 %8242 }
0x1bcf   :  { %v8279_v55 = vsel %vm760_vm3, %v14708_v44, %v8243_v17 }
0x1bd0   :  { %8295 = vst [vmem:[#allocation2 + $0x58] sm:$0xff] %v8279_v55 }
0x1bd2   :  { %v8245_v47 = vpop.permute.xlu0 %8244 }
0x1bd3   :  { %v8280_v32 = vsel %vm760_vm3, %v14709_v10, %v8245_v47 }
0x1bd4   :  { %8296 = vst [vmem:[#allocation2 + $0x60] sm:$0xff] %v8280_v32 }
0x1bd6   :  { %v8247_v4 = vpop.permute.xlu1 %8246 }
0x1bd7   :  { %v8281_v6 = vsel %vm760_vm3, %v14710_v52, %v8247_v4 }
0x1bd8   :  { %8297 = vst [vmem:[#allocation2 + $0x68] sm:$0xff] %v8281_v6 }
0x1bda   :  { %v8249_v62 = vpop.permute.xlu0 %8248 }
0x1bdb   :  { %v8282_v26 = vsel %vm760_vm3, %v14711_v23, %v8249_v62 }
0x1bdc   :  { %8298 = vst [vmem:[#allocation2 + $0x70] sm:$0xff] %v8282_v26 }
0x1bde   :  { %v8251_v22 = vpop.permute.xlu1 %8250 }
0x1bdf   :  { %v8283_v12 = vsel %vm760_vm3, %v14712_v63, %v8251_v22 }
0x1be0   :  { %8299 = vst [vmem:[#allocation2 + $0x78] sm:$0xff] %v8283_v12 }
0x1be1   :  { %11005 = shalt.err (!%p11002_p6)
}
0x1be2   :  { %s11292_s1 = smov 128   ;;  %s11293_s21 = smov 8  }
0x1be3   :  { %8311 = dma.vmem_to_hbm [thread:$0]  %s8306_s25, 2048, %s14575_s16, [#allocation3], %s11292_s1, %s11292_s1, %s11293_s21  }
0x1be4   :  { %11150 = dma.done.wait [#allocation3], 2048  }
0x1be5   :  { %11151 = vsyncadd [#allocation3], 4294965248 }
0x1be6   :  { %8315 = vsyncpa [#allocation3], 1 }

</bundles_post_ra>
